<compile_context>
chip_gen: v5e
topology: v5e:2x2
jax: 0.10.0
libtpu: 0.0.40
codegen_flags: <defaults>
</compile_context>

<pallas_src>
import numpy as np
import jax
import jax.numpy as jnp
from jax.experimental import pallas as pl
from jax.experimental.pallas import tpu as pltpu


# ------------------------------- helpers -----------------------------------

def _round_up(n, m):
    return ((n + m - 1) // m) * m


def _row_tile(n, max_tile=512):
    """Largest row tile <= max_tile that divides n (prefer 16/8 aligned)."""
    if n <= max_tile:
        return n
    for t in range(max_tile - max_tile % 16, 15, -16):
        if n % t == 0:
            return t
    for t in range(max_tile - max_tile % 8, 7, -8):
        if n % t == 0:
            return t
    return n


def _time_chunk(t, max_chunk=64):
    """Largest time-chunk <= max_chunk that divides t."""
    if t <= max_chunk:
        return t
    best = 1
    for c in range(1, max_chunk + 1):
        if t % c == 0:
            best = c
    return best


_REC_VMEM = 48 * 1024 * 1024   # explicit scoped-VMEM budget for recurrences


# ----------------------------- generic kernels ------------------------------

def _linear_kernel(x_ref, w_ref, b_ref, o_ref):
    acc = jnp.dot(x_ref[...].astype(jnp.bfloat16),
                  w_ref[...].astype(jnp.bfloat16),
                  preferred_element_type=jnp.float32)
    o_ref[...] = (acc + b_ref[...]).astype(o_ref.dtype)


def pallas_linear(x, w, b, out_dtype=jnp.float32):
    """Row-tiled y = x @ w + b with bf16 MXU operands."""
    N, D = x.shape
    M = w.shape[1]
    TR = _row_tile(N)
    return pl.pallas_call(
        _linear_kernel,
        grid=(N // TR,),
        in_specs=[pl.BlockSpec((TR, D), lambda i: (i, 0)),
                  pl.BlockSpec((D, M), lambda i: (0, 0)),
                  pl.BlockSpec((1, M), lambda i: (0, 0))],
        out_specs=pl.BlockSpec((TR, M), lambda i: (i, 0)),
        out_shape=jax.ShapeDtypeStruct((N, M), out_dtype),
        compiler_params=pltpu.CompilerParams(
            dimension_semantics=("parallel",)),
    )(x, w, b.reshape(1, M))


def pallas_gate_proj(x, w_stack, b_stack, out_dtype=jnp.bfloat16):
    """Single-source -> 2-direction gate projection: out[d] = x @ w[d] + b[d]."""
    N, D = x.shape
    M = w_stack.shape[-1]
    TR = _row_tile(N)
    return pl.pallas_call(
        _linear_kernel,
        grid=(2, N // TR),
        in_specs=[pl.BlockSpec((TR, D), lambda d, i: (i, 0)),
                  pl.BlockSpec((None, D, M), lambda d, i: (d, 0, 0)),
                  pl.BlockSpec((None, 1, M), lambda d, i: (d, 0, 0))],
        out_specs=pl.BlockSpec((None, TR, M), lambda d, i: (d, i, 0)),
        out_shape=jax.ShapeDtypeStruct((2, N, M), out_dtype),
        compiler_params=pltpu.CompilerParams(
            dimension_semantics=("parallel", "parallel")),
    )(x, w_stack, b_stack.reshape(2, 1, M))


def _gate_proj_pair_kernel(x_ref, w_ref, b_ref, o_ref):
    # x_ref: (2, TR, H) [fwd|bwd hidden], w_ref: (2, H, M) for one out-direction
    x = x_ref[...].astype(jnp.bfloat16)
    w = w_ref[...].astype(jnp.bfloat16)
    acc = jnp.dot(x[0], w[0], preferred_element_type=jnp.float32)
    acc = acc + jnp.dot(x[1], w[1], preferred_element_type=jnp.float32)
    o_ref[...] = (acc + b_ref[...]).astype(o_ref.dtype)


def pallas_gate_proj_pair(x2, w_stack2, b_stack, out_dtype=jnp.bfloat16):
    """Dual-source -> 2-direction gate projection (consumes the direction-
    stacked BiLSTM output directly; replaces concat + linear)."""
    _, N, H = x2.shape
    M = w_stack2.shape[-1]
    TR = _row_tile(N)
    return pl.pallas_call(
        _gate_proj_pair_kernel,
        grid=(2, N // TR),
        in_specs=[pl.BlockSpec((2, TR, H), lambda d, i: (0, i, 0)),
                  pl.BlockSpec((None, 2, H, M), lambda d, i: (d, 0, 0, 0)),
                  pl.BlockSpec((None, 1, M), lambda d, i: (d, 0, 0))],
        out_specs=pl.BlockSpec((None, TR, M), lambda d, i: (d, i, 0)),
        out_shape=jax.ShapeDtypeStruct((2, N, M), out_dtype),
        compiler_params=pltpu.CompilerParams(
            dimension_semantics=("parallel", "parallel")),
    )(x2, w_stack2, b_stack.reshape(2, 1, M))


def _gcn_agg_kernel(a_ref, xw_ref, b_ref, o_ref):
    agg = jnp.dot(a_ref[...].astype(jnp.bfloat16),
                  xw_ref[...].astype(jnp.bfloat16),
                  preferred_element_type=jnp.float32)
    o_ref[...] = jnp.maximum(agg + b_ref[...], 0.0)


def pallas_gcn(a, x, w, b):
    """relu(A_norm @ (X W) + b).  XW is produced by the tiled linear and the
    aggregation is row-tiled + "parallel" (no in-kernel scratch init)."""
    N = x.shape[0]
    G = w.shape[1]
    xw = pallas_linear(x, w, jnp.zeros((G,), jnp.float32))        # (N, G)
    TR = _row_tile(N)
    # TODO(synk): for very large N add a contraction grid axis over A columns.
    return pl.pallas_call(
        _gcn_agg_kernel,
        grid=(N // TR,),
        in_specs=[pl.BlockSpec((TR, N), lambda i: (i, 0)),
                  pl.BlockSpec((N, G), lambda i: (0, 0)),
                  pl.BlockSpec((1, G), lambda i: (0, 0))],
        out_specs=pl.BlockSpec((TR, G), lambda i: (i, 0)),
        out_shape=jax.ShapeDtypeStruct((N, G), jnp.float32),
        compiler_params=pltpu.CompilerParams(
            dimension_semantics=("parallel",)),
    )(a, xw, b.reshape(1, G))


def _mlp_head_kernel(x_ref, w1_ref, b1_ref, g_ref, be_ref, w2_ref, b2_ref, o_ref):
    h = jnp.dot(x_ref[...].astype(jnp.bfloat16), w1_ref[...].astype(jnp.bfloat16),
                preferred_element_type=jnp.float32) + b1_ref[...]
    mu = jnp.mean(h, axis=-1, keepdims=True)
    var = jnp.mean((h - mu) ** 2, axis=-1, keepdims=True)
    h = (h - mu) * jax.lax.rsqrt(var + 1e-5) * g_ref[...] + be_ref[...]
    h = jnp.maximum(h, 0.0)
    o_ref[...] = (jnp.dot(h.astype(jnp.bfloat16), w2_ref[...].astype(jnp.bfloat16),
                          preferred_element_type=jnp.float32) + b2_ref[...]
                  ).astype(o_ref.dtype)


def pallas_mlp_head(x, w1, b1, gamma, beta, w2, b2):
    """Linear -> LayerNorm -> ReLU -> Linear, row-tiled (dropouts are identity
    in eval mode)."""
    N, _ = x.shape
    H1 = w1.shape[1]
    C = w2.shape[1]
    TR = _row_tile(N)
    return pl.pallas_call(
        _mlp_head_kernel,
        grid=(N // TR,),
        in_specs=[pl.BlockSpec((TR, x.shape[1]), lambda i: (i, 0)),
                  pl.BlockSpec((x.shape[1], H1), lambda i: (0, 0)),
                  pl.BlockSpec((1, H1), lambda i: (0, 0)),
                  pl.BlockSpec((1, H1), lambda i: (0, 0)),
                  pl.BlockSpec((1, H1), lambda i: (0, 0)),
                  pl.BlockSpec((H1, C), lambda i: (0, 0)),
                  pl.BlockSpec((1, C), lambda i: (0, 0))],
        out_specs=pl.BlockSpec((TR, C), lambda i: (i, 0)),
        out_shape=jax.ShapeDtypeStruct((N, C), jnp.float32),
        compiler_params=pltpu.CompilerParams(
            dimension_semantics=("parallel",)),
    )(x, w1, b1.reshape(1, H1), gamma.reshape(1, H1), beta.reshape(1, H1),
      w2, b2.reshape(1, C))


def _pool_chunk_kernel(h_ref, o_ref, sum_sc, max_sc):
    """Streaming [avg | max | last] pooling over the time axis of the
    direction-stacked (2, T, B, H) hidden; lane-dense (B, 6H) output."""
    i = pl.program_id(0)
    n_chunks = pl.num_programs(0)
    h = h_ref[...]                                        # (2, Tc, B, H)

    @pl.when(i == 0)
    def _():
        sum_sc[...] = jnp.zeros_like(sum_sc)
        max_sc[...] = jnp.full_like(max_sc, -jnp.inf)

    sum_sc[...] += jnp.concatenate(
        [jnp.sum(h[0], axis=0), jnp.sum(h[1], axis=0)], axis=-1)
    max_sc[...] = jnp.maximum(
        max_sc[...],
        jnp.concatenate([jnp.max(h[0], axis=0), jnp.max(h[1], axis=0)], axis=-1))

    @pl.when(i == n_chunks - 1)
    def _():
        total_t = n_chunks * h_ref.shape[1]
        last = jnp.concatenate([h[0, -1], h[1, -1]], axis=-1)
        o_ref[...] = jnp.concatenate(
            [sum_sc[...] * (1.0 / total_t), max_sc[...], last], axis=-1)


def pallas_pool(h2):
    """h2: (2, T, B, H) -> (B, 6H) == torch.cat([avg, max, last], dim=1)."""
    _, T, B, H = h2.shape
    Tc = _time_chunk(T)
    return pl.pallas_call(
        _pool_chunk_kernel,
        grid=(T // Tc,),
        in_specs=[pl.BlockSpec((2, Tc, B, H), lambda i: (0, i, 0, 0))],
        out_specs=pl.BlockSpec((B, 6 * H), lambda i: (0, 0)),
        out_shape=jax.ShapeDtypeStruct((B, 6 * H), jnp.float32),
        scratch_shapes=[pltpu.VMEM((B, 2 * H), jnp.float32),
                        pltpu.VMEM((B, 2 * H), jnp.float32)],
        compiler_params=pltpu.CompilerParams(
            dimension_semantics=("arbitrary",)),
    )(h2)


# -------------------------- recurrent sequence kernels ----------------------

def _lstm_chunk_kernel(xg_ref, whh_ref, o_ref, h_sc, c_sc):
    """Unidirectional LSTM over one time chunk.  xg_ref: (Tc, B, 4H) bf16,
    whh_ref: (H, 4H).  h/c live in the fori_loop carry; scratch only carries
    state across chunks."""
    Tc = xg_ref.shape[0]
    H = h_sc.shape[-1]

    @pl.when(pl.program_id(0) == 0)
    def _():
        h_sc[...] = jnp.zeros_like(h_sc)
        c_sc[...] = jnp.zeros_like(c_sc)

    whh = whh_ref[...].astype(jnp.bfloat16)

    def step(t, carry):
        h, c = carry
        gates = xg_ref[t].astype(jnp.float32) + jnp.dot(
            h.astype(jnp.bfloat16), whh, preferred_element_type=jnp.float32)
        i = jax.nn.sigmoid(gates[:, 0:H])
        f = jax.nn.sigmoid(gates[:, H:2 * H])
        g = jnp.tanh(gates[:, 2 * H:3 * H])
        o = jax.nn.sigmoid(gates[:, 3 * H:4 * H])
        c = f * c + i * g
        h = o * jnp.tanh(c)
        o_ref[t] = h
        return (h, c)

    hT, cT = jax.lax.fori_loop(0, Tc, step, (h_sc[...], c_sc[...]),
                               unroll=Tc if Tc <= 8 else 4)
    h_sc[...] = hT
    c_sc[...] = cT


def _bilstm_chunk_kernel(xg_ref, whh_ref, o_ref, h_sc, c_sc):
    """One direction (grid axis 0, "parallel") x one time chunk (grid axis 1,
    "arbitrary").  For d == 1 the chunk order is already reversed by the
    index_map; local time is walked backwards in-kernel."""
    d = pl.program_id(0)
    Tc = xg_ref.shape[0]
    H = h_sc.shape[-1]

    @pl.when(pl.program_id(1) == 0)
    def _():
        h_sc[...] = jnp.zeros_like(h_sc)
        c_sc[...] = jnp.zeros_like(c_sc)

    whh = whh_ref[...].astype(jnp.bfloat16)

    def step(s, carry):
        h, c = carry
        t = s + d * (Tc - 1 - 2 * s)        # d=0: s ;  d=1: Tc-1-s
        gates = xg_ref[t].astype(jnp.float32) + jnp.dot(
            h.astype(jnp.bfloat16), whh, preferred_element_type=jnp.float32)
        i = jax.nn.sigmoid(gates[:, 0:H])
        f = jax.nn.sigmoid(gates[:, H:2 * H])
        g = jnp.tanh(gates[:, 2 * H:3 * H])
        o = jax.nn.sigmoid(gates[:, 3 * H:4 * H])
        c = f * c + i * g
        h = o * jnp.tanh(c)
        o_ref[t] = h
        return (h, c)

    hT, cT = jax.lax.fori_loop(0, Tc, step, (h_sc[...], c_sc[...]),
                               unroll=Tc if Tc <= 8 else 4)
    h_sc[...] = hT
    c_sc[...] = cT


def _syn_lstm_chunk_kernel(xg_ref, wh_ref, o_ref, h_sc, c_sc):
    """MyLSTM ("syn-LSTM") with all six gate matmuls fused into one (H, 6H)
    recurrent matmul.  Gate column order: [i o f ii | u uu]."""
    Tc = xg_ref.shape[0]
    H = h_sc.shape[-1]

    @pl.when(pl.program_id(0) == 0)
    def _():
        h_sc[...] = jnp.zeros_like(h_sc)
        c_sc[...] = jnp.zeros_like(c_sc)

    wh = wh_ref[...].astype(jnp.bfloat16)

    def step(t, carry):
        h, c = carry
        gates = xg_ref[t].astype(jnp.float32) + jnp.dot(
            h.astype(jnp.bfloat16), wh, preferred_element_type=jnp.float32)
        s = jax.nn.sigmoid(gates[:, 0:4 * H])
        tg = jnp.tanh(gates[:, 4 * H:6 * H])
        i, o, f, ii = (s[:, 0:H], s[:, H:2 * H], s[:, 2 * H:3 * H], s[:, 3 * H:4 * H])
        u, uu = tg[:, 0:H], tg[:, H:2 * H]
        c = i * u + ii * uu + f * c
        h = o * jnp.tanh(c)
        o_ref[t] = h
        return (h, c)

    hT, cT = jax.lax.fori_loop(0, Tc, step, (h_sc[...], c_sc[...]),
                               unroll=Tc if Tc <= 8 else 4)
    h_sc[...] = hT
    c_sc[...] = cT


def _char_bwd_cell_kernel(x_ref, w_ref, b_ref, o_ref):
    """One LSTM step from zero (h, c): only i/g/o gate columns are computed
    (forget gate multiplies c_prev = 0 and is dropped)."""
    g = jnp.dot(x_ref[...].astype(jnp.bfloat16), w_ref[...].astype(jnp.bfloat16),
                preferred_element_type=jnp.float32) + b_ref[...]
    H = o_ref.shape[-1]
    i = jax.nn.sigmoid(g[:, 0:H])
    gg = jnp.tanh(g[:, H:2 * H])
    o = jax.nn.sigmoid(g[:, 2 * H:3 * H])
    o_ref[...] = o * jnp.tanh(i * gg)


# ------------------------------ layer wrappers -------------------------------

def run_lstm_seq(xg, whh):
    """Unidirectional LSTM.  xg: (T, B, 4H) bf16 time-major -> (T, B, H) f32."""
    T, B, G4 = xg.shape
    H = G4 // 4
    Tc = _time_chunk(T)
    return pl.pallas_call(
        _lstm_chunk_kernel,
        grid=(T // Tc,),
        in_specs=[pl.BlockSpec((Tc, B, 4 * H), lambda i: (i, 0, 0)),
                  pl.BlockSpec((H, 4 * H), lambda i: (0, 0))],
        out_specs=pl.BlockSpec((Tc, B, H), lambda i: (i, 0, 0)),
        out_shape=jax.ShapeDtypeStruct((T, B, H), jnp.float32),
        scratch_shapes=[pltpu.VMEM((B, H), jnp.float32),
                        pltpu.VMEM((B, H), jnp.float32)],
        compiler_params=pltpu.CompilerParams(
            dimension_semantics=("arbitrary",),
            vmem_limit_bytes=_REC_VMEM),
    )(xg, whh)


def run_bilstm_seq(xg2, whh_stack):
    """Bidirectional LSTM.  xg2: (2, T, B, 4H) bf16 (dir 0 = fwd, dir 1 = bwd,
    both projected from timestep t); whh_stack: (2, H, 4H).
    Returns (2, T, B, H) f32: out[0,t] = h_fwd(t), out[1,t] = h_bwd(t)."""
    _, T, B, G4 = xg2.shape
    H = G4 // 4
    Tc = _time_chunk(T)
    nC = T // Tc
    # fwd streams chunks 0..nC-1, bwd streams nC-1..0 (reversal by index_map)
    idx = lambda d, i: (d, i + d * (nC - 1 - 2 * i), 0, 0)
    return pl.pallas_call(
        _bilstm_chunk_kernel,
        grid=(2, nC),
        in_specs=[pl.BlockSpec((None, Tc, B, 4 * H), idx),
                  pl.BlockSpec((None, H, 4 * H), lambda d, i: (d, 0, 0))],
        out_specs=pl.BlockSpec((None, Tc, B, H), idx),
        out_shape=jax.ShapeDtypeStruct((2, T, B, H), jnp.float32),
        scratch_shapes=[pltpu.VMEM((B, H), jnp.float32),
                        pltpu.VMEM((B, H), jnp.float32)],
        compiler_params=pltpu.CompilerParams(
            dimension_semantics=("parallel", "arbitrary"),
            vmem_limit_bytes=_REC_VMEM),
    )(xg2, whh_stack)


def run_sa_bilstm(x_tm, p):
    """2-layer bidirectional LSTM on time-major x_tm (T, B, F).
    Returns the direction-stacked (2, T, B, Hs) output of layer 1."""
    T, B, F = x_tm.shape
    Hs = p['sa_w_hh_l0'].shape[1]

    # --- layer 0: single-source gate projection for both directions
    w0 = jnp.stack([p['sa_w_ih_l0'].T, p['sa_w_ih_l0r'].T])              # (2,F,4Hs)
    b0 = jnp.stack([p['sa_b_ih_l0'] + p['sa_b_hh_l0'],
                    p['sa_b_ih_l0r'] + p['sa_b_hh_l0r']])                 # (2,4Hs)
    whh0 = jnp.stack([p['sa_w_hh_l0'].T, p['sa_w_hh_l0r'].T])             # (2,Hs,4Hs)
    xg0 = pallas_gate_proj(x_tm.reshape(T * B, F), w0, b0).reshape(2, T, B, 4 * Hs)
    h0 = run_bilstm_seq(xg0, whh0)                                        # (2,T,B,Hs)

    # --- layer 1: dual-source projection consumes (2,T,B,Hs) directly
    w1 = jnp.stack([jnp.stack([p['sa_w_ih_l1'][:, :Hs].T,
                               p['sa_w_ih_l1'][:, Hs:].T]),
                    jnp.stack([p['sa_w_ih_l1r'][:, :Hs].T,
                               p['sa_w_ih_l1r'][:, Hs:].T])])             # (2,2,Hs,4Hs)
    b1 = jnp.stack([p['sa_b_ih_l1'] + p['sa_b_hh_l1'],
                    p['sa_b_ih_l1r'] + p['sa_b_hh_l1r']])
    whh1 = jnp.stack([p['sa_w_hh_l1'].T, p['sa_w_hh_l1r'].T])
    xg1 = pallas_gate_proj_pair(h0.reshape(2, T * B, Hs), w1, b1
                                ).reshape(2, T, B, 4 * Hs)
    h1 = run_bilstm_seq(xg1, whh1)                                        # (2,T,B,Hs)
    return h1


def run_syn_lstm(x_tm, m_tm, p):
    """MyLSTM on time-major inputs: x_tm (T,B,Din), m_tm (T,B,G) -> (T,B,H)."""
    T, B, Din = x_tm.shape
    G = m_tm.shape[-1]
    H = p['syn_b1'].shape[0]
    zx = jnp.zeros((Din, H), jnp.float32)
    zm = jnp.zeros((G, H), jnp.float32)
    # fused gate column order: [i(all1) o(all2) f(all3) ii(all11) u(all4) uu(all44)]
    w_h = jnp.concatenate([p['syn_w1'][:H], p['syn_w2'][:H], p['syn_w3'][:H],
                           p['syn_w11'][:H], p['syn_w4'][:H], p['syn_w44'][:H]],
                          axis=1)                                         # (H, 6H)
    w_x = jnp.concatenate([p['syn_w1'][H:], p['syn_w2'][H:H + Din],
                           p['syn_w3'][H:H + Din], zx,
                           p['syn_w4'][H:], zx], axis=1)                  # (Din, 6H)
    w_m = jnp.concatenate([zm, p['syn_w2'][H + Din:], p['syn_w3'][H + Din:],
                           p['syn_w11'][H:], zm, p['syn_w44'][H:]], axis=1)  # (G, 6H)
    bias = jnp.concatenate([p['syn_b1'], p['syn_b2'], p['syn_b3'],
                            p['syn_b11'], p['syn_b4'], p['syn_b44']])
    w_xm = jnp.concatenate([w_x, w_m], axis=0)                            # (Din+G, 6H)

    z = jnp.concatenate([x_tm, m_tm], axis=-1).reshape(T * B, Din + G)
    xg = pallas_linear(z, w_xm, bias, out_dtype=jnp.bfloat16).reshape(T, B, 6 * H)

    Tc = _time_chunk(T)
    return pl.pallas_call(
        _syn_lstm_chunk_kernel,
        grid=(T // Tc,),
        in_specs=[pl.BlockSpec((Tc, B, 6 * H), lambda i: (i, 0, 0)),
                  pl.BlockSpec((H, 6 * H), lambda i: (0, 0))],
        out_specs=pl.BlockSpec((Tc, B, H), lambda i: (i, 0, 0)),
        out_shape=jax.ShapeDtypeStruct((T, B, H), jnp.float32),
        scratch_shapes=[pltpu.VMEM((B, H), jnp.float32),
                        pltpu.VMEM((B, H), jnp.float32)],
        compiler_params=pltpu.CompilerParams(
            dimension_semantics=("arbitrary",),
            vmem_limit_bytes=_REC_VMEM),
    )(xg, w_h)


# ------------------------------ plain-JAX glue -------------------------------

def build_gcn_adjacency(edge_index, num_nodes):
    # GCNConv normalization: add self-loops, symmetric D^-1/2 (A+I) D^-1/2.
    # TODO(synk): sparse edge scatter has no clean Pallas equivalent; built as a
    # dense normalized adjacency here, aggregation runs as a Pallas matmul.
    src = jnp.concatenate([edge_index[0], jnp.arange(num_nodes, dtype=jnp.int32)])
    dst = jnp.concatenate([edge_index[1], jnp.arange(num_nodes, dtype=jnp.int32)])
    deg = jnp.zeros((num_nodes,), jnp.float32).at[dst].add(1.0)
    dinv = 1.0 / jnp.sqrt(deg)          # safe: self-loops guarantee deg >= 1
    norm = dinv[src] * dinv[dst]
    a = jnp.zeros((num_nodes, num_nodes), jnp.float32).at[dst, src].add(norm)
    return a


def char_bilstm(p, char_inputs, char_lens):
    """pack_padded_sequence + BiLSTM + gather at (len-1): forward hidden at
    len-1 (prefix-only recurrence); backward hidden at len-1 is, under packing,
    one backward step from zero state on the last valid char."""
    Nc, Lc = char_inputs.shape
    emb = p['char_emb'][char_inputs]                                   # (Nc, Lc, E)
    E = emb.shape[-1]
    Hc = p['char_w_hh_f'].shape[1]

    # forward direction: time-major gate slab (bf16), streamed recurrence
    emb_tm = jnp.transpose(emb, (1, 0, 2))                             # narrow transpose
    xg = pallas_linear(emb_tm.reshape(Lc * Nc, E), p['char_w_ih_f'].T,
                       p['char_b_ih_f'] + p['char_b_hh_f'],
                       out_dtype=jnp.bfloat16).reshape(Lc, Nc, 4 * Hc)
    h_fwd = run_lstm_seq(xg, p['char_w_hh_f'].T)                       # (Lc, Nc, Hc)

    idx = char_lens - 1
    rows = jnp.arange(Nc)
    h_fwd_last = h_fwd[idx, rows]                                      # (Nc, Hc)
    emb_last = emb[rows, idx]                                          # (Nc, E)

    # backward direction (zero state, i/g/o columns only)
    w_r = p['char_w_ih_r']
    b_r = p['char_b_ih_r'] + p['char_b_hh_r']
    w_igo = jnp.concatenate([w_r[0:Hc], w_r[2 * Hc:3 * Hc], w_r[3 * Hc:4 * Hc]],
                            axis=0).T                                  # (E, 3Hc)
    b_igo = jnp.concatenate([b_r[0:Hc], b_r[2 * Hc:3 * Hc], b_r[3 * Hc:4 * Hc]])
    TR = _row_tile(Nc)
    h_bwd_last = pl.pallas_call(
        _char_bwd_cell_kernel,
        grid=(Nc // TR,),
        in_specs=[pl.BlockSpec((TR, E), lambda i: (i, 0)),
                  pl.BlockSpec((E, 3 * Hc), lambda i: (0, 0)),
                  pl.BlockSpec((1, 3 * Hc), lambda i: (0, 0))],
        out_specs=pl.BlockSpec((TR, Hc), lambda i: (i, 0)),
        out_shape=jax.ShapeDtypeStruct((Nc, Hc), jnp.float32),
        compiler_params=pltpu.CompilerParams(
            dimension_semantics=("parallel",)),
    )(emb_last, w_igo, b_igo.reshape(1, 3 * Hc))
    return jnp.concatenate([h_fwd_last, h_bwd_last], axis=-1)          # (Nc, 2Hc)


def nncrf_forward(p, word_inputs, char_inputs, char_lens, edge_index, dep_labels):
    B, T = word_inputs.shape
    # pad the batch to a multiple of 8 (sublane alignment); padded rows are
    # fully independent and sliced off at the end.
    Bp = _round_up(B, 8)
    if Bp != B:
        word_inputs = jnp.concatenate(
            [word_inputs, jnp.zeros((Bp - B, T), word_inputs.dtype)], axis=0)
        char_inputs = jnp.concatenate(
            [char_inputs,
             jnp.zeros(((Bp - B) * T, char_inputs.shape[1]), char_inputs.dtype)],
            axis=0)
        char_lens = jnp.concatenate(
            [char_lens, jnp.ones(((Bp - B) * T,), char_lens.dtype)], axis=0)
    num_nodes = Bp * T

    # word + char features (batch-major, narrow)
    word_emb = p['word_emb'][word_inputs]                              # (Bp, T, We)
    char_feat = char_bilstm(p, char_inputs, char_lens).reshape(Bp, T, -1)
    word_features = jnp.concatenate([word_emb, char_feat], axis=-1)    # (Bp, T, F)

    # graph features: dep-embedding scatter-add per target node + GCN
    x_nodes = word_features.reshape(num_nodes, -1)
    dep_embs = p['dep_emb'][dep_labels]                                # (E, D_dep)
    dep_exp = jnp.zeros((num_nodes, dep_embs.shape[-1]),
                        jnp.float32).at[edge_index[1]].add(dep_embs)
    x_nodes = jnp.concatenate([x_nodes, dep_exp], axis=-1)             # (N, F+D_dep)
    a_norm = build_gcn_adjacency(edge_index, num_nodes)
    gcn_out = pallas_gcn(a_norm, x_nodes, p['gcn_w'], p['gcn_b'])      # (N, G)
    gcn_out = gcn_out.reshape(Bp, T, -1)

    # time-major layout for the recurrent stack (only narrow tensors transposed)
    wf_tm = jnp.transpose(word_features, (1, 0, 2))                    # (T, Bp, F)
    gcn_tm = jnp.transpose(gcn_out, (1, 0, 2))                         # (T, Bp, G)

    # NER branch: syn-LSTM on [word_features, gcn_out] with graph memory gcn_out
    combined_tm = jnp.concatenate([wf_tm, gcn_tm], axis=-1)
    lstm_out_ner = run_syn_lstm(combined_tm, gcn_tm, p)                # (T, Bp, H)

    # SA branch: 2-layer BiLSTM, directions on a parallel grid axis
    lstm_out_sa = run_sa_bilstm(wf_tm, p)                              # (2, T, Bp, Hs)

    # heads (row-tiled), consumed time-major; only narrow results transposed back
    emissions_ner = pallas_mlp_head(
        lstm_out_ner.reshape(T * Bp, -1),
        p['ner_w1'], p['ner_b1'], p['ner_gamma'], p['ner_beta'],
        p['ner_w2'], p['ner_b2']).reshape(T, Bp, -1)
    emissions_ner = jnp.transpose(emissions_ner, (1, 0, 2))[:B]        # (B, T, C)

    pooled = pallas_pool(lstm_out_sa)                                  # (Bp, 3*hid)
    emissions_sa = pallas_mlp_head(
        pooled, p['sa_w1'], p['sa_b1'], p['sa_gamma'], p['sa_beta'],
        p['sa_w2'], p['sa_b2'])[:B]                                    # (B, 2)

    predicted_tags = jnp.argmax(emissions_ner, axis=-1)                # (B, T)
    predicted_sentiments = jnp.argmax(emissions_sa, axis=1)            # (B,)
    return predicted_tags, predicted_sentiments, emissions_ner, emissions_sa


# ----------------------------- parameter init --------------------------------

def init_params(key, *, word_vocab, word_emb, char_vocab, char_emb, char_hid,
                dep_vocab, dep_emb, gcn_hid, hid, labels):
    keys = iter(jax.random.split(key, 80))

    def rnd(shape, scale=0.2):
        return jax.random.normal(next(keys), shape, jnp.float32) * scale

    Hc = char_hid // 2
    word_feat = word_emb + char_hid
    syn_in = word_feat + gcn_hid
    Hs = hid // 2

    p = {
        'word_emb': rnd((word_vocab, word_emb)),
        'char_emb': rnd((char_vocab, char_emb)),
        # char BiLSTM (torch layout: w_ih (4H, D), w_hh (4H, H))
        'char_w_ih_f': rnd((4 * Hc, char_emb)), 'char_w_hh_f': rnd((4 * Hc, Hc)),
        'char_b_ih_f': rnd((4 * Hc,)), 'char_b_hh_f': rnd((4 * Hc,)),
        'char_w_ih_r': rnd((4 * Hc, char_emb)), 'char_w_hh_r': rnd((4 * Hc, Hc)),
        'char_b_ih_r': rnd((4 * Hc,)), 'char_b_hh_r': rnd((4 * Hc,)),
        'dep_emb': rnd((dep_vocab, dep_emb)),
        # GCN (stored (in, out))
        'gcn_w': rnd((word_feat + dep_emb, gcn_hid)), 'gcn_b': rnd((gcn_hid,)),
        # syn-LSTM linears (stored (in, out), input order = concat order)
        'syn_w1': rnd((hid + syn_in, hid)), 'syn_b1': rnd((hid,)),
        'syn_w2': rnd((hid + syn_in + gcn_hid, hid)), 'syn_b2': rnd((hid,)),
        'syn_w3': rnd((hid + syn_in + gcn_hid, hid)), 'syn_b3': rnd((hid,)),
        'syn_w4': rnd((hid + syn_in, hid)), 'syn_b4': rnd((hid,)),
        'syn_w11': rnd((hid + gcn_hid, hid)), 'syn_b11': rnd((hid,)),
        'syn_w44': rnd((hid + gcn_hid, hid)), 'syn_b44': rnd((hid,)),
        # SA BiLSTM, 2 layers (torch layout)
        'sa_w_ih_l0': rnd((4 * Hs, word_feat)), 'sa_w_hh_l0': rnd((4 * Hs, Hs)),
        'sa_b_ih_l0': rnd((4 * Hs,)), 'sa_b_hh_l0': rnd((4 * Hs,)),
        'sa_w_ih_l0r': rnd((4 * Hs, word_feat)), 'sa_w_hh_l0r': rnd((4 * Hs, Hs)),
        'sa_b_ih_l0r': rnd((4 * Hs,)), 'sa_b_hh_l0r': rnd((4 * Hs,)),
        'sa_w_ih_l1': rnd((4 * Hs, 2 * Hs)), 'sa_w_hh_l1': rnd((4 * Hs, Hs)),
        'sa_b_ih_l1': rnd((4 * Hs,)), 'sa_b_hh_l1': rnd((4 * Hs,)),
        'sa_w_ih_l1r': rnd((4 * Hs, 2 * Hs)), 'sa_w_hh_l1r': rnd((4 * Hs, Hs)),
        'sa_b_ih_l1r': rnd((4 * Hs,)), 'sa_b_hh_l1r': rnd((4 * Hs,)),
        # hidden2tag_ner
        'ner_w1': rnd((hid, hid // 2)), 'ner_b1': rnd((hid // 2,)),
        'ner_gamma': jnp.ones((hid // 2,), jnp.float32),
        'ner_beta': jnp.zeros((hid // 2,), jnp.float32),
        'ner_w2': rnd((hid // 2, labels)), 'ner_b2': rnd((labels,)),
        # hidden2tag_sa
        'sa_w1': rnd((hid * 3, 64)), 'sa_b1': rnd((64,)),
        'sa_gamma': jnp.ones((64,), jnp.float32),
        'sa_beta': jnp.zeros((64,), jnp.float32),
        'sa_w2': rnd((64, 2)), 'sa_b2': rnd((2,)),
    }
    return p


# ----------------------------------- main -------------------------------------

if __name__ == "__main__":
    B, T = 2, 8
    WORD_VOCAB, WORD_EMB = 20, 16
    CHAR_VOCAB, CHAR_EMB, CHAR_HID = 12, 8, 16
    Lc = 5
    DEP_VOCAB, DEP_EMB = 6, 8
    GCN_HID = 16
    HID = 32
    LABELS = 5
    PAD_IDX = 0

    root = jax.random.PRNGKey(0)
    k_par, k_w, k_c, k_cl, k_dep = jax.random.split(root, 5)

    params = init_params(k_par, word_vocab=WORD_VOCAB, word_emb=WORD_EMB,
                         char_vocab=CHAR_VOCAB, char_emb=CHAR_EMB,
                         char_hid=CHAR_HID, dep_vocab=DEP_VOCAB,
                         dep_emb=DEP_EMB, gcn_hid=GCN_HID, hid=HID,
                         labels=LABELS)

    # deterministic example inputs
    word_inputs = jax.random.randint(k_w, (B, T), 1, WORD_VOCAB, dtype=jnp.int32)
    lengths = np.array([T, T - 2], dtype=np.int32)
    word_inputs = word_inputs.at[1, int(lengths[1]):].set(PAD_IDX)

    char_inputs = jax.random.randint(k_c, (B * T, Lc), 1, CHAR_VOCAB, dtype=jnp.int32)
    char_lens = jax.random.randint(k_cl, (B * T,), 1, Lc + 1, dtype=jnp.int32)

    # dependency-chain graph: edge (head = t-1) -> (dependent = t) per sentence
    src, dst = [], []
    for b in range(B):
        for t in range(1, T):
            src.append(b * T + t - 1)
            dst.append(b * T + t)
    edge_index = jnp.array([src, dst], dtype=jnp.int32)          # (2, E)
    dep_labels = jax.random.randint(k_dep, (edge_index.shape[1],),
                                    0, DEP_VOCAB, dtype=jnp.int32)

    fwd = jax.jit(nncrf_forward)
    pred_tags, pred_sent, em_ner, em_sa = fwd(params, word_inputs, char_inputs,
                                              char_lens, edge_index, dep_labels)
    jax.block_until_ready((pred_tags, pred_sent, em_ner, em_sa))

    # host-side truncation of predicted tag sequences (like the torch list comp)
    pred_tags_np = np.asarray(pred_tags)
    predicted_tags = [pred_tags_np[i, :int(lengths[i])].tolist() for i in range(B)]
    predicted_sentiments = np.asarray(pred_sent).tolist()
    assert len(predicted_tags) == B and len(predicted_sentiments) == B
    assert em_ner.shape == (B, T, LABELS) and em_sa.shape == (B, 2)

    print("KERNEL_OK")
</pallas_src>

<mosaic_0001>
module attributes {stable_mosaic.version = 11 : i64} {
  func.func @_char_bwd_cell_kernel(%arg0: i32, %arg1: memref<64x8xf32, #tpu.memory_space<vmem>>, %arg2: memref<8x24xf32, #tpu.memory_space<vmem>>, %arg3: memref<1x24xf32, #tpu.memory_space<vmem>>, %arg4: memref<64x8xf32, #tpu.memory_space<vmem>>) attributes {dimension_semantics = [#tpu.dimension_semantics<parallel>], iteration_bounds = array<i64: 1>, scalar_prefetch = 0 : i64, scratch_operands = 0 : i64, tpu.core_type = #tpu.core_type<tc>, window_params = [{transform_indices = @transform_0, window_bounds = array<i64: 64, 8>}, {pipeline_mode = #tpu.pipeline_mode<synchronous>, transform_indices = @transform_1, window_bounds = array<i64: 8, 24>}, {pipeline_mode = #tpu.pipeline_mode<synchronous>, transform_indices = @transform_2, window_bounds = array<i64: 1, 24>}, {transform_indices = @transform_3, window_bounds = array<i64: 64, 8>}]} {
    %c0 = arith.constant 0 : index
    %c0_0 = arith.constant 0 : index
    %0 = vector.load %arg1[%c0, %c0_0] : memref<64x8xf32, #tpu.memory_space<vmem>>, vector<64x8xf32>
    %1 = arith.truncf %0 : vector<64x8xf32> to vector<64x8xbf16>
    %c0_1 = arith.constant 0 : index
    %c0_2 = arith.constant 0 : index
    %2 = vector.load %arg2[%c0_1, %c0_2] : memref<8x24xf32, #tpu.memory_space<vmem>>, vector<8x24xf32>
    %3 = arith.truncf %2 : vector<8x24xf32> to vector<8x24xbf16>
    %cst = arith.constant dense<0.000000e+00> : vector<64x24xf32>
    %4 = tpu.matmul %1, %3, %cst {dimension_numbers = #tpu.dot_dimension_numbers<[1], [0], [0], [1], [0, 0, 1, 1], [], []>} : vector<64x8xbf16>, vector<8x24xbf16>, vector<64x24xf32> -> vector<64x24xf32>
    %c0_3 = arith.constant 0 : index
    %c0_4 = arith.constant 0 : index
    %5 = vector.load %arg3[%c0_3, %c0_4] : memref<1x24xf32, #tpu.memory_space<vmem>>, vector<1x24xf32>
    %6 = vector.broadcast %5 : vector<1x24xf32> to vector<64x24xf32>
    %7 = arith.addf %4, %6 : vector<64x24xf32>
    %8 = vector.extract_strided_slice %7 {offsets = [0, 0], sizes = [64, 8], strides = [1, 1]} : vector<64x24xf32> to vector<64x8xf32>
    %9 = arith.negf %8 : vector<64x8xf32>
    %10 = math.exp %9 : vector<64x8xf32>
    %cst_5 = arith.constant 1.000000e+00 : f32
    %11 = vector.broadcast %cst_5 : f32 to vector<64x8xf32>
    %12 = arith.addf %11, %10 : vector<64x8xf32>
    %13 = arith.divf %11, %12 : vector<64x8xf32>
    %14 = vector.extract_strided_slice %7 {offsets = [0, 8], sizes = [64, 8], strides = [1, 1]} : vector<64x24xf32> to vector<64x8xf32>
    %15 = math.tanh %14 : vector<64x8xf32>
    %16 = vector.extract_strided_slice %7 {offsets = [0, 16], sizes = [64, 8], strides = [1, 1]} : vector<64x24xf32> to vector<64x8xf32>
    %17 = arith.negf %16 : vector<64x8xf32>
    %18 = math.exp %17 : vector<64x8xf32>
    %cst_6 = arith.constant 1.000000e+00 : f32
    %19 = vector.broadcast %cst_6 : f32 to vector<64x8xf32>
    %20 = arith.addf %19, %18 : vector<64x8xf32>
    %21 = arith.divf %19, %20 : vector<64x8xf32>
    %22 = arith.mulf %13, %15 : vector<64x8xf32>
    %23 = math.tanh %22 : vector<64x8xf32>
    %24 = arith.mulf %21, %23 : vector<64x8xf32>
    %c0_7 = arith.constant 0 : index
    %c0_8 = arith.constant 0 : index
    %25 = vector.load %arg4[%c0_7, %c0_8] : memref<64x8xf32, #tpu.memory_space<vmem>>, vector<64x8xf32>
    tpu.vector_store %arg4[%c0_7, %c0_8], %24 {strides = array<i32>} : memref<64x8xf32, #tpu.memory_space<vmem>>, vector<64x8xf32>,
    return
  }
  func.func @transform_0(%arg0: i32) -> (i32, i32) {
    %c0_i32 = arith.constant 0 : i32
    %c0_i32_0 = arith.constant 0 : i32
    return %arg0, %c0_i32 : i32, i32
  }
  func.func @transform_1(%arg0: i32) -> (i32, i32) {
    %c0_i32 = arith.constant 0 : i32
    %c0_i32_0 = arith.constant 0 : i32
    %c0_i32_1 = arith.constant 0 : i32
    return %c0_i32, %c0_i32_0 : i32, i32
  }
  func.func @transform_2(%arg0: i32) -> (i32, i32) {
    %c0_i32 = arith.constant 0 : i32
    %c0_i32_0 = arith.constant 0 : i32
    %c0_i32_1 = arith.constant 0 : i32
    return %c0_i32, %c0_i32_0 : i32, i32
  }
  func.func @transform_3(%arg0: i32) -> (i32, i32) {
    %c0_i32 = arith.constant 0 : i32
    %c0_i32_0 = arith.constant 0 : i32
    return %arg0, %c0_i32 : i32, i32
  }
}

module attributes {stable_mosaic.version = 11 : i64} {
  func.func @_linear_kernel(%arg0: i32, %arg1: memref<320x8xf32, #tpu.memory_space<vmem>>, %arg2: memref<8x32xf32, #tpu.memory_space<vmem>>, %arg3: memref<1x32xf32, #tpu.memory_space<vmem>>, %arg4: memref<320x32xbf16, #tpu.memory_space<vmem>>) attributes {dimension_semantics = [#tpu.dimension_semantics<parallel>], iteration_bounds = array<i64: 1>, scalar_prefetch = 0 : i64, scratch_operands = 0 : i64, tpu.core_type = #tpu.core_type<tc>, window_params = [{transform_indices = @transform_0, window_bounds = array<i64: 320, 8>}, {pipeline_mode = #tpu.pipeline_mode<synchronous>, transform_indices = @transform_1, window_bounds = array<i64: 8, 32>}, {pipeline_mode = #tpu.pipeline_mode<synchronous>, transform_indices = @transform_2, window_bounds = array<i64: 1, 32>}, {transform_indices = @transform_3, window_bounds = array<i64: 320, 32>}]} {
    %c0 = arith.constant 0 : index
    %c0_0 = arith.constant 0 : index
    %0 = vector.load %arg1[%c0, %c0_0] : memref<320x8xf32, #tpu.memory_space<vmem>>, vector<320x8xf32>
    %1 = arith.truncf %0 : vector<320x8xf32> to vector<320x8xbf16>
    %c0_1 = arith.constant 0 : index
    %c0_2 = arith.constant 0 : index
    %2 = vector.load %arg2[%c0_1, %c0_2] : memref<8x32xf32, #tpu.memory_space<vmem>>, vector<8x32xf32>
    %3 = arith.truncf %2 : vector<8x32xf32> to vector<8x32xbf16>
    %cst = arith.constant dense<0.000000e+00> : vector<320x32xf32>
    %4 = tpu.matmul %1, %3, %cst {dimension_numbers = #tpu.dot_dimension_numbers<[1], [0], [0], [1], [0, 0, 1, 1], [], []>} : vector<320x8xbf16>, vector<8x32xbf16>, vector<320x32xf32> -> vector<320x32xf32>
    %c0_3 = arith.constant 0 : index
    %c0_4 = arith.constant 0 : index
    %5 = vector.load %arg3[%c0_3, %c0_4] : memref<1x32xf32, #tpu.memory_space<vmem>>, vector<1x32xf32>
    %6 = vector.broadcast %5 : vector<1x32xf32> to vector<320x32xf32>
    %7 = arith.addf %4, %6 : vector<320x32xf32>
    %8 = arith.truncf %7 : vector<320x32xf32> to vector<320x32xbf16>
    %c0_5 = arith.constant 0 : index
    %c0_6 = arith.constant 0 : index
    %9 = vector.load %arg4[%c0_5, %c0_6] : memref<320x32xbf16, #tpu.memory_space<vmem>>, vector<320x32xbf16>
    tpu.vector_store %arg4[%c0_5, %c0_6], %8 {strides = array<i32>} : memref<320x32xbf16, #tpu.memory_space<vmem>>, vector<320x32xbf16>,
    return
  }
  func.func @transform_0(%arg0: i32) -> (i32, i32) {
    %c0_i32 = arith.constant 0 : i32
    %c0_i32_0 = arith.constant 0 : i32
    return %arg0, %c0_i32 : i32, i32
  }
  func.func @transform_1(%arg0: i32) -> (i32, i32) {
    %c0_i32 = arith.constant 0 : i32
    %c0_i32_0 = arith.constant 0 : i32
    %c0_i32_1 = arith.constant 0 : i32
    return %c0_i32, %c0_i32_0 : i32, i32
  }
  func.func @transform_2(%arg0: i32) -> (i32, i32) {
    %c0_i32 = arith.constant 0 : i32
    %c0_i32_0 = arith.constant 0 : i32
    %c0_i32_1 = arith.constant 0 : i32
    return %c0_i32, %c0_i32_0 : i32, i32
  }
  func.func @transform_3(%arg0: i32) -> (i32, i32) {
    %c0_i32 = arith.constant 0 : i32
    %c0_i32_0 = arith.constant 0 : i32
    return %arg0, %c0_i32 : i32, i32
  }
}

module attributes {stable_mosaic.version = 11 : i64} {
  func.func @_lstm_chunk_kernel(%arg0: i32, %arg1: memref<5x64x32xbf16, #tpu.memory_space<vmem>>, %arg2: memref<8x32xf32, #tpu.memory_space<vmem>>, %arg3: memref<5x64x8xf32, #tpu.memory_space<vmem>>, %arg4: memref<64x8xf32, #tpu.memory_space<vmem>>, %arg5: memref<64x8xf32, #tpu.memory_space<vmem>>) attributes {dimension_semantics = [#tpu.dimension_semantics<arbitrary>], iteration_bounds = array<i64: 1>, scalar_prefetch = 0 : i64, scratch_operands = 2 : i64, tpu.core_type = #tpu.core_type<tc>, window_params = [{transform_indices = @transform_0, window_bounds = array<i64: 5, 64, 32>}, {pipeline_mode = #tpu.pipeline_mode<synchronous>, transform_indices = @transform_1, window_bounds = array<i64: 8, 32>}, {transform_indices = @transform_2, window_bounds = array<i64: 5, 64, 8>}]} {
    %c0_i32 = arith.constant 0 : i32
    %0 = arith.cmpi eq, %arg0, %c0_i32 : i32
    %1 = arith.extui %0 : i1 to i32
    %c0_i32_0 = arith.constant 0 : i32
    %2 = arith.cmpi ne, %1, %c0_i32_0 : i32
    scf.if %2 {
      %cst_50 = arith.constant 0.000000e+00 : f32
      %189 = vector.broadcast %cst_50 : f32 to vector<64x8xf32>
      %c0_51 = arith.constant 0 : index
      %c0_52 = arith.constant 0 : index
      %190 = vector.load %arg4[%c0_51, %c0_52] : memref<64x8xf32, #tpu.memory_space<vmem>>, vector<64x8xf32>
      tpu.vector_store %arg4[%c0_51, %c0_52], %189 {strides = array<i32>} : memref<64x8xf32, #tpu.memory_space<vmem>>, vector<64x8xf32>,
      %cst_53 = arith.constant 0.000000e+00 : f32
      %191 = vector.broadcast %cst_53 : f32 to vector<64x8xf32>
      %c0_54 = arith.constant 0 : index
      %c0_55 = arith.constant 0 : index
      %192 = vector.load %arg5[%c0_54, %c0_55] : memref<64x8xf32, #tpu.memory_space<vmem>>, vector<64x8xf32>
      tpu.vector_store %arg5[%c0_54, %c0_55], %191 {strides = array<i32>} : memref<64x8xf32, #tpu.memory_space<vmem>>, vector<64x8xf32>,
    } else {
    }
    %c0 = arith.constant 0 : index
    %c0_1 = arith.constant 0 : index
    %3 = vector.load %arg2[%c0, %c0_1] : memref<8x32xf32, #tpu.memory_space<vmem>>, vector<8x32xf32>
    %4 = arith.truncf %3 : vector<8x32xf32> to vector<8x32xbf16>
    %c0_2 = arith.constant 0 : index
    %c0_3 = arith.constant 0 : index
    %5 = vector.load %arg4[%c0_2, %c0_3] : memref<64x8xf32, #tpu.memory_space<vmem>>, vector<64x8xf32>
    %c0_4 = arith.constant 0 : index
    %c0_5 = arith.constant 0 : index
    %6 = vector.load %arg5[%c0_4, %c0_5] : memref<64x8xf32, #tpu.memory_space<vmem>>, vector<64x8xf32>
    %c0_i32_6 = arith.constant 0 : i32
    %7 = arith.index_cast %c0_i32_6 : i32 to index
    %c0_7 = arith.constant 0 : index
    %c0_8 = arith.constant 0 : index
    %8 = vector.load %arg1[%7, %c0_7, %c0_8] : memref<5x64x32xbf16, #tpu.memory_space<vmem>>, vector<1x64x32xbf16>
    %9 = vector.shape_cast %8 : vector<1x64x32xbf16> to vector<64x32xbf16>
    %10 = arith.extf %9 : vector<64x32xbf16> to vector<64x32xf32>
    %11 = arith.truncf %5 : vector<64x8xf32> to vector<64x8xbf16>
    %cst = arith.constant dense<0.000000e+00> : vector<64x32xf32>
    %12 = tpu.matmul %11, %4, %cst {dimension_numbers = #tpu.dot_dimension_numbers<[1], [0], [0], [1], [0, 0, 1, 1], [], []>} : vector<64x8xbf16>, vector<8x32xbf16>, vector<64x32xf32> -> vector<64x32xf32>
    %13 = arith.addf %10, %12 : vector<64x32xf32>
    %14 = vector.extract_strided_slice %13 {offsets = [0, 0], sizes = [64, 8], strides = [1, 1]} : vector<64x32xf32> to vector<64x8xf32>
    %15 = arith.negf %14 : vector<64x8xf32>
    %16 = math.exp %15 : vector<64x8xf32>
    %cst_9 = arith.constant 1.000000e+00 : f32
    %17 = vector.broadcast %cst_9 : f32 to vector<64x8xf32>
    %18 = arith.addf %17, %16 : vector<64x8xf32>
    %19 = arith.divf %17, %18 : vector<64x8xf32>
    %20 = vector.extract_strided_slice %13 {offsets = [0, 8], sizes = [64, 8], strides = [1, 1]} : vector<64x32xf32> to vector<64x8xf32>
    %21 = arith.negf %20 : vector<64x8xf32>
    %22 = math.exp %21 : vector<64x8xf32>
    %cst_10 = arith.constant 1.000000e+00 : f32
    %23 = vector.broadcast %cst_10 : f32 to vector<64x8xf32>
    %24 = arith.addf %23, %22 : vector<64x8xf32>
    %25 = arith.divf %23, %24 : vector<64x8xf32>
    %26 = vector.extract_strided_slice %13 {offsets = [0, 16], sizes = [64, 8], strides = [1, 1]} : vector<64x32xf32> to vector<64x8xf32>
    %27 = math.tanh %26 : vector<64x8xf32>
    %28 = vector.extract_strided_slice %13 {offsets = [0, 24], sizes = [64, 8], strides = [1, 1]} : vector<64x32xf32> to vector<64x8xf32>
    %29 = arith.negf %28 : vector<64x8xf32>
    %30 = math.exp %29 : vector<64x8xf32>
    %cst_11 = arith.constant 1.000000e+00 : f32
    %31 = vector.broadcast %cst_11 : f32 to vector<64x8xf32>
    %32 = arith.addf %31, %30 : vector<64x8xf32>
    %33 = arith.divf %31, %32 : vector<64x8xf32>
    %34 = arith.mulf %25, %6 : vector<64x8xf32>
    %35 = arith.mulf %19, %27 : vector<64x8xf32>
    %36 = arith.addf %34, %35 : vector<64x8xf32>
    %37 = math.tanh %36 : vector<64x8xf32>
    %38 = arith.mulf %33, %37 : vector<64x8xf32>
    %39 = arith.index_cast %c0_i32_6 : i32 to index
    %c0_12 = arith.constant 0 : index
    %c0_13 = arith.constant 0 : index
    %40 = vector.load %arg3[%39, %c0_12, %c0_13] : memref<5x64x8xf32, #tpu.memory_space<vmem>>, vector<1x64x8xf32>
    %41 = vector.shape_cast %40 : vector<1x64x8xf32> to vector<64x8xf32>
    %42 = vector.shape_cast %38 : vector<64x8xf32> to vector<1x64x8xf32>
    tpu.vector_store %arg3[%39, %c0_12, %c0_13], %42 {strides = array<i32>} : memref<5x64x8xf32, #tpu.memory_space<vmem>>, vector<1x64x8xf32>,
    %c1_i32 = arith.constant 1 : i32
    %43 = arith.index_cast %c1_i32 : i32 to index
    %c0_14 = arith.constant 0 : index
    %c0_15 = arith.constant 0 : index
    %44 = vector.load %arg1[%43, %c0_14, %c0_15] : memref<5x64x32xbf16, #tpu.memory_space<vmem>>, vector<1x64x32xbf16>
    %45 = vector.shape_cast %44 : vector<1x64x32xbf16> to vector<64x32xbf16>
    %46 = arith.extf %45 : vector<64x32xbf16> to vector<64x32xf32>
    %47 = arith.truncf %38 : vector<64x8xf32> to vector<64x8xbf16>
    %cst_16 = arith.constant dense<0.000000e+00> : vector<64x32xf32>
    %48 = tpu.matmul %47, %4, %cst_16 {dimension_numbers = #tpu.dot_dimension_numbers<[1], [0], [0], [1], [0, 0, 1, 1], [], []>} : vector<64x8xbf16>, vector<8x32xbf16>, vector<64x32xf32> -> vector<64x32xf32>
    %49 = arith.addf %46, %48 : vector<64x32xf32>
    %50 = vector.extract_strided_slice %49 {offsets = [0, 0], sizes = [64, 8], strides = [1, 1]} : vector<64x32xf32> to vector<64x8xf32>
    %51 = arith.negf %50 : vector<64x8xf32>
    %52 = math.exp %51 : vector<64x8xf32>
    %cst_17 = arith.constant 1.000000e+00 : f32
    %53 = vector.broadcast %cst_17 : f32 to vector<64x8xf32>
    %54 = arith.addf %53, %52 : vector<64x8xf32>
    %55 = arith.divf %53, %54 : vector<64x8xf32>
    %56 = vector.extract_strided_slice %49 {offsets = [0, 8], sizes = [64, 8], strides = [1, 1]} : vector<64x32xf32> to vector<64x8xf32>
    %57 = arith.negf %56 : vector<64x8xf32>
    %58 = math.exp %57 : vector<64x8xf32>
    %cst_18 = arith.constant 1.000000e+00 : f32
    %59 = vector.broadcast %cst_18 : f32 to vector<64x8xf32>
    %60 = arith.addf %59, %58 : vector<64x8xf32>
    %61 = arith.divf %59, %60 : vector<64x8xf32>
    %62 = vector.extract_strided_slice %49 {offsets = [0, 16], sizes = [64, 8], strides = [1, 1]} : vector<64x32xf32> to vector<64x8xf32>
    %63 = math.tanh %62 : vector<64x8xf32>
    %64 = vector.extract_strided_slice %49 {offsets = [0, 24], sizes = [64, 8], strides = [1, 1]} : vector<64x32xf32> to vector<64x8xf32>
    %65 = arith.negf %64 : vector<64x8xf32>
    %66 = math.exp %65 : vector<64x8xf32>
    %cst_19 = arith.constant 1.000000e+00 : f32
    %67 = vector.broadcast %cst_19 : f32 to vector<64x8xf32>
    %68 = arith.addf %67, %66 : vector<64x8xf32>
    %69 = arith.divf %67, %68 : vector<64x8xf32>
    %70 = arith.mulf %61, %36 : vector<64x8xf32>
    %71 = arith.mulf %55, %63 : vector<64x8xf32>
    %72 = arith.addf %70, %71 : vector<64x8xf32>
    %73 = math.tanh %72 : vector<64x8xf32>
    %74 = arith.mulf %69, %73 : vector<64x8xf32>
    %75 = arith.index_cast %c1_i32 : i32 to index
    %c0_20 = arith.constant 0 : index
    %c0_21 = arith.constant 0 : index
    %76 = vector.load %arg3[%75, %c0_20, %c0_21] : memref<5x64x8xf32, #tpu.memory_space<vmem>>, vector<1x64x8xf32>
    %77 = vector.shape_cast %76 : vector<1x64x8xf32> to vector<64x8xf32>
    %78 = vector.shape_cast %74 : vector<64x8xf32> to vector<1x64x8xf32>
    tpu.vector_store %arg3[%75, %c0_20, %c0_21], %78 {strides = array<i32>} : memref<5x64x8xf32, #tpu.memory_space<vmem>>, vector<1x64x8xf32>,
    %c2_i32 = arith.constant 2 : i32
    %79 = arith.index_cast %c2_i32 : i32 to index
    %c0_22 = arith.constant 0 : index
    %c0_23 = arith.constant 0 : index
    %80 = vector.load %arg1[%79, %c0_22, %c0_23] : memref<5x64x32xbf16, #tpu.memory_space<vmem>>, vector<1x64x32xbf16>
    %81 = vector.shape_cast %80 : vector<1x64x32xbf16> to vector<64x32xbf16>
    %82 = arith.extf %81 : vector<64x32xbf16> to vector<64x32xf32>
    %83 = arith.truncf %74 : vector<64x8xf32> to vector<64x8xbf16>
    %cst_24 = arith.constant dense<0.000000e+00> : vector<64x32xf32>
    %84 = tpu.matmul %83, %4, %cst_24 {dimension_numbers = #tpu.dot_dimension_numbers<[1], [0], [0], [1], [0, 0, 1, 1], [], []>} : vector<64x8xbf16>, vector<8x32xbf16>, vector<64x32xf32> -> vector<64x32xf32>
    %85 = arith.addf %82, %84 : vector<64x32xf32>
    %86 = vector.extract_strided_slice %85 {offsets = [0, 0], sizes = [64, 8], strides = [1, 1]} : vector<64x32xf32> to vector<64x8xf32>
    %87 = arith.negf %86 : vector<64x8xf32>
    %88 = math.exp %87 : vector<64x8xf32>
    %cst_25 = arith.constant 1.000000e+00 : f32
    %89 = vector.broadcast %cst_25 : f32 to vector<64x8xf32>
    %90 = arith.addf %89, %88 : vector<64x8xf32>
    %91 = arith.divf %89, %90 : vector<64x8xf32>
    %92 = vector.extract_strided_slice %85 {offsets = [0, 8], sizes = [64, 8], strides = [1, 1]} : vector<64x32xf32> to vector<64x8xf32>
    %93 = arith.negf %92 : vector<64x8xf32>
    %94 = math.exp %93 : vector<64x8xf32>
    %cst_26 = arith.constant 1.000000e+00 : f32
    %95 = vector.broadcast %cst_26 : f32 to vector<64x8xf32>
    %96 = arith.addf %95, %94 : vector<64x8xf32>
    %97 = arith.divf %95, %96 : vector<64x8xf32>
    %98 = vector.extract_strided_slice %85 {offsets = [0, 16], sizes = [64, 8], strides = [1, 1]} : vector<64x32xf32> to vector<64x8xf32>
    %99 = math.tanh %98 : vector<64x8xf32>
    %100 = vector.extract_strided_slice %85 {offsets = [0, 24], sizes = [64, 8], strides = [1, 1]} : vector<64x32xf32> to vector<64x8xf32>
    %101 = arith.negf %100 : vector<64x8xf32>
    %102 = math.exp %101 : vector<64x8xf32>
    %cst_27 = arith.constant 1.000000e+00 : f32
    %103 = vector.broadcast %cst_27 : f32 to vector<64x8xf32>
    %104 = arith.addf %103, %102 : vector<64x8xf32>
    %105 = arith.divf %103, %104 : vector<64x8xf32>
    %106 = arith.mulf %97, %72 : vector<64x8xf32>
    %107 = arith.mulf %91, %99 : vector<64x8xf32>
    %108 = arith.addf %106, %107 : vector<64x8xf32>
    %109 = math.tanh %108 : vector<64x8xf32>
    %110 = arith.mulf %105, %109 : vector<64x8xf32>
    %111 = arith.index_cast %c2_i32 : i32 to index
    %c0_28 = arith.constant 0 : index
    %c0_29 = arith.constant 0 : index
    %112 = vector.load %arg3[%111, %c0_28, %c0_29] : memref<5x64x8xf32, #tpu.memory_space<vmem>>, vector<1x64x8xf32>
    %113 = vector.shape_cast %112 : vector<1x64x8xf32> to vector<64x8xf32>
    %114 = vector.shape_cast %110 : vector<64x8xf32> to vector<1x64x8xf32>
    tpu.vector_store %arg3[%111, %c0_28, %c0_29], %114 {strides = array<i32>} : memref<5x64x8xf32, #tpu.memory_space<vmem>>, vector<1x64x8xf32>,
    %c3_i32 = arith.constant 3 : i32
    %115 = arith.index_cast %c3_i32 : i32 to index
    %c0_30 = arith.constant 0 : index
    %c0_31 = arith.constant 0 : index
    %116 = vector.load %arg1[%115, %c0_30, %c0_31] : memref<5x64x32xbf16, #tpu.memory_space<vmem>>, vector<1x64x32xbf16>
    %117 = vector.shape_cast %116 : vector<1x64x32xbf16> to vector<64x32xbf16>
    %118 = arith.extf %117 : vector<64x32xbf16> to vector<64x32xf32>
    %119 = arith.truncf %110 : vector<64x8xf32> to vector<64x8xbf16>
    %cst_32 = arith.constant dense<0.000000e+00> : vector<64x32xf32>
    %120 = tpu.matmul %119, %4, %cst_32 {dimension_numbers = #tpu.dot_dimension_numbers<[1], [0], [0], [1], [0, 0, 1, 1], [], []>} : vector<64x8xbf16>, vector<8x32xbf16>, vector<64x32xf32> -> vector<64x32xf32>
    %121 = arith.addf %118, %120 : vector<64x32xf32>
    %122 = vector.extract_strided_slice %121 {offsets = [0, 0], sizes = [64, 8], strides = [1, 1]} : vector<64x32xf32> to vector<64x8xf32>
    %123 = arith.negf %122 : vector<64x8xf32>
    %124 = math.exp %123 : vector<64x8xf32>
    %cst_33 = arith.constant 1.000000e+00 : f32
    %125 = vector.broadcast %cst_33 : f32 to vector<64x8xf32>
    %126 = arith.addf %125, %124 : vector<64x8xf32>
    %127 = arith.divf %125, %126 : vector<64x8xf32>
    %128 = vector.extract_strided_slice %121 {offsets = [0, 8], sizes = [64, 8], strides = [1, 1]} : vector<64x32xf32> to vector<64x8xf32>
    %129 = arith.negf %128 : vector<64x8xf32>
    %130 = math.exp %129 : vector<64x8xf32>
    %cst_34 = arith.constant 1.000000e+00 : f32
    %131 = vector.broadcast %cst_34 : f32 to vector<64x8xf32>
    %132 = arith.addf %131, %130 : vector<64x8xf32>
    %133 = arith.divf %131, %132 : vector<64x8xf32>
    %134 = vector.extract_strided_slice %121 {offsets = [0, 16], sizes = [64, 8], strides = [1, 1]} : vector<64x32xf32> to vector<64x8xf32>
    %135 = math.tanh %134 : vector<64x8xf32>
    %136 = vector.extract_strided_slice %121 {offsets = [0, 24], sizes = [64, 8], strides = [1, 1]} : vector<64x32xf32> to vector<64x8xf32>
    %137 = arith.negf %136 : vector<64x8xf32>
    %138 = math.exp %137 : vector<64x8xf32>
    %cst_35 = arith.constant 1.000000e+00 : f32
    %139 = vector.broadcast %cst_35 : f32 to vector<64x8xf32>
    %140 = arith.addf %139, %138 : vector<64x8xf32>
    %141 = arith.divf %139, %140 : vector<64x8xf32>
    %142 = arith.mulf %133, %108 : vector<64x8xf32>
    %143 = arith.mulf %127, %135 : vector<64x8xf32>
    %144 = arith.addf %142, %143 : vector<64x8xf32>
    %145 = math.tanh %144 : vector<64x8xf32>
    %146 = arith.mulf %141, %145 : vector<64x8xf32>
    %147 = arith.index_cast %c3_i32 : i32 to index
    %c0_36 = arith.constant 0 : index
    %c0_37 = arith.constant 0 : index
    %148 = vector.load %arg3[%147, %c0_36, %c0_37] : memref<5x64x8xf32, #tpu.memory_space<vmem>>, vector<1x64x8xf32>
    %149 = vector.shape_cast %148 : vector<1x64x8xf32> to vector<64x8xf32>
    %150 = vector.shape_cast %146 : vector<64x8xf32> to vector<1x64x8xf32>
    tpu.vector_store %arg3[%147, %c0_36, %c0_37], %150 {strides = array<i32>} : memref<5x64x8xf32, #tpu.memory_space<vmem>>, vector<1x64x8xf32>,
    %c4_i32 = arith.constant 4 : i32
    %151 = arith.index_cast %c4_i32 : i32 to index
    %c0_38 = arith.constant 0 : index
    %c0_39 = arith.constant 0 : index
    %152 = vector.load %arg1[%151, %c0_38, %c0_39] : memref<5x64x32xbf16, #tpu.memory_space<vmem>>, vector<1x64x32xbf16>
    %153 = vector.shape_cast %152 : vector<1x64x32xbf16> to vector<64x32xbf16>
    %154 = arith.extf %153 : vector<64x32xbf16> to vector<64x32xf32>
    %155 = arith.truncf %146 : vector<64x8xf32> to vector<64x8xbf16>
    %cst_40 = arith.constant dense<0.000000e+00> : vector<64x32xf32>
    %156 = tpu.matmul %155, %4, %cst_40 {dimension_numbers = #tpu.dot_dimension_numbers<[1], [0], [0], [1], [0, 0, 1, 1], [], []>} : vector<64x8xbf16>, vector<8x32xbf16>, vector<64x32xf32> -> vector<64x32xf32>
    %157 = arith.addf %154, %156 : vector<64x32xf32>
    %158 = vector.extract_strided_slice %157 {offsets = [0, 0], sizes = [64, 8], strides = [1, 1]} : vector<64x32xf32> to vector<64x8xf32>
    %159 = arith.negf %158 : vector<64x8xf32>
    %160 = math.exp %159 : vector<64x8xf32>
    %cst_41 = arith.constant 1.000000e+00 : f32
    %161 = vector.broadcast %cst_41 : f32 to vector<64x8xf32>
    %162 = arith.addf %161, %160 : vector<64x8xf32>
    %163 = arith.divf %161, %162 : vector<64x8xf32>
    %164 = vector.extract_strided_slice %157 {offsets = [0, 8], sizes = [64, 8], strides = [1, 1]} : vector<64x32xf32> to vector<64x8xf32>
    %165 = arith.negf %164 : vector<64x8xf32>
    %166 = math.exp %165 : vector<64x8xf32>
    %cst_42 = arith.constant 1.000000e+00 : f32
    %167 = vector.broadcast %cst_42 : f32 to vector<64x8xf32>
    %168 = arith.addf %167, %166 : vector<64x8xf32>
    %169 = arith.divf %167, %168 : vector<64x8xf32>
    %170 = vector.extract_strided_slice %157 {offsets = [0, 16], sizes = [64, 8], strides = [1, 1]} : vector<64x32xf32> to vector<64x8xf32>
    %171 = math.tanh %170 : vector<64x8xf32>
    %172 = vector.extract_strided_slice %157 {offsets = [0, 24], sizes = [64, 8], strides = [1, 1]} : vector<64x32xf32> to vector<64x8xf32>
    %173 = arith.negf %172 : vector<64x8xf32>
    %174 = math.exp %173 : vector<64x8xf32>
    %cst_43 = arith.constant 1.000000e+00 : f32
    %175 = vector.broadcast %cst_43 : f32 to vector<64x8xf32>
    %176 = arith.addf %175, %174 : vector<64x8xf32>
    %177 = arith.divf %175, %176 : vector<64x8xf32>
    %178 = arith.mulf %169, %144 : vector<64x8xf32>
    %179 = arith.mulf %163, %171 : vector<64x8xf32>
    %180 = arith.addf %178, %179 : vector<64x8xf32>
    %181 = math.tanh %180 : vector<64x8xf32>
    %182 = arith.mulf %177, %181 : vector<64x8xf32>
    %183 = arith.index_cast %c4_i32 : i32 to index
    %c0_44 = arith.constant 0 : index
    %c0_45 = arith.constant 0 : index
    %184 = vector.load %arg3[%183, %c0_44, %c0_45] : memref<5x64x8xf32, #tpu.memory_space<vmem>>, vector<1x64x8xf32>
    %185 = vector.shape_cast %184 : vector<1x64x8xf32> to vector<64x8xf32>
    %186 = vector.shape_cast %182 : vector<64x8xf32> to vector<1x64x8xf32>
    tpu.vector_store %arg3[%183, %c0_44, %c0_45], %186 {strides = array<i32>} : memref<5x64x8xf32, #tpu.memory_space<vmem>>, vector<1x64x8xf32>,
    %c5_i32 = arith.constant 5 : i32
    %c0_46 = arith.constant 0 : index
    %c0_47 = arith.constant 0 : index
    %187 = vector.load %arg4[%c0_46, %c0_47] : memref<64x8xf32, #tpu.memory_space<vmem>>, vector<64x8xf32>
    tpu.vector_store %arg4[%c0_46, %c0_47], %182 {strides = array<i32>} : memref<64x8xf32, #tpu.memory_space<vmem>>, vector<64x8xf32>,
    %c0_48 = arith.constant 0 : index
    %c0_49 = arith.constant 0 : index
    %188 = vector.load %arg5[%c0_48, %c0_49] : memref<64x8xf32, #tpu.memory_space<vmem>>, vector<64x8xf32>
    tpu.vector_store %arg5[%c0_48, %c0_49], %180 {strides = array<i32>} : memref<64x8xf32, #tpu.memory_space<vmem>>, vector<64x8xf32>,
    return
  }
  func.func @transform_0(%arg0: i32) -> (i32, i32, i32) {
    %c0_i32 = arith.constant 0 : i32
    %c0_i32_0 = arith.constant 0 : i32
    %c0_i32_1 = arith.constant 0 : i32
    return %arg0, %c0_i32, %c0_i32_0 : i32, i32, i32
  }
  func.func @transform_1(%arg0: i32) -> (i32, i32) {
    %c0_i32 = arith.constant 0 : i32
    %c0_i32_0 = arith.constant 0 : i32
    %c0_i32_1 = arith.constant 0 : i32
    return %c0_i32, %c0_i32_0 : i32, i32
  }
  func.func @transform_2(%arg0: i32) -> (i32, i32, i32) {
    %c0_i32 = arith.constant 0 : i32
    %c0_i32_0 = arith.constant 0 : i32
    %c0_i32_1 = arith.constant 0 : i32
    return %arg0, %c0_i32, %c0_i32_0 : i32, i32, i32
  }
}

module attributes {stable_mosaic.version = 11 : i64} {
  func.func @_gcn_agg_kernel(%arg0: i32, %arg1: memref<64x64xf32, #tpu.memory_space<vmem>>, %arg2: memref<64x16xf32, #tpu.memory_space<vmem>>, %arg3: memref<1x16xf32, #tpu.memory_space<vmem>>, %arg4: memref<64x16xf32, #tpu.memory_space<vmem>>) attributes {dimension_semantics = [#tpu.dimension_semantics<parallel>], iteration_bounds = array<i64: 1>, scalar_prefetch = 0 : i64, scratch_operands = 0 : i64, tpu.core_type = #tpu.core_type<tc>, window_params = [{transform_indices = @transform_0, window_bounds = array<i64: 64, 64>}, {pipeline_mode = #tpu.pipeline_mode<synchronous>, transform_indices = @transform_1, window_bounds = array<i64: 64, 16>}, {pipeline_mode = #tpu.pipeline_mode<synchronous>, transform_indices = @transform_2, window_bounds = array<i64: 1, 16>}, {transform_indices = @transform_3, window_bounds = array<i64: 64, 16>}]} {
    %c0 = arith.constant 0 : index
    %c0_0 = arith.constant 0 : index
    %0 = vector.load %arg1[%c0, %c0_0] : memref<64x64xf32, #tpu.memory_space<vmem>>, vector<64x64xf32>
    %1 = arith.truncf %0 : vector<64x64xf32> to vector<64x64xbf16>
    %c0_1 = arith.constant 0 : index
    %c0_2 = arith.constant 0 : index
    %2 = vector.load %arg2[%c0_1, %c0_2] : memref<64x16xf32, #tpu.memory_space<vmem>>, vector<64x16xf32>
    %3 = arith.truncf %2 : vector<64x16xf32> to vector<64x16xbf16>
    %cst = arith.constant dense<0.000000e+00> : vector<64x16xf32>
    %4 = tpu.matmul %1, %3, %cst {dimension_numbers = #tpu.dot_dimension_numbers<[1], [0], [0], [1], [0, 0, 1, 1], [], []>} : vector<64x64xbf16>, vector<64x16xbf16>, vector<64x16xf32> -> vector<64x16xf32>
    %c0_3 = arith.constant 0 : index
    %c0_4 = arith.constant 0 : index
    %5 = vector.load %arg3[%c0_3, %c0_4] : memref<1x16xf32, #tpu.memory_space<vmem>>, vector<1x16xf32>
    %6 = vector.broadcast %5 : vector<1x16xf32> to vector<64x16xf32>
    %7 = arith.addf %4, %6 : vector<64x16xf32>
    %cst_5 = arith.constant 0.000000e+00 : f32
    %8 = vector.broadcast %cst_5 : f32 to vector<64x16xf32>
    %9 = arith.maximumf %7, %8 : vector<64x16xf32>
    %c0_6 = arith.constant 0 : index
    %c0_7 = arith.constant 0 : index
    %10 = vector.load %arg4[%c0_6, %c0_7] : memref<64x16xf32, #tpu.memory_space<vmem>>, vector<64x16xf32>
    tpu.vector_store %arg4[%c0_6, %c0_7], %9 {strides = array<i32>} : memref<64x16xf32, #tpu.memory_space<vmem>>, vector<64x16xf32>,
    return
  }
  func.func @transform_0(%arg0: i32) -> (i32, i32) {
    %c0_i32 = arith.constant 0 : i32
    %c0_i32_0 = arith.constant 0 : i32
    return %arg0, %c0_i32 : i32, i32
  }
  func.func @transform_1(%arg0: i32) -> (i32, i32) {
    %c0_i32 = arith.constant 0 : i32
    %c0_i32_0 = arith.constant 0 : i32
    %c0_i32_1 = arith.constant 0 : i32
    return %c0_i32, %c0_i32_0 : i32, i32
  }
  func.func @transform_2(%arg0: i32) -> (i32, i32) {
    %c0_i32 = arith.constant 0 : i32
    %c0_i32_0 = arith.constant 0 : i32
    %c0_i32_1 = arith.constant 0 : i32
    return %c0_i32, %c0_i32_0 : i32, i32
  }
  func.func @transform_3(%arg0: i32) -> (i32, i32) {
    %c0_i32 = arith.constant 0 : i32
    %c0_i32_0 = arith.constant 0 : i32
    return %arg0, %c0_i32 : i32, i32
  }
}

module attributes {stable_mosaic.version = 11 : i64} {
  func.func @_linear_kernel(%arg0: i32, %arg1: memref<64x40xf32, #tpu.memory_space<vmem>>, %arg2: memref<40x16xf32, #tpu.memory_space<vmem>>, %arg3: memref<1x16xf32, #tpu.memory_space<vmem>>, %arg4: memref<64x16xf32, #tpu.memory_space<vmem>>) attributes {dimension_semantics = [#tpu.dimension_semantics<parallel>], iteration_bounds = array<i64: 1>, scalar_prefetch = 0 : i64, scratch_operands = 0 : i64, tpu.core_type = #tpu.core_type<tc>, window_params = [{transform_indices = @transform_0, window_bounds = array<i64: 64, 40>}, {pipeline_mode = #tpu.pipeline_mode<synchronous>, transform_indices = @transform_1, window_bounds = array<i64: 40, 16>}, {pipeline_mode = #tpu.pipeline_mode<synchronous>, transform_indices = @transform_2, window_bounds = array<i64: 1, 16>}, {transform_indices = @transform_3, window_bounds = array<i64: 64, 16>}]} {
    %c0 = arith.constant 0 : index
    %c0_0 = arith.constant 0 : index
    %0 = vector.load %arg1[%c0, %c0_0] : memref<64x40xf32, #tpu.memory_space<vmem>>, vector<64x40xf32>
    %1 = arith.truncf %0 : vector<64x40xf32> to vector<64x40xbf16>
    %c0_1 = arith.constant 0 : index
    %c0_2 = arith.constant 0 : index
    %2 = vector.load %arg2[%c0_1, %c0_2] : memref<40x16xf32, #tpu.memory_space<vmem>>, vector<40x16xf32>
    %3 = arith.truncf %2 : vector<40x16xf32> to vector<40x16xbf16>
    %cst = arith.constant dense<0.000000e+00> : vector<64x16xf32>
    %4 = tpu.matmul %1, %3, %cst {dimension_numbers = #tpu.dot_dimension_numbers<[1], [0], [0], [1], [0, 0, 1, 1], [], []>} : vector<64x40xbf16>, vector<40x16xbf16>, vector<64x16xf32> -> vector<64x16xf32>
    %c0_3 = arith.constant 0 : index
    %c0_4 = arith.constant 0 : index
    %5 = vector.load %arg3[%c0_3, %c0_4] : memref<1x16xf32, #tpu.memory_space<vmem>>, vector<1x16xf32>
    %6 = vector.broadcast %5 : vector<1x16xf32> to vector<64x16xf32>
    %7 = arith.addf %4, %6 : vector<64x16xf32>
    %c0_5 = arith.constant 0 : index
    %c0_6 = arith.constant 0 : index
    %8 = vector.load %arg4[%c0_5, %c0_6] : memref<64x16xf32, #tpu.memory_space<vmem>>, vector<64x16xf32>
    tpu.vector_store %arg4[%c0_5, %c0_6], %7 {strides = array<i32>} : memref<64x16xf32, #tpu.memory_space<vmem>>, vector<64x16xf32>,
    return
  }
  func.func @transform_0(%arg0: i32) -> (i32, i32) {
    %c0_i32 = arith.constant 0 : i32
    %c0_i32_0 = arith.constant 0 : i32
    return %arg0, %c0_i32 : i32, i32
  }
  func.func @transform_1(%arg0: i32) -> (i32, i32) {
    %c0_i32 = arith.constant 0 : i32
    %c0_i32_0 = arith.constant 0 : i32
    %c0_i32_1 = arith.constant 0 : i32
    return %c0_i32, %c0_i32_0 : i32, i32
  }
  func.func @transform_2(%arg0: i32) -> (i32, i32) {
    %c0_i32 = arith.constant 0 : i32
    %c0_i32_0 = arith.constant 0 : i32
    %c0_i32_1 = arith.constant 0 : i32
    return %c0_i32, %c0_i32_0 : i32, i32
  }
  func.func @transform_3(%arg0: i32) -> (i32, i32) {
    %c0_i32 = arith.constant 0 : i32
    %c0_i32_0 = arith.constant 0 : i32
    return %arg0, %c0_i32 : i32, i32
  }
}

module attributes {stable_mosaic.version = 11 : i64} {
  func.func @_linear_kernel(%arg0: i32, %arg1: memref<64x64xf32, #tpu.memory_space<vmem>>, %arg2: memref<64x192xf32, #tpu.memory_space<vmem>>, %arg3: memref<1x192xf32, #tpu.memory_space<vmem>>, %arg4: memref<64x192xbf16, #tpu.memory_space<vmem>>) attributes {dimension_semantics = [#tpu.dimension_semantics<parallel>], iteration_bounds = array<i64: 1>, scalar_prefetch = 0 : i64, scratch_operands = 0 : i64, tpu.core_type = #tpu.core_type<tc>, window_params = [{transform_indices = @transform_0, window_bounds = array<i64: 64, 64>}, {pipeline_mode = #tpu.pipeline_mode<synchronous>, transform_indices = @transform_1, window_bounds = array<i64: 64, 192>}, {pipeline_mode = #tpu.pipeline_mode<synchronous>, transform_indices = @transform_2, window_bounds = array<i64: 1, 192>}, {transform_indices = @transform_3, window_bounds = array<i64: 64, 192>}]} {
    %c0 = arith.constant 0 : index
    %c0_0 = arith.constant 0 : index
    %0 = vector.load %arg1[%c0, %c0_0] : memref<64x64xf32, #tpu.memory_space<vmem>>, vector<64x64xf32>
    %1 = arith.truncf %0 : vector<64x64xf32> to vector<64x64xbf16>
    %c0_1 = arith.constant 0 : index
    %c0_2 = arith.constant 0 : index
    %2 = vector.load %arg2[%c0_1, %c0_2] : memref<64x192xf32, #tpu.memory_space<vmem>>, vector<64x192xf32>
    %3 = arith.truncf %2 : vector<64x192xf32> to vector<64x192xbf16>
    %cst = arith.constant dense<0.000000e+00> : vector<64x192xf32>
    %4 = tpu.matmul %1, %3, %cst {dimension_numbers = #tpu.dot_dimension_numbers<[1], [0], [0], [1], [0, 0, 1, 1], [], []>} : vector<64x64xbf16>, vector<64x192xbf16>, vector<64x192xf32> -> vector<64x192xf32>
    %c0_3 = arith.constant 0 : index
    %c0_4 = arith.constant 0 : index
    %5 = vector.load %arg3[%c0_3, %c0_4] : memref<1x192xf32, #tpu.memory_space<vmem>>, vector<1x192xf32>
    %6 = vector.broadcast %5 : vector<1x192xf32> to vector<64x192xf32>
    %7 = arith.addf %4, %6 : vector<64x192xf32>
    %8 = arith.truncf %7 : vector<64x192xf32> to vector<64x192xbf16>
    %c0_5 = arith.constant 0 : index
    %c0_6 = arith.constant 0 : index
    %9 = vector.load %arg4[%c0_5, %c0_6] : memref<64x192xbf16, #tpu.memory_space<vmem>>, vector<64x192xbf16>
    tpu.vector_store %arg4[%c0_5, %c0_6], %8 {strides = array<i32>} : memref<64x192xbf16, #tpu.memory_space<vmem>>, vector<64x192xbf16>,
    return
  }
  func.func @transform_0(%arg0: i32) -> (i32, i32) {
    %c0_i32 = arith.constant 0 : i32
    %c0_i32_0 = arith.constant 0 : i32
    return %arg0, %c0_i32 : i32, i32
  }
  func.func @transform_1(%arg0: i32) -> (i32, i32) {
    %c0_i32 = arith.constant 0 : i32
    %c0_i32_0 = arith.constant 0 : i32
    %c0_i32_1 = arith.constant 0 : i32
    return %c0_i32, %c0_i32_0 : i32, i32
  }
  func.func @transform_2(%arg0: i32) -> (i32, i32) {
    %c0_i32 = arith.constant 0 : i32
    %c0_i32_0 = arith.constant 0 : i32
    %c0_i32_1 = arith.constant 0 : i32
    return %c0_i32, %c0_i32_0 : i32, i32
  }
  func.func @transform_3(%arg0: i32) -> (i32, i32) {
    %c0_i32 = arith.constant 0 : i32
    %c0_i32_0 = arith.constant 0 : i32
    return %arg0, %c0_i32 : i32, i32
  }
}

module attributes {stable_mosaic.version = 11 : i64} {
  func.func @_syn_lstm_chunk_kernel(%arg0: i32, %arg1: memref<8x8x192xbf16, #tpu.memory_space<vmem>>, %arg2: memref<32x192xf32, #tpu.memory_space<vmem>>, %arg3: memref<8x8x32xf32, #tpu.memory_space<vmem>>, %arg4: memref<8x32xf32, #tpu.memory_space<vmem>>, %arg5: memref<8x32xf32, #tpu.memory_space<vmem>>) attributes {dimension_semantics = [#tpu.dimension_semantics<arbitrary>], iteration_bounds = array<i64: 1>, scalar_prefetch = 0 : i64, scratch_operands = 2 : i64, tpu.core_type = #tpu.core_type<tc>, window_params = [{transform_indices = @transform_0, window_bounds = array<i64: 8, 8, 192>}, {pipeline_mode = #tpu.pipeline_mode<synchronous>, transform_indices = @transform_1, window_bounds = array<i64: 32, 192>}, {transform_indices = @transform_2, window_bounds = array<i64: 8, 8, 32>}]} {
    %c0_i32 = arith.constant 0 : i32
    %0 = arith.cmpi eq, %arg0, %c0_i32 : i32
    %1 = arith.extui %0 : i1 to i32
    %c0_i32_0 = arith.constant 0 : i32
    %2 = arith.cmpi ne, %1, %c0_i32_0 : i32
    scf.if %2 {
      %cst_58 = arith.constant 0.000000e+00 : f32
      %265 = vector.broadcast %cst_58 : f32 to vector<8x32xf32>
      %c0_59 = arith.constant 0 : index
      %c0_60 = arith.constant 0 : index
      %266 = vector.load %arg4[%c0_59, %c0_60] : memref<8x32xf32, #tpu.memory_space<vmem>>, vector<8x32xf32>
      tpu.vector_store %arg4[%c0_59, %c0_60], %265 {strides = array<i32>} : memref<8x32xf32, #tpu.memory_space<vmem>>, vector<8x32xf32>,
      %cst_61 = arith.constant 0.000000e+00 : f32
      %267 = vector.broadcast %cst_61 : f32 to vector<8x32xf32>
      %c0_62 = arith.constant 0 : index
      %c0_63 = arith.constant 0 : index
      %268 = vector.load %arg5[%c0_62, %c0_63] : memref<8x32xf32, #tpu.memory_space<vmem>>, vector<8x32xf32>
      tpu.vector_store %arg5[%c0_62, %c0_63], %267 {strides = array<i32>} : memref<8x32xf32, #tpu.memory_space<vmem>>, vector<8x32xf32>,
    } else {
    }
    %c0 = arith.constant 0 : index
    %c0_1 = arith.constant 0 : index
    %3 = vector.load %arg2[%c0, %c0_1] : memref<32x192xf32, #tpu.memory_space<vmem>>, vector<32x192xf32>
    %4 = arith.truncf %3 : vector<32x192xf32> to vector<32x192xbf16>
    %c0_2 = arith.constant 0 : index
    %c0_3 = arith.constant 0 : index
    %5 = vector.load %arg4[%c0_2, %c0_3] : memref<8x32xf32, #tpu.memory_space<vmem>>, vector<8x32xf32>
    %c0_4 = arith.constant 0 : index
    %c0_5 = arith.constant 0 : index
    %6 = vector.load %arg5[%c0_4, %c0_5] : memref<8x32xf32, #tpu.memory_space<vmem>>, vector<8x32xf32>
    %c0_i32_6 = arith.constant 0 : i32
    %7 = arith.index_cast %c0_i32_6 : i32 to index
    %c0_7 = arith.constant 0 : index
    %c0_8 = arith.constant 0 : index
    %8 = vector.load %arg1[%7, %c0_7, %c0_8] : memref<8x8x192xbf16, #tpu.memory_space<vmem>>, vector<1x8x192xbf16>
    %9 = vector.shape_cast %8 : vector<1x8x192xbf16> to vector<8x192xbf16>
    %10 = arith.extf %9 : vector<8x192xbf16> to vector<8x192xf32>
    %11 = arith.truncf %5 : vector<8x32xf32> to vector<8x32xbf16>
    %cst = arith.constant dense<0.000000e+00> : vector<8x192xf32>
    %12 = tpu.matmul %11, %4, %cst {dimension_numbers = #tpu.dot_dimension_numbers<[1], [0], [0], [1], [0, 0, 1, 1], [], []>} : vector<8x32xbf16>, vector<32x192xbf16>, vector<8x192xf32> -> vector<8x192xf32>
    %13 = arith.addf %10, %12 : vector<8x192xf32>
    %14 = vector.extract_strided_slice %13 {offsets = [0, 0], sizes = [8, 128], strides = [1, 1]} : vector<8x192xf32> to vector<8x128xf32>
    %15 = arith.negf %14 : vector<8x128xf32>
    %16 = math.exp %15 : vector<8x128xf32>
    %cst_9 = arith.constant 1.000000e+00 : f32
    %17 = vector.broadcast %cst_9 : f32 to vector<8x128xf32>
    %18 = arith.addf %17, %16 : vector<8x128xf32>
    %19 = arith.divf %17, %18 : vector<8x128xf32>
    %20 = vector.extract_strided_slice %13 {offsets = [0, 128], sizes = [8, 64], strides = [1, 1]} : vector<8x192xf32> to vector<8x64xf32>
    %21 = math.tanh %20 : vector<8x64xf32>
    %22 = vector.extract_strided_slice %19 {offsets = [0, 0], sizes = [8, 32], strides = [1, 1]} : vector<8x128xf32> to vector<8x32xf32>
    %23 = vector.extract_strided_slice %19 {offsets = [0, 32], sizes = [8, 32], strides = [1, 1]} : vector<8x128xf32> to vector<8x32xf32>
    %24 = vector.extract_strided_slice %19 {offsets = [0, 64], sizes = [8, 32], strides = [1, 1]} : vector<8x128xf32> to vector<8x32xf32>
    %25 = vector.extract_strided_slice %19 {offsets = [0, 96], sizes = [8, 32], strides = [1, 1]} : vector<8x128xf32> to vector<8x32xf32>
    %26 = vector.extract_strided_slice %21 {offsets = [0, 0], sizes = [8, 32], strides = [1, 1]} : vector<8x64xf32> to vector<8x32xf32>
    %27 = vector.extract_strided_slice %21 {offsets = [0, 32], sizes = [8, 32], strides = [1, 1]} : vector<8x64xf32> to vector<8x32xf32>
    %28 = arith.mulf %22, %26 : vector<8x32xf32>
    %29 = arith.mulf %25, %27 : vector<8x32xf32>
    %30 = arith.addf %28, %29 : vector<8x32xf32>
    %31 = arith.mulf %24, %6 : vector<8x32xf32>
    %32 = arith.addf %30, %31 : vector<8x32xf32>
    %33 = math.tanh %32 : vector<8x32xf32>
    %34 = arith.mulf %23, %33 : vector<8x32xf32>
    %35 = arith.index_cast %c0_i32_6 : i32 to index
    %c0_10 = arith.constant 0 : index
    %c0_11 = arith.constant 0 : index
    %36 = vector.load %arg3[%35, %c0_10, %c0_11] : memref<8x8x32xf32, #tpu.memory_space<vmem>>, vector<1x8x32xf32>
    %37 = vector.shape_cast %36 : vector<1x8x32xf32> to vector<8x32xf32>
    %38 = vector.shape_cast %34 : vector<8x32xf32> to vector<1x8x32xf32>
    tpu.vector_store %arg3[%35, %c0_10, %c0_11], %38 {strides = array<i32>} : memref<8x8x32xf32, #tpu.memory_space<vmem>>, vector<1x8x32xf32>,
    %c1_i32 = arith.constant 1 : i32
    %39 = arith.index_cast %c1_i32 : i32 to index
    %c0_12 = arith.constant 0 : index
    %c0_13 = arith.constant 0 : index
    %40 = vector.load %arg1[%39, %c0_12, %c0_13] : memref<8x8x192xbf16, #tpu.memory_space<vmem>>, vector<1x8x192xbf16>
    %41 = vector.shape_cast %40 : vector<1x8x192xbf16> to vector<8x192xbf16>
    %42 = arith.extf %41 : vector<8x192xbf16> to vector<8x192xf32>
    %43 = arith.truncf %34 : vector<8x32xf32> to vector<8x32xbf16>
    %cst_14 = arith.constant dense<0.000000e+00> : vector<8x192xf32>
    %44 = tpu.matmul %43, %4, %cst_14 {dimension_numbers = #tpu.dot_dimension_numbers<[1], [0], [0], [1], [0, 0, 1, 1], [], []>} : vector<8x32xbf16>, vector<32x192xbf16>, vector<8x192xf32> -> vector<8x192xf32>
    %45 = arith.addf %42, %44 : vector<8x192xf32>
    %46 = vector.extract_strided_slice %45 {offsets = [0, 0], sizes = [8, 128], strides = [1, 1]} : vector<8x192xf32> to vector<8x128xf32>
    %47 = arith.negf %46 : vector<8x128xf32>
    %48 = math.exp %47 : vector<8x128xf32>
    %cst_15 = arith.constant 1.000000e+00 : f32
    %49 = vector.broadcast %cst_15 : f32 to vector<8x128xf32>
    %50 = arith.addf %49, %48 : vector<8x128xf32>
    %51 = arith.divf %49, %50 : vector<8x128xf32>
    %52 = vector.extract_strided_slice %45 {offsets = [0, 128], sizes = [8, 64], strides = [1, 1]} : vector<8x192xf32> to vector<8x64xf32>
    %53 = math.tanh %52 : vector<8x64xf32>
    %54 = vector.extract_strided_slice %51 {offsets = [0, 0], sizes = [8, 32], strides = [1, 1]} : vector<8x128xf32> to vector<8x32xf32>
    %55 = vector.extract_strided_slice %51 {offsets = [0, 32], sizes = [8, 32], strides = [1, 1]} : vector<8x128xf32> to vector<8x32xf32>
    %56 = vector.extract_strided_slice %51 {offsets = [0, 64], sizes = [8, 32], strides = [1, 1]} : vector<8x128xf32> to vector<8x32xf32>
    %57 = vector.extract_strided_slice %51 {offsets = [0, 96], sizes = [8, 32], strides = [1, 1]} : vector<8x128xf32> to vector<8x32xf32>
    %58 = vector.extract_strided_slice %53 {offsets = [0, 0], sizes = [8, 32], strides = [1, 1]} : vector<8x64xf32> to vector<8x32xf32>
    %59 = vector.extract_strided_slice %53 {offsets = [0, 32], sizes = [8, 32], strides = [1, 1]} : vector<8x64xf32> to vector<8x32xf32>
    %60 = arith.mulf %54, %58 : vector<8x32xf32>
    %61 = arith.mulf %57, %59 : vector<8x32xf32>
    %62 = arith.addf %60, %61 : vector<8x32xf32>
    %63 = arith.mulf %56, %32 : vector<8x32xf32>
    %64 = arith.addf %62, %63 : vector<8x32xf32>
    %65 = math.tanh %64 : vector<8x32xf32>
    %66 = arith.mulf %55, %65 : vector<8x32xf32>
    %67 = arith.index_cast %c1_i32 : i32 to index
    %c0_16 = arith.constant 0 : index
    %c0_17 = arith.constant 0 : index
    %68 = vector.load %arg3[%67, %c0_16, %c0_17] : memref<8x8x32xf32, #tpu.memory_space<vmem>>, vector<1x8x32xf32>
    %69 = vector.shape_cast %68 : vector<1x8x32xf32> to vector<8x32xf32>
    %70 = vector.shape_cast %66 : vector<8x32xf32> to vector<1x8x32xf32>
    tpu.vector_store %arg3[%67, %c0_16, %c0_17], %70 {strides = array<i32>} : memref<8x8x32xf32, #tpu.memory_space<vmem>>, vector<1x8x32xf32>,
    %c2_i32 = arith.constant 2 : i32
    %71 = arith.index_cast %c2_i32 : i32 to index
    %c0_18 = arith.constant 0 : index
    %c0_19 = arith.constant 0 : index
    %72 = vector.load %arg1[%71, %c0_18, %c0_19] : memref<8x8x192xbf16, #tpu.memory_space<vmem>>, vector<1x8x192xbf16>
    %73 = vector.shape_cast %72 : vector<1x8x192xbf16> to vector<8x192xbf16>
    %74 = arith.extf %73 : vector<8x192xbf16> to vector<8x192xf32>
    %75 = arith.truncf %66 : vector<8x32xf32> to vector<8x32xbf16>
    %cst_20 = arith.constant dense<0.000000e+00> : vector<8x192xf32>
    %76 = tpu.matmul %75, %4, %cst_20 {dimension_numbers = #tpu.dot_dimension_numbers<[1], [0], [0], [1], [0, 0, 1, 1], [], []>} : vector<8x32xbf16>, vector<32x192xbf16>, vector<8x192xf32> -> vector<8x192xf32>
    %77 = arith.addf %74, %76 : vector<8x192xf32>
    %78 = vector.extract_strided_slice %77 {offsets = [0, 0], sizes = [8, 128], strides = [1, 1]} : vector<8x192xf32> to vector<8x128xf32>
    %79 = arith.negf %78 : vector<8x128xf32>
    %80 = math.exp %79 : vector<8x128xf32>
    %cst_21 = arith.constant 1.000000e+00 : f32
    %81 = vector.broadcast %cst_21 : f32 to vector<8x128xf32>
    %82 = arith.addf %81, %80 : vector<8x128xf32>
    %83 = arith.divf %81, %82 : vector<8x128xf32>
    %84 = vector.extract_strided_slice %77 {offsets = [0, 128], sizes = [8, 64], strides = [1, 1]} : vector<8x192xf32> to vector<8x64xf32>
    %85 = math.tanh %84 : vector<8x64xf32>
    %86 = vector.extract_strided_slice %83 {offsets = [0, 0], sizes = [8, 32], strides = [1, 1]} : vector<8x128xf32> to vector<8x32xf32>
    %87 = vector.extract_strided_slice %83 {offsets = [0, 32], sizes = [8, 32], strides = [1, 1]} : vector<8x128xf32> to vector<8x32xf32>
    %88 = vector.extract_strided_slice %83 {offsets = [0, 64], sizes = [8, 32], strides = [1, 1]} : vector<8x128xf32> to vector<8x32xf32>
    %89 = vector.extract_strided_slice %83 {offsets = [0, 96], sizes = [8, 32], strides = [1, 1]} : vector<8x128xf32> to vector<8x32xf32>
    %90 = vector.extract_strided_slice %85 {offsets = [0, 0], sizes = [8, 32], strides = [1, 1]} : vector<8x64xf32> to vector<8x32xf32>
    %91 = vector.extract_strided_slice %85 {offsets = [0, 32], sizes = [8, 32], strides = [1, 1]} : vector<8x64xf32> to vector<8x32xf32>
    %92 = arith.mulf %86, %90 : vector<8x32xf32>
    %93 = arith.mulf %89, %91 : vector<8x32xf32>
    %94 = arith.addf %92, %93 : vector<8x32xf32>
    %95 = arith.mulf %88, %64 : vector<8x32xf32>
    %96 = arith.addf %94, %95 : vector<8x32xf32>
    %97 = math.tanh %96 : vector<8x32xf32>
    %98 = arith.mulf %87, %97 : vector<8x32xf32>
    %99 = arith.index_cast %c2_i32 : i32 to index
    %c0_22 = arith.constant 0 : index
    %c0_23 = arith.constant 0 : index
    %100 = vector.load %arg3[%99, %c0_22, %c0_23] : memref<8x8x32xf32, #tpu.memory_space<vmem>>, vector<1x8x32xf32>
    %101 = vector.shape_cast %100 : vector<1x8x32xf32> to vector<8x32xf32>
    %102 = vector.shape_cast %98 : vector<8x32xf32> to vector<1x8x32xf32>
    tpu.vector_store %arg3[%99, %c0_22, %c0_23], %102 {strides = array<i32>} : memref<8x8x32xf32, #tpu.memory_space<vmem>>, vector<1x8x32xf32>,
    %c3_i32 = arith.constant 3 : i32
    %103 = arith.index_cast %c3_i32 : i32 to index
    %c0_24 = arith.constant 0 : index
    %c0_25 = arith.constant 0 : index
    %104 = vector.load %arg1[%103, %c0_24, %c0_25] : memref<8x8x192xbf16, #tpu.memory_space<vmem>>, vector<1x8x192xbf16>
    %105 = vector.shape_cast %104 : vector<1x8x192xbf16> to vector<8x192xbf16>
    %106 = arith.extf %105 : vector<8x192xbf16> to vector<8x192xf32>
    %107 = arith.truncf %98 : vector<8x32xf32> to vector<8x32xbf16>
    %cst_26 = arith.constant dense<0.000000e+00> : vector<8x192xf32>
    %108 = tpu.matmul %107, %4, %cst_26 {dimension_numbers = #tpu.dot_dimension_numbers<[1], [0], [0], [1], [0, 0, 1, 1], [], []>} : vector<8x32xbf16>, vector<32x192xbf16>, vector<8x192xf32> -> vector<8x192xf32>
    %109 = arith.addf %106, %108 : vector<8x192xf32>
    %110 = vector.extract_strided_slice %109 {offsets = [0, 0], sizes = [8, 128], strides = [1, 1]} : vector<8x192xf32> to vector<8x128xf32>
    %111 = arith.negf %110 : vector<8x128xf32>
    %112 = math.exp %111 : vector<8x128xf32>
    %cst_27 = arith.constant 1.000000e+00 : f32
    %113 = vector.broadcast %cst_27 : f32 to vector<8x128xf32>
    %114 = arith.addf %113, %112 : vector<8x128xf32>
    %115 = arith.divf %113, %114 : vector<8x128xf32>
    %116 = vector.extract_strided_slice %109 {offsets = [0, 128], sizes = [8, 64], strides = [1, 1]} : vector<8x192xf32> to vector<8x64xf32>
    %117 = math.tanh %116 : vector<8x64xf32>
    %118 = vector.extract_strided_slice %115 {offsets = [0, 0], sizes = [8, 32], strides = [1, 1]} : vector<8x128xf32> to vector<8x32xf32>
    %119 = vector.extract_strided_slice %115 {offsets = [0, 32], sizes = [8, 32], strides = [1, 1]} : vector<8x128xf32> to vector<8x32xf32>
    %120 = vector.extract_strided_slice %115 {offsets = [0, 64], sizes = [8, 32], strides = [1, 1]} : vector<8x128xf32> to vector<8x32xf32>
    %121 = vector.extract_strided_slice %115 {offsets = [0, 96], sizes = [8, 32], strides = [1, 1]} : vector<8x128xf32> to vector<8x32xf32>
    %122 = vector.extract_strided_slice %117 {offsets = [0, 0], sizes = [8, 32], strides = [1, 1]} : vector<8x64xf32> to vector<8x32xf32>
    %123 = vector.extract_strided_slice %117 {offsets = [0, 32], sizes = [8, 32], strides = [1, 1]} : vector<8x64xf32> to vector<8x32xf32>
    %124 = arith.mulf %118, %122 : vector<8x32xf32>
    %125 = arith.mulf %121, %123 : vector<8x32xf32>
    %126 = arith.addf %124, %125 : vector<8x32xf32>
    %127 = arith.mulf %120, %96 : vector<8x32xf32>
    %128 = arith.addf %126, %127 : vector<8x32xf32>
    %129 = math.tanh %128 : vector<8x32xf32>
    %130 = arith.mulf %119, %129 : vector<8x32xf32>
    %131 = arith.index_cast %c3_i32 : i32 to index
    %c0_28 = arith.constant 0 : index
    %c0_29 = arith.constant 0 : index
    %132 = vector.load %arg3[%131, %c0_28, %c0_29] : memref<8x8x32xf32, #tpu.memory_space<vmem>>, vector<1x8x32xf32>
    %133 = vector.shape_cast %132 : vector<1x8x32xf32> to vector<8x32xf32>
    %134 = vector.shape_cast %130 : vector<8x32xf32> to vector<1x8x32xf32>
    tpu.vector_store %arg3[%131, %c0_28, %c0_29], %134 {strides = array<i32>} : memref<8x8x32xf32, #tpu.memory_space<vmem>>, vector<1x8x32xf32>,
    %c4_i32 = arith.constant 4 : i32
    %135 = arith.index_cast %c4_i32 : i32 to index
    %c0_30 = arith.constant 0 : index
    %c0_31 = arith.constant 0 : index
    %136 = vector.load %arg1[%135, %c0_30, %c0_31] : memref<8x8x192xbf16, #tpu.memory_space<vmem>>, vector<1x8x192xbf16>
    %137 = vector.shape_cast %136 : vector<1x8x192xbf16> to vector<8x192xbf16>
    %138 = arith.extf %137 : vector<8x192xbf16> to vector<8x192xf32>
    %139 = arith.truncf %130 : vector<8x32xf32> to vector<8x32xbf16>
    %cst_32 = arith.constant dense<0.000000e+00> : vector<8x192xf32>
    %140 = tpu.matmul %139, %4, %cst_32 {dimension_numbers = #tpu.dot_dimension_numbers<[1], [0], [0], [1], [0, 0, 1, 1], [], []>} : vector<8x32xbf16>, vector<32x192xbf16>, vector<8x192xf32> -> vector<8x192xf32>
    %141 = arith.addf %138, %140 : vector<8x192xf32>
    %142 = vector.extract_strided_slice %141 {offsets = [0, 0], sizes = [8, 128], strides = [1, 1]} : vector<8x192xf32> to vector<8x128xf32>
    %143 = arith.negf %142 : vector<8x128xf32>
    %144 = math.exp %143 : vector<8x128xf32>
    %cst_33 = arith.constant 1.000000e+00 : f32
    %145 = vector.broadcast %cst_33 : f32 to vector<8x128xf32>
    %146 = arith.addf %145, %144 : vector<8x128xf32>
    %147 = arith.divf %145, %146 : vector<8x128xf32>
    %148 = vector.extract_strided_slice %141 {offsets = [0, 128], sizes = [8, 64], strides = [1, 1]} : vector<8x192xf32> to vector<8x64xf32>
    %149 = math.tanh %148 : vector<8x64xf32>
    %150 = vector.extract_strided_slice %147 {offsets = [0, 0], sizes = [8, 32], strides = [1, 1]} : vector<8x128xf32> to vector<8x32xf32>
    %151 = vector.extract_strided_slice %147 {offsets = [0, 32], sizes = [8, 32], strides = [1, 1]} : vector<8x128xf32> to vector<8x32xf32>
    %152 = vector.extract_strided_slice %147 {offsets = [0, 64], sizes = [8, 32], strides = [1, 1]} : vector<8x128xf32> to vector<8x32xf32>
    %153 = vector.extract_strided_slice %147 {offsets = [0, 96], sizes = [8, 32], strides = [1, 1]} : vector<8x128xf32> to vector<8x32xf32>
    %154 = vector.extract_strided_slice %149 {offsets = [0, 0], sizes = [8, 32], strides = [1, 1]} : vector<8x64xf32> to vector<8x32xf32>
    %155 = vector.extract_strided_slice %149 {offsets = [0, 32], sizes = [8, 32], strides = [1, 1]} : vector<8x64xf32> to vector<8x32xf32>
    %156 = arith.mulf %150, %154 : vector<8x32xf32>
    %157 = arith.mulf %153, %155 : vector<8x32xf32>
    %158 = arith.addf %156, %157 : vector<8x32xf32>
    %159 = arith.mulf %152, %128 : vector<8x32xf32>
    %160 = arith.addf %158, %159 : vector<8x32xf32>
    %161 = math.tanh %160 : vector<8x32xf32>
    %162 = arith.mulf %151, %161 : vector<8x32xf32>
    %163 = arith.index_cast %c4_i32 : i32 to index
    %c0_34 = arith.constant 0 : index
    %c0_35 = arith.constant 0 : index
    %164 = vector.load %arg3[%163, %c0_34, %c0_35] : memref<8x8x32xf32, #tpu.memory_space<vmem>>, vector<1x8x32xf32>
    %165 = vector.shape_cast %164 : vector<1x8x32xf32> to vector<8x32xf32>
    %166 = vector.shape_cast %162 : vector<8x32xf32> to vector<1x8x32xf32>
    tpu.vector_store %arg3[%163, %c0_34, %c0_35], %166 {strides = array<i32>} : memref<8x8x32xf32, #tpu.memory_space<vmem>>, vector<1x8x32xf32>,
    %c5_i32 = arith.constant 5 : i32
    %167 = arith.index_cast %c5_i32 : i32 to index
    %c0_36 = arith.constant 0 : index
    %c0_37 = arith.constant 0 : index
    %168 = vector.load %arg1[%167, %c0_36, %c0_37] : memref<8x8x192xbf16, #tpu.memory_space<vmem>>, vector<1x8x192xbf16>
    %169 = vector.shape_cast %168 : vector<1x8x192xbf16> to vector<8x192xbf16>
    %170 = arith.extf %169 : vector<8x192xbf16> to vector<8x192xf32>
    %171 = arith.truncf %162 : vector<8x32xf32> to vector<8x32xbf16>
    %cst_38 = arith.constant dense<0.000000e+00> : vector<8x192xf32>
    %172 = tpu.matmul %171, %4, %cst_38 {dimension_numbers = #tpu.dot_dimension_numbers<[1], [0], [0], [1], [0, 0, 1, 1], [], []>} : vector<8x32xbf16>, vector<32x192xbf16>, vector<8x192xf32> -> vector<8x192xf32>
    %173 = arith.addf %170, %172 : vector<8x192xf32>
    %174 = vector.extract_strided_slice %173 {offsets = [0, 0], sizes = [8, 128], strides = [1, 1]} : vector<8x192xf32> to vector<8x128xf32>
    %175 = arith.negf %174 : vector<8x128xf32>
    %176 = math.exp %175 : vector<8x128xf32>
    %cst_39 = arith.constant 1.000000e+00 : f32
    %177 = vector.broadcast %cst_39 : f32 to vector<8x128xf32>
    %178 = arith.addf %177, %176 : vector<8x128xf32>
    %179 = arith.divf %177, %178 : vector<8x128xf32>
    %180 = vector.extract_strided_slice %173 {offsets = [0, 128], sizes = [8, 64], strides = [1, 1]} : vector<8x192xf32> to vector<8x64xf32>
    %181 = math.tanh %180 : vector<8x64xf32>
    %182 = vector.extract_strided_slice %179 {offsets = [0, 0], sizes = [8, 32], strides = [1, 1]} : vector<8x128xf32> to vector<8x32xf32>
    %183 = vector.extract_strided_slice %179 {offsets = [0, 32], sizes = [8, 32], strides = [1, 1]} : vector<8x128xf32> to vector<8x32xf32>
    %184 = vector.extract_strided_slice %179 {offsets = [0, 64], sizes = [8, 32], strides = [1, 1]} : vector<8x128xf32> to vector<8x32xf32>
    %185 = vector.extract_strided_slice %179 {offsets = [0, 96], sizes = [8, 32], strides = [1, 1]} : vector<8x128xf32> to vector<8x32xf32>
    %186 = vector.extract_strided_slice %181 {offsets = [0, 0], sizes = [8, 32], strides = [1, 1]} : vector<8x64xf32> to vector<8x32xf32>
    %187 = vector.extract_strided_slice %181 {offsets = [0, 32], sizes = [8, 32], strides = [1, 1]} : vector<8x64xf32> to vector<8x32xf32>
    %188 = arith.mulf %182, %186 : vector<8x32xf32>
    %189 = arith.mulf %185, %187 : vector<8x32xf32>
    %190 = arith.addf %188, %189 : vector<8x32xf32>
    %191 = arith.mulf %184, %160 : vector<8x32xf32>
    %192 = arith.addf %190, %191 : vector<8x32xf32>
    %193 = math.tanh %192 : vector<8x32xf32>
    %194 = arith.mulf %183, %193 : vector<8x32xf32>
    %195 = arith.index_cast %c5_i32 : i32 to index
    %c0_40 = arith.constant 0 : index
    %c0_41 = arith.constant 0 : index
    %196 = vector.load %arg3[%195, %c0_40, %c0_41] : memref<8x8x32xf32, #tpu.memory_space<vmem>>, vector<1x8x32xf32>
    %197 = vector.shape_cast %196 : vector<1x8x32xf32> to vector<8x32xf32>
    %198 = vector.shape_cast %194 : vector<8x32xf32> to vector<1x8x32xf32>
    tpu.vector_store %arg3[%195, %c0_40, %c0_41], %198 {strides = array<i32>} : memref<8x8x32xf32, #tpu.memory_space<vmem>>, vector<1x8x32xf32>,
    %c6_i32 = arith.constant 6 : i32
    %199 = arith.index_cast %c6_i32 : i32 to index
    %c0_42 = arith.constant 0 : index
    %c0_43 = arith.constant 0 : index
    %200 = vector.load %arg1[%199, %c0_42, %c0_43] : memref<8x8x192xbf16, #tpu.memory_space<vmem>>, vector<1x8x192xbf16>
    %201 = vector.shape_cast %200 : vector<1x8x192xbf16> to vector<8x192xbf16>
    %202 = arith.extf %201 : vector<8x192xbf16> to vector<8x192xf32>
    %203 = arith.truncf %194 : vector<8x32xf32> to vector<8x32xbf16>
    %cst_44 = arith.constant dense<0.000000e+00> : vector<8x192xf32>
    %204 = tpu.matmul %203, %4, %cst_44 {dimension_numbers = #tpu.dot_dimension_numbers<[1], [0], [0], [1], [0, 0, 1, 1], [], []>} : vector<8x32xbf16>, vector<32x192xbf16>, vector<8x192xf32> -> vector<8x192xf32>
    %205 = arith.addf %202, %204 : vector<8x192xf32>
    %206 = vector.extract_strided_slice %205 {offsets = [0, 0], sizes = [8, 128], strides = [1, 1]} : vector<8x192xf32> to vector<8x128xf32>
    %207 = arith.negf %206 : vector<8x128xf32>
    %208 = math.exp %207 : vector<8x128xf32>
    %cst_45 = arith.constant 1.000000e+00 : f32
    %209 = vector.broadcast %cst_45 : f32 to vector<8x128xf32>
    %210 = arith.addf %209, %208 : vector<8x128xf32>
    %211 = arith.divf %209, %210 : vector<8x128xf32>
    %212 = vector.extract_strided_slice %205 {offsets = [0, 128], sizes = [8, 64], strides = [1, 1]} : vector<8x192xf32> to vector<8x64xf32>
    %213 = math.tanh %212 : vector<8x64xf32>
    %214 = vector.extract_strided_slice %211 {offsets = [0, 0], sizes = [8, 32], strides = [1, 1]} : vector<8x128xf32> to vector<8x32xf32>
    %215 = vector.extract_strided_slice %211 {offsets = [0, 32], sizes = [8, 32], strides = [1, 1]} : vector<8x128xf32> to vector<8x32xf32>
    %216 = vector.extract_strided_slice %211 {offsets = [0, 64], sizes = [8, 32], strides = [1, 1]} : vector<8x128xf32> to vector<8x32xf32>
    %217 = vector.extract_strided_slice %211 {offsets = [0, 96], sizes = [8, 32], strides = [1, 1]} : vector<8x128xf32> to vector<8x32xf32>
    %218 = vector.extract_strided_slice %213 {offsets = [0, 0], sizes = [8, 32], strides = [1, 1]} : vector<8x64xf32> to vector<8x32xf32>
    %219 = vector.extract_strided_slice %213 {offsets = [0, 32], sizes = [8, 32], strides = [1, 1]} : vector<8x64xf32> to vector<8x32xf32>
    %220 = arith.mulf %214, %218 : vector<8x32xf32>
    %221 = arith.mulf %217, %219 : vector<8x32xf32>
    %222 = arith.addf %220, %221 : vector<8x32xf32>
    %223 = arith.mulf %216, %192 : vector<8x32xf32>
    %224 = arith.addf %222, %223 : vector<8x32xf32>
    %225 = math.tanh %224 : vector<8x32xf32>
    %226 = arith.mulf %215, %225 : vector<8x32xf32>
    %227 = arith.index_cast %c6_i32 : i32 to index
    %c0_46 = arith.constant 0 : index
    %c0_47 = arith.constant 0 : index
    %228 = vector.load %arg3[%227, %c0_46, %c0_47] : memref<8x8x32xf32, #tpu.memory_space<vmem>>, vector<1x8x32xf32>
    %229 = vector.shape_cast %228 : vector<1x8x32xf32> to vector<8x32xf32>
    %230 = vector.shape_cast %226 : vector<8x32xf32> to vector<1x8x32xf32>
    tpu.vector_store %arg3[%227, %c0_46, %c0_47], %230 {strides = array<i32>} : memref<8x8x32xf32, #tpu.memory_space<vmem>>, vector<1x8x32xf32>,
    %c7_i32 = arith.constant 7 : i32
    %231 = arith.index_cast %c7_i32 : i32 to index
    %c0_48 = arith.constant 0 : index
    %c0_49 = arith.constant 0 : index
    %232 = vector.load %arg1[%231, %c0_48, %c0_49] : memref<8x8x192xbf16, #tpu.memory_space<vmem>>, vector<1x8x192xbf16>
    %233 = vector.shape_cast %232 : vector<1x8x192xbf16> to vector<8x192xbf16>
    %234 = arith.extf %233 : vector<8x192xbf16> to vector<8x192xf32>
    %235 = arith.truncf %226 : vector<8x32xf32> to vector<8x32xbf16>
    %cst_50 = arith.constant dense<0.000000e+00> : vector<8x192xf32>
    %236 = tpu.matmul %235, %4, %cst_50 {dimension_numbers = #tpu.dot_dimension_numbers<[1], [0], [0], [1], [0, 0, 1, 1], [], []>} : vector<8x32xbf16>, vector<32x192xbf16>, vector<8x192xf32> -> vector<8x192xf32>
    %237 = arith.addf %234, %236 : vector<8x192xf32>
    %238 = vector.extract_strided_slice %237 {offsets = [0, 0], sizes = [8, 128], strides = [1, 1]} : vector<8x192xf32> to vector<8x128xf32>
    %239 = arith.negf %238 : vector<8x128xf32>
    %240 = math.exp %239 : vector<8x128xf32>
    %cst_51 = arith.constant 1.000000e+00 : f32
    %241 = vector.broadcast %cst_51 : f32 to vector<8x128xf32>
    %242 = arith.addf %241, %240 : vector<8x128xf32>
    %243 = arith.divf %241, %242 : vector<8x128xf32>
    %244 = vector.extract_strided_slice %237 {offsets = [0, 128], sizes = [8, 64], strides = [1, 1]} : vector<8x192xf32> to vector<8x64xf32>
    %245 = math.tanh %244 : vector<8x64xf32>
    %246 = vector.extract_strided_slice %243 {offsets = [0, 0], sizes = [8, 32], strides = [1, 1]} : vector<8x128xf32> to vector<8x32xf32>
    %247 = vector.extract_strided_slice %243 {offsets = [0, 32], sizes = [8, 32], strides = [1, 1]} : vector<8x128xf32> to vector<8x32xf32>
    %248 = vector.extract_strided_slice %243 {offsets = [0, 64], sizes = [8, 32], strides = [1, 1]} : vector<8x128xf32> to vector<8x32xf32>
    %249 = vector.extract_strided_slice %243 {offsets = [0, 96], sizes = [8, 32], strides = [1, 1]} : vector<8x128xf32> to vector<8x32xf32>
    %250 = vector.extract_strided_slice %245 {offsets = [0, 0], sizes = [8, 32], strides = [1, 1]} : vector<8x64xf32> to vector<8x32xf32>
    %251 = vector.extract_strided_slice %245 {offsets = [0, 32], sizes = [8, 32], strides = [1, 1]} : vector<8x64xf32> to vector<8x32xf32>
    %252 = arith.mulf %246, %250 : vector<8x32xf32>
    %253 = arith.mulf %249, %251 : vector<8x32xf32>
    %254 = arith.addf %252, %253 : vector<8x32xf32>
    %255 = arith.mulf %248, %224 : vector<8x32xf32>
    %256 = arith.addf %254, %255 : vector<8x32xf32>
    %257 = math.tanh %256 : vector<8x32xf32>
    %258 = arith.mulf %247, %257 : vector<8x32xf32>
    %259 = arith.index_cast %c7_i32 : i32 to index
    %c0_52 = arith.constant 0 : index
    %c0_53 = arith.constant 0 : index
    %260 = vector.load %arg3[%259, %c0_52, %c0_53] : memref<8x8x32xf32, #tpu.memory_space<vmem>>, vector<1x8x32xf32>
    %261 = vector.shape_cast %260 : vector<1x8x32xf32> to vector<8x32xf32>
    %262 = vector.shape_cast %258 : vector<8x32xf32> to vector<1x8x32xf32>
    tpu.vector_store %arg3[%259, %c0_52, %c0_53], %262 {strides = array<i32>} : memref<8x8x32xf32, #tpu.memory_space<vmem>>, vector<1x8x32xf32>,
    %c8_i32 = arith.constant 8 : i32
    %c0_54 = arith.constant 0 : index
    %c0_55 = arith.constant 0 : index
    %263 = vector.load %arg4[%c0_54, %c0_55] : memref<8x32xf32, #tpu.memory_space<vmem>>, vector<8x32xf32>
    tpu.vector_store %arg4[%c0_54, %c0_55], %258 {strides = array<i32>} : memref<8x32xf32, #tpu.memory_space<vmem>>, vector<8x32xf32>,
    %c0_56 = arith.constant 0 : index
    %c0_57 = arith.constant 0 : index
    %264 = vector.load %arg5[%c0_56, %c0_57] : memref<8x32xf32, #tpu.memory_space<vmem>>, vector<8x32xf32>
    tpu.vector_store %arg5[%c0_56, %c0_57], %256 {strides = array<i32>} : memref<8x32xf32, #tpu.memory_space<vmem>>, vector<8x32xf32>,
    return
  }
  func.func @transform_0(%arg0: i32) -> (i32, i32, i32) {
    %c0_i32 = arith.constant 0 : i32
    %c0_i32_0 = arith.constant 0 : i32
    %c0_i32_1 = arith.constant 0 : i32
    return %arg0, %c0_i32, %c0_i32_0 : i32, i32, i32
  }
  func.func @transform_1(%arg0: i32) -> (i32, i32) {
    %c0_i32 = arith.constant 0 : i32
    %c0_i32_0 = arith.constant 0 : i32
    %c0_i32_1 = arith.constant 0 : i32
    return %c0_i32, %c0_i32_0 : i32, i32
  }
  func.func @transform_2(%arg0: i32) -> (i32, i32, i32) {
    %c0_i32 = arith.constant 0 : i32
    %c0_i32_0 = arith.constant 0 : i32
    %c0_i32_1 = arith.constant 0 : i32
    return %arg0, %c0_i32, %c0_i32_0 : i32, i32, i32
  }
}

module attributes {stable_mosaic.version = 11 : i64} {
  func.func @_mlp_head_kernel(%arg0: i32, %arg1: memref<64x32xf32, #tpu.memory_space<vmem>>, %arg2: memref<32x16xf32, #tpu.memory_space<vmem>>, %arg3: memref<1x16xf32, #tpu.memory_space<vmem>>, %arg4: memref<1x16xf32, #tpu.memory_space<vmem>>, %arg5: memref<1x16xf32, #tpu.memory_space<vmem>>, %arg6: memref<16x5xf32, #tpu.memory_space<vmem>>, %arg7: memref<1x5xf32, #tpu.memory_space<vmem>>, %arg8: memref<64x5xf32, #tpu.memory_space<vmem>>) attributes {dimension_semantics = [#tpu.dimension_semantics<parallel>], iteration_bounds = array<i64: 1>, scalar_prefetch = 0 : i64, scratch_operands = 0 : i64, tpu.core_type = #tpu.core_type<tc>, window_params = [{transform_indices = @transform_0, window_bounds = array<i64: 64, 32>}, {pipeline_mode = #tpu.pipeline_mode<synchronous>, transform_indices = @transform_1, window_bounds = array<i64: 32, 16>}, {pipeline_mode = #tpu.pipeline_mode<synchronous>, transform_indices = @transform_2, window_bounds = array<i64: 1, 16>}, {pipeline_mode = #tpu.pipeline_mode<synchronous>, transform_indices = @transform_3, window_bounds = array<i64: 1, 16>}, {pipeline_mode = #tpu.pipeline_mode<synchronous>, transform_indices = @transform_4, window_bounds = array<i64: 1, 16>}, {pipeline_mode = #tpu.pipeline_mode<synchronous>, transform_indices = @transform_5, window_bounds = array<i64: 16, 5>}, {pipeline_mode = #tpu.pipeline_mode<synchronous>, transform_indices = @transform_6, window_bounds = array<i64: 1, 5>}, {transform_indices = @transform_7, window_bounds = array<i64: 64, 5>}]} {
    %c0 = arith.constant 0 : index
    %c0_0 = arith.constant 0 : index
    %0 = vector.load %arg1[%c0, %c0_0] : memref<64x32xf32, #tpu.memory_space<vmem>>, vector<64x32xf32>
    %1 = arith.truncf %0 : vector<64x32xf32> to vector<64x32xbf16>
    %c0_1 = arith.constant 0 : index
    %c0_2 = arith.constant 0 : index
    %2 = vector.load %arg2[%c0_1, %c0_2] : memref<32x16xf32, #tpu.memory_space<vmem>>, vector<32x16xf32>
    %3 = arith.truncf %2 : vector<32x16xf32> to vector<32x16xbf16>
    %cst = arith.constant dense<0.000000e+00> : vector<64x16xf32>
    %4 = tpu.matmul %1, %3, %cst {dimension_numbers = #tpu.dot_dimension_numbers<[1], [0], [0], [1], [0, 0, 1, 1], [], []>} : vector<64x32xbf16>, vector<32x16xbf16>, vector<64x16xf32> -> vector<64x16xf32>
    %c0_3 = arith.constant 0 : index
    %c0_4 = arith.constant 0 : index
    %5 = vector.load %arg3[%c0_3, %c0_4] : memref<1x16xf32, #tpu.memory_space<vmem>>, vector<1x16xf32>
    %6 = vector.broadcast %5 : vector<1x16xf32> to vector<64x16xf32>
    %7 = arith.addf %4, %6 : vector<64x16xf32>
    %cst_5 = arith.constant dense<0.000000e+00> : vector<64xf32>
    %8 = vector.multi_reduction <add>, %7, %cst_5 [1] : vector<64x16xf32> to vector<64xf32>
    %9 = vector.shape_cast %8 : vector<64xf32> to vector<64x1xf32>
    %cst_6 = arith.constant 1.600000e+01 : f32
    %10 = vector.broadcast %cst_6 : f32 to vector<64x1xf32>
    %11 = arith.divf %9, %10 : vector<64x1xf32>
    %12 = vector.broadcast %11 : vector<64x1xf32> to vector<64x16xf32>
    %13 = arith.subf %7, %12 : vector<64x16xf32>
    %14 = arith.mulf %13, %13 : vector<64x16xf32>
    %cst_7 = arith.constant dense<0.000000e+00> : vector<64xf32>
    %15 = vector.multi_reduction <add>, %14, %cst_7 [1] : vector<64x16xf32> to vector<64xf32>
    %16 = vector.shape_cast %15 : vector<64xf32> to vector<64x1xf32>
    %cst_8 = arith.constant 1.600000e+01 : f32
    %17 = vector.broadcast %cst_8 : f32 to vector<64x1xf32>
    %18 = arith.divf %16, %17 : vector<64x1xf32>
    %19 = vector.broadcast %11 : vector<64x1xf32> to vector<64x16xf32>
    %20 = arith.subf %7, %19 : vector<64x16xf32>
    %cst_9 = arith.constant 9.99999974E-6 : f32
    %21 = vector.broadcast %cst_9 : f32 to vector<64x1xf32>
    %22 = arith.addf %18, %21 : vector<64x1xf32>
    %23 = math.rsqrt %22 : vector<64x1xf32>
    %24 = vector.broadcast %23 : vector<64x1xf32> to vector<64x16xf32>
    %25 = arith.mulf %20, %24 : vector<64x16xf32>
    %c0_10 = arith.constant 0 : index
    %c0_11 = arith.constant 0 : index
    %26 = vector.load %arg4[%c0_10, %c0_11] : memref<1x16xf32, #tpu.memory_space<vmem>>, vector<1x16xf32>
    %27 = vector.broadcast %26 : vector<1x16xf32> to vector<64x16xf32>
    %28 = arith.mulf %25, %27 : vector<64x16xf32>
    %c0_12 = arith.constant 0 : index
    %c0_13 = arith.constant 0 : index
    %29 = vector.load %arg5[%c0_12, %c0_13] : memref<1x16xf32, #tpu.memory_space<vmem>>, vector<1x16xf32>
    %30 = vector.broadcast %29 : vector<1x16xf32> to vector<64x16xf32>
    %31 = arith.addf %28, %30 : vector<64x16xf32>
    %cst_14 = arith.constant 0.000000e+00 : f32
    %32 = vector.broadcast %cst_14 : f32 to vector<64x16xf32>
    %33 = arith.maximumf %31, %32 : vector<64x16xf32>
    %34 = arith.truncf %33 : vector<64x16xf32> to vector<64x16xbf16>
    %c0_15 = arith.constant 0 : index
    %c0_16 = arith.constant 0 : index
    %35 = vector.load %arg6[%c0_15, %c0_16] : memref<16x5xf32, #tpu.memory_space<vmem>>, vector<16x5xf32>
    %36 = arith.truncf %35 : vector<16x5xf32> to vector<16x5xbf16>
    %cst_17 = arith.constant dense<0.000000e+00> : vector<64x5xf32>
    %37 = tpu.matmul %34, %36, %cst_17 {dimension_numbers = #tpu.dot_dimension_numbers<[1], [0], [0], [1], [0, 0, 1, 1], [], []>} : vector<64x16xbf16>, vector<16x5xbf16>, vector<64x5xf32> -> vector<64x5xf32>
    %c0_18 = arith.constant 0 : index
    %c0_19 = arith.constant 0 : index
    %38 = vector.load %arg7[%c0_18, %c0_19] : memref<1x5xf32, #tpu.memory_space<vmem>>, vector<1x5xf32>
    %39 = vector.broadcast %38 : vector<1x5xf32> to vector<64x5xf32>
    %40 = arith.addf %37, %39 : vector<64x5xf32>
    %c0_20 = arith.constant 0 : index
    %c0_21 = arith.constant 0 : index
    %41 = vector.load %arg8[%c0_20, %c0_21] : memref<64x5xf32, #tpu.memory_space<vmem>>, vector<64x5xf32>
    tpu.vector_store %arg8[%c0_20, %c0_21], %40 {strides = array<i32>} : memref<64x5xf32, #tpu.memory_space<vmem>>, vector<64x5xf32>,
    return
  }
  func.func @transform_0(%arg0: i32) -> (i32, i32) {
    %c0_i32 = arith.constant 0 : i32
    %c0_i32_0 = arith.constant 0 : i32
    return %arg0, %c0_i32 : i32, i32
  }
  func.func @transform_1(%arg0: i32) -> (i32, i32) {
    %c0_i32 = arith.constant 0 : i32
    %c0_i32_0 = arith.constant 0 : i32
    %c0_i32_1 = arith.constant 0 : i32
    return %c0_i32, %c0_i32_0 : i32, i32
  }
  func.func @transform_2(%arg0: i32) -> (i32, i32) {
    %c0_i32 = arith.constant 0 : i32
    %c0_i32_0 = arith.constant 0 : i32
    %c0_i32_1 = arith.constant 0 : i32
    return %c0_i32, %c0_i32_0 : i32, i32
  }
  func.func @transform_3(%arg0: i32) -> (i32, i32) {
    %c0_i32 = arith.constant 0 : i32
    %c0_i32_0 = arith.constant 0 : i32
    %c0_i32_1 = arith.constant 0 : i32
    return %c0_i32, %c0_i32_0 : i32, i32
  }
  func.func @transform_4(%arg0: i32) -> (i32, i32) {
    %c0_i32 = arith.constant 0 : i32
    %c0_i32_0 = arith.constant 0 : i32
    %c0_i32_1 = arith.constant 0 : i32
    return %c0_i32, %c0_i32_0 : i32, i32
  }
  func.func @transform_5(%arg0: i32) -> (i32, i32) {
    %c0_i32 = arith.constant 0 : i32
    %c0_i32_0 = arith.constant 0 : i32
    %c0_i32_1 = arith.constant 0 : i32
    return %c0_i32, %c0_i32_0 : i32, i32
  }
  func.func @transform_6(%arg0: i32) -> (i32, i32) {
    %c0_i32 = arith.constant 0 : i32
    %c0_i32_0 = arith.constant 0 : i32
    %c0_i32_1 = arith.constant 0 : i32
    return %c0_i32, %c0_i32_0 : i32, i32
  }
  func.func @transform_7(%arg0: i32) -> (i32, i32) {
    %c0_i32 = arith.constant 0 : i32
    %c0_i32_0 = arith.constant 0 : i32
    return %arg0, %c0_i32 : i32, i32
  }
}

module attributes {stable_mosaic.version = 11 : i64} {
  func.func @_linear_kernel(%arg0: i32, %arg1: i32, %arg2: memref<64x32xf32, #tpu.memory_space<vmem>>, %arg3: memref<1x32x64xf32, #tpu.memory_space<vmem>>, %arg4: memref<1x1x64xf32, #tpu.memory_space<vmem>>, %arg5: memref<1x64x64xbf16, #tpu.memory_space<vmem>>) attributes {dimension_semantics = [#tpu.dimension_semantics<parallel>, #tpu.dimension_semantics<parallel>], iteration_bounds = array<i64: 2, 1>, scalar_prefetch = 0 : i64, scratch_operands = 0 : i64, tpu.core_type = #tpu.core_type<tc>, window_params = [{transform_indices = @transform_0, window_bounds = array<i64: 64, 32>}, {transform_indices = @transform_1, window_bounds = array<i64: 1, 32, 64>}, {transform_indices = @transform_2, window_bounds = array<i64: 1, 1, 64>}, {transform_indices = @transform_3, window_bounds = array<i64: 1, 64, 64>}]} {
    %c0 = arith.constant 0 : index
    %c0_0 = arith.constant 0 : index
    %0 = vector.load %arg2[%c0, %c0_0] : memref<64x32xf32, #tpu.memory_space<vmem>>, vector<64x32xf32>
    %1 = arith.truncf %0 : vector<64x32xf32> to vector<64x32xbf16>
    %c0_1 = arith.constant 0 : index
    %c0_2 = arith.constant 0 : index
    %c0_3 = arith.constant 0 : index
    %2 = vector.load %arg3[%c0_1, %c0_2, %c0_3] : memref<1x32x64xf32, #tpu.memory_space<vmem>>, vector<1x32x64xf32>
    %3 = vector.shape_cast %2 : vector<1x32x64xf32> to vector<32x64xf32>
    %4 = arith.truncf %3 : vector<32x64xf32> to vector<32x64xbf16>
    %cst = arith.constant dense<0.000000e+00> : vector<64x64xf32>
    %5 = tpu.matmul %1, %4, %cst {dimension_numbers = #tpu.dot_dimension_numbers<[1], [0], [0], [1], [0, 0, 1, 1], [], []>} : vector<64x32xbf16>, vector<32x64xbf16>, vector<64x64xf32> -> vector<64x64xf32>
    %c0_4 = arith.constant 0 : index
    %c0_5 = arith.constant 0 : index
    %c0_6 = arith.constant 0 : index
    %6 = vector.load %arg4[%c0_4, %c0_5, %c0_6] : memref<1x1x64xf32, #tpu.memory_space<vmem>>, vector<1x1x64xf32>
    %7 = vector.shape_cast %6 : vector<1x1x64xf32> to vector<1x64xf32>
    %8 = vector.broadcast %7 : vector<1x64xf32> to vector<64x64xf32>
    %9 = arith.addf %5, %8 : vector<64x64xf32>
    %10 = arith.truncf %9 : vector<64x64xf32> to vector<64x64xbf16>
    %c0_7 = arith.constant 0 : index
    %c0_8 = arith.constant 0 : index
    %c0_9 = arith.constant 0 : index
    %11 = vector.load %arg5[%c0_7, %c0_8, %c0_9] : memref<1x64x64xbf16, #tpu.memory_space<vmem>>, vector<1x64x64xbf16>
    %12 = vector.shape_cast %11 : vector<1x64x64xbf16> to vector<64x64xbf16>
    %13 = vector.shape_cast %10 : vector<64x64xbf16> to vector<1x64x64xbf16>
    tpu.vector_store %arg5[%c0_7, %c0_8, %c0_9], %13 {strides = array<i32>} : memref<1x64x64xbf16, #tpu.memory_space<vmem>>, vector<1x64x64xbf16>,
    return
  }
  func.func @transform_0(%arg0: i32, %arg1: i32) -> (i32, i32) {
    %c0_i32 = arith.constant 0 : i32
    %c0_i32_0 = arith.constant 0 : i32
    return %arg1, %c0_i32 : i32, i32
  }
  func.func @transform_1(%arg0: i32, %arg1: i32) -> (i32, i32, i32) {
    %c0_i32 = arith.constant 0 : i32
    %c0_i32_0 = arith.constant 0 : i32
    %c0_i32_1 = arith.constant 0 : i32
    return %arg0, %c0_i32, %c0_i32_0 : i32, i32, i32
  }
  func.func @transform_2(%arg0: i32, %arg1: i32) -> (i32, i32, i32) {
    %c0_i32 = arith.constant 0 : i32
    %c0_i32_0 = arith.constant 0 : i32
    %c0_i32_1 = arith.constant 0 : i32
    return %arg0, %c0_i32, %c0_i32_0 : i32, i32, i32
  }
  func.func @transform_3(%arg0: i32, %arg1: i32) -> (i32, i32, i32) {
    %c0_i32 = arith.constant 0 : i32
    %c0_i32_0 = arith.constant 0 : i32
    return %arg0, %arg1, %c0_i32 : i32, i32, i32
  }
}

module attributes {stable_mosaic.version = 11 : i64} {
  func.func @_bilstm_chunk_kernel(%arg0: i32, %arg1: i32, %arg2: memref<1x8x8x64xbf16, #tpu.memory_space<vmem>>, %arg3: memref<1x16x64xf32, #tpu.memory_space<vmem>>, %arg4: memref<1x8x8x16xf32, #tpu.memory_space<vmem>>, %arg5: memref<8x16xf32, #tpu.memory_space<vmem>>, %arg6: memref<8x16xf32, #tpu.memory_space<vmem>>) attributes {dimension_semantics = [#tpu.dimension_semantics<parallel>, #tpu.dimension_semantics<arbitrary>], iteration_bounds = array<i64: 2, 1>, scalar_prefetch = 0 : i64, scratch_operands = 2 : i64, tpu.core_type = #tpu.core_type<tc>, window_params = [{transform_indices = @transform_0, window_bounds = array<i64: 1, 8, 8, 64>}, {transform_indices = @transform_1, window_bounds = array<i64: 1, 16, 64>}, {transform_indices = @transform_2, window_bounds = array<i64: 1, 8, 8, 16>}]} {
    %c0_i32 = arith.constant 0 : i32
    %0 = arith.cmpi eq, %arg1, %c0_i32 : i32
    %1 = arith.extui %0 : i1 to i32
    %c0_i32_0 = arith.constant 0 : i32
    %2 = arith.cmpi ne, %1, %c0_i32_0 : i32
    scf.if %2 {
      %cst_107 = arith.constant 0.000000e+00 : f32
      %330 = vector.broadcast %cst_107 : f32 to vector<8x16xf32>
      %c0_108 = arith.constant 0 : index
      %c0_109 = arith.constant 0 : index
      %331 = vector.load %arg5[%c0_108, %c0_109] : memref<8x16xf32, #tpu.memory_space<vmem>>, vector<8x16xf32>
      tpu.vector_store %arg5[%c0_108, %c0_109], %330 {strides = array<i32>} : memref<8x16xf32, #tpu.memory_space<vmem>>, vector<8x16xf32>,
      %cst_110 = arith.constant 0.000000e+00 : f32
      %332 = vector.broadcast %cst_110 : f32 to vector<8x16xf32>
      %c0_111 = arith.constant 0 : index
      %c0_112 = arith.constant 0 : index
      %333 = vector.load %arg6[%c0_111, %c0_112] : memref<8x16xf32, #tpu.memory_space<vmem>>, vector<8x16xf32>
      tpu.vector_store %arg6[%c0_111, %c0_112], %332 {strides = array<i32>} : memref<8x16xf32, #tpu.memory_space<vmem>>, vector<8x16xf32>,
    } else {
    }
    %c0 = arith.constant 0 : index
    %c0_1 = arith.constant 0 : index
    %c0_2 = arith.constant 0 : index
    %3 = vector.load %arg3[%c0, %c0_1, %c0_2] : memref<1x16x64xf32, #tpu.memory_space<vmem>>, vector<1x16x64xf32>
    %4 = vector.shape_cast %3 : vector<1x16x64xf32> to vector<16x64xf32>
    %5 = arith.truncf %4 : vector<16x64xf32> to vector<16x64xbf16>
    %c0_3 = arith.constant 0 : index
    %c0_4 = arith.constant 0 : index
    %6 = vector.load %arg5[%c0_3, %c0_4] : memref<8x16xf32, #tpu.memory_space<vmem>>, vector<8x16xf32>
    %c0_5 = arith.constant 0 : index
    %c0_6 = arith.constant 0 : index
    %7 = vector.load %arg6[%c0_5, %c0_6] : memref<8x16xf32, #tpu.memory_space<vmem>>, vector<8x16xf32>
    %c0_i32_7 = arith.constant 0 : i32
    %c2_i32 = arith.constant 2 : i32
    %8 = arith.muli %c2_i32, %c0_i32_7 : i32
    %c7_i32 = arith.constant 7 : i32
    %9 = arith.subi %c7_i32, %8 : i32
    %10 = arith.muli %arg0, %9 : i32
    %11 = arith.addi %c0_i32_7, %10 : i32
    %c0_8 = arith.constant 0 : index
    %12 = arith.index_cast %11 : i32 to index
    %c0_9 = arith.constant 0 : index
    %c0_10 = arith.constant 0 : index
    %13 = vector.load %arg2[%c0_8, %12, %c0_9, %c0_10] : memref<1x8x8x64xbf16, #tpu.memory_space<vmem>>, vector<1x1x8x64xbf16>
    %14 = vector.shape_cast %13 : vector<1x1x8x64xbf16> to vector<8x64xbf16>
    %15 = arith.extf %14 : vector<8x64xbf16> to vector<8x64xf32>
    %16 = arith.truncf %6 : vector<8x16xf32> to vector<8x16xbf16>
    %cst = arith.constant dense<0.000000e+00> : vector<8x64xf32>
    %17 = tpu.matmul %16, %5, %cst {dimension_numbers = #tpu.dot_dimension_numbers<[1], [0], [0], [1], [0, 0, 1, 1], [], []>} : vector<8x16xbf16>, vector<16x64xbf16>, vector<8x64xf32> -> vector<8x64xf32>
    %18 = arith.addf %15, %17 : vector<8x64xf32>
    %19 = vector.extract_strided_slice %18 {offsets = [0, 0], sizes = [8, 16], strides = [1, 1]} : vector<8x64xf32> to vector<8x16xf32>
    %20 = arith.negf %19 : vector<8x16xf32>
    %21 = math.exp %20 : vector<8x16xf32>
    %cst_11 = arith.constant 1.000000e+00 : f32
    %22 = vector.broadcast %cst_11 : f32 to vector<8x16xf32>
    %23 = arith.addf %22, %21 : vector<8x16xf32>
    %24 = arith.divf %22, %23 : vector<8x16xf32>
    %25 = vector.extract_strided_slice %18 {offsets = [0, 16], sizes = [8, 16], strides = [1, 1]} : vector<8x64xf32> to vector<8x16xf32>
    %26 = arith.negf %25 : vector<8x16xf32>
    %27 = math.exp %26 : vector<8x16xf32>
    %cst_12 = arith.constant 1.000000e+00 : f32
    %28 = vector.broadcast %cst_12 : f32 to vector<8x16xf32>
    %29 = arith.addf %28, %27 : vector<8x16xf32>
    %30 = arith.divf %28, %29 : vector<8x16xf32>
    %31 = vector.extract_strided_slice %18 {offsets = [0, 32], sizes = [8, 16], strides = [1, 1]} : vector<8x64xf32> to vector<8x16xf32>
    %32 = math.tanh %31 : vector<8x16xf32>
    %33 = vector.extract_strided_slice %18 {offsets = [0, 48], sizes = [8, 16], strides = [1, 1]} : vector<8x64xf32> to vector<8x16xf32>
    %34 = arith.negf %33 : vector<8x16xf32>
    %35 = math.exp %34 : vector<8x16xf32>
    %cst_13 = arith.constant 1.000000e+00 : f32
    %36 = vector.broadcast %cst_13 : f32 to vector<8x16xf32>
    %37 = arith.addf %36, %35 : vector<8x16xf32>
    %38 = arith.divf %36, %37 : vector<8x16xf32>
    %39 = arith.mulf %30, %7 : vector<8x16xf32>
    %40 = arith.mulf %24, %32 : vector<8x16xf32>
    %41 = arith.addf %39, %40 : vector<8x16xf32>
    %42 = math.tanh %41 : vector<8x16xf32>
    %43 = arith.mulf %38, %42 : vector<8x16xf32>
    %c0_14 = arith.constant 0 : index
    %44 = arith.index_cast %11 : i32 to index
    %c0_15 = arith.constant 0 : index
    %c0_16 = arith.constant 0 : index
    %45 = vector.load %arg4[%c0_14, %44, %c0_15, %c0_16] : memref<1x8x8x16xf32, #tpu.memory_space<vmem>>, vector<1x1x8x16xf32>
    %46 = vector.shape_cast %45 : vector<1x1x8x16xf32> to vector<8x16xf32>
    %47 = vector.shape_cast %43 : vector<8x16xf32> to vector<1x1x8x16xf32>
    tpu.vector_store %arg4[%c0_14, %44, %c0_15, %c0_16], %47 {strides = array<i32>} : memref<1x8x8x16xf32, #tpu.memory_space<vmem>>, vector<1x1x8x16xf32>,
    %c1_i32 = arith.constant 1 : i32
    %c2_i32_17 = arith.constant 2 : i32
    %48 = arith.muli %c2_i32_17, %c1_i32 : i32
    %c7_i32_18 = arith.constant 7 : i32
    %49 = arith.subi %c7_i32_18, %48 : i32
    %50 = arith.muli %arg0, %49 : i32
    %51 = arith.addi %c1_i32, %50 : i32
    %c0_19 = arith.constant 0 : index
    %52 = arith.index_cast %51 : i32 to index
    %c0_20 = arith.constant 0 : index
    %c0_21 = arith.constant 0 : index
    %53 = vector.load %arg2[%c0_19, %52, %c0_20, %c0_21] : memref<1x8x8x64xbf16, #tpu.memory_space<vmem>>, vector<1x1x8x64xbf16>
    %54 = vector.shape_cast %53 : vector<1x1x8x64xbf16> to vector<8x64xbf16>
    %55 = arith.extf %54 : vector<8x64xbf16> to vector<8x64xf32>
    %56 = arith.truncf %43 : vector<8x16xf32> to vector<8x16xbf16>
    %cst_22 = arith.constant dense<0.000000e+00> : vector<8x64xf32>
    %57 = tpu.matmul %56, %5, %cst_22 {dimension_numbers = #tpu.dot_dimension_numbers<[1], [0], [0], [1], [0, 0, 1, 1], [], []>} : vector<8x16xbf16>, vector<16x64xbf16>, vector<8x64xf32> -> vector<8x64xf32>
    %58 = arith.addf %55, %57 : vector<8x64xf32>
    %59 = vector.extract_strided_slice %58 {offsets = [0, 0], sizes = [8, 16], strides = [1, 1]} : vector<8x64xf32> to vector<8x16xf32>
    %60 = arith.negf %59 : vector<8x16xf32>
    %61 = math.exp %60 : vector<8x16xf32>
    %cst_23 = arith.constant 1.000000e+00 : f32
    %62 = vector.broadcast %cst_23 : f32 to vector<8x16xf32>
    %63 = arith.addf %62, %61 : vector<8x16xf32>
    %64 = arith.divf %62, %63 : vector<8x16xf32>
    %65 = vector.extract_strided_slice %58 {offsets = [0, 16], sizes = [8, 16], strides = [1, 1]} : vector<8x64xf32> to vector<8x16xf32>
    %66 = arith.negf %65 : vector<8x16xf32>
    %67 = math.exp %66 : vector<8x16xf32>
    %cst_24 = arith.constant 1.000000e+00 : f32
    %68 = vector.broadcast %cst_24 : f32 to vector<8x16xf32>
    %69 = arith.addf %68, %67 : vector<8x16xf32>
    %70 = arith.divf %68, %69 : vector<8x16xf32>
    %71 = vector.extract_strided_slice %58 {offsets = [0, 32], sizes = [8, 16], strides = [1, 1]} : vector<8x64xf32> to vector<8x16xf32>
    %72 = math.tanh %71 : vector<8x16xf32>
    %73 = vector.extract_strided_slice %58 {offsets = [0, 48], sizes = [8, 16], strides = [1, 1]} : vector<8x64xf32> to vector<8x16xf32>
    %74 = arith.negf %73 : vector<8x16xf32>
    %75 = math.exp %74 : vector<8x16xf32>
    %cst_25 = arith.constant 1.000000e+00 : f32
    %76 = vector.broadcast %cst_25 : f32 to vector<8x16xf32>
    %77 = arith.addf %76, %75 : vector<8x16xf32>
    %78 = arith.divf %76, %77 : vector<8x16xf32>
    %79 = arith.mulf %70, %41 : vector<8x16xf32>
    %80 = arith.mulf %64, %72 : vector<8x16xf32>
    %81 = arith.addf %79, %80 : vector<8x16xf32>
    %82 = math.tanh %81 : vector<8x16xf32>
    %83 = arith.mulf %78, %82 : vector<8x16xf32>
    %c0_26 = arith.constant 0 : index
    %84 = arith.index_cast %51 : i32 to index
    %c0_27 = arith.constant 0 : index
    %c0_28 = arith.constant 0 : index
    %85 = vector.load %arg4[%c0_26, %84, %c0_27, %c0_28] : memref<1x8x8x16xf32, #tpu.memory_space<vmem>>, vector<1x1x8x16xf32>
    %86 = vector.shape_cast %85 : vector<1x1x8x16xf32> to vector<8x16xf32>
    %87 = vector.shape_cast %83 : vector<8x16xf32> to vector<1x1x8x16xf32>
    tpu.vector_store %arg4[%c0_26, %84, %c0_27, %c0_28], %87 {strides = array<i32>} : memref<1x8x8x16xf32, #tpu.memory_space<vmem>>, vector<1x1x8x16xf32>,
    %c2_i32_29 = arith.constant 2 : i32
    %c2_i32_30 = arith.constant 2 : i32
    %88 = arith.muli %c2_i32_30, %c2_i32_29 : i32
    %c7_i32_31 = arith.constant 7 : i32
    %89 = arith.subi %c7_i32_31, %88 : i32
    %90 = arith.muli %arg0, %89 : i32
    %91 = arith.addi %c2_i32_29, %90 : i32
    %c0_32 = arith.constant 0 : index
    %92 = arith.index_cast %91 : i32 to index
    %c0_33 = arith.constant 0 : index
    %c0_34 = arith.constant 0 : index
    %93 = vector.load %arg2[%c0_32, %92, %c0_33, %c0_34] : memref<1x8x8x64xbf16, #tpu.memory_space<vmem>>, vector<1x1x8x64xbf16>
    %94 = vector.shape_cast %93 : vector<1x1x8x64xbf16> to vector<8x64xbf16>
    %95 = arith.extf %94 : vector<8x64xbf16> to vector<8x64xf32>
    %96 = arith.truncf %83 : vector<8x16xf32> to vector<8x16xbf16>
    %cst_35 = arith.constant dense<0.000000e+00> : vector<8x64xf32>
    %97 = tpu.matmul %96, %5, %cst_35 {dimension_numbers = #tpu.dot_dimension_numbers<[1], [0], [0], [1], [0, 0, 1, 1], [], []>} : vector<8x16xbf16>, vector<16x64xbf16>, vector<8x64xf32> -> vector<8x64xf32>
    %98 = arith.addf %95, %97 : vector<8x64xf32>
    %99 = vector.extract_strided_slice %98 {offsets = [0, 0], sizes = [8, 16], strides = [1, 1]} : vector<8x64xf32> to vector<8x16xf32>
    %100 = arith.negf %99 : vector<8x16xf32>
    %101 = math.exp %100 : vector<8x16xf32>
    %cst_36 = arith.constant 1.000000e+00 : f32
    %102 = vector.broadcast %cst_36 : f32 to vector<8x16xf32>
    %103 = arith.addf %102, %101 : vector<8x16xf32>
    %104 = arith.divf %102, %103 : vector<8x16xf32>
    %105 = vector.extract_strided_slice %98 {offsets = [0, 16], sizes = [8, 16], strides = [1, 1]} : vector<8x64xf32> to vector<8x16xf32>
    %106 = arith.negf %105 : vector<8x16xf32>
    %107 = math.exp %106 : vector<8x16xf32>
    %cst_37 = arith.constant 1.000000e+00 : f32
    %108 = vector.broadcast %cst_37 : f32 to vector<8x16xf32>
    %109 = arith.addf %108, %107 : vector<8x16xf32>
    %110 = arith.divf %108, %109 : vector<8x16xf32>
    %111 = vector.extract_strided_slice %98 {offsets = [0, 32], sizes = [8, 16], strides = [1, 1]} : vector<8x64xf32> to vector<8x16xf32>
    %112 = math.tanh %111 : vector<8x16xf32>
    %113 = vector.extract_strided_slice %98 {offsets = [0, 48], sizes = [8, 16], strides = [1, 1]} : vector<8x64xf32> to vector<8x16xf32>
    %114 = arith.negf %113 : vector<8x16xf32>
    %115 = math.exp %114 : vector<8x16xf32>
    %cst_38 = arith.constant 1.000000e+00 : f32
    %116 = vector.broadcast %cst_38 : f32 to vector<8x16xf32>
    %117 = arith.addf %116, %115 : vector<8x16xf32>
    %118 = arith.divf %116, %117 : vector<8x16xf32>
    %119 = arith.mulf %110, %81 : vector<8x16xf32>
    %120 = arith.mulf %104, %112 : vector<8x16xf32>
    %121 = arith.addf %119, %120 : vector<8x16xf32>
    %122 = math.tanh %121 : vector<8x16xf32>
    %123 = arith.mulf %118, %122 : vector<8x16xf32>
    %c0_39 = arith.constant 0 : index
    %124 = arith.index_cast %91 : i32 to index
    %c0_40 = arith.constant 0 : index
    %c0_41 = arith.constant 0 : index
    %125 = vector.load %arg4[%c0_39, %124, %c0_40, %c0_41] : memref<1x8x8x16xf32, #tpu.memory_space<vmem>>, vector<1x1x8x16xf32>
    %126 = vector.shape_cast %125 : vector<1x1x8x16xf32> to vector<8x16xf32>
    %127 = vector.shape_cast %123 : vector<8x16xf32> to vector<1x1x8x16xf32>
    tpu.vector_store %arg4[%c0_39, %124, %c0_40, %c0_41], %127 {strides = array<i32>} : memref<1x8x8x16xf32, #tpu.memory_space<vmem>>, vector<1x1x8x16xf32>,
    %c3_i32 = arith.constant 3 : i32
    %c2_i32_42 = arith.constant 2 : i32
    %128 = arith.muli %c2_i32_42, %c3_i32 : i32
    %c7_i32_43 = arith.constant 7 : i32
    %129 = arith.subi %c7_i32_43, %128 : i32
    %130 = arith.muli %arg0, %129 : i32
    %131 = arith.addi %c3_i32, %130 : i32
    %c0_44 = arith.constant 0 : index
    %132 = arith.index_cast %131 : i32 to index
    %c0_45 = arith.constant 0 : index
    %c0_46 = arith.constant 0 : index
    %133 = vector.load %arg2[%c0_44, %132, %c0_45, %c0_46] : memref<1x8x8x64xbf16, #tpu.memory_space<vmem>>, vector<1x1x8x64xbf16>
    %134 = vector.shape_cast %133 : vector<1x1x8x64xbf16> to vector<8x64xbf16>
    %135 = arith.extf %134 : vector<8x64xbf16> to vector<8x64xf32>
    %136 = arith.truncf %123 : vector<8x16xf32> to vector<8x16xbf16>
    %cst_47 = arith.constant dense<0.000000e+00> : vector<8x64xf32>
    %137 = tpu.matmul %136, %5, %cst_47 {dimension_numbers = #tpu.dot_dimension_numbers<[1], [0], [0], [1], [0, 0, 1, 1], [], []>} : vector<8x16xbf16>, vector<16x64xbf16>, vector<8x64xf32> -> vector<8x64xf32>
    %138 = arith.addf %135, %137 : vector<8x64xf32>
    %139 = vector.extract_strided_slice %138 {offsets = [0, 0], sizes = [8, 16], strides = [1, 1]} : vector<8x64xf32> to vector<8x16xf32>
    %140 = arith.negf %139 : vector<8x16xf32>
    %141 = math.exp %140 : vector<8x16xf32>
    %cst_48 = arith.constant 1.000000e+00 : f32
    %142 = vector.broadcast %cst_48 : f32 to vector<8x16xf32>
    %143 = arith.addf %142, %141 : vector<8x16xf32>
    %144 = arith.divf %142, %143 : vector<8x16xf32>
    %145 = vector.extract_strided_slice %138 {offsets = [0, 16], sizes = [8, 16], strides = [1, 1]} : vector<8x64xf32> to vector<8x16xf32>
    %146 = arith.negf %145 : vector<8x16xf32>
    %147 = math.exp %146 : vector<8x16xf32>
    %cst_49 = arith.constant 1.000000e+00 : f32
    %148 = vector.broadcast %cst_49 : f32 to vector<8x16xf32>
    %149 = arith.addf %148, %147 : vector<8x16xf32>
    %150 = arith.divf %148, %149 : vector<8x16xf32>
    %151 = vector.extract_strided_slice %138 {offsets = [0, 32], sizes = [8, 16], strides = [1, 1]} : vector<8x64xf32> to vector<8x16xf32>
    %152 = math.tanh %151 : vector<8x16xf32>
    %153 = vector.extract_strided_slice %138 {offsets = [0, 48], sizes = [8, 16], strides = [1, 1]} : vector<8x64xf32> to vector<8x16xf32>
    %154 = arith.negf %153 : vector<8x16xf32>
    %155 = math.exp %154 : vector<8x16xf32>
    %cst_50 = arith.constant 1.000000e+00 : f32
    %156 = vector.broadcast %cst_50 : f32 to vector<8x16xf32>
    %157 = arith.addf %156, %155 : vector<8x16xf32>
    %158 = arith.divf %156, %157 : vector<8x16xf32>
    %159 = arith.mulf %150, %121 : vector<8x16xf32>
    %160 = arith.mulf %144, %152 : vector<8x16xf32>
    %161 = arith.addf %159, %160 : vector<8x16xf32>
    %162 = math.tanh %161 : vector<8x16xf32>
    %163 = arith.mulf %158, %162 : vector<8x16xf32>
    %c0_51 = arith.constant 0 : index
    %164 = arith.index_cast %131 : i32 to index
    %c0_52 = arith.constant 0 : index
    %c0_53 = arith.constant 0 : index
    %165 = vector.load %arg4[%c0_51, %164, %c0_52, %c0_53] : memref<1x8x8x16xf32, #tpu.memory_space<vmem>>, vector<1x1x8x16xf32>
    %166 = vector.shape_cast %165 : vector<1x1x8x16xf32> to vector<8x16xf32>
    %167 = vector.shape_cast %163 : vector<8x16xf32> to vector<1x1x8x16xf32>
    tpu.vector_store %arg4[%c0_51, %164, %c0_52, %c0_53], %167 {strides = array<i32>} : memref<1x8x8x16xf32, #tpu.memory_space<vmem>>, vector<1x1x8x16xf32>,
    %c4_i32 = arith.constant 4 : i32
    %c2_i32_54 = arith.constant 2 : i32
    %168 = arith.muli %c2_i32_54, %c4_i32 : i32
    %c7_i32_55 = arith.constant 7 : i32
    %169 = arith.subi %c7_i32_55, %168 : i32
    %170 = arith.muli %arg0, %169 : i32
    %171 = arith.addi %c4_i32, %170 : i32
    %c0_56 = arith.constant 0 : index
    %172 = arith.index_cast %171 : i32 to index
    %c0_57 = arith.constant 0 : index
    %c0_58 = arith.constant 0 : index
    %173 = vector.load %arg2[%c0_56, %172, %c0_57, %c0_58] : memref<1x8x8x64xbf16, #tpu.memory_space<vmem>>, vector<1x1x8x64xbf16>
    %174 = vector.shape_cast %173 : vector<1x1x8x64xbf16> to vector<8x64xbf16>
    %175 = arith.extf %174 : vector<8x64xbf16> to vector<8x64xf32>
    %176 = arith.truncf %163 : vector<8x16xf32> to vector<8x16xbf16>
    %cst_59 = arith.constant dense<0.000000e+00> : vector<8x64xf32>
    %177 = tpu.matmul %176, %5, %cst_59 {dimension_numbers = #tpu.dot_dimension_numbers<[1], [0], [0], [1], [0, 0, 1, 1], [], []>} : vector<8x16xbf16>, vector<16x64xbf16>, vector<8x64xf32> -> vector<8x64xf32>
    %178 = arith.addf %175, %177 : vector<8x64xf32>
    %179 = vector.extract_strided_slice %178 {offsets = [0, 0], sizes = [8, 16], strides = [1, 1]} : vector<8x64xf32> to vector<8x16xf32>
    %180 = arith.negf %179 : vector<8x16xf32>
    %181 = math.exp %180 : vector<8x16xf32>
    %cst_60 = arith.constant 1.000000e+00 : f32
    %182 = vector.broadcast %cst_60 : f32 to vector<8x16xf32>
    %183 = arith.addf %182, %181 : vector<8x16xf32>
    %184 = arith.divf %182, %183 : vector<8x16xf32>
    %185 = vector.extract_strided_slice %178 {offsets = [0, 16], sizes = [8, 16], strides = [1, 1]} : vector<8x64xf32> to vector<8x16xf32>
    %186 = arith.negf %185 : vector<8x16xf32>
    %187 = math.exp %186 : vector<8x16xf32>
    %cst_61 = arith.constant 1.000000e+00 : f32
    %188 = vector.broadcast %cst_61 : f32 to vector<8x16xf32>
    %189 = arith.addf %188, %187 : vector<8x16xf32>
    %190 = arith.divf %188, %189 : vector<8x16xf32>
    %191 = vector.extract_strided_slice %178 {offsets = [0, 32], sizes = [8, 16], strides = [1, 1]} : vector<8x64xf32> to vector<8x16xf32>
    %192 = math.tanh %191 : vector<8x16xf32>
    %193 = vector.extract_strided_slice %178 {offsets = [0, 48], sizes = [8, 16], strides = [1, 1]} : vector<8x64xf32> to vector<8x16xf32>
    %194 = arith.negf %193 : vector<8x16xf32>
    %195 = math.exp %194 : vector<8x16xf32>
    %cst_62 = arith.constant 1.000000e+00 : f32
    %196 = vector.broadcast %cst_62 : f32 to vector<8x16xf32>
    %197 = arith.addf %196, %195 : vector<8x16xf32>
    %198 = arith.divf %196, %197 : vector<8x16xf32>
    %199 = arith.mulf %190, %161 : vector<8x16xf32>
    %200 = arith.mulf %184, %192 : vector<8x16xf32>
    %201 = arith.addf %199, %200 : vector<8x16xf32>
    %202 = math.tanh %201 : vector<8x16xf32>
    %203 = arith.mulf %198, %202 : vector<8x16xf32>
    %c0_63 = arith.constant 0 : index
    %204 = arith.index_cast %171 : i32 to index
    %c0_64 = arith.constant 0 : index
    %c0_65 = arith.constant 0 : index
    %205 = vector.load %arg4[%c0_63, %204, %c0_64, %c0_65] : memref<1x8x8x16xf32, #tpu.memory_space<vmem>>, vector<1x1x8x16xf32>
    %206 = vector.shape_cast %205 : vector<1x1x8x16xf32> to vector<8x16xf32>
    %207 = vector.shape_cast %203 : vector<8x16xf32> to vector<1x1x8x16xf32>
    tpu.vector_store %arg4[%c0_63, %204, %c0_64, %c0_65], %207 {strides = array<i32>} : memref<1x8x8x16xf32, #tpu.memory_space<vmem>>, vector<1x1x8x16xf32>,
    %c5_i32 = arith.constant 5 : i32
    %c2_i32_66 = arith.constant 2 : i32
    %208 = arith.muli %c2_i32_66, %c5_i32 : i32
    %c7_i32_67 = arith.constant 7 : i32
    %209 = arith.subi %c7_i32_67, %208 : i32
    %210 = arith.muli %arg0, %209 : i32
    %211 = arith.addi %c5_i32, %210 : i32
    %c0_68 = arith.constant 0 : index
    %212 = arith.index_cast %211 : i32 to index
    %c0_69 = arith.constant 0 : index
    %c0_70 = arith.constant 0 : index
    %213 = vector.load %arg2[%c0_68, %212, %c0_69, %c0_70] : memref<1x8x8x64xbf16, #tpu.memory_space<vmem>>, vector<1x1x8x64xbf16>
    %214 = vector.shape_cast %213 : vector<1x1x8x64xbf16> to vector<8x64xbf16>
    %215 = arith.extf %214 : vector<8x64xbf16> to vector<8x64xf32>
    %216 = arith.truncf %203 : vector<8x16xf32> to vector<8x16xbf16>
    %cst_71 = arith.constant dense<0.000000e+00> : vector<8x64xf32>
    %217 = tpu.matmul %216, %5, %cst_71 {dimension_numbers = #tpu.dot_dimension_numbers<[1], [0], [0], [1], [0, 0, 1, 1], [], []>} : vector<8x16xbf16>, vector<16x64xbf16>, vector<8x64xf32> -> vector<8x64xf32>
    %218 = arith.addf %215, %217 : vector<8x64xf32>
    %219 = vector.extract_strided_slice %218 {offsets = [0, 0], sizes = [8, 16], strides = [1, 1]} : vector<8x64xf32> to vector<8x16xf32>
    %220 = arith.negf %219 : vector<8x16xf32>
    %221 = math.exp %220 : vector<8x16xf32>
    %cst_72 = arith.constant 1.000000e+00 : f32
    %222 = vector.broadcast %cst_72 : f32 to vector<8x16xf32>
    %223 = arith.addf %222, %221 : vector<8x16xf32>
    %224 = arith.divf %222, %223 : vector<8x16xf32>
    %225 = vector.extract_strided_slice %218 {offsets = [0, 16], sizes = [8, 16], strides = [1, 1]} : vector<8x64xf32> to vector<8x16xf32>
    %226 = arith.negf %225 : vector<8x16xf32>
    %227 = math.exp %226 : vector<8x16xf32>
    %cst_73 = arith.constant 1.000000e+00 : f32
    %228 = vector.broadcast %cst_73 : f32 to vector<8x16xf32>
    %229 = arith.addf %228, %227 : vector<8x16xf32>
    %230 = arith.divf %228, %229 : vector<8x16xf32>
    %231 = vector.extract_strided_slice %218 {offsets = [0, 32], sizes = [8, 16], strides = [1, 1]} : vector<8x64xf32> to vector<8x16xf32>
    %232 = math.tanh %231 : vector<8x16xf32>
    %233 = vector.extract_strided_slice %218 {offsets = [0, 48], sizes = [8, 16], strides = [1, 1]} : vector<8x64xf32> to vector<8x16xf32>
    %234 = arith.negf %233 : vector<8x16xf32>
    %235 = math.exp %234 : vector<8x16xf32>
    %cst_74 = arith.constant 1.000000e+00 : f32
    %236 = vector.broadcast %cst_74 : f32 to vector<8x16xf32>
    %237 = arith.addf %236, %235 : vector<8x16xf32>
    %238 = arith.divf %236, %237 : vector<8x16xf32>
    %239 = arith.mulf %230, %201 : vector<8x16xf32>
    %240 = arith.mulf %224, %232 : vector<8x16xf32>
    %241 = arith.addf %239, %240 : vector<8x16xf32>
    %242 = math.tanh %241 : vector<8x16xf32>
    %243 = arith.mulf %238, %242 : vector<8x16xf32>
    %c0_75 = arith.constant 0 : index
    %244 = arith.index_cast %211 : i32 to index
    %c0_76 = arith.constant 0 : index
    %c0_77 = arith.constant 0 : index
    %245 = vector.load %arg4[%c0_75, %244, %c0_76, %c0_77] : memref<1x8x8x16xf32, #tpu.memory_space<vmem>>, vector<1x1x8x16xf32>
    %246 = vector.shape_cast %245 : vector<1x1x8x16xf32> to vector<8x16xf32>
    %247 = vector.shape_cast %243 : vector<8x16xf32> to vector<1x1x8x16xf32>
    tpu.vector_store %arg4[%c0_75, %244, %c0_76, %c0_77], %247 {strides = array<i32>} : memref<1x8x8x16xf32, #tpu.memory_space<vmem>>, vector<1x1x8x16xf32>,
    %c6_i32 = arith.constant 6 : i32
    %c2_i32_78 = arith.constant 2 : i32
    %248 = arith.muli %c2_i32_78, %c6_i32 : i32
    %c7_i32_79 = arith.constant 7 : i32
    %249 = arith.subi %c7_i32_79, %248 : i32
    %250 = arith.muli %arg0, %249 : i32
    %251 = arith.addi %c6_i32, %250 : i32
    %c0_80 = arith.constant 0 : index
    %252 = arith.index_cast %251 : i32 to index
    %c0_81 = arith.constant 0 : index
    %c0_82 = arith.constant 0 : index
    %253 = vector.load %arg2[%c0_80, %252, %c0_81, %c0_82] : memref<1x8x8x64xbf16, #tpu.memory_space<vmem>>, vector<1x1x8x64xbf16>
    %254 = vector.shape_cast %253 : vector<1x1x8x64xbf16> to vector<8x64xbf16>
    %255 = arith.extf %254 : vector<8x64xbf16> to vector<8x64xf32>
    %256 = arith.truncf %243 : vector<8x16xf32> to vector<8x16xbf16>
    %cst_83 = arith.constant dense<0.000000e+00> : vector<8x64xf32>
    %257 = tpu.matmul %256, %5, %cst_83 {dimension_numbers = #tpu.dot_dimension_numbers<[1], [0], [0], [1], [0, 0, 1, 1], [], []>} : vector<8x16xbf16>, vector<16x64xbf16>, vector<8x64xf32> -> vector<8x64xf32>
    %258 = arith.addf %255, %257 : vector<8x64xf32>
    %259 = vector.extract_strided_slice %258 {offsets = [0, 0], sizes = [8, 16], strides = [1, 1]} : vector<8x64xf32> to vector<8x16xf32>
    %260 = arith.negf %259 : vector<8x16xf32>
    %261 = math.exp %260 : vector<8x16xf32>
    %cst_84 = arith.constant 1.000000e+00 : f32
    %262 = vector.broadcast %cst_84 : f32 to vector<8x16xf32>
    %263 = arith.addf %262, %261 : vector<8x16xf32>
    %264 = arith.divf %262, %263 : vector<8x16xf32>
    %265 = vector.extract_strided_slice %258 {offsets = [0, 16], sizes = [8, 16], strides = [1, 1]} : vector<8x64xf32> to vector<8x16xf32>
    %266 = arith.negf %265 : vector<8x16xf32>
    %267 = math.exp %266 : vector<8x16xf32>
    %cst_85 = arith.constant 1.000000e+00 : f32
    %268 = vector.broadcast %cst_85 : f32 to vector<8x16xf32>
    %269 = arith.addf %268, %267 : vector<8x16xf32>
    %270 = arith.divf %268, %269 : vector<8x16xf32>
    %271 = vector.extract_strided_slice %258 {offsets = [0, 32], sizes = [8, 16], strides = [1, 1]} : vector<8x64xf32> to vector<8x16xf32>
    %272 = math.tanh %271 : vector<8x16xf32>
    %273 = vector.extract_strided_slice %258 {offsets = [0, 48], sizes = [8, 16], strides = [1, 1]} : vector<8x64xf32> to vector<8x16xf32>
    %274 = arith.negf %273 : vector<8x16xf32>
    %275 = math.exp %274 : vector<8x16xf32>
    %cst_86 = arith.constant 1.000000e+00 : f32
    %276 = vector.broadcast %cst_86 : f32 to vector<8x16xf32>
    %277 = arith.addf %276, %275 : vector<8x16xf32>
    %278 = arith.divf %276, %277 : vector<8x16xf32>
    %279 = arith.mulf %270, %241 : vector<8x16xf32>
    %280 = arith.mulf %264, %272 : vector<8x16xf32>
    %281 = arith.addf %279, %280 : vector<8x16xf32>
    %282 = math.tanh %281 : vector<8x16xf32>
    %283 = arith.mulf %278, %282 : vector<8x16xf32>
    %c0_87 = arith.constant 0 : index
    %284 = arith.index_cast %251 : i32 to index
    %c0_88 = arith.constant 0 : index
    %c0_89 = arith.constant 0 : index
    %285 = vector.load %arg4[%c0_87, %284, %c0_88, %c0_89] : memref<1x8x8x16xf32, #tpu.memory_space<vmem>>, vector<1x1x8x16xf32>
    %286 = vector.shape_cast %285 : vector<1x1x8x16xf32> to vector<8x16xf32>
    %287 = vector.shape_cast %283 : vector<8x16xf32> to vector<1x1x8x16xf32>
    tpu.vector_store %arg4[%c0_87, %284, %c0_88, %c0_89], %287 {strides = array<i32>} : memref<1x8x8x16xf32, #tpu.memory_space<vmem>>, vector<1x1x8x16xf32>,
    %c7_i32_90 = arith.constant 7 : i32
    %c2_i32_91 = arith.constant 2 : i32
    %288 = arith.muli %c2_i32_91, %c7_i32_90 : i32
    %c7_i32_92 = arith.constant 7 : i32
    %289 = arith.subi %c7_i32_92, %288 : i32
    %290 = arith.muli %arg0, %289 : i32
    %291 = arith.addi %c7_i32_90, %290 : i32
    %c0_93 = arith.constant 0 : index
    %292 = arith.index_cast %291 : i32 to index
    %c0_94 = arith.constant 0 : index
    %c0_95 = arith.constant 0 : index
    %293 = vector.load %arg2[%c0_93, %292, %c0_94, %c0_95] : memref<1x8x8x64xbf16, #tpu.memory_space<vmem>>, vector<1x1x8x64xbf16>
    %294 = vector.shape_cast %293 : vector<1x1x8x64xbf16> to vector<8x64xbf16>
    %295 = arith.extf %294 : vector<8x64xbf16> to vector<8x64xf32>
    %296 = arith.truncf %283 : vector<8x16xf32> to vector<8x16xbf16>
    %cst_96 = arith.constant dense<0.000000e+00> : vector<8x64xf32>
    %297 = tpu.matmul %296, %5, %cst_96 {dimension_numbers = #tpu.dot_dimension_numbers<[1], [0], [0], [1], [0, 0, 1, 1], [], []>} : vector<8x16xbf16>, vector<16x64xbf16>, vector<8x64xf32> -> vector<8x64xf32>
    %298 = arith.addf %295, %297 : vector<8x64xf32>
    %299 = vector.extract_strided_slice %298 {offsets = [0, 0], sizes = [8, 16], strides = [1, 1]} : vector<8x64xf32> to vector<8x16xf32>
    %300 = arith.negf %299 : vector<8x16xf32>
    %301 = math.exp %300 : vector<8x16xf32>
    %cst_97 = arith.constant 1.000000e+00 : f32
    %302 = vector.broadcast %cst_97 : f32 to vector<8x16xf32>
    %303 = arith.addf %302, %301 : vector<8x16xf32>
    %304 = arith.divf %302, %303 : vector<8x16xf32>
    %305 = vector.extract_strided_slice %298 {offsets = [0, 16], sizes = [8, 16], strides = [1, 1]} : vector<8x64xf32> to vector<8x16xf32>
    %306 = arith.negf %305 : vector<8x16xf32>
    %307 = math.exp %306 : vector<8x16xf32>
    %cst_98 = arith.constant 1.000000e+00 : f32
    %308 = vector.broadcast %cst_98 : f32 to vector<8x16xf32>
    %309 = arith.addf %308, %307 : vector<8x16xf32>
    %310 = arith.divf %308, %309 : vector<8x16xf32>
    %311 = vector.extract_strided_slice %298 {offsets = [0, 32], sizes = [8, 16], strides = [1, 1]} : vector<8x64xf32> to vector<8x16xf32>
    %312 = math.tanh %311 : vector<8x16xf32>
    %313 = vector.extract_strided_slice %298 {offsets = [0, 48], sizes = [8, 16], strides = [1, 1]} : vector<8x64xf32> to vector<8x16xf32>
    %314 = arith.negf %313 : vector<8x16xf32>
    %315 = math.exp %314 : vector<8x16xf32>
    %cst_99 = arith.constant 1.000000e+00 : f32
    %316 = vector.broadcast %cst_99 : f32 to vector<8x16xf32>
    %317 = arith.addf %316, %315 : vector<8x16xf32>
    %318 = arith.divf %316, %317 : vector<8x16xf32>
    %319 = arith.mulf %310, %281 : vector<8x16xf32>
    %320 = arith.mulf %304, %312 : vector<8x16xf32>
    %321 = arith.addf %319, %320 : vector<8x16xf32>
    %322 = math.tanh %321 : vector<8x16xf32>
    %323 = arith.mulf %318, %322 : vector<8x16xf32>
    %c0_100 = arith.constant 0 : index
    %324 = arith.index_cast %291 : i32 to index
    %c0_101 = arith.constant 0 : index
    %c0_102 = arith.constant 0 : index
    %325 = vector.load %arg4[%c0_100, %324, %c0_101, %c0_102] : memref<1x8x8x16xf32, #tpu.memory_space<vmem>>, vector<1x1x8x16xf32>
    %326 = vector.shape_cast %325 : vector<1x1x8x16xf32> to vector<8x16xf32>
    %327 = vector.shape_cast %323 : vector<8x16xf32> to vector<1x1x8x16xf32>
    tpu.vector_store %arg4[%c0_100, %324, %c0_101, %c0_102], %327 {strides = array<i32>} : memref<1x8x8x16xf32, #tpu.memory_space<vmem>>, vector<1x1x8x16xf32>,
    %c8_i32 = arith.constant 8 : i32
    %c0_103 = arith.constant 0 : index
    %c0_104 = arith.constant 0 : index
    %328 = vector.load %arg5[%c0_103, %c0_104] : memref<8x16xf32, #tpu.memory_space<vmem>>, vector<8x16xf32>
    tpu.vector_store %arg5[%c0_103, %c0_104], %323 {strides = array<i32>} : memref<8x16xf32, #tpu.memory_space<vmem>>, vector<8x16xf32>,
    %c0_105 = arith.constant 0 : index
    %c0_106 = arith.constant 0 : index
    %329 = vector.load %arg6[%c0_105, %c0_106] : memref<8x16xf32, #tpu.memory_space<vmem>>, vector<8x16xf32>
    tpu.vector_store %arg6[%c0_105, %c0_106], %321 {strides = array<i32>} : memref<8x16xf32, #tpu.memory_space<vmem>>, vector<8x16xf32>,
    return
  }
  func.func @transform_0(%arg0: i32, %arg1: i32) -> (i32, i32, i32, i32) {
    %c2_i32 = arith.constant 2 : i32
    %0 = arith.muli %c2_i32, %arg1 : i32
    %c0_i32 = arith.constant 0 : i32
    %1 = arith.subi %c0_i32, %0 : i32
    %2 = arith.muli %arg0, %1 : i32
    %3 = arith.addi %arg1, %2 : i32
    %c0_i32_0 = arith.constant 0 : i32
    %c0_i32_1 = arith.constant 0 : i32
    %c0_i32_2 = arith.constant 0 : i32
    return %arg0, %3, %c0_i32_0, %c0_i32_1 : i32, i32, i32, i32
  }
  func.func @transform_1(%arg0: i32, %arg1: i32) -> (i32, i32, i32) {
    %c0_i32 = arith.constant 0 : i32
    %c0_i32_0 = arith.constant 0 : i32
    %c0_i32_1 = arith.constant 0 : i32
    return %arg0, %c0_i32, %c0_i32_0 : i32, i32, i32
  }
  func.func @transform_2(%arg0: i32, %arg1: i32) -> (i32, i32, i32, i32) {
    %c2_i32 = arith.constant 2 : i32
    %0 = arith.muli %c2_i32, %arg1 : i32
    %c0_i32 = arith.constant 0 : i32
    %1 = arith.subi %c0_i32, %0 : i32
    %2 = arith.muli %arg0, %1 : i32
    %3 = arith.addi %arg1, %2 : i32
    %c0_i32_0 = arith.constant 0 : i32
    %c0_i32_1 = arith.constant 0 : i32
    %c0_i32_2 = arith.constant 0 : i32
    return %arg0, %3, %c0_i32_0, %c0_i32_1 : i32, i32, i32, i32
  }
}

module attributes {stable_mosaic.version = 11 : i64} {
  func.func @_pool_chunk_kernel(%arg0: i32, %arg1: memref<2x8x8x16xf32, #tpu.memory_space<vmem>>, %arg2: memref<8x96xf32, #tpu.memory_space<vmem>>, %arg3: memref<8x32xf32, #tpu.memory_space<vmem>>, %arg4: memref<8x32xf32, #tpu.memory_space<vmem>>) attributes {dimension_semantics = [#tpu.dimension_semantics<arbitrary>], iteration_bounds = array<i64: 1>, scalar_prefetch = 0 : i64, scratch_operands = 2 : i64, tpu.core_type = #tpu.core_type<tc>, window_params = [{transform_indices = @transform_0, window_bounds = array<i64: 2, 8, 8, 16>}, {pipeline_mode = #tpu.pipeline_mode<synchronous>, transform_indices = @transform_1, window_bounds = array<i64: 8, 96>}]} {
    %c0 = arith.constant 0 : index
    %c0_0 = arith.constant 0 : index
    %c0_1 = arith.constant 0 : index
    %c0_2 = arith.constant 0 : index
    %0 = vector.load %arg1[%c0, %c0_0, %c0_1, %c0_2] : memref<2x8x8x16xf32, #tpu.memory_space<vmem>>, vector<2x8x8x16xf32>
    %c0_i32 = arith.constant 0 : i32
    %1 = arith.cmpi eq, %arg0, %c0_i32 : i32
    %2 = arith.extui %1 : i1 to i32
    %c0_i32_3 = arith.constant 0 : i32
    %3 = arith.cmpi ne, %2, %c0_i32_3 : i32
    scf.if %3 {
      %cst_17 = arith.constant 0.000000e+00 : f32
      %27 = vector.broadcast %cst_17 : f32 to vector<8x32xf32>
      %c0_18 = arith.constant 0 : index
      %c0_19 = arith.constant 0 : index
      %28 = vector.load %arg3[%c0_18, %c0_19] : memref<8x32xf32, #tpu.memory_space<vmem>>, vector<8x32xf32>
      tpu.vector_store %arg3[%c0_18, %c0_19], %27 {strides = array<i32>} : memref<8x32xf32, #tpu.memory_space<vmem>>, vector<8x32xf32>,
      %cst_20 = arith.constant 0xFF800000 : f32
      %29 = vector.broadcast %cst_20 : f32 to vector<8x32xf32>
      %c0_21 = arith.constant 0 : index
      %c0_22 = arith.constant 0 : index
      %30 = vector.load %arg4[%c0_21, %c0_22] : memref<8x32xf32, #tpu.memory_space<vmem>>, vector<8x32xf32>
      tpu.vector_store %arg4[%c0_21, %c0_22], %29 {strides = array<i32>} : memref<8x32xf32, #tpu.memory_space<vmem>>, vector<8x32xf32>,
    } else {
    }
    %c0_4 = arith.constant 0 : index
    %c0_5 = arith.constant 0 : index
    %4 = vector.load %arg3[%c0_4, %c0_5] : memref<8x32xf32, #tpu.memory_space<vmem>>, vector<8x32xf32>
    %5 = vector.extract_strided_slice %0 {offsets = [0, 0, 0, 0], sizes = [1, 8, 8, 16], strides = [1, 1, 1, 1]} : vector<2x8x8x16xf32> to vector<1x8x8x16xf32>
    %6 = vector.shape_cast %5 : vector<1x8x8x16xf32> to vector<8x8x16xf32>
    %cst = arith.constant dense<0.000000e+00> : vector<8x16xf32>
    %7 = vector.multi_reduction <add>, %6, %cst [0] : vector<8x8x16xf32> to vector<8x16xf32>
    %8 = vector.extract_strided_slice %0 {offsets = [1, 0, 0, 0], sizes = [1, 8, 8, 16], strides = [1, 1, 1, 1]} : vector<2x8x8x16xf32> to vector<1x8x8x16xf32>
    %9 = vector.shape_cast %8 : vector<1x8x8x16xf32> to vector<8x8x16xf32>
    %cst_6 = arith.constant dense<0.000000e+00> : vector<8x16xf32>
    %10 = vector.multi_reduction <add>, %9, %cst_6 [0] : vector<8x8x16xf32> to vector<8x16xf32>
    %11 = tpu.concatenate %7, %10 in 1 : vector<8x16xf32>, vector<8x16xf32> -> vector<8x32xf32>
    %12 = arith.addf %4, %11 : vector<8x32xf32>
    %c0_7 = arith.constant 0 : index
    %c0_8 = arith.constant 0 : index
    %13 = vector.load %arg3[%c0_7, %c0_8] : memref<8x32xf32, #tpu.memory_space<vmem>>, vector<8x32xf32>
    tpu.vector_store %arg3[%c0_7, %c0_8], %12 {strides = array<i32>} : memref<8x32xf32, #tpu.memory_space<vmem>>, vector<8x32xf32>,
    %c0_9 = arith.constant 0 : index
    %c0_10 = arith.constant 0 : index
    %14 = vector.load %arg4[%c0_9, %c0_10] : memref<8x32xf32, #tpu.memory_space<vmem>>, vector<8x32xf32>
    %15 = vector.extract_strided_slice %0 {offsets = [0, 0, 0, 0], sizes = [1, 8, 8, 16], strides = [1, 1, 1, 1]} : vector<2x8x8x16xf32> to vector<1x8x8x16xf32>
    %16 = vector.shape_cast %15 : vector<1x8x8x16xf32> to vector<8x8x16xf32>
    %cst_11 = arith.constant dense<0xFF800000> : vector<8x16xf32>
    %17 = vector.multi_reduction <maximumf>, %16, %cst_11 [0] : vector<8x8x16xf32> to vector<8x16xf32>
    %18 = vector.extract_strided_slice %0 {offsets = [1, 0, 0, 0], sizes = [1, 8, 8, 16], strides = [1, 1, 1, 1]} : vector<2x8x8x16xf32> to vector<1x8x8x16xf32>
    %19 = vector.shape_cast %18 : vector<1x8x8x16xf32> to vector<8x8x16xf32>
    %cst_12 = arith.constant dense<0xFF800000> : vector<8x16xf32>
    %20 = vector.multi_reduction <maximumf>, %19, %cst_12 [0] : vector<8x8x16xf32> to vector<8x16xf32>
    %21 = tpu.concatenate %17, %20 in 1 : vector<8x16xf32>, vector<8x16xf32> -> vector<8x32xf32>
    %22 = arith.maximumf %14, %21 : vector<8x32xf32>
    %c0_13 = arith.constant 0 : index
    %c0_14 = arith.constant 0 : index
    %23 = vector.load %arg4[%c0_13, %c0_14] : memref<8x32xf32, #tpu.memory_space<vmem>>, vector<8x32xf32>
    tpu.vector_store %arg4[%c0_13, %c0_14], %22 {strides = array<i32>} : memref<8x32xf32, #tpu.memory_space<vmem>>, vector<8x32xf32>,
    %c0_i32_15 = arith.constant 0 : i32
    %24 = arith.cmpi eq, %arg0, %c0_i32_15 : i32
    %25 = arith.extui %24 : i1 to i32
    %c0_i32_16 = arith.constant 0 : i32
    %26 = arith.cmpi ne, %25, %c0_i32_16 : i32
    scf.if %26 {
      %27 = vector.extract_strided_slice %0 {offsets = [0, 7, 0, 0], sizes = [1, 1, 8, 16], strides = [1, 1, 1, 1]} : vector<2x8x8x16xf32> to vector<1x1x8x16xf32>
      %28 = vector.shape_cast %27 : vector<1x1x8x16xf32> to vector<8x16xf32>
      %29 = vector.extract_strided_slice %0 {offsets = [1, 7, 0, 0], sizes = [1, 1, 8, 16], strides = [1, 1, 1, 1]} : vector<2x8x8x16xf32> to vector<1x1x8x16xf32>
      %30 = vector.shape_cast %29 : vector<1x1x8x16xf32> to vector<8x16xf32>
      %31 = tpu.concatenate %28, %30 in 1 : vector<8x16xf32>, vector<8x16xf32> -> vector<8x32xf32>
      %c0_17 = arith.constant 0 : index
      %c0_18 = arith.constant 0 : index
      %32 = vector.load %arg3[%c0_17, %c0_18] : memref<8x32xf32, #tpu.memory_space<vmem>>, vector<8x32xf32>
      %cst_19 = arith.constant 1.250000e-01 : f32
      %33 = vector.broadcast %cst_19 : f32 to vector<8x32xf32>
      %34 = arith.mulf %32, %33 : vector<8x32xf32>
      %c0_20 = arith.constant 0 : index
      %c0_21 = arith.constant 0 : index
      %35 = vector.load %arg4[%c0_20, %c0_21] : memref<8x32xf32, #tpu.memory_space<vmem>>, vector<8x32xf32>
      %36 = tpu.concatenate %34, %35, %31 in 1 : vector<8x32xf32>, vector<8x32xf32>, vector<8x32xf32> -> vector<8x96xf32>
      %c0_22 = arith.constant 0 : index
      %c0_23 = arith.constant 0 : index
      %37 = vector.load %arg2[%c0_22, %c0_23] : memref<8x96xf32, #tpu.memory_space<vmem>>, vector<8x96xf32>
      tpu.vector_store %arg2[%c0_22, %c0_23], %36 {strides = array<i32>} : memref<8x96xf32, #tpu.memory_space<vmem>>, vector<8x96xf32>,
    } else {
    }
    return
  }
  func.func @transform_0(%arg0: i32) -> (i32, i32, i32, i32) {
    %c0_i32 = arith.constant 0 : i32
    %c0_i32_0 = arith.constant 0 : i32
    %c0_i32_1 = arith.constant 0 : i32
    %c0_i32_2 = arith.constant 0 : i32
    return %c0_i32, %arg0, %c0_i32_0, %c0_i32_1 : i32, i32, i32, i32
  }
  func.func @transform_1(%arg0: i32) -> (i32, i32) {
    %c0_i32 = arith.constant 0 : i32
    %c0_i32_0 = arith.constant 0 : i32
    %c0_i32_1 = arith.constant 0 : i32
    return %c0_i32, %c0_i32_0 : i32, i32
  }
}

module attributes {stable_mosaic.version = 11 : i64} {
  func.func @_gate_proj_pair_kernel(%arg0: i32, %arg1: i32, %arg2: memref<2x64x16xf32, #tpu.memory_space<vmem>>, %arg3: memref<1x2x16x64xf32, #tpu.memory_space<vmem>>, %arg4: memref<1x1x64xf32, #tpu.memory_space<vmem>>, %arg5: memref<1x64x64xbf16, #tpu.memory_space<vmem>>) attributes {dimension_semantics = [#tpu.dimension_semantics<parallel>, #tpu.dimension_semantics<parallel>], iteration_bounds = array<i64: 2, 1>, scalar_prefetch = 0 : i64, scratch_operands = 0 : i64, tpu.core_type = #tpu.core_type<tc>, window_params = [{transform_indices = @transform_0, window_bounds = array<i64: 2, 64, 16>}, {transform_indices = @transform_1, window_bounds = array<i64: 1, 2, 16, 64>}, {transform_indices = @transform_2, window_bounds = array<i64: 1, 1, 64>}, {transform_indices = @transform_3, window_bounds = array<i64: 1, 64, 64>}]} {
    %c0 = arith.constant 0 : index
    %c0_0 = arith.constant 0 : index
    %c0_1 = arith.constant 0 : index
    %0 = vector.load %arg2[%c0, %c0_0, %c0_1] : memref<2x64x16xf32, #tpu.memory_space<vmem>>, vector<2x64x16xf32>
    %1 = arith.truncf %0 : vector<2x64x16xf32> to vector<2x64x16xbf16>
    %c0_2 = arith.constant 0 : index
    %c0_3 = arith.constant 0 : index
    %c0_4 = arith.constant 0 : index
    %c0_5 = arith.constant 0 : index
    %2 = vector.load %arg3[%c0_2, %c0_3, %c0_4, %c0_5] : memref<1x2x16x64xf32, #tpu.memory_space<vmem>>, vector<1x2x16x64xf32>
    %3 = vector.shape_cast %2 : vector<1x2x16x64xf32> to vector<2x16x64xf32>
    %4 = arith.truncf %3 : vector<2x16x64xf32> to vector<2x16x64xbf16>
    %5 = vector.extract_strided_slice %1 {offsets = [0, 0, 0], sizes = [1, 64, 16], strides = [1, 1, 1]} : vector<2x64x16xbf16> to vector<1x64x16xbf16>
    %6 = vector.shape_cast %5 : vector<1x64x16xbf16> to vector<64x16xbf16>
    %7 = vector.extract_strided_slice %4 {offsets = [0, 0, 0], sizes = [1, 16, 64], strides = [1, 1, 1]} : vector<2x16x64xbf16> to vector<1x16x64xbf16>
    %8 = vector.shape_cast %7 : vector<1x16x64xbf16> to vector<16x64xbf16>
    %cst = arith.constant dense<0.000000e+00> : vector<64x64xf32>
    %9 = tpu.matmul %6, %8, %cst {dimension_numbers = #tpu.dot_dimension_numbers<[1], [0], [0], [1], [0, 0, 1, 1], [], []>} : vector<64x16xbf16>, vector<16x64xbf16>, vector<64x64xf32> -> vector<64x64xf32>
    %10 = vector.extract_strided_slice %1 {offsets = [1, 0, 0], sizes = [1, 64, 16], strides = [1, 1, 1]} : vector<2x64x16xbf16> to vector<1x64x16xbf16>
    %11 = vector.shape_cast %10 : vector<1x64x16xbf16> to vector<64x16xbf16>
    %12 = vector.extract_strided_slice %4 {offsets = [1, 0, 0], sizes = [1, 16, 64], strides = [1, 1, 1]} : vector<2x16x64xbf16> to vector<1x16x64xbf16>
    %13 = vector.shape_cast %12 : vector<1x16x64xbf16> to vector<16x64xbf16>
    %cst_6 = arith.constant dense<0.000000e+00> : vector<64x64xf32>
    %14 = tpu.matmul %11, %13, %cst_6 {dimension_numbers = #tpu.dot_dimension_numbers<[1], [0], [0], [1], [0, 0, 1, 1], [], []>} : vector<64x16xbf16>, vector<16x64xbf16>, vector<64x64xf32> -> vector<64x64xf32>
    %15 = arith.addf %9, %14 : vector<64x64xf32>
    %c0_7 = arith.constant 0 : index
    %c0_8 = arith.constant 0 : index
    %c0_9 = arith.constant 0 : index
    %16 = vector.load %arg4[%c0_7, %c0_8, %c0_9] : memref<1x1x64xf32, #tpu.memory_space<vmem>>, vector<1x1x64xf32>
    %17 = vector.shape_cast %16 : vector<1x1x64xf32> to vector<1x64xf32>
    %18 = vector.broadcast %17 : vector<1x64xf32> to vector<64x64xf32>
    %19 = arith.addf %15, %18 : vector<64x64xf32>
    %20 = arith.truncf %19 : vector<64x64xf32> to vector<64x64xbf16>
    %c0_10 = arith.constant 0 : index
    %c0_11 = arith.constant 0 : index
    %c0_12 = arith.constant 0 : index
    %21 = vector.load %arg5[%c0_10, %c0_11, %c0_12] : memref<1x64x64xbf16, #tpu.memory_space<vmem>>, vector<1x64x64xbf16>
    %22 = vector.shape_cast %21 : vector<1x64x64xbf16> to vector<64x64xbf16>
    %23 = vector.shape_cast %20 : vector<64x64xbf16> to vector<1x64x64xbf16>
    tpu.vector_store %arg5[%c0_10, %c0_11, %c0_12], %23 {strides = array<i32>} : memref<1x64x64xbf16, #tpu.memory_space<vmem>>, vector<1x64x64xbf16>,
    return
  }
  func.func @transform_0(%arg0: i32, %arg1: i32) -> (i32, i32, i32) {
    %c0_i32 = arith.constant 0 : i32
    %c0_i32_0 = arith.constant 0 : i32
    %c0_i32_1 = arith.constant 0 : i32
    return %c0_i32, %arg1, %c0_i32_0 : i32, i32, i32
  }
  func.func @transform_1(%arg0: i32, %arg1: i32) -> (i32, i32, i32, i32) {
    %c0_i32 = arith.constant 0 : i32
    %c0_i32_0 = arith.constant 0 : i32
    %c0_i32_1 = arith.constant 0 : i32
    %c0_i32_2 = arith.constant 0 : i32
    return %arg0, %c0_i32, %c0_i32_0, %c0_i32_1 : i32, i32, i32, i32
  }
  func.func @transform_2(%arg0: i32, %arg1: i32) -> (i32, i32, i32) {
    %c0_i32 = arith.constant 0 : i32
    %c0_i32_0 = arith.constant 0 : i32
    %c0_i32_1 = arith.constant 0 : i32
    return %arg0, %c0_i32, %c0_i32_0 : i32, i32, i32
  }
  func.func @transform_3(%arg0: i32, %arg1: i32) -> (i32, i32, i32) {
    %c0_i32 = arith.constant 0 : i32
    %c0_i32_0 = arith.constant 0 : i32
    return %arg0, %arg1, %c0_i32 : i32, i32, i32
  }
}

module attributes {stable_mosaic.version = 11 : i64} {
  func.func @_mlp_head_kernel(%arg0: i32, %arg1: memref<8x96xf32, #tpu.memory_space<vmem>>, %arg2: memref<96x64xf32, #tpu.memory_space<vmem>>, %arg3: memref<1x64xf32, #tpu.memory_space<vmem>>, %arg4: memref<1x64xf32, #tpu.memory_space<vmem>>, %arg5: memref<1x64xf32, #tpu.memory_space<vmem>>, %arg6: memref<64x2xf32, #tpu.memory_space<vmem>>, %arg7: memref<1x2xf32, #tpu.memory_space<vmem>>, %arg8: memref<8x2xf32, #tpu.memory_space<vmem>>) attributes {dimension_semantics = [#tpu.dimension_semantics<parallel>], iteration_bounds = array<i64: 1>, scalar_prefetch = 0 : i64, scratch_operands = 0 : i64, tpu.core_type = #tpu.core_type<tc>, window_params = [{transform_indices = @transform_0, window_bounds = array<i64: 8, 96>}, {pipeline_mode = #tpu.pipeline_mode<synchronous>, transform_indices = @transform_1, window_bounds = array<i64: 96, 64>}, {pipeline_mode = #tpu.pipeline_mode<synchronous>, transform_indices = @transform_2, window_bounds = array<i64: 1, 64>}, {pipeline_mode = #tpu.pipeline_mode<synchronous>, transform_indices = @transform_3, window_bounds = array<i64: 1, 64>}, {pipeline_mode = #tpu.pipeline_mode<synchronous>, transform_indices = @transform_4, window_bounds = array<i64: 1, 64>}, {pipeline_mode = #tpu.pipeline_mode<synchronous>, transform_indices = @transform_5, window_bounds = array<i64: 64, 2>}, {pipeline_mode = #tpu.pipeline_mode<synchronous>, transform_indices = @transform_6, window_bounds = array<i64: 1, 2>}, {transform_indices = @transform_7, window_bounds = array<i64: 8, 2>}]} {
    %c0 = arith.constant 0 : index
    %c0_0 = arith.constant 0 : index
    %0 = vector.load %arg1[%c0, %c0_0] : memref<8x96xf32, #tpu.memory_space<vmem>>, vector<8x96xf32>
    %1 = arith.truncf %0 : vector<8x96xf32> to vector<8x96xbf16>
    %c0_1 = arith.constant 0 : index
    %c0_2 = arith.constant 0 : index
    %2 = vector.load %arg2[%c0_1, %c0_2] : memref<96x64xf32, #tpu.memory_space<vmem>>, vector<96x64xf32>
    %3 = arith.truncf %2 : vector<96x64xf32> to vector<96x64xbf16>
    %cst = arith.constant dense<0.000000e+00> : vector<8x64xf32>
    %4 = tpu.matmul %1, %3, %cst {dimension_numbers = #tpu.dot_dimension_numbers<[1], [0], [0], [1], [0, 0, 1, 1], [], []>} : vector<8x96xbf16>, vector<96x64xbf16>, vector<8x64xf32> -> vector<8x64xf32>
    %c0_3 = arith.constant 0 : index
    %c0_4 = arith.constant 0 : index
    %5 = vector.load %arg3[%c0_3, %c0_4] : memref<1x64xf32, #tpu.memory_space<vmem>>, vector<1x64xf32>
    %6 = vector.broadcast %5 : vector<1x64xf32> to vector<8x64xf32>
    %7 = arith.addf %4, %6 : vector<8x64xf32>
    %cst_5 = arith.constant dense<0.000000e+00> : vector<8xf32>
    %8 = vector.multi_reduction <add>, %7, %cst_5 [1] : vector<8x64xf32> to vector<8xf32>
    %9 = vector.shape_cast %8 : vector<8xf32> to vector<8x1xf32>
    %cst_6 = arith.constant 6.400000e+01 : f32
    %10 = vector.broadcast %cst_6 : f32 to vector<8x1xf32>
    %11 = arith.divf %9, %10 : vector<8x1xf32>
    %12 = vector.broadcast %11 : vector<8x1xf32> to vector<8x64xf32>
    %13 = arith.subf %7, %12 : vector<8x64xf32>
    %14 = arith.mulf %13, %13 : vector<8x64xf32>
    %cst_7 = arith.constant dense<0.000000e+00> : vector<8xf32>
    %15 = vector.multi_reduction <add>, %14, %cst_7 [1] : vector<8x64xf32> to vector<8xf32>
    %16 = vector.shape_cast %15 : vector<8xf32> to vector<8x1xf32>
    %cst_8 = arith.constant 6.400000e+01 : f32
    %17 = vector.broadcast %cst_8 : f32 to vector<8x1xf32>
    %18 = arith.divf %16, %17 : vector<8x1xf32>
    %19 = vector.broadcast %11 : vector<8x1xf32> to vector<8x64xf32>
    %20 = arith.subf %7, %19 : vector<8x64xf32>
    %cst_9 = arith.constant 9.99999974E-6 : f32
    %21 = vector.broadcast %cst_9 : f32 to vector<8x1xf32>
    %22 = arith.addf %18, %21 : vector<8x1xf32>
    %23 = math.rsqrt %22 : vector<8x1xf32>
    %24 = vector.broadcast %23 : vector<8x1xf32> to vector<8x64xf32>
    %25 = arith.mulf %20, %24 : vector<8x64xf32>
    %c0_10 = arith.constant 0 : index
    %c0_11 = arith.constant 0 : index
    %26 = vector.load %arg4[%c0_10, %c0_11] : memref<1x64xf32, #tpu.memory_space<vmem>>, vector<1x64xf32>
    %27 = vector.broadcast %26 : vector<1x64xf32> to vector<8x64xf32>
    %28 = arith.mulf %25, %27 : vector<8x64xf32>
    %c0_12 = arith.constant 0 : index
    %c0_13 = arith.constant 0 : index
    %29 = vector.load %arg5[%c0_12, %c0_13] : memref<1x64xf32, #tpu.memory_space<vmem>>, vector<1x64xf32>
    %30 = vector.broadcast %29 : vector<1x64xf32> to vector<8x64xf32>
    %31 = arith.addf %28, %30 : vector<8x64xf32>
    %cst_14 = arith.constant 0.000000e+00 : f32
    %32 = vector.broadcast %cst_14 : f32 to vector<8x64xf32>
    %33 = arith.maximumf %31, %32 : vector<8x64xf32>
    %34 = arith.truncf %33 : vector<8x64xf32> to vector<8x64xbf16>
    %c0_15 = arith.constant 0 : index
    %c0_16 = arith.constant 0 : index
    %35 = vector.load %arg6[%c0_15, %c0_16] : memref<64x2xf32, #tpu.memory_space<vmem>>, vector<64x2xf32>
    %36 = arith.truncf %35 : vector<64x2xf32> to vector<64x2xbf16>
    %cst_17 = arith.constant dense<0.000000e+00> : vector<8x2xf32>
    %37 = tpu.matmul %34, %36, %cst_17 {dimension_numbers = #tpu.dot_dimension_numbers<[1], [0], [0], [1], [0, 0, 1, 1], [], []>} : vector<8x64xbf16>, vector<64x2xbf16>, vector<8x2xf32> -> vector<8x2xf32>
    %c0_18 = arith.constant 0 : index
    %c0_19 = arith.constant 0 : index
    %38 = vector.load %arg7[%c0_18, %c0_19] : memref<1x2xf32, #tpu.memory_space<vmem>>, vector<1x2xf32>
    %39 = vector.broadcast %38 : vector<1x2xf32> to vector<8x2xf32>
    %40 = arith.addf %37, %39 : vector<8x2xf32>
    %c0_20 = arith.constant 0 : index
    %c0_21 = arith.constant 0 : index
    %41 = vector.load %arg8[%c0_20, %c0_21] : memref<8x2xf32, #tpu.memory_space<vmem>>, vector<8x2xf32>
    tpu.vector_store %arg8[%c0_20, %c0_21], %40 {strides = array<i32>} : memref<8x2xf32, #tpu.memory_space<vmem>>, vector<8x2xf32>,
    return
  }
  func.func @transform_0(%arg0: i32) -> (i32, i32) {
    %c0_i32 = arith.constant 0 : i32
    %c0_i32_0 = arith.constant 0 : i32
    return %arg0, %c0_i32 : i32, i32
  }
  func.func @transform_1(%arg0: i32) -> (i32, i32) {
    %c0_i32 = arith.constant 0 : i32
    %c0_i32_0 = arith.constant 0 : i32
    %c0_i32_1 = arith.constant 0 : i32
    return %c0_i32, %c0_i32_0 : i32, i32
  }
  func.func @transform_2(%arg0: i32) -> (i32, i32) {
    %c0_i32 = arith.constant 0 : i32
    %c0_i32_0 = arith.constant 0 : i32
    %c0_i32_1 = arith.constant 0 : i32
    return %c0_i32, %c0_i32_0 : i32, i32
  }
  func.func @transform_3(%arg0: i32) -> (i32, i32) {
    %c0_i32 = arith.constant 0 : i32
    %c0_i32_0 = arith.constant 0 : i32
    %c0_i32_1 = arith.constant 0 : i32
    return %c0_i32, %c0_i32_0 : i32, i32
  }
  func.func @transform_4(%arg0: i32) -> (i32, i32) {
    %c0_i32 = arith.constant 0 : i32
    %c0_i32_0 = arith.constant 0 : i32
    %c0_i32_1 = arith.constant 0 : i32
    return %c0_i32, %c0_i32_0 : i32, i32
  }
  func.func @transform_5(%arg0: i32) -> (i32, i32) {
    %c0_i32 = arith.constant 0 : i32
    %c0_i32_0 = arith.constant 0 : i32
    %c0_i32_1 = arith.constant 0 : i32
    return %c0_i32, %c0_i32_0 : i32, i32
  }
  func.func @transform_6(%arg0: i32) -> (i32, i32) {
    %c0_i32 = arith.constant 0 : i32
    %c0_i32_0 = arith.constant 0 : i32
    %c0_i32_1 = arith.constant 0 : i32
    return %c0_i32, %c0_i32_0 : i32, i32
  }
  func.func @transform_7(%arg0: i32) -> (i32, i32) {
    %c0_i32 = arith.constant 0 : i32
    %c0_i32_0 = arith.constant 0 : i32
    return %arg0, %c0_i32 : i32, i32
  }
}

</mosaic_0001>

<bundles_post_ra>
// kernel: mul.1
= control target key start
LH: loop header
LB: loop body
LE: loop exit
PB: predicated region body
PF: predicated region fallthrough
CT: control target
= control target key end

     0   :  { %s34_s0 = inlined_call_operand.vmem [shape: f32[78], index: 0, kind: input, shape index: {}]   ;;  %s35_s1 = inlined_call_operand.vmem [shape: f32[78], index: 1, kind: input, shape index: {}]   ;;  %s36_s2 = inlined_call_operand.vmem [shape: f32[78], index: 2, kind: output, shape index: {}]  }
   0x1   :  { %v3_v0 = vld [vmem:[%s34_s0] sm:$0x1] }
   0x2   :  { %v4_v1 = vld [vmem:[%s35_s1] sm:$0x1] }
   0x3   :  { %v7_v2 = vmul.f32 %v4_v1, %v3_v0 }
   0x5   :  { %9 = vst [vmem:[%s36_s2] sm:$0x1] %v7_v2 }

// kernel: nncrf_forward.16
= control target key start
LH: loop header
LB: loop body
LE: loop exit
PB: predicated region body
PF: predicated region fallthrough
CT: control target
= control target key end

     0   :  { %vm46_vm0 = vcmask 1043456   ;;  %vm33_vm1 = vcmask 64512   ;;  %s454_s30 = smov 120   ;;  %s456_s4 = smov 112   ;;  %s705_s1 = inlined_call_operand.vmem [shape: f32[8,24], index: 1, kind: input, shape index: {}]   ;;  %s706_s0 = inlined_call_operand.vmem [shape: f32[64,8], index: 0, kind: input, shape index: {}]   ;;  %s707_s2 = inlined_call_operand.vmem [shape: f32[1,24], index: 2, kind: input, shape index: {}]   ;;  %s708_s3 = inlined_call_operand.vmem [shape: f32[64,8], index: 3, kind: output, shape index: {}]  }
   0x1   :  { %v27_v0 = vld [vmem:[%s705_s1] sm:$0xff]  ;;  %v16_v2 = vld [vmem:[%s706_s0 + $0x8] sm:$0xff]  ;;  %v17_v4 = vld [vmem:[%s706_s0 + $0x10] sm:$0xff] }
   0x2   :  { %v15_v1 = vld [vmem:[%s706_s0] sm:$0xff]  ;;  %v28_v3 = vpack.c.bf16 %v27_v0, %v27_v0  ;;  %v18_v5 = vld [vmem:[%s706_s0 + $0x18] sm:$0xff]  ;;  %v20_v7 = vld [vmem:[%s706_s0 + $0x28] sm:$0xff] }
   0x3   :  { %v19_v6 = vld [vmem:[%s706_s0 + $0x20] sm:$0xff]  ;;  %v21_v8 = vld [vmem:[%s706_s0 + $0x30] sm:$0xff]  ;;  %v22_v9 = vld [vmem:[%s706_s0 + $0x38] sm:$0xff]  ;;  %v23_v11 = vpack.c.bf16 %v16_v2, %v15_v1  ;;  %v24_v12 = vpack.c.bf16 %v18_v5, %v17_v4 }
   0x4   :  { %v48_v10 = vsel %vm46_vm0, %v28_v3, 0  ;;  %v25_v13 = vpack.c.bf16 %v20_v7, %v19_v6  ;;  %v26_v14 = vpack.c.bf16 %v22_v9, %v21_v8  ;;  %v389_v15 = vld [vmem:[%s707_s2] ss:$0 sm:$0xff]  ;;  %s455_s2 = smov 16  }
   0x5   :  { %57 = vmatpush.bf16.msra.mxu0 %v48_v10  ;;  %383 = vmatpush.bf16.msra.mxu1 %v48_v10 }
   0x6   :  { %384 = vmatpush.bf16.msra.mxu2 %v48_v10  ;;  %385 = vmatpush.bf16.msra.mxu3 %v48_v10 }
   0x8   :  { %371 = vmatmul.msk.bf16.vlgmr.msra.gmra.mxu0 %vm33_vm1, %v23_v11  ;;  %372 = vmatmul.msk.bf16.vlgmr.msra.gmra.mxu1 %vm33_vm1, %v24_v12 }
   0x9   :  { %373 = vmatmul.msk.bf16.vlgmr.msra.gmra.mxu2 %vm33_vm1, %v25_v13  ;;  %374 = vmatmul.msk.bf16.vlgmr.msra.gmra.mxu3 %vm33_vm1, %v26_v14 }
  0x85   :  { %v59_v16 = vpop.f32.mrf.mxu0  ;;  %v64_v17 = vpop.f32.mrf.mxu1 }
  0x86   :  { %v60_v18 = vadd.f32 %v389_v15, %v59_v16  ;;  %v65_v19 = vadd.f32 %v389_v15, %v64_v17 }
  0x88   :  { %390 = vtanh.f32 %v60_v18  ;;  %v375_v43 = vmul.f32 -1.442695, %v60_v18  ;;  %v377_v44 = vmul.f32 -1.442695, %v65_v19 }
  0x89   :  { %392 = vtanh.f32 %v65_v19 }
  0x8c   :  { %v69_v20 = vpop.f32.mrf.mxu2  ;;  %v74_v25 = vpop.f32.mrf.mxu3 }
  0x8d   :  { %v70_v21 = vadd.f32 %v389_v15, %v69_v20  ;;  %v61_v24 = vpop.f32.mrf.mxu0  ;;  %v66_v26 = vpop.f32.mrf.mxu1  ;;  %v75_v32 = vadd.f32 %v389_v15, %v74_v25 }
  0x8e   :  { %v391_v22 = vpop.eup %390  ;;  %v62_v27 = vadd.f32 %v389_v15, %v61_v24  ;;  %v67_v28 = vadd.f32 %v389_v15, %v66_v26 }
  0x8f   :  { %v393_v23 = vpop.eup %392  ;;  %394 = vtanh.f32 %v70_v21  ;;  %247 = vrot.lane.b32.xlu0 %v391_v22, %s454_s30  ;;  %v379_v40 = vmul.f32 -1.442695, %v70_v21  ;;  %v381_v62 = vmul.f32 -1.442695, %v75_v32 }
  0x90   :  { %251 = vrot.lane.b32.xlu1 %v393_v23, %s454_s30  ;;  %396 = vtanh.f32 %v62_v27  ;;  %v376_v51 = vmul.f32 -1.442695, %v62_v27  ;;  %v378_v54 = vmul.f32 -1.442695, %v67_v28 }
  0x91   :  { %398 = vtanh.f32 %v67_v28 }
  0x92   :  { %400 = vtanh.f32 %v75_v32 }
  0x94   :  { %v71_v30 = vpop.f32.mrf.mxu2  ;;  %v76_v33 = vpop.f32.mrf.mxu3 }
  0x95   :  { %v395_v29 = vpop.eup %394  ;;  %v72_v31 = vadd.f32 %v389_v15, %v71_v30  ;;  %v77_v35 = vadd.f32 %v389_v15, %v76_v33 }
  0x96   :  { %255 = vrot.lane.b32.xlu2 %v395_v29, %s454_s30  ;;  %v397_v34 = vpop.eup %396 }
  0x97   :  { %402 = vtanh.f32 %v72_v31  ;;  %249 = vrot.lane.b32.xlu0 %v397_v34, %s454_s30  ;;  %v399_v36 = vpop.eup %398  ;;  %v380_v46 = vmul.f32 -1.442695, %v72_v31  ;;  %v382_v2 = vmul.f32 -1.442695, %v77_v35 }
  0x98   :  { %404 = vtanh.f32 %v77_v35  ;;  %253 = vrot.lane.b32.xlu1 %v399_v36, %s454_s30  ;;  %v401_v37 = vpop.eup %400 }
  0x99   :  { %406 = vpow2.f32 %v379_v40 }
  0x9d   :  { %v403_v38 = vpop.eup %402 }
  0x9e   :  { %257 = vrot.lane.b32.xlu2 %v403_v38, %s454_s30  ;;  %v405_v39 = vpop.eup %404 }
  0x9f   :  { %259 = vrot.lane.b32.xlu0 %v401_v37, %s454_s30  ;;  %v407_v41 = vpop.eup %406 }
  0xa0   :  { %261 = vrot.lane.b32.xlu1 %v405_v39, %s454_s30  ;;  %v107_v42 = vadd.f32 1.0, %v407_v41 }
  0xa2   :  { %408 = vrcp.f32 %v107_v42  ;;  %vm176_vm2 = vweird.f32 %v107_v42  ;;  %v182_v58 = vand.u32 2147483648, %v107_v42  ;;  %v180_v60 = vand.u32 2147483647, %v107_v42 }
  0xa3   :  { %410 = vpow2.f32 %v375_v43 }
  0xa4   :  { %412 = vpow2.f32 %v377_v44  ;;  %v183_v3 = vor.u32 1.1754944e-38, %v182_v58  ;;  %vm181_vm5 = vcmp.eq.f32.partialorder %v180_v60, 8.507059e+37 }
  0xa5   :  { %414 = vpow2.f32 %v380_v46 }
  0xa8   :  { %v409_v45 = vpop.eup %408 }
  0xa9   :  { %v411_v47 = vpop.eup %410  ;;  %v172_v48 = vmul.f32 %v409_v45, %v107_v42  ;;  %vm177_vm3 = vweird.f32 %v409_v45 }
  0xaa   :  { %v413_v49 = vpop.eup %412  ;;  %v511_v50 = vadd.f32 1.0, %v411_v47  ;;  %vm521_vm4 = vmor %vm176_vm2, %vm177_vm3 }
  0xab   :  { %v173_v52 = vsub.f32 1.0, %v172_v48  ;;  %v513_v53 = vadd.f32 1.0, %v413_v49  ;;  %v415_v55 = vpop.eup %414 }
  0xac   :  { %416 = vrcp.f32 %v511_v50  ;;  %v517_v57 = vadd.f32 1.0, %v415_v55  ;;  %vm116_vm6 = vweird.f32 %v511_v50  ;;  %v122_v26 = vand.u32 2147483648, %v511_v50 }
  0xad   :  { %418 = vpow2.f32 %v376_v51  ;;  %v174_v56 = vmul.f32 %v409_v45, %v173_v52  ;;  %v120_v28 = vand.u32 2147483647, %v511_v50  ;;  %v150_v32 = vand.u32 2147483647, %v513_v53 }
  0xae   :  { %420 = vrcp.f32 %v513_v53  ;;  %v152_v33 = vand.u32 2147483648, %v513_v53  ;;  %vm146_vm10 = vweird.f32 %v513_v53  ;;  %v123_v36 = vor.u32 1.1754944e-38, %v122_v26 }
  0xaf   :  { %422 = vpow2.f32 %v378_v54  ;;  %v175_v59 = vadd.f32 %v409_v45, %v174_v56  ;;  %vm121_vm12 = vcmp.eq.f32.partialorder %v120_v28, 8.507059e+37  ;;  %vm151_vm13 = vcmp.eq.f32.partialorder %v150_v32, 8.507059e+37 }
  0xb0   :  { %424 = vrcp.f32 %v517_v57  ;;  %v153_v41 = vor.u32 1.1754944e-38, %v152_v33  ;;  %vm191_vm14 = vweird.f32 %v517_v57  ;;  %v197_v47 = vand.u32 2147483648, %v517_v57 }
  0xb1   :  { %v179_v4 = vsel %vm521_vm4, %v409_v45, %v175_v59  ;;  %426 = vpow2.f32 %v381_v62 }
  0xb2   :  { %v519_v61 = vpop.eup %416  ;;  %428 = vpow2.f32 %v382_v2  ;;  %v536_v10 = vsel %vm181_vm5, %v183_v3, %v179_v4  ;;  %v198_v59 = vor.u32 1.1754944e-38, %v197_v47 }
  0xb3   :  { %v419_v0 = vpop.eup %418  ;;  %v112_v7 = vmul.f32 %v519_v61, %v511_v50  ;;  %vm117_vm7 = vweird.f32 %v519_v61 }
  0xb4   :  { %v525_v1 = vpop.eup %420  ;;  %v530_v6 = vadd.f32 1.0, %v419_v0  ;;  %vm566_vm9 = vmor %vm116_vm6, %vm117_vm7 }
  0xb5   :  { %v423_v5 = vpop.eup %422  ;;  %v142_v8 = vmul.f32 %v525_v1, %v513_v53  ;;  %v113_v14 = vsub.f32 1.0, %v112_v7  ;;  %vm147_vm8 = vweird.f32 %v525_v1  ;;  %v195_v53 = vand.u32 2147483647, %v517_v57 }
  0xb6   :  { %v538_v11 = vadd.f32 1.0, %v423_v5  ;;  %v541_v13 = vpop.eup %424  ;;  %430 = vrcp.f32 %v530_v6  ;;  %vm577_vm11 = vmor %vm146_vm10, %vm147_vm8  ;;  %vm131_vm3 = vweird.f32 %v530_v6  ;;  %v135_v2 = vand.u32 2147483647, %v530_v6 }
  0xb7   :  { %v143_v15 = vsub.f32 1.0, %v142_v8  ;;  %v427_v16 = vpop.eup %426  ;;  %v187_v17 = vmul.f32 %v541_v13, %v517_v57  ;;  %v114_v19 = vmul.f32 %v519_v61, %v113_v14  ;;  %vm192_vm15 = vweird.f32 %v541_v13 }
  0xb8   :  { %v429_v18 = vpop.eup %428  ;;  %v548_v20 = vadd.f32 1.0, %v427_v16  ;;  %vm193_vm0 = vmor %vm191_vm14, %vm192_vm15  ;;  %vm196_vm2 = vcmp.eq.f32.partialorder %v195_v53, 8.507059e+37  ;;  %v137_v3 = vand.u32 2147483648, %v530_v6  ;;  %vm161_vm7 = vweird.f32 %v538_v11 }
  0xb9   :  { %v144_v21 = vmul.f32 %v525_v1, %v143_v15  ;;  %v555_v24 = vadd.f32 1.0, %v429_v18  ;;  %v188_v25 = vsub.f32 1.0, %v187_v17  ;;  %v115_v27 = vadd.f32 %v519_v61, %v114_v19 }
  0xba   :  { %v138_v16 = vor.u32 1.1754944e-38, %v137_v3  ;;  %vm206_vm10 = vweird.f32 %v548_v20  ;;  %v210_v26 = vand.u32 2147483647, %v548_v20 }
  0xbb   :  { %v145_v30 = vadd.f32 %v525_v1, %v144_v21  ;;  %v189_v35 = vmul.f32 %v541_v13, %v188_v25  ;;  %v119_v38 = vsel %vm566_vm9, %v519_v61, %v115_v27  ;;  %vm136_vm9 = vcmp.eq.f32.partialorder %v135_v2, 8.507059e+37 }
  0xbc   :  { %v551_v22 = vpop.eup %430  ;;  %v594_v46 = vsel %vm121_vm12, %v123_v36, %v119_v38  ;;  %v227_v33 = vand.u32 2147483648, %v555_v24 }
  0xbd   :  { %v127_v34 = vmul.f32 %v551_v22, %v530_v6  ;;  %v149_v40 = vsel %vm577_vm11, %v525_v1, %v145_v30  ;;  %v190_v44 = vadd.f32 %v541_v13, %v189_v35  ;;  %vm132_vm4 = vweird.f32 %v551_v22 }
  0xbe   :  { %v597_v49 = vsel %vm151_vm13, %v153_v41, %v149_v40  ;;  %vm622_vm6 = vmor %vm131_vm3, %vm132_vm4  ;;  %vm221_vm13 = vweird.f32 %v555_v24  ;;  %v228_v37 = vor.u32 1.1754944e-38, %v227_v33 }
  0xbf   :  { %v128_v42 = vsub.f32 1.0, %v127_v34  ;;  %v194_v58 = vsel %vm193_vm0, %v541_v13, %v190_v44  ;;  %v165_v13 = vand.u32 2147483647, %v538_v11  ;;  %vm211_vm0 = vcmp.eq.f32.partialorder %v210_v26, 8.507059e+37 }
  0xc0   :  { %v612_v57 = vsel %vm196_vm2, %v198_v59, %v194_v58 }
  0xc1   :  { %v129_v55 = vmul.f32 %v551_v22, %v128_v42  ;;  %vm166_vm12 = vcmp.eq.f32.partialorder %v165_v13, 8.507059e+37 }
  0xc3   :  { %v130_v63 = vadd.f32 %v551_v22, %v129_v55 }
  0xc5   :  { %v134_v6 = vsel %vm622_vm6, %v551_v22, %v130_v63  ;;  %v212_v22 = vand.u32 2147483648, %v548_v20 }
  0xc6   :  { %v644_v19 = vsel %vm136_vm9, %v138_v16, %v134_v6 }
  0xc7   :  { %v213_v34 = vor.u32 1.1754944e-38, %v212_v22 }
  0xf0   :  { %v256_v9 = vpop.permute.xlu2 %255 }
  0xf1   :  { %v275_v12 = vmul.f32 %v256_v9, %v536_v10  ;;  %v167_v9 = vand.u32 2147483648, %v538_v11 }
  0xf3   :  { %432 = vtanh.f32 %v275_v12  ;;  %v168_v18 = vor.u32 1.1754944e-38, %v167_v9 }
  0xf4   :  { %434 = vrcp.f32 %v538_v11 }
  0xf5   :  { %436 = vrcp.f32 %v548_v20 }
  0xf6   :  { %438 = vrcp.f32 %v555_v24 }
  0xf8   :  { %v258_v60 = vpop.permute.xlu2 %257 }
  0xf9   :  { %v433_v23 = vpop.eup %432  ;;  %v276_v1 = vmul.f32 %v258_v60, %v612_v57 }
  0xfa   :  { %303 = vrot.lane.b32.xlu0 %v433_v23, %s455_s2  ;;  %v561_v29 = vpop.eup %434 }
  0xfb   :  { %v157_v39 = vmul.f32 %v561_v29, %v538_v11  ;;  %v589_v43 = vpop.eup %436  ;;  %vm162_vm5 = vweird.f32 %v561_v29 }
  0xfc   :  { %v600_v52 = vpop.eup %438  ;;  %v202_v56 = vmul.f32 %v589_v43, %v548_v20  ;;  %vm634_vm8 = vmor %vm161_vm7, %vm162_vm5  ;;  %vm207_vm11 = vweird.f32 %v589_v43  ;;  %v225_v20 = vand.u32 2147483647, %v555_v24 }
  0xfd   :  { %v158_v51 = vsub.f32 1.0, %v157_v39  ;;  %v217_v62 = vmul.f32 %v600_v52, %v555_v24  ;;  %vm651_vm14 = vmor %vm206_vm10, %vm207_vm11  ;;  %vm222_vm15 = vweird.f32 %v600_v52 }
  0xfe   :  { %v203_v0 = vsub.f32 1.0, %v202_v56  ;;  %vm223_vm2 = vmor %vm221_vm13, %vm222_vm15  ;;  %vm226_vm3 = vcmp.eq.f32.partialorder %v225_v20, 8.507059e+37 }
  0xff   :  { %v159_v61 = vmul.f32 %v561_v29, %v158_v51  ;;  %v218_v7 = vsub.f32 1.0, %v217_v62 }
 0x100   :  { %v204_v14 = vmul.f32 %v589_v43, %v203_v0 }
 0x101   :  { %v248_v45 = vpop.permute.xlu0 %247  ;;  %v160_v5 = vadd.f32 %v561_v29, %v159_v61  ;;  %v219_v11 = vmul.f32 %v600_v52, %v218_v7 }
 0x102   :  { %v252_v48 = vpop.permute.xlu1 %251  ;;  %v271_v50 = vmul.f32 %v248_v45, %v594_v46  ;;  %v205_v25 = vadd.f32 %v589_v43, %v204_v14 }
 0x103   :  { %v273_v54 = vmul.f32 %v252_v48, %v597_v49  ;;  %v164_v17 = vsel %vm634_vm8, %v561_v29, %v160_v5  ;;  %v220_v31 = vadd.f32 %v600_v52, %v219_v11 }
 0x104   :  { %440 = vtanh.f32 %v271_v50  ;;  %v169_v27 = vsel %vm166_vm12, %v168_v18, %v164_v17  ;;  %v209_v35 = vsel %vm651_vm14, %v589_v43, %v205_v25 }
 0x105   :  { %442 = vtanh.f32 %v273_v54  ;;  %v224_v36 = vsel %vm223_vm2, %v600_v52, %v220_v31  ;;  %v214_v38 = vsel %vm211_vm0, %v213_v34, %v209_v35 }
 0x106   :  { %444 = vtanh.f32 %v276_v1  ;;  %v229_v42 = vsel %vm226_vm3, %v228_v37, %v224_v36 }
 0x109   :  { %v250_v21 = vpop.permute.xlu0 %249 }
 0x10a   :  { %v441_v4 = vpop.eup %440  ;;  %v272_v23 = vmul.f32 %v250_v21, %v644_v19  ;;  %v254_v28 = vpop.permute.xlu1 %253 }
 0x10b   :  { %v443_v8 = vpop.eup %442  ;;  %295 = vrot.lane.b32.xlu2 %v441_v4, %s455_s2  ;;  %v274_v30 = vmul.f32 %v254_v28, %v169_v27 }
 0x10c   :  { %299 = vrot.lane.b32.xlu1 %v443_v8, %s455_s2  ;;  %446 = vtanh.f32 %v272_v23  ;;  %v445_v32 = vpop.eup %444 }
 0x10d   :  { %448 = vtanh.f32 %v274_v30 }
 0x111   :  { %v260_v39 = vpop.permute.xlu0 %259 }
 0x112   :  { %v447_v40 = vpop.eup %446  ;;  %v277_v41 = vmul.f32 %v260_v39, %v214_v38  ;;  %v262_v44 = vpop.permute.xlu1 %261 }
 0x113   :  { %297 = vrot.lane.b32.xlu0 %v447_v40, %s455_s2  ;;  %v449_v24 = vpop.eup %448  ;;  %v278_v45 = vmul.f32 %v262_v44, %v229_v42 }
 0x114   :  { %305 = vrot.lane.b32.xlu1 %v445_v32, %s455_s2  ;;  %450 = vtanh.f32 %v277_v41  ;;  %301 = vrot.lane.b32.xlu2 %v449_v24, %s455_s2 }
 0x115   :  { %452 = vtanh.f32 %v278_v45 }
 0x11a   :  { %v451_v43 = vpop.eup %450 }
 0x11b   :  { %v453_v47 = vpop.eup %452 }
 0x11c   :  { %309 = vrot.lane.b32.xlu0 %v453_v47, %s455_s2  ;;  %307 = vrot.lane.b32.xlu2 %v451_v43, %s455_s2 }
 0x165   :  { %v296_v48 = vpop.permute.xlu2 %295 }
 0x166   :  { %v319_v50 = vmul.f32 %v296_v48, %v594_v46 }
 0x168   :  { %335 = vrot.lane.b32.xlu1 %v319_v50, %s456_s4 }
 0x16c   :  { %v304_v51 = vpop.permute.xlu0 %303 }
 0x16d   :  { %v323_v52 = vmul.f32 %v304_v51, %v536_v10 }
 0x16e   :  { %v302_v53 = vpop.permute.xlu2 %301 }
 0x16f   :  { %343 = vrot.lane.b32.xlu2 %v323_v52, %s456_s4  ;;  %v322_v54 = vmul.f32 %v302_v53, %v169_v27 }
 0x171   :  { %341 = vrot.lane.b32.xlu1 %v322_v54, %s456_s4 }
 0x176   :  { %v308_v55 = vpop.permute.xlu2 %307 }
 0x177   :  { %v325_v56 = vmul.f32 %v308_v55, %v214_v38 }
 0x179   :  { %347 = vrot.lane.b32.xlu1 %v325_v56, %s456_s4 }
 0x17e   :  { %v300_v58 = vpop.permute.xlu1 %299 }
 0x17f   :  { %v321_v59 = vmul.f32 %v300_v58, %v597_v49 }
 0x181   :  { %339 = vrot.lane.b32.xlu0 %v321_v59, %s456_s4 }
 0x185   :  { %v298_v46 = vpop.permute.xlu0 %297 }
 0x186   :  { %v306_v60 = vpop.permute.xlu1 %305  ;;  %v320_v62 = vmul.f32 %v298_v46, %v644_v19 }
 0x187   :  { %v324_v61 = vmul.f32 %v306_v60, %v612_v57 }
 0x188   :  { %337 = vrot.lane.b32.xlu2 %v320_v62, %s456_s4 }
 0x189   :  { %345 = vrot.lane.b32.xlu0 %v324_v61, %s456_s4 }
 0x18e   :  { %v310_v10 = vpop.permute.xlu0 %309 }
 0x18f   :  { %v326_v63 = vmul.f32 %v310_v10, %v229_v42 }
 0x191   :  { %349 = vrot.lane.b32.xlu2 %v326_v63, %s456_s4 }
 0x1c9   :  { %v344_v0 = vpop.permute.xlu2 %343 }
 0x1ca   :  { %363 = vst.msk [vmem:[%s708_s3 + $0x20] sm:$0xff] %vm33_vm1, %v344_v0 }
 0x1da   :  { %v336_v49 = vpop.permute.xlu1 %335 }
 0x1db   :  { %359 = vst.msk [vmem:[%s708_s3] sm:$0xff] %vm33_vm1, %v336_v49 }
 0x1e2   :  { %v338_v57 = vpop.permute.xlu2 %337 }
 0x1e3   :  { %360 = vst.msk [vmem:[%s708_s3 + $0x8] sm:$0xff] %vm33_vm1, %v338_v57  ;;  %v342_v1 = vpop.permute.xlu1 %341 }
 0x1e4   :  { %362 = vst.msk [vmem:[%s708_s3 + $0x18] sm:$0xff] %vm33_vm1, %v342_v1 }
 0x1eb   :  { %v348_v2 = vpop.permute.xlu1 %347  ;;  %v350_v3 = vpop.permute.xlu2 %349 }
 0x1ec   :  { %365 = vst.msk [vmem:[%s708_s3 + $0x30] sm:$0xff] %vm33_vm1, %v348_v2 }
 0x1ed   :  { %366 = vst.msk [vmem:[%s708_s3 + $0x38] sm:$0xff] %vm33_vm1, %v350_v3 }
 0x1f3   :  { %v340_v4 = vpop.permute.xlu0 %339 }
 0x1f4   :  { %361 = vst.msk [vmem:[%s708_s3 + $0x10] sm:$0xff] %vm33_vm1, %v340_v4 }
 0x1fb   :  { %v346_v5 = vpop.permute.xlu0 %345 }
 0x1fc   :  { %364 = vst.msk [vmem:[%s708_s3 + $0x28] sm:$0xff] %vm33_vm1, %v346_v5 }

// kernel: nncrf_forward.14
= control target key start
LH: loop header
LB: loop body
LE: loop exit
PB: predicated region body
PF: predicated region fallthrough
CT: control target
= control target key end

     0   :  { %vm142_vm0 = vcmask 1043456   ;;  %vm81_vm1 = vcmask 64512   ;;  %vm295_vm2 = vcmask 257024   ;;  %s732_s1 = inlined_call_operand.vmem [shape: f32[8,32], index: 1, kind: input, shape index: {}]   ;;  %s733_s0 = inlined_call_operand.vmem [shape: f32[320,8], index: 0, kind: input, shape index: {}]   ;;  %s734_s2 = inlined_call_operand.vmem [shape: f32[1,32], index: 2, kind: input, shape index: {}]   ;;  %s735_s3 = inlined_call_operand.vmem [shape: bf16[320,32], index: 3, kind: output, shape index: {}]  }
   0x1   :  { %v75_v0 = vld [vmem:[%s732_s1] sm:$0xff]  ;;  %v16_v2 = vld [vmem:[%s733_s0 + $0x8] sm:$0xff]  ;;  %v25_v4 = vld [vmem:[%s733_s0 + $0x50] sm:$0xff] }
   0x2   :  { %v15_v1 = vld [vmem:[%s733_s0] sm:$0xff]  ;;  %v76_v3 = vpack.c.bf16 %v75_v0, %v75_v0  ;;  %v26_v5 = vld [vmem:[%s733_s0 + $0x58] sm:$0xff]  ;;  %v36_v7 = vld [vmem:[%s733_s0 + $0xa8] sm:$0xff] }
   0x3   :  { %v35_v6 = vld [vmem:[%s733_s0 + $0xa0] sm:$0xff]  ;;  %v45_v8 = vld [vmem:[%s733_s0 + $0xf0] sm:$0xff]  ;;  %v46_v9 = vld [vmem:[%s733_s0 + $0xf8] sm:$0xff]  ;;  %v55_v11 = vpack.c.bf16 %v16_v2, %v15_v1  ;;  %v60_v12 = vpack.c.bf16 %v26_v5, %v25_v4 }
   0x4   :  { %v144_v10 = vsel %vm142_vm0, %v76_v3, 0  ;;  %v65_v13 = vpack.c.bf16 %v36_v7, %v35_v6  ;;  %v70_v14 = vpack.c.bf16 %v46_v9, %v45_v8  ;;  %v17_v15 = vld [vmem:[%s733_s0 + $0x10] sm:$0xff]  ;;  %v18_v16 = vld [vmem:[%s733_s0 + $0x18] sm:$0xff]  ;;  %v27_v17 = vld [vmem:[%s733_s0 + $0x60] sm:$0xff] }
   0x5   :  { %153 = vmatpush.bf16.msra.mxu0 %v144_v10  ;;  %360 = vmatpush.bf16.msra.mxu1 %v144_v10  ;;  %v28_v18 = vld [vmem:[%s733_s0 + $0x68] sm:$0xff]  ;;  %v37_v19 = vld [vmem:[%s733_s0 + $0xb0] sm:$0xff]  ;;  %v38_v20 = vld [vmem:[%s733_s0 + $0xb8] sm:$0xff]  ;;  %v56_v23 = vpack.c.bf16 %v18_v16, %v17_v15 }
   0x6   :  { %361 = vmatpush.bf16.msra.mxu2 %v144_v10  ;;  %362 = vmatpush.bf16.msra.mxu3 %v144_v10  ;;  %v47_v21 = vld [vmem:[%s733_s0 + $0x100] sm:$0xff]  ;;  %v48_v22 = vld [vmem:[%s733_s0 + $0x108] sm:$0xff]  ;;  %v61_v24 = vpack.c.bf16 %v28_v18, %v27_v17  ;;  %v66_v25 = vpack.c.bf16 %v38_v20, %v37_v19  ;;  %v29_v29 = vld [vmem:[%s733_s0 + $0x70] sm:$0xff] }
   0x7   :  { %v71_v26 = vpack.c.bf16 %v48_v22, %v47_v21  ;;  %v19_v27 = vld [vmem:[%s733_s0 + $0x20] sm:$0xff]  ;;  %v20_v28 = vld [vmem:[%s733_s0 + $0x28] sm:$0xff]  ;;  %v30_v30 = vld [vmem:[%s733_s0 + $0x78] sm:$0xff] }
   0x8   :  { %340 = vmatmul.msk.bf16.vlgmr.msra.gmra.mxu0 %vm81_vm1, %v55_v11  ;;  %345 = vmatmul.msk.bf16.vlgmr.msra.gmra.mxu1 %vm81_vm1, %v60_v12  ;;  %v39_v31 = vld [vmem:[%s733_s0 + $0xc0] sm:$0xff]  ;;  %v40_v32 = vld [vmem:[%s733_s0 + $0xc8] sm:$0xff]  ;;  %v49_v33 = vld [vmem:[%s733_s0 + $0x110] sm:$0xff]  ;;  %v57_v35 = vpack.c.bf16 %v20_v28, %v19_v27  ;;  %v62_v36 = vpack.c.bf16 %v30_v30, %v29_v29 }
   0x9   :  { %350 = vmatmul.msk.bf16.vlgmr.msra.gmra.mxu2 %vm81_vm1, %v65_v13  ;;  %355 = vmatmul.msk.bf16.vlgmr.msra.gmra.mxu3 %vm81_vm1, %v70_v14  ;;  %v50_v34 = vld [vmem:[%s733_s0 + $0x118] sm:$0xff]  ;;  %v67_v37 = vpack.c.bf16 %v40_v32, %v39_v31  ;;  %v21_v39 = vld [vmem:[%s733_s0 + $0x30] sm:$0xff]  ;;  %v31_v41 = vld [vmem:[%s733_s0 + $0x80] sm:$0xff] }
   0xa   :  { %v72_v38 = vpack.c.bf16 %v50_v34, %v49_v33  ;;  %v22_v40 = vld [vmem:[%s733_s0 + $0x38] sm:$0xff]  ;;  %v32_v42 = vld [vmem:[%s733_s0 + $0x88] sm:$0xff]  ;;  %v41_v43 = vld [vmem:[%s733_s0 + $0xd0] sm:$0xff] }
   0xb   :  { %v42_v44 = vld [vmem:[%s733_s0 + $0xd8] sm:$0xff]  ;;  %v51_v45 = vld [vmem:[%s733_s0 + $0x120] sm:$0xff]  ;;  %v52_v46 = vld [vmem:[%s733_s0 + $0x128] sm:$0xff]  ;;  %v58_v47 = vpack.c.bf16 %v22_v40, %v21_v39  ;;  %v63_v48 = vpack.c.bf16 %v32_v42, %v31_v41 }
   0xc   :  { %v68_v49 = vpack.c.bf16 %v42_v44, %v41_v43  ;;  %v73_v50 = vpack.c.bf16 %v52_v46, %v51_v45  ;;  %v23_v51 = vld [vmem:[%s733_s0 + $0x40] sm:$0xff]  ;;  %v24_v52 = vld [vmem:[%s733_s0 + $0x48] sm:$0xff]  ;;  %v33_v53 = vld [vmem:[%s733_s0 + $0x90] sm:$0xff] }
   0xd   :  { %v34_v54 = vld [vmem:[%s733_s0 + $0x98] sm:$0xff]  ;;  %v43_v55 = vld [vmem:[%s733_s0 + $0xe0] sm:$0xff]  ;;  %v44_v56 = vld [vmem:[%s733_s0 + $0xe8] sm:$0xff]  ;;  %v59_v59 = vpack.c.bf16 %v24_v52, %v23_v51 }
   0xe   :  { %v53_v57 = vld [vmem:[%s733_s0 + $0x130] sm:$0xff]  ;;  %v54_v58 = vld [vmem:[%s733_s0 + $0x138] sm:$0xff]  ;;  %v64_v60 = vpack.c.bf16 %v34_v54, %v33_v53  ;;  %v69_v61 = vpack.c.bf16 %v44_v56, %v43_v55  ;;  %v530_v63 = vld [vmem:[%s734_s2] ss:$0 sm:$0xff] }
   0xf   :  { %v74_v62 = vpack.c.bf16 %v54_v58, %v53_v57 }
  0x18   :  { %341 = vmatmul.msk.bf16.gmra.mxu0 %vm81_vm1, %v56_v23  ;;  %346 = vmatmul.msk.bf16.gmra.mxu1 %vm81_vm1, %v61_v24 }
  0x19   :  { %351 = vmatmul.msk.bf16.gmra.mxu2 %vm81_vm1, %v66_v25  ;;  %356 = vmatmul.msk.bf16.gmra.mxu3 %vm81_vm1, %v71_v26 }
  0x28   :  { %342 = vmatmul.msk.bf16.gmra.mxu0 %vm81_vm1, %v57_v35  ;;  %347 = vmatmul.msk.bf16.gmra.mxu1 %vm81_vm1, %v62_v36 }
  0x29   :  { %352 = vmatmul.msk.bf16.gmra.mxu2 %vm81_vm1, %v67_v37  ;;  %357 = vmatmul.msk.bf16.gmra.mxu3 %vm81_vm1, %v72_v38 }
  0x38   :  { %343 = vmatmul.msk.bf16.gmra.mxu0 %vm81_vm1, %v58_v47  ;;  %348 = vmatmul.msk.bf16.gmra.mxu1 %vm81_vm1, %v63_v48 }
  0x39   :  { %353 = vmatmul.msk.bf16.gmra.mxu2 %vm81_vm1, %v68_v49  ;;  %358 = vmatmul.msk.bf16.gmra.mxu3 %vm81_vm1, %v73_v50 }
  0x48   :  { %344 = vmatmul.msk.bf16.gmra.mxu0 %vm81_vm1, %v59_v59  ;;  %349 = vmatmul.msk.bf16.gmra.mxu1 %vm81_vm1, %v64_v60 }
  0x49   :  { %354 = vmatmul.msk.bf16.gmra.mxu2 %vm81_vm1, %v69_v61  ;;  %359 = vmatmul.msk.bf16.gmra.mxu3 %vm81_vm1, %v74_v62 }
  0x85   :  { %v155_v0 = vpop.f32.mrf.mxu0  ;;  %v180_v1 = vpop.f32.mrf.mxu1 }
  0x86   :  { %v156_v2 = vadd.f32 %v530_v63, %v155_v0  ;;  %v181_v3 = vadd.f32 %v530_v63, %v180_v1 }
  0x88   :  { %v255_v4 = vpack.c.bf16 %v156_v2, %v156_v2  ;;  %v265_v5 = vpack.c.bf16 %v181_v3, %v181_v3 }
  0x8a   :  { %296 = vst.msk [vmem:[%s735_s3] sm:$0xf] %vm295_vm2, %v255_v4 }
  0x8b   :  { %306 = vst.msk [vmem:[%s735_s3 + $0x28] sm:$0xf] %vm295_vm2, %v265_v5 }
  0x8c   :  { %v205_v6 = vpop.f32.mrf.mxu2  ;;  %v230_v7 = vpop.f32.mrf.mxu3 }
  0x8d   :  { %v206_v8 = vadd.f32 %v530_v63, %v205_v6  ;;  %v231_v9 = vadd.f32 %v530_v63, %v230_v7  ;;  %v157_v10 = vpop.f32.mrf.mxu0  ;;  %v182_v11 = vpop.f32.mrf.mxu1 }
  0x8e   :  { %v158_v12 = vadd.f32 %v530_v63, %v157_v10  ;;  %v183_v13 = vadd.f32 %v530_v63, %v182_v11 }
  0x8f   :  { %v275_v14 = vpack.c.bf16 %v206_v8, %v206_v8  ;;  %v285_v15 = vpack.c.bf16 %v231_v9, %v231_v9 }
  0x90   :  { %v256_v16 = vpack.c.bf16 %v158_v12, %v158_v12  ;;  %v266_v17 = vpack.c.bf16 %v183_v13, %v183_v13 }
  0x91   :  { %316 = vst.msk [vmem:[%s735_s3 + $0x50] sm:$0xf] %vm295_vm2, %v275_v14 }
  0x92   :  { %326 = vst.msk [vmem:[%s735_s3 + $0x78] sm:$0xf] %vm295_vm2, %v285_v15 }
  0x93   :  { %297 = vst.msk [vmem:[%s735_s3 + $0x4] sm:$0xf] %vm295_vm2, %v256_v16 }
  0x94   :  { %307 = vst.msk [vmem:[%s735_s3 + $0x2c] sm:$0xf] %vm295_vm2, %v266_v17  ;;  %v207_v18 = vpop.f32.mrf.mxu2  ;;  %v232_v19 = vpop.f32.mrf.mxu3 }
  0x95   :  { %v208_v20 = vadd.f32 %v530_v63, %v207_v18  ;;  %v233_v21 = vadd.f32 %v530_v63, %v232_v19  ;;  %v160_v22 = vpop.f32.mrf.mxu0  ;;  %v185_v23 = vpop.f32.mrf.mxu1 }
  0x96   :  { %v161_v24 = vadd.f32 %v530_v63, %v160_v22  ;;  %v186_v25 = vadd.f32 %v530_v63, %v185_v23 }
  0x97   :  { %v276_v26 = vpack.c.bf16 %v208_v20, %v208_v20  ;;  %v286_v27 = vpack.c.bf16 %v233_v21, %v233_v21 }
  0x98   :  { %v257_v28 = vpack.c.bf16 %v161_v24, %v161_v24  ;;  %v267_v29 = vpack.c.bf16 %v186_v25, %v186_v25 }
  0x99   :  { %317 = vst.msk [vmem:[%s735_s3 + $0x54] sm:$0xf] %vm295_vm2, %v276_v26 }
  0x9a   :  { %327 = vst.msk [vmem:[%s735_s3 + $0x7c] sm:$0xf] %vm295_vm2, %v286_v27 }
  0x9b   :  { %298 = vst.msk [vmem:[%s735_s3 + $0x8] sm:$0xf] %vm295_vm2, %v257_v28 }
  0x9c   :  { %308 = vst.msk [vmem:[%s735_s3 + $0x30] sm:$0xf] %vm295_vm2, %v267_v29  ;;  %v210_v30 = vpop.f32.mrf.mxu2  ;;  %v235_v31 = vpop.f32.mrf.mxu3 }
  0x9d   :  { %v211_v32 = vadd.f32 %v530_v63, %v210_v30  ;;  %v236_v33 = vadd.f32 %v530_v63, %v235_v31  ;;  %v162_v34 = vpop.f32.mrf.mxu0  ;;  %v187_v35 = vpop.f32.mrf.mxu1 }
  0x9e   :  { %v163_v36 = vadd.f32 %v530_v63, %v162_v34  ;;  %v188_v37 = vadd.f32 %v530_v63, %v187_v35 }
  0x9f   :  { %v277_v38 = vpack.c.bf16 %v211_v32, %v211_v32  ;;  %v287_v39 = vpack.c.bf16 %v236_v33, %v236_v33 }
  0xa0   :  { %v258_v40 = vpack.c.bf16 %v163_v36, %v163_v36  ;;  %v268_v41 = vpack.c.bf16 %v188_v37, %v188_v37 }
  0xa1   :  { %318 = vst.msk [vmem:[%s735_s3 + $0x58] sm:$0xf] %vm295_vm2, %v277_v38 }
  0xa2   :  { %328 = vst.msk [vmem:[%s735_s3 + $0x80] sm:$0xf] %vm295_vm2, %v287_v39 }
  0xa3   :  { %299 = vst.msk [vmem:[%s735_s3 + $0xc] sm:$0xf] %vm295_vm2, %v258_v40 }
  0xa4   :  { %309 = vst.msk [vmem:[%s735_s3 + $0x34] sm:$0xf] %vm295_vm2, %v268_v41  ;;  %v212_v42 = vpop.f32.mrf.mxu2  ;;  %v237_v43 = vpop.f32.mrf.mxu3 }
  0xa5   :  { %v213_v44 = vadd.f32 %v530_v63, %v212_v42  ;;  %v238_v45 = vadd.f32 %v530_v63, %v237_v43  ;;  %v165_v46 = vpop.f32.mrf.mxu0  ;;  %v190_v47 = vpop.f32.mrf.mxu1 }
  0xa6   :  { %v166_v48 = vadd.f32 %v530_v63, %v165_v46  ;;  %v191_v49 = vadd.f32 %v530_v63, %v190_v47 }
  0xa7   :  { %v278_v50 = vpack.c.bf16 %v213_v44, %v213_v44  ;;  %v288_v51 = vpack.c.bf16 %v238_v45, %v238_v45 }
  0xa8   :  { %v259_v52 = vpack.c.bf16 %v166_v48, %v166_v48  ;;  %v269_v53 = vpack.c.bf16 %v191_v49, %v191_v49 }
  0xa9   :  { %319 = vst.msk [vmem:[%s735_s3 + $0x5c] sm:$0xf] %vm295_vm2, %v278_v50 }
  0xaa   :  { %329 = vst.msk [vmem:[%s735_s3 + $0x84] sm:$0xf] %vm295_vm2, %v288_v51 }
  0xab   :  { %300 = vst.msk [vmem:[%s735_s3 + $0x10] sm:$0xf] %vm295_vm2, %v259_v52 }
  0xac   :  { %310 = vst.msk [vmem:[%s735_s3 + $0x38] sm:$0xf] %vm295_vm2, %v269_v53  ;;  %v215_v54 = vpop.f32.mrf.mxu2  ;;  %v240_v55 = vpop.f32.mrf.mxu3 }
  0xad   :  { %v216_v56 = vadd.f32 %v530_v63, %v215_v54  ;;  %v241_v57 = vadd.f32 %v530_v63, %v240_v55  ;;  %v167_v58 = vpop.f32.mrf.mxu0  ;;  %v192_v59 = vpop.f32.mrf.mxu1 }
  0xae   :  { %v168_v60 = vadd.f32 %v530_v63, %v167_v58  ;;  %v193_v61 = vadd.f32 %v530_v63, %v192_v59 }
  0xaf   :  { %v279_v62 = vpack.c.bf16 %v216_v56, %v216_v56  ;;  %v289_v0 = vpack.c.bf16 %v241_v57, %v241_v57 }
  0xb0   :  { %v260_v1 = vpack.c.bf16 %v168_v60, %v168_v60  ;;  %v270_v2 = vpack.c.bf16 %v193_v61, %v193_v61 }
  0xb1   :  { %320 = vst.msk [vmem:[%s735_s3 + $0x60] sm:$0xf] %vm295_vm2, %v279_v62 }
  0xb2   :  { %330 = vst.msk [vmem:[%s735_s3 + $0x88] sm:$0xf] %vm295_vm2, %v289_v0 }
  0xb3   :  { %301 = vst.msk [vmem:[%s735_s3 + $0x14] sm:$0xf] %vm295_vm2, %v260_v1 }
  0xb4   :  { %311 = vst.msk [vmem:[%s735_s3 + $0x3c] sm:$0xf] %vm295_vm2, %v270_v2  ;;  %v217_v3 = vpop.f32.mrf.mxu2  ;;  %v242_v4 = vpop.f32.mrf.mxu3 }
  0xb5   :  { %v218_v5 = vadd.f32 %v530_v63, %v217_v3  ;;  %v243_v6 = vadd.f32 %v530_v63, %v242_v4  ;;  %v170_v7 = vpop.f32.mrf.mxu0  ;;  %v195_v8 = vpop.f32.mrf.mxu1 }
  0xb6   :  { %v171_v9 = vadd.f32 %v530_v63, %v170_v7  ;;  %v196_v10 = vadd.f32 %v530_v63, %v195_v8 }
  0xb7   :  { %v280_v11 = vpack.c.bf16 %v218_v5, %v218_v5  ;;  %v290_v12 = vpack.c.bf16 %v243_v6, %v243_v6 }
  0xb8   :  { %v261_v13 = vpack.c.bf16 %v171_v9, %v171_v9  ;;  %v271_v14 = vpack.c.bf16 %v196_v10, %v196_v10 }
  0xb9   :  { %321 = vst.msk [vmem:[%s735_s3 + $0x64] sm:$0xf] %vm295_vm2, %v280_v11 }
  0xba   :  { %331 = vst.msk [vmem:[%s735_s3 + $0x8c] sm:$0xf] %vm295_vm2, %v290_v12 }
  0xbb   :  { %302 = vst.msk [vmem:[%s735_s3 + $0x18] sm:$0xf] %vm295_vm2, %v261_v13 }
  0xbc   :  { %312 = vst.msk [vmem:[%s735_s3 + $0x40] sm:$0xf] %vm295_vm2, %v271_v14  ;;  %v220_v15 = vpop.f32.mrf.mxu2  ;;  %v245_v16 = vpop.f32.mrf.mxu3 }
  0xbd   :  { %v221_v17 = vadd.f32 %v530_v63, %v220_v15  ;;  %v246_v18 = vadd.f32 %v530_v63, %v245_v16  ;;  %v172_v19 = vpop.f32.mrf.mxu0  ;;  %v197_v20 = vpop.f32.mrf.mxu1 }
  0xbe   :  { %v173_v21 = vadd.f32 %v530_v63, %v172_v19  ;;  %v198_v22 = vadd.f32 %v530_v63, %v197_v20 }
  0xbf   :  { %v281_v23 = vpack.c.bf16 %v221_v17, %v221_v17  ;;  %v291_v24 = vpack.c.bf16 %v246_v18, %v246_v18 }
  0xc0   :  { %v262_v25 = vpack.c.bf16 %v173_v21, %v173_v21  ;;  %v272_v26 = vpack.c.bf16 %v198_v22, %v198_v22 }
  0xc1   :  { %322 = vst.msk [vmem:[%s735_s3 + $0x68] sm:$0xf] %vm295_vm2, %v281_v23 }
  0xc2   :  { %332 = vst.msk [vmem:[%s735_s3 + $0x90] sm:$0xf] %vm295_vm2, %v291_v24 }
  0xc3   :  { %303 = vst.msk [vmem:[%s735_s3 + $0x1c] sm:$0xf] %vm295_vm2, %v262_v25 }
  0xc4   :  { %313 = vst.msk [vmem:[%s735_s3 + $0x44] sm:$0xf] %vm295_vm2, %v272_v26  ;;  %v222_v27 = vpop.f32.mrf.mxu2  ;;  %v247_v28 = vpop.f32.mrf.mxu3 }
  0xc5   :  { %v223_v29 = vadd.f32 %v530_v63, %v222_v27  ;;  %v248_v30 = vadd.f32 %v530_v63, %v247_v28  ;;  %v175_v31 = vpop.f32.mrf.mxu0  ;;  %v200_v32 = vpop.f32.mrf.mxu1 }
  0xc6   :  { %v176_v33 = vadd.f32 %v530_v63, %v175_v31  ;;  %v201_v34 = vadd.f32 %v530_v63, %v200_v32 }
  0xc7   :  { %v282_v35 = vpack.c.bf16 %v223_v29, %v223_v29  ;;  %v292_v36 = vpack.c.bf16 %v248_v30, %v248_v30 }
  0xc8   :  { %v263_v37 = vpack.c.bf16 %v176_v33, %v176_v33  ;;  %v273_v38 = vpack.c.bf16 %v201_v34, %v201_v34 }
  0xc9   :  { %323 = vst.msk [vmem:[%s735_s3 + $0x6c] sm:$0xf] %vm295_vm2, %v282_v35 }
  0xca   :  { %333 = vst.msk [vmem:[%s735_s3 + $0x94] sm:$0xf] %vm295_vm2, %v292_v36 }
  0xcb   :  { %304 = vst.msk [vmem:[%s735_s3 + $0x20] sm:$0xf] %vm295_vm2, %v263_v37 }
  0xcc   :  { %314 = vst.msk [vmem:[%s735_s3 + $0x48] sm:$0xf] %vm295_vm2, %v273_v38  ;;  %v225_v39 = vpop.f32.mrf.mxu2  ;;  %v250_v40 = vpop.f32.mrf.mxu3 }
  0xcd   :  { %v226_v41 = vadd.f32 %v530_v63, %v225_v39  ;;  %v251_v42 = vadd.f32 %v530_v63, %v250_v40  ;;  %v177_v43 = vpop.f32.mrf.mxu0  ;;  %v202_v44 = vpop.f32.mrf.mxu1 }
  0xce   :  { %v178_v45 = vadd.f32 %v530_v63, %v177_v43  ;;  %v203_v46 = vadd.f32 %v530_v63, %v202_v44 }
  0xcf   :  { %v283_v47 = vpack.c.bf16 %v226_v41, %v226_v41  ;;  %v293_v48 = vpack.c.bf16 %v251_v42, %v251_v42 }
  0xd0   :  { %v264_v49 = vpack.c.bf16 %v178_v45, %v178_v45  ;;  %v274_v50 = vpack.c.bf16 %v203_v46, %v203_v46 }
  0xd1   :  { %324 = vst.msk [vmem:[%s735_s3 + $0x70] sm:$0xf] %vm295_vm2, %v283_v47 }
  0xd2   :  { %334 = vst.msk [vmem:[%s735_s3 + $0x98] sm:$0xf] %vm295_vm2, %v293_v48 }
  0xd3   :  { %305 = vst.msk [vmem:[%s735_s3 + $0x24] sm:$0xf] %vm295_vm2, %v264_v49 }
  0xd4   :  { %315 = vst.msk [vmem:[%s735_s3 + $0x4c] sm:$0xf] %vm295_vm2, %v274_v50  ;;  %v227_v51 = vpop.f32.mrf.mxu2  ;;  %v252_v52 = vpop.f32.mrf.mxu3 }
  0xd5   :  { %v228_v53 = vadd.f32 %v530_v63, %v227_v51  ;;  %v253_v54 = vadd.f32 %v530_v63, %v252_v52 }
  0xd7   :  { %v284_v55 = vpack.c.bf16 %v228_v53, %v228_v53  ;;  %v294_v56 = vpack.c.bf16 %v253_v54, %v253_v54 }
  0xd9   :  { %325 = vst.msk [vmem:[%s735_s3 + $0x74] sm:$0xf] %vm295_vm2, %v284_v55 }
  0xda   :  { %335 = vst.msk [vmem:[%s735_s3 + $0x9c] sm:$0xf] %vm295_vm2, %v294_v56 }

// kernel: nncrf_forward.18
= control target key start
LH: loop header
LB: loop body
LE: loop exit
PB: predicated region body
PF: predicated region fallthrough
CT: control target
= control target key end

     0   :  { %vm43_vm0 = vcmask 523264   ;;  %vm93_vm1 = vcmask 130048   ;;  %s226_s1 = inlined_call_operand.vmem [shape: f32[64,16], index: 1, kind: input, shape index: {}]   ;;  %s227_s2 = inlined_call_operand.vmem [shape: f32[1,16], index: 2, kind: input, shape index: {}]   ;;  %s228_s0 = inlined_call_operand.vmem [shape: f32[64,64], index: 0, kind: input, shape index: {}]   ;;  %s229_s3 = inlined_call_operand.vmem [shape: f32[64,16], index: 3, kind: output, shape index: {}]  }
   0x1   :  { %v33_v0 = vld [vmem:[%s226_s1 + $0x30] sm:$0xff]  ;;  %v34_v1 = vld [vmem:[%s226_s1 + $0x38] sm:$0xff]  ;;  %v31_v2 = vld [vmem:[%s226_s1 + $0x20] sm:$0xff] }
   0x2   :  { %v38_v3 = vpack.c.bf16 %v34_v1, %v33_v0  ;;  %v32_v4 = vld [vmem:[%s226_s1 + $0x28] sm:$0xff]  ;;  %v29_v6 = vld [vmem:[%s226_s1 + $0x10] sm:$0xff]  ;;  %v30_v7 = vld [vmem:[%s226_s1 + $0x18] sm:$0xff] }
   0x3   :  { %v37_v5 = vpack.c.bf16 %v32_v4, %v31_v2  ;;  %v36_v8 = vpack.c.bf16 %v30_v7, %v29_v6  ;;  %v27_v9 = vld [vmem:[%s226_s1] sm:$0xff]  ;;  %v28_v10 = vld [vmem:[%s226_s1 + $0x8] sm:$0xff]  ;;  %v17_v14 = vld [vmem:[%s228_s0 + $0x10] sm:$0xff] }
   0x4   :  { %60 = vmatpush.bf16.msra.mxu0 %v38_v3  ;;  %110 = vmatpush.bf16.msra.mxu1 %v38_v3  ;;  %v15_v11 = vld [vmem:[%s228_s0] sm:$0xff]  ;;  %v16_v12 = vld [vmem:[%s228_s0 + $0x8] sm:$0xff]  ;;  %v35_v13 = vpack.c.bf16 %v28_v10, %v27_v9  ;;  %v18_v15 = vld [vmem:[%s228_s0 + $0x18] sm:$0xff] }
   0x5   :  { %111 = vmatpush.bf16.msra.mxu2 %v38_v3  ;;  %112 = vmatpush.bf16.msra.mxu3 %v38_v3  ;;  %v19_v16 = vld [vmem:[%s228_s0 + $0x20] sm:$0xff]  ;;  %v20_v17 = vld [vmem:[%s228_s0 + $0x28] sm:$0xff]  ;;  %v21_v18 = vld [vmem:[%s228_s0 + $0x30] sm:$0xff]  ;;  %v23_v20 = vpack.c.bf16 %v16_v12, %v15_v11  ;;  %v24_v21 = vpack.c.bf16 %v18_v15, %v17_v14 }
   0x6   :  { %v22_v19 = vld [vmem:[%s228_s0 + $0x38] sm:$0xff]  ;;  %v25_v22 = vpack.c.bf16 %v20_v17, %v19_v16  ;;  %v122_v24 = vld [vmem:[%s227_s2] ss:$0 sm:$0xff] }
   0x7   :  { %v26_v23 = vpack.c.bf16 %v22_v19, %v21_v18 }
   0x8   :  { %61 = vmatpush.bf16.msra.mxu0 %v37_v5  ;;  %113 = vmatpush.bf16.msra.mxu1 %v37_v5 }
   0x9   :  { %114 = vmatpush.bf16.msra.mxu2 %v37_v5  ;;  %115 = vmatpush.bf16.msra.mxu3 %v37_v5 }
   0xc   :  { %62 = vmatpush.bf16.msra.mxu0 %v36_v8  ;;  %116 = vmatpush.bf16.msra.mxu1 %v36_v8 }
   0xd   :  { %117 = vmatpush.bf16.msra.mxu2 %v36_v8  ;;  %118 = vmatpush.bf16.msra.mxu3 %v36_v8 }
  0x10   :  { %63 = vmatpush.bf16.msra.mxu0 %v35_v13  ;;  %119 = vmatpush.bf16.msra.mxu1 %v35_v13 }
  0x11   :  { %120 = vmatpush.bf16.msra.mxu2 %v35_v13  ;;  %121 = vmatpush.bf16.msra.mxu3 %v35_v13 }
  0x13   :  { %106 = vmatmul.msk.bf16.vlgmr.msra.gmra.mxu0 %vm43_vm0, %v23_v20  ;;  %107 = vmatmul.msk.bf16.vlgmr.msra.gmra.mxu1 %vm43_vm0, %v24_v21 }
  0x14   :  { %108 = vmatmul.msk.bf16.vlgmr.msra.gmra.mxu2 %vm43_vm0, %v25_v22  ;;  %109 = vmatmul.msk.bf16.vlgmr.msra.gmra.mxu3 %vm43_vm0, %v26_v23 }
  0x90   :  { %v65_v25 = vpop.f32.mrf.mxu0  ;;  %v70_v26 = vpop.f32.mrf.mxu1 }
  0x91   :  { %v66_v27 = vadd.f32 %v122_v24, %v65_v25  ;;  %v71_v28 = vadd.f32 %v122_v24, %v70_v26 }
  0x93   :  { %v85_v29 = vmax.f32 %v66_v27, 0.0  ;;  %v87_v30 = vmax.f32 %v71_v28, 0.0 }
  0x95   :  { %94 = vst.msk [vmem:[%s229_s3] sm:$0xff] %vm93_vm1, %v85_v29 }
  0x96   :  { %96 = vst.msk [vmem:[%s229_s3 + $0x10] sm:$0xff] %vm93_vm1, %v87_v30 }
  0x97   :  { %v75_v31 = vpop.f32.mrf.mxu2  ;;  %v80_v32 = vpop.f32.mrf.mxu3 }
  0x98   :  { %v76_v33 = vadd.f32 %v122_v24, %v75_v31  ;;  %v81_v34 = vadd.f32 %v122_v24, %v80_v32  ;;  %v67_v35 = vpop.f32.mrf.mxu0  ;;  %v72_v36 = vpop.f32.mrf.mxu1 }
  0x99   :  { %v68_v37 = vadd.f32 %v122_v24, %v67_v35  ;;  %v73_v38 = vadd.f32 %v122_v24, %v72_v36 }
  0x9a   :  { %v89_v39 = vmax.f32 %v76_v33, 0.0  ;;  %v91_v40 = vmax.f32 %v81_v34, 0.0 }
  0x9b   :  { %v86_v41 = vmax.f32 %v68_v37, 0.0  ;;  %v88_v42 = vmax.f32 %v73_v38, 0.0 }
  0x9c   :  { %98 = vst.msk [vmem:[%s229_s3 + $0x20] sm:$0xff] %vm93_vm1, %v89_v39 }
  0x9d   :  { %100 = vst.msk [vmem:[%s229_s3 + $0x30] sm:$0xff] %vm93_vm1, %v91_v40 }
  0x9e   :  { %95 = vst.msk [vmem:[%s229_s3 + $0x8] sm:$0xff] %vm93_vm1, %v86_v41 }
  0x9f   :  { %97 = vst.msk [vmem:[%s229_s3 + $0x18] sm:$0xff] %vm93_vm1, %v88_v42  ;;  %v77_v43 = vpop.f32.mrf.mxu2  ;;  %v82_v44 = vpop.f32.mrf.mxu3 }
  0xa0   :  { %v78_v45 = vadd.f32 %v122_v24, %v77_v43  ;;  %v83_v46 = vadd.f32 %v122_v24, %v82_v44 }
  0xa2   :  { %v90_v47 = vmax.f32 %v78_v45, 0.0  ;;  %v92_v48 = vmax.f32 %v83_v46, 0.0 }
  0xa4   :  { %99 = vst.msk [vmem:[%s229_s3 + $0x28] sm:$0xff] %vm93_vm1, %v90_v47 }
  0xa5   :  { %101 = vst.msk [vmem:[%s229_s3 + $0x38] sm:$0xff] %vm93_vm1, %v92_v48 }

// kernel: nncrf_forward.15
= control target key start
LH: loop header
LB: loop body
LE: loop exit
PB: predicated region body
PF: predicated region fallthrough
CT: control target
= control target key end

     0   :  { %vm16_vm0 = vcmask 64512   ;;  %vm84_vm1 = vcmask 1043456   ;;  %v2773_v1 = vmov 0.0   ;;  %s2774_s16 = smov 112   ;;  %s2775_s19 = smov 8   ;;  %s4035_s1 = inlined_call_operand.vmem [shape: f32[8,32], index: 1, kind: input, shape index: {}]   ;;  %s4036_s0 = inlined_call_operand.vmem [shape: bf16[5,64,32], index: 0, kind: input, shape index: {}]   ;;  %s4037_s2 = inlined_call_operand.vmem [shape: f32[5,64,8], index: 2, kind: output, shape index: {}]  }
   0x1   :  { %v33_v0 = vld [vmem:[%s4035_s1] sm:$0xff]  ;;  %17 = vst.msk [vmem:[#allocation2] sm:$0xff] %vm16_vm0, %v2773_v1  ;;  %v2425_v17 = vld [vmem:[%s4036_s0 + $0x8] sm:$0xff]   ;;  %v2426_v26 = vld [vmem:[%s4036_s0 + $0x10] sm:$0xff]   ;;  %s2776_s20 = smov 16   ;;  %s2777_s21 = smov 104  }
   0x2   :  { %v34_v2 = vpack.c.bf16 %v33_v0, %v33_v0  ;;  %18 = vst.msk [vmem:[#allocation2 + $0x8] sm:$0xff] %vm16_vm0, %v2773_v1  ;;  %v2346_v16 = vld [vmem:[%s4036_s0] sm:$0xff]   ;;  %v2351_v19 = vunpack.c.l.bf16 %v2425_v17  ;;  %v2352_v29 = vunpack.c.h.bf16 %v2425_v17  ;;  %v2355_v32 = vunpack.c.l.bf16 %v2426_v26  ;;  %v2832_v39 = vld [vmem:[%s4036_s0 + $0x18] sm:$0xff]   ;;  %s2778_s26 = smov 120  }
   0x3   :  { %19 = vst.msk [vmem:[#allocation2 + $0x10] sm:$0xff] %vm16_vm0, %v2773_v1  ;;  %v2347_v18 = vunpack.c.l.bf16 %v2346_v16  ;;  %v2348_v24 = vunpack.c.h.bf16 %v2346_v16  ;;  %v2356_v37 = vunpack.c.h.bf16 %v2426_v26  ;;  %v2359_v42 = vunpack.c.l.bf16 %v2832_v39 }
   0x4   :  { %v86_v3 = vsel %vm84_vm1, %v34_v2, 0  ;;  %20 = vst.msk [vmem:[#allocation2 + $0x18] sm:$0xff] %vm16_vm0, %v2773_v1 }
   0x5   :  { %95 = vmatpush.bf16.msra.mxu0 %v86_v3  ;;  %2444 = vmatpush.bf16.msra.mxu1 %v86_v3  ;;  %21 = vst.msk [vmem:[#allocation2 + $0x20] sm:$0xff] %vm16_vm0, %v2773_v1 }
   0x6   :  { %22 = vst.msk [vmem:[#allocation2 + $0x28] sm:$0xff] %vm16_vm0, %v2773_v1  ;;  %2445 = vmatpush.bf16.msra.mxu2 %v86_v3  ;;  %2446 = vmatpush.bf16.msra.mxu3 %v86_v3 }
   0x7   :  { %23 = vst.msk [vmem:[#allocation2 + $0x30] sm:$0xff] %vm16_vm0, %v2773_v1 }
   0x8   :  { %v35_v4 = vld [vmem:[#allocation2] sm:$0xff]  ;;  %24 = vst.msk [vmem:[#allocation2 + $0x38] sm:$0xff] %vm16_vm0, %v2773_v1 }
   0x9   :  { %545 = vmatpush.bf16.msrb.mxu1 %v86_v3  ;;  %1802 = vmatpush.bf16.msrb.mxu0 %v86_v3  ;;  %v36_v5 = vld [vmem:[#allocation2 + $0x8] sm:$0xff]  ;;  %25 = vst.msk [vmem:[#allocation3] sm:$0xff] %vm16_vm0, %v2773_v1 }
   0xa   :  { %964 = vmatpush.bf16.msrb.mxu2 %v86_v3  ;;  %1383 = vmatpush.bf16.msrb.mxu3 %v86_v3  ;;  %v67_v6 = vpack.c.bf16 %v36_v5, %v35_v4  ;;  %26 = vst.msk [vmem:[#allocation3 + $0x8] sm:$0xff] %vm16_vm0, %v2773_v1  ;;  %v37_v7 = vld [vmem:[#allocation2 + $0x10] sm:$0xff] }
   0xb   :  { %27 = vst.msk [vmem:[#allocation3 + $0x10] sm:$0xff] %vm16_vm0, %v2773_v1  ;;  %v38_v8 = vld [vmem:[#allocation2 + $0x18] sm:$0xff] }
   0xc   :  { %2221 = vmatmul.msk.bf16.vlgmr.msra.gmra.mxu0 %vm16_vm0, %v67_v6  ;;  %28 = vst.msk [vmem:[#allocation3 + $0x18] sm:$0xff] %vm16_vm0, %v2773_v1  ;;  %v68_v9 = vpack.c.bf16 %v38_v8, %v37_v7  ;;  %v39_v10 = vld [vmem:[#allocation2 + $0x20] sm:$0xff] }
   0xd   :  { %29 = vst.msk [vmem:[#allocation3 + $0x20] sm:$0xff] %vm16_vm0, %v2773_v1  ;;  %v40_v11 = vld [vmem:[#allocation2 + $0x28] sm:$0xff] }
   0xe   :  { %30 = vst.msk [vmem:[#allocation3 + $0x28] sm:$0xff] %vm16_vm0, %v2773_v1  ;;  %2222 = vmatmul.msk.bf16.vlgmr.msra.gmra.mxu1 %vm16_vm0, %v68_v9  ;;  %v69_v12 = vpack.c.bf16 %v40_v11, %v39_v10  ;;  %v41_v13 = vld [vmem:[#allocation2 + $0x30] sm:$0xff] }
   0xf   :  { %31 = vst.msk [vmem:[#allocation3 + $0x30] sm:$0xff] %vm16_vm0, %v2773_v1  ;;  %v42_v14 = vld [vmem:[#allocation2 + $0x38] sm:$0xff] }
  0x10   :  { %32 = vst.msk [vmem:[#allocation3 + $0x38] sm:$0xff] %vm16_vm0, %v2773_v1  ;;  %2223 = vmatmul.msk.bf16.vlgmr.msra.gmra.mxu2 %vm16_vm0, %v69_v12  ;;  %v70_v15 = vpack.c.bf16 %v42_v14, %v41_v13  ;;  %v43_v43 = vld [vmem:[#allocation3] sm:$0xff] }
  0x11   :  { %v44_v47 = vld [vmem:[#allocation3 + $0x8] sm:$0xff] }
  0x12   :  { %2224 = vmatmul.msk.bf16.vlgmr.msra.gmra.mxu3 %vm16_vm0, %v70_v15 }
  0x13   :  { %v46_v50 = vld [vmem:[#allocation3 + $0x18] sm:$0xff] }
  0x14   :  { %v47_v51 = vld [vmem:[#allocation3 + $0x20] sm:$0xff] }
  0x89   :  { %v97_v20 = vpop.f32.mrf.mxu0 }
  0x8a   :  { %v117_v21 = vadd.f32 %v2347_v18, %v97_v20 }
  0x8b   :  { %v102_v22 = vpop.f32.mrf.mxu1 }
  0x8c   :  { %2453 = vtanh.f32 %v117_v21  ;;  %v119_v23 = vadd.f32 %v2351_v19, %v102_v22  ;;  %v2225_v53 = vmul.f32 -1.442695, %v117_v21 }
  0x8e   :  { %2455 = vtanh.f32 %v119_v23  ;;  %v2227_v59 = vmul.f32 -1.442695, %v119_v23 }
  0x91   :  { %v99_v25 = vpop.f32.mrf.mxu0 }
  0x92   :  { %v2454_v27 = vpop.eup %2453  ;;  %v118_v28 = vadd.f32 %v2348_v24, %v99_v25  ;;  %v2360_v25 = vunpack.c.h.bf16 %v2832_v39 }
  0x93   :  { %v104_v30 = vpop.f32.mrf.mxu1  ;;  %333 = vrot.lane.b32.xlu0 %v2454_v27, %s2774_s16  ;;  %v107_v31 = vpop.f32.mrf.mxu2 }
  0x94   :  { %2457 = vtanh.f32 %v118_v28  ;;  %v2456_v33 = vpop.eup %2455  ;;  %v120_v34 = vadd.f32 %v2352_v29, %v104_v30  ;;  %v121_v35 = vadd.f32 %v2355_v32, %v107_v31  ;;  %v2226_v55 = vmul.f32 -1.442695, %v118_v28 }
  0x95   :  { %337 = vrot.lane.b32.xlu1 %v2456_v33, %s2774_s16  ;;  %v112_v44 = vpop.f32.mrf.mxu3 }
  0x96   :  { %2459 = vtanh.f32 %v120_v34  ;;  %v123_v46 = vadd.f32 %v2359_v42, %v112_v44  ;;  %v2228_v0 = vmul.f32 -1.442695, %v120_v34  ;;  %v2229_v4 = vmul.f32 -1.442695, %v121_v35 }
  0x97   :  { %2461 = vtanh.f32 %v121_v35 }
  0x98   :  { %v2231_v7 = vmul.f32 -1.442695, %v123_v46 }
  0x9a   :  { %v2458_v36 = vpop.eup %2457 }
  0x9b   :  { %335 = vrot.lane.b32.xlu0 %v2458_v36, %s2774_s16  ;;  %v109_v38 = vpop.f32.mrf.mxu2 }
  0x9c   :  { %v122_v40 = vadd.f32 %v2356_v37, %v109_v38  ;;  %v2460_v41 = vpop.eup %2459 }
  0x9d   :  { %339 = vrot.lane.b32.xlu1 %v2460_v41, %s2774_s16  ;;  %v2462_v45 = vpop.eup %2461  ;;  %v114_v29 = vpop.f32.mrf.mxu3 }
  0x9e   :  { %2463 = vtanh.f32 %v122_v40  ;;  %341 = vrot.lane.b32.xlu2 %v2462_v45, %s2774_s16  ;;  %v2230_v52 = vmul.f32 -1.442695, %v122_v40  ;;  %v2874_v36 = vadd.f32 %v2360_v25, %v114_v29 }
  0x9f   :  { %2465 = vtanh.f32 %v123_v46 }
  0xa0   :  { %2467 = vpow2.f32 %v2230_v52 }
  0xa1   :  { %2469 = vpow2.f32 %v2225_v53 }
  0xa2   :  { %2471 = vpow2.f32 %v2226_v55 }
  0xa3   :  { %293 = vrot.lane.b32.xlu0 %v43_v43, %s2775_s19 }
  0xa4   :  { %v2464_v48 = vpop.eup %2463 }
  0xa5   :  { %295 = vrot.lane.b32.xlu1 %v44_v47, %s2775_s19  ;;  %v2466_v49 = vpop.eup %2465 }
  0xa6   :  { %343 = vrot.lane.b32.xlu2 %v2464_v48, %s2774_s16  ;;  %v2468_v54 = vpop.eup %2467 }
  0xa7   :  { %v2470_v56 = vpop.eup %2469  ;;  %v154_v57 = vadd.f32 1.0, %v2468_v54 }
  0xa8   :  { %v149_v58 = vadd.f32 1.0, %v2470_v56  ;;  %v2472_v60 = vpop.eup %2471 }
  0xa9   :  { %2473 = vrcp.f32 %v154_v57  ;;  %v2843_v62 = vadd.f32 1.0, %v2472_v60  ;;  %vm237_vm2 = vweird.f32 %v154_v57  ;;  %v243_v14 = vand.u32 2147483648, %v154_v57 }
  0xaa   :  { %2475 = vrcp.f32 %v149_v58  ;;  %v241_v16 = vand.u32 2147483647, %v154_v57  ;;  %vm162_vm6 = vweird.f32 %v149_v58  ;;  %v168_v26 = vand.u32 2147483648, %v149_v58 }
  0xab   :  { %2477 = vpow2.f32 %v2227_v59  ;;  %v244_v27 = vor.u32 1.1754944e-38, %v243_v14  ;;  %v166_v30 = vand.u32 2147483647, %v149_v58  ;;  %v183_v47 = vand.u32 2147483648, %v2843_v62 }
  0xac   :  { %2479 = vrcp.f32 %v2843_v62  ;;  %vm242_vm7 = vcmp.eq.f32.partialorder %v241_v16, 8.507059e+37  ;;  %v169_v37 = vor.u32 1.1754944e-38, %v168_v26  ;;  %vm177_vm11 = vweird.f32 %v2843_v62 }
  0xad   :  { %345 = vrot.lane.b32.xlu1 %v2466_v49, %s2774_s16  ;;  %2481 = vpow2.f32 %v2228_v0  ;;  %vm167_vm9 = vcmp.eq.f32.partialorder %v166_v30, 8.507059e+37  ;;  %v181_v48 = vand.u32 2147483647, %v2843_v62  ;;  %v184_v55 = vor.u32 1.1754944e-38, %v183_v47  ;;  %v48_v30 = vld [vmem:[#allocation3 + $0x28] sm:$0xff] }
  0xae   :  { %2483 = vpow2.f32 %v2229_v4 }
  0xaf   :  { %v2474_v61 = vpop.eup %2473  ;;  %vm182_vm15 = vcmp.eq.f32.partialorder %v181_v48, 8.507059e+37 }
  0xb0   :  { %v2476_v63 = vpop.eup %2475  ;;  %v233_v1 = vmul.f32 %v2474_v61, %v154_v57  ;;  %vm238_vm3 = vweird.f32 %v2474_v61 }
  0xb1   :  { %v2478_v2 = vpop.eup %2477  ;;  %v158_v3 = vmul.f32 %v2476_v63, %v149_v58  ;;  %vm2857_vm4 = vmor %vm237_vm2, %vm238_vm3  ;;  %vm163_vm5 = vweird.f32 %v2476_v63 }
  0xb2   :  { %v2846_v5 = vadd.f32 1.0, %v2478_v2  ;;  %v234_v6 = vsub.f32 1.0, %v233_v1  ;;  %v2848_v9 = vpop.eup %2479  ;;  %vm164_vm8 = vmor %vm162_vm6, %vm163_vm5 }
  0xb3   :  { %v159_v8 = vsub.f32 1.0, %v158_v3  ;;  %v2482_v11 = vpop.eup %2481  ;;  %v173_v13 = vmul.f32 %v2848_v9, %v2843_v62  ;;  %vm178_vm10 = vweird.f32 %v2848_v9 }
  0xb4   :  { %2485 = vrcp.f32 %v2846_v5  ;;  %v235_v10 = vmul.f32 %v2474_v61, %v234_v6  ;;  %v2484_v17 = vpop.eup %2483  ;;  %v2853_v18 = vadd.f32 1.0, %v2482_v11  ;;  %vm179_vm12 = vmor %vm177_vm11, %vm178_vm10  ;;  %vm192_vm13 = vweird.f32 %v2846_v5 }
  0xb5   :  { %299 = vrot.lane.b32.xlu1 %v46_v50, %s2775_s19  ;;  %2487 = vpow2.f32 %v2231_v7  ;;  %v160_v12 = vmul.f32 %v2476_v63, %v159_v8  ;;  %v174_v23 = vsub.f32 1.0, %v173_v13  ;;  %v2864_v28 = vadd.f32 1.0, %v2484_v17 }
  0xb6   :  { %v236_v15 = vadd.f32 %v2474_v61, %v235_v10  ;;  %2489 = vrcp.f32 %v2853_v18  ;;  %v198_v57 = vand.u32 2147483648, %v2846_v5  ;;  %vm207_vm3 = vweird.f32 %v2853_v18  ;;  %v45_v10 = vld [vmem:[#allocation3 + $0x10] sm:$0xff] }
  0xb7   :  { %v161_v22 = vadd.f32 %v2476_v63, %v160_v12  ;;  %v175_v34 = vmul.f32 %v2848_v9, %v174_v23  ;;  %2491 = vrcp.f32 %v2864_v28  ;;  %v211_v13 = vand.u32 2147483647, %v2853_v18 }
  0xb8   :  { %v240_v31 = vsel %vm2857_vm4, %v2474_v61, %v236_v15  ;;  %2493 = vtanh.f32 %v2874_v36  ;;  %v196_v61 = vand.u32 2147483647, %v2846_v5  ;;  %v199_v2 = vor.u32 1.1754944e-38, %v198_v57 }
  0xb9   :  { %v165_v33 = vsel %vm164_vm8, %v2476_v63, %v161_v22  ;;  %v2876_v38 = vsel %vm242_vm7, %v244_v27, %v240_v31  ;;  %v176_v45 = vadd.f32 %v2848_v9, %v175_v34  ;;  %vm222_vm6 = vweird.f32 %v2864_v28 }
  0xba   :  { %v2861_v21 = vpop.eup %2485  ;;  %v2880_v40 = vsel %vm167_vm9, %v169_v37, %v165_v33  ;;  %vm197_vm2 = vcmp.eq.f32.partialorder %v196_v61, 8.507059e+37  ;;  %vm212_vm8 = vcmp.eq.f32.partialorder %v211_v13, 8.507059e+37  ;;  %v228_v20 = vand.u32 2147483648, %v2864_v28 }
  0xbb   :  { %v2488_v24 = vpop.eup %2487  ;;  %v188_v32 = vmul.f32 %v2861_v21, %v2846_v5  ;;  %v180_v53 = vsel %vm179_vm12, %v2848_v9, %v176_v45  ;;  %vm193_vm14 = vweird.f32 %v2861_v21  ;;  %v213_v9 = vand.u32 2147483648, %v2853_v18 }
  0xbc   :  { %v2872_v35 = vadd.f32 1.0, %v2488_v24  ;;  %v2886_v46 = vpop.eup %2489  ;;  %v2905_v58 = vsel %vm182_vm15, %v184_v55, %v180_v53  ;;  %vm194_vm1 = vmor %vm192_vm13, %vm193_vm14  ;;  %v226_v25 = vand.u32 2147483647, %v2864_v28  ;;  %v2232_v45 = vmul.f32 -1.442695, %v2874_v36 }
  0xbd   :  { %301 = vrot.lane.b32.xlu1 %v47_v51, %s2775_s19  ;;  %v189_v42 = vsub.f32 1.0, %v188_v32  ;;  %v2894_v50 = vpop.eup %2491  ;;  %v203_v52 = vmul.f32 %v2886_v46, %v2853_v18  ;;  %vm208_vm4 = vweird.f32 %v2886_v46  ;;  %v214_v17 = vor.u32 1.1754944e-38, %v213_v9 }
  0xbe   :  { %2495 = vrcp.f32 %v2872_v35  ;;  %v2494_v54 = vpop.eup %2493  ;;  %v218_v0 = vmul.f32 %v2894_v50, %v2864_v28  ;;  %vm2926_vm5 = vmor %vm207_vm3, %vm208_vm4  ;;  %vm223_vm7 = vweird.f32 %v2894_v50  ;;  %vm252_vm9 = vweird.f32 %v2872_v35 }
  0xbf   :  { %v190_v51 = vmul.f32 %v2861_v21, %v189_v42  ;;  %v204_v62 = vsub.f32 1.0, %v203_v52  ;;  %v258_v22 = vand.u32 2147483648, %v2872_v35  ;;  %vm2944_vm11 = vmor %vm222_vm6, %vm223_vm7  ;;  %v256_v27 = vand.u32 2147483647, %v2872_v35  ;;  %v49_v42 = vld [vmem:[#allocation3 + $0x30] sm:$0xff] }
  0xc0   :  { %v219_v6 = vsub.f32 1.0, %v218_v0  ;;  %v229_v32 = vor.u32 1.1754944e-38, %v228_v20  ;;  %vm227_vm13 = vcmp.eq.f32.partialorder %v226_v25, 8.507059e+37  ;;  %2497 = vpow2.f32 %v2232_v45 }
  0xc1   :  { %v191_v60 = vadd.f32 %v2861_v21, %v190_v51  ;;  %v205_v4 = vmul.f32 %v2886_v46, %v204_v62  ;;  %v259_v33 = vor.u32 1.1754944e-38, %v258_v22  ;;  %vm257_vm14 = vcmp.eq.f32.partialorder %v256_v27, 8.507059e+37 }
  0xc2   :  { %v220_v15 = vmul.f32 %v2894_v50, %v219_v6 }
  0xc3   :  { %v195_v3 = vsel %vm194_vm1, %v2861_v21, %v191_v60  ;;  %v206_v12 = vadd.f32 %v2886_v46, %v205_v4 }
  0xc4   :  { %v2902_v56 = vpop.eup %2495  ;;  %v2920_v8 = vsel %vm197_vm2, %v199_v2, %v195_v3  ;;  %v221_v23 = vadd.f32 %v2894_v50, %v220_v15 }
  0xc5   :  { %v248_v1 = vmul.f32 %v2902_v56, %v2872_v35  ;;  %v210_v18 = vsel %vm2926_vm5, %v2886_v46, %v206_v12  ;;  %vm253_vm10 = vweird.f32 %v2902_v56 }
  0xc6   :  { %v2951_v29 = vsel %vm212_vm8, %v214_v17, %v210_v18  ;;  %vm254_vm12 = vmor %vm252_vm9, %vm253_vm10  ;;  %v225_v34 = vsel %vm2944_vm11, %v2894_v50, %v221_v23  ;;  %v2498_v46 = vpop.eup %2497 }
  0xc7   :  { %v249_v7 = vsub.f32 1.0, %v248_v1  ;;  %v2960_v28 = vsel %vm227_vm13, %v229_v32, %v225_v34  ;;  %v156_v47 = vadd.f32 1.0, %v2498_v46 }
  0xc9   :  { %v250_v16 = vmul.f32 %v2902_v56, %v249_v7  ;;  %2499 = vrcp.f32 %v156_v47  ;;  %vm267_vm15 = vweird.f32 %v156_v47  ;;  %v271_v57 = vand.u32 2147483647, %v156_v47 }
  0xcb   :  { %v251_v26 = vadd.f32 %v2902_v56, %v250_v16  ;;  %vm272_vm3 = vcmp.eq.f32.partialorder %v271_v57, 8.507059e+37 }
  0xcd   :  { %v255_v37 = vsel %vm254_vm12, %v2902_v56, %v251_v26 }
  0xce   :  { %v2962_v35 = vsel %vm257_vm14, %v259_v33, %v255_v37 }
  0xcf   :  { %v2500_v48 = vpop.eup %2499 }
  0xd0   :  { %vm268_vm1 = vweird.f32 %v2500_v48 }
  0xd1   :  { %vm269_vm2 = vmor %vm267_vm15, %vm268_vm1 }
  0xf8   :  { %v2855_v19 = vpop.permute.xlu2 %341 }
 0x100   :  { %v344_v41 = vpop.permute.xlu2 %343 }
 0x101   :  { %v362_v44 = vmul.f32 %v344_v41, %v2876_v38 }
 0x103   :  { %383 = vrot.lane.b32.xlu1 %v362_v44, %s2775_s19  ;;  %v50_v44 = vld [vmem:[#allocation3 + $0x38] sm:$0xff] }
 0x105   :  { %v334_v39 = vpop.permute.xlu0 %333 }
 0x106   :  { %v357_v43 = vmul.f32 %v334_v39, %v2880_v40 }
 0x107   :  { %v338_v49 = vpop.permute.xlu1 %337 }
 0x108   :  { %373 = vrot.lane.b32.xlu2 %v357_v43, %s2775_s19  ;;  %v359_v11 = vmul.f32 %v338_v49, %v2920_v8  ;;  %v361_v43 = vmul.f32 %v2855_v19, %v2960_v28  ;;  %v263_v49 = vmul.f32 %v2500_v48, %v156_v47 }
 0x10a   :  { %v264_v50 = vsub.f32 1.0, %v263_v49 }
 0x10c   :  { %v265_v19 = vmul.f32 %v2500_v48, %v264_v50 }
 0x10d   :  { %v336_v59 = vpop.permute.xlu0 %335 }
 0x10e   :  { %v358_v63 = vmul.f32 %v336_v59, %v2905_v58  ;;  %v266_v56 = vadd.f32 %v2500_v48, %v265_v19 }
 0x10f   :  { %v340_v5 = vpop.permute.xlu1 %339 }
 0x110   :  { %375 = vrot.lane.b32.xlu0 %v358_v63, %s2775_s19  ;;  %347 = vrot.lane.b32.xlu2 %v2494_v54, %s2774_s16  ;;  %v360_v31 = vmul.f32 %v340_v5, %v2951_v29  ;;  %v273_v54 = vand.u32 2147483648, %v156_v47  ;;  %v270_v59 = vsel %vm269_vm2, %v2500_v48, %v266_v56 }
 0x112   :  { %v274_v36 = vor.u32 1.1754944e-38, %v273_v54 }
 0x114   :  { %v2976_v60 = vsel %vm272_vm3, %v274_v36, %v270_v59 }
 0x115   :  { %v294_v51 = vpop.permute.xlu0 %293 }
 0x116   :  { %v317_v52 = vmul.f32 %v294_v51, %v2880_v40 }
 0x117   :  { %v296_v21 = vpop.permute.xlu1 %295 }
 0x118   :  { %297 = vrot.lane.b32.xlu0 %v45_v10, %s2775_s19  ;;  %377 = vrot.lane.b32.xlu2 %v359_v11, %s2775_s19  ;;  %v318_v1 = vmul.f32 %v296_v21, %v2905_v58 }
 0x11f   :  { %v346_v39 = vpop.permute.xlu1 %345 }
 0x120   :  { %379 = vrot.lane.b32.xlu0 %v360_v31, %s2775_s19  ;;  %303 = vrot.lane.b32.xlu2 %v48_v30, %s2775_s19  ;;  %v363_v41 = vmul.f32 %v346_v39, %v2962_v35 }
 0x122   :  { %385 = vrot.lane.b32.xlu1 %v363_v41, %s2775_s19 }
 0x127   :  { %v300_v0 = vpop.permute.xlu1 %299 }
 0x128   :  { %381 = vrot.lane.b32.xlu0 %v361_v43, %s2775_s19  ;;  %305 = vrot.lane.b32.xlu2 %v49_v42, %s2775_s19  ;;  %v320_v14 = vmul.f32 %v300_v0, %v2951_v29 }
 0x12f   :  { %v302_v5 = vpop.permute.xlu1 %301 }
 0x130   :  { %307 = vrot.lane.b32.xlu0 %v50_v44, %s2775_s19  ;;  %v321_v20 = vmul.f32 %v302_v5, %v2960_v28 }
 0x162   :  { %v374_v53 = vpop.permute.xlu2 %373 }
 0x163   :  { %v2973_v55 = vadd.f32 %v374_v53, %v317_v52 }
 0x165   :  { %2501 = vtanh.f32 %v2973_v55 }
 0x16a   :  { %v348_v61 = vpop.permute.xlu2 %347 }
 0x16b   :  { %v2502_v62 = vpop.eup %2501  ;;  %v364_v63 = vmul.f32 %v348_v61, %v2976_v60 }
 0x16c   :  { %421 = vrot.lane.b32.xlu0 %v2502_v62, %s2776_s20 }
 0x16d   :  { %387 = vrot.lane.b32.xlu2 %v364_v63, %s2775_s19 }
 0x172   :  { %v378_v2 = vpop.permute.xlu2 %377 }
 0x175   :  { %v384_v13 = vpop.permute.xlu1 %383 }
 0x17a   :  { %v304_v10 = vpop.permute.xlu2 %303 }
 0x17b   :  { %v322_v12 = vmul.f32 %v304_v10, %v2876_v38 }
 0x17d   :  { %v2992_v16 = vadd.f32 %v384_v13, %v322_v12 }
 0x182   :  { %v376_v3 = vpop.permute.xlu0 %375  ;;  %v306_v24 = vpop.permute.xlu2 %305 }
 0x183   :  { %v2982_v4 = vadd.f32 %v376_v3, %v318_v1  ;;  %v323_v27 = vmul.f32 %v306_v24, %v2962_v35  ;;  %v2429_v3 = vld [vmem:[%s4036_s0 + $0x28] sm:$0xff]  }
 0x184   :  { %v2367_v5 = vunpack.c.l.bf16 %v2429_v3  ;;  %v2368_v10 = vunpack.c.h.bf16 %v2429_v3 }
 0x185   :  { %2503 = vtanh.f32 %v2982_v4 }
 0x18a   :  { %v298_v6 = vpop.permute.xlu0 %297 }
 0x18b   :  { %v2504_v7 = vpop.eup %2503  ;;  %v319_v9 = vmul.f32 %v298_v6, %v2920_v8 }
 0x18c   :  { %423 = vrot.lane.b32.xlu1 %v2504_v7, %s2776_s20 }
 0x18d   :  { %v2987_v11 = vadd.f32 %v378_v2, %v319_v9 }
 0x18f   :  { %2505 = vtanh.f32 %v2987_v11 }
 0x192   :  { %v380_v15 = vpop.permute.xlu0 %379 }
 0x193   :  { %v2994_v17 = vadd.f32 %v380_v15, %v320_v14  ;;  %v2430_v15 = vld [vmem:[%s4036_s0 + $0x30] sm:$0xff]  }
 0x194   :  { %v386_v26 = vpop.permute.xlu1 %385  ;;  %v2372_v24 = vunpack.c.h.bf16 %v2430_v15 }
 0x195   :  { %v2506_v18 = vpop.eup %2505  ;;  %2507 = vtanh.f32 %v2994_v17  ;;  %v3006_v30 = vadd.f32 %v386_v26, %v323_v27 }
 0x196   :  { %425 = vrot.lane.b32.xlu2 %v2506_v18, %s2776_s20  ;;  %2509 = vtanh.f32 %v2992_v16  ;;  %v2371_v18 = vunpack.c.l.bf16 %v2430_v15 }
 0x19a   :  { %v382_v21 = vpop.permute.xlu0 %381 }
 0x19b   :  { %v2508_v22 = vpop.eup %2507  ;;  %v3000_v23 = vadd.f32 %v382_v21, %v321_v20 }
 0x19c   :  { %427 = vrot.lane.b32.xlu0 %v2508_v22, %s2776_s20  ;;  %v2510_v25 = vpop.eup %2509 }
 0x19d   :  { %2511 = vtanh.f32 %v3000_v23 }
 0x19e   :  { %431 = vrot.lane.b32.xlu2 %v2510_v25, %s2776_s20  ;;  %2513 = vtanh.f32 %v3006_v30 }
 0x1a2   :  { %v308_v33 = vpop.permute.xlu0 %307 }
 0x1a3   :  { %v2512_v31 = vpop.eup %2511  ;;  %v324_v34 = vmul.f32 %v308_v33, %v2976_v60 }
 0x1a4   :  { %429 = vrot.lane.b32.xlu1 %v2512_v31, %s2776_s20  ;;  %v2514_v32 = vpop.eup %2513  ;;  %v3073_v31 = vld [vmem:[%s4036_s0 + $0x38] sm:$0xff]  }
 0x1ac   :  { %433 = vrot.lane.b32.xlu1 %v2514_v32, %s2776_s20  ;;  %v2375_v32 = vunpack.c.l.bf16 %v3073_v31 }
 0x1c7   :  { %v388_v37 = vpop.permute.xlu2 %387 }
 0x1c8   :  { %v3012_v39 = vadd.f32 %v388_v37, %v324_v34 }
 0x1ca   :  { %2515 = vtanh.f32 %v3012_v39 }
 0x1d0   :  { %v2516_v41 = vpop.eup %2515 }
 0x1d1   :  { %435 = vrot.lane.b32.xlu2 %v2516_v41, %s2776_s20 }
 0x1de   :  { %v422_v42 = vpop.permute.xlu0 %421 }
 0x1df   :  { %v3017_v44 = vmul.f32 %v422_v42, %v2880_v40 }
 0x1f0   :  { %v426_v47 = vpop.permute.xlu2 %425 }
 0x1f1   :  { %v3026_v49 = vmul.f32 %v426_v47, %v2920_v8 }
 0x1fe   :  { %v424_v43 = vpop.permute.xlu1 %423 }
 0x1ff   :  { %v3020_v45 = vmul.f32 %v424_v43, %v2905_v58  ;;  %v432_v58 = vpop.permute.xlu2 %431 }
 0x200   :  { %v3035_v19 = vmul.f32 %v432_v58, %v2876_v38 }
 0x201   :  { %v510_v46 = vpack.c.bf16 %v3020_v45, %v3017_v44 }
 0x203   :  { %518 = vrot.lane.b32.xlu0 %v510_v46, %s2777_s21 }
 0x20e   :  { %v428_v48 = vpop.permute.xlu0 %427 }
 0x20f   :  { %v3029_v50 = vmul.f32 %v428_v48, %v2951_v29 }
 0x211   :  { %v511_v40 = vpack.c.bf16 %v3029_v50, %v3026_v49 }
 0x213   :  { %520 = vrot.lane.b32.xlu0 %v511_v40, %s2777_s21 }
 0x216   :  { %v430_v51 = vpop.permute.xlu1 %429 }
 0x217   :  { %v3038_v52 = vmul.f32 %v430_v51, %v2960_v28 }
 0x219   :  { %v512_v8 = vpack.c.bf16 %v3035_v19, %v3038_v52 }
 0x21b   :  { %522 = vrot.lane.b32.xlu1 %v512_v8, %s2777_s21 }
 0x21e   :  { %v434_v29 = vpop.permute.xlu1 %433 }
 0x21f   :  { %v3044_v54 = vmul.f32 %v434_v29, %v2962_v35  ;;  %v2428_v35 = vld [vmem:[%s4036_s0 + $0x20] sm:$0xff]  }
 0x220   :  { %v2364_v63 = vunpack.c.h.bf16 %v2428_v35 }
 0x22b   :  { %v436_v53 = vpop.permute.xlu2 %435 }
 0x22c   :  { %v3047_v56 = vmul.f32 %v436_v53, %v2976_v60  ;;  %v2363_v60 = vunpack.c.l.bf16 %v2428_v35 }
 0x22e   :  { %v513_v38 = vpack.c.bf16 %v3047_v56, %v3044_v54 }
 0x230   :  { %524 = vrot.lane.b32.xlu2 %v513_v38, %s2777_s21 }
 0x275   :  { %v519_v28 = vpop.permute.xlu0 %518 }
 0x276   :  { %2241 = vmatmul.msk.bf16.vlgmr.msrb.gmra.mxu1 %vm16_vm0, %v519_v28 }
 0x285   :  { %v521_v57 = vpop.permute.xlu0 %520 }
 0x286   :  { %2242 = vmatmul.msk.bf16.gmra.mxu1 %vm16_vm0, %v521_v57 }
 0x28a   :  { %v525_v59 = vpop.permute.xlu2 %524 }
 0x28d   :  { %v523_v36 = vpop.permute.xlu1 %522 }
 0x296   :  { %2243 = vmatmul.msk.bf16.gmra.mxu1 %vm16_vm0, %v523_v36 }
 0x2a6   :  { %2244 = vmatmul.msk.bf16.gmra.mxu1 %vm16_vm0, %v525_v59 }
 0x2f3   :  { %v547_v61 = vpop.f32.mrf.mxu1 }
 0x2f4   :  { %v567_v62 = vadd.f32 %v2363_v60, %v547_v61 }
 0x2f6   :  { %2517 = vtanh.f32 %v567_v62  ;;  %v2245_v42 = vmul.f32 -1.442695, %v567_v62 }
 0x2fb   :  { %v549_v0 = vpop.f32.mrf.mxu1 }
 0x2fc   :  { %v2518_v1 = vpop.eup %2517  ;;  %v568_v2 = vadd.f32 %v2364_v63, %v549_v0 }
 0x2fd   :  { %751 = vrot.lane.b32.xlu0 %v2518_v1, %s2774_s16 }
 0x2fe   :  { %2519 = vtanh.f32 %v568_v2  ;;  %v2246_v43 = vmul.f32 -1.442695, %v568_v2 }
 0x303   :  { %v552_v6 = vpop.f32.mrf.mxu1 }
 0x304   :  { %v2520_v7 = vpop.eup %2519  ;;  %v569_v9 = vadd.f32 %v2367_v5, %v552_v6 }
 0x305   :  { %753 = vrot.lane.b32.xlu1 %v2520_v7, %s2774_s16 }
 0x306   :  { %2521 = vtanh.f32 %v569_v9  ;;  %v2247_v48 = vmul.f32 -1.442695, %v569_v9  ;;  %v2376_v9 = vunpack.c.h.bf16 %v3073_v31 }
 0x30b   :  { %v554_v12 = vpop.f32.mrf.mxu1 }
 0x30c   :  { %v2522_v13 = vpop.eup %2521  ;;  %v570_v14 = vadd.f32 %v2368_v10, %v554_v12 }
 0x30d   :  { %755 = vrot.lane.b32.xlu2 %v2522_v13, %s2774_s16 }
 0x30e   :  { %2523 = vtanh.f32 %v570_v14  ;;  %v2248_v8 = vmul.f32 -1.442695, %v570_v14 }
 0x313   :  { %v557_v20 = vpop.f32.mrf.mxu1 }
 0x314   :  { %v2524_v21 = vpop.eup %2523  ;;  %v571_v22 = vadd.f32 %v2371_v18, %v557_v20 }
 0x315   :  { %757 = vrot.lane.b32.xlu0 %v2524_v21, %s2774_s16 }
 0x316   :  { %2525 = vtanh.f32 %v571_v22  ;;  %v2249_v57 = vmul.f32 -1.442695, %v571_v22 }
 0x31b   :  { %v559_v25 = vpop.f32.mrf.mxu1 }
 0x31c   :  { %v2526_v26 = vpop.eup %2525  ;;  %v572_v27 = vadd.f32 %v2372_v24, %v559_v25 }
 0x31d   :  { %759 = vrot.lane.b32.xlu1 %v2526_v26, %s2774_s16 }
 0x31e   :  { %2527 = vtanh.f32 %v572_v27  ;;  %v2250_v29 = vmul.f32 -1.442695, %v572_v27 }
 0x323   :  { %v562_v33 = vpop.f32.mrf.mxu1 }
 0x324   :  { %v2528_v34 = vpop.eup %2527  ;;  %v573_v37 = vadd.f32 %v2375_v32, %v562_v33 }
 0x325   :  { %761 = vrot.lane.b32.xlu2 %v2528_v34, %s2774_s16 }
 0x326   :  { %2529 = vtanh.f32 %v573_v37  ;;  %v2251_v35 = vmul.f32 -1.442695, %v573_v37 }
 0x327   :  { %2531 = vpow2.f32 %v2245_v42 }
 0x328   :  { %2533 = vpow2.f32 %v2246_v43 }
 0x32b   :  { %v564_v12 = vpop.f32.mrf.mxu1 }
 0x32c   :  { %v2530_v41 = vpop.eup %2529  ;;  %v3098_v22 = vadd.f32 %v2376_v9, %v564_v12 }
 0x32d   :  { %763 = vrot.lane.b32.xlu2 %v2530_v41, %s2774_s16  ;;  %v2532_v46 = vpop.eup %2531 }
 0x32e   :  { %v599_v47 = vadd.f32 1.0, %v2532_v46  ;;  %v2534_v40 = vpop.eup %2533 }
 0x32f   :  { %v3078_v58 = vadd.f32 1.0, %v2534_v40 }
 0x330   :  { %2535 = vrcp.f32 %v599_v47  ;;  %v618_v6 = vand.u32 2147483648, %v599_v47  ;;  %vm612_vm5 = vweird.f32 %v599_v47  ;;  %v616_v10 = vand.u32 2147483647, %v599_v47 }
 0x331   :  { %2537 = vpow2.f32 %v2247_v48  ;;  %v633_v37 = vand.u32 2147483648, %v3078_v58  ;;  %vm627_vm9 = vweird.f32 %v3078_v58  ;;  %v631_v41 = vand.u32 2147483647, %v3078_v58 }
 0x332   :  { %2539 = vrcp.f32 %v3078_v58  ;;  %v619_v21 = vor.u32 1.1754944e-38, %v618_v6  ;;  %vm617_vm7 = vcmp.eq.f32.partialorder %v616_v10, 8.507059e+37 }
 0x333   :  { %2541 = vpow2.f32 %v2248_v8  ;;  %v634_v48 = vor.u32 1.1754944e-38, %v633_v37  ;;  %vm632_vm11 = vcmp.eq.f32.partialorder %v631_v41, 8.507059e+37 }
 0x334   :  { %2543 = vpow2.f32 %v2250_v29 }
 0x336   :  { %v2536_v51 = vpop.eup %2535 }
 0x337   :  { %v2538_v53 = vpop.eup %2537  ;;  %v608_v38 = vmul.f32 %v2536_v51, %v599_v47  ;;  %vm613_vm4 = vweird.f32 %v2536_v51 }
 0x338   :  { %v3081_v28 = vadd.f32 1.0, %v2538_v53  ;;  %v2540_v59 = vpop.eup %2539  ;;  %vm614_vm6 = vmor %vm612_vm5, %vm613_vm4 }
 0x339   :  { %v609_v36 = vsub.f32 1.0, %v608_v38  ;;  %v2542_v60 = vpop.eup %2541  ;;  %v623_v63 = vmul.f32 %v2540_v59, %v3078_v58  ;;  %vm628_vm8 = vweird.f32 %v2540_v59 }
 0x33a   :  { %2545 = vrcp.f32 %v3081_v28  ;;  %v2544_v61 = vpop.eup %2543  ;;  %v3085_v0 = vadd.f32 1.0, %v2542_v60  ;;  %vm629_vm10 = vmor %vm627_vm9, %vm628_vm8  ;;  %vm642_vm13 = vweird.f32 %v3081_v28 }
 0x33b   :  { %2547 = vpow2.f32 %v2249_v57  ;;  %v610_v62 = vmul.f32 %v2536_v51, %v609_v36  ;;  %v3087_v1 = vadd.f32 1.0, %v2544_v61  ;;  %v624_v3 = vsub.f32 1.0, %v623_v63 }
 0x33c   :  { %2549 = vpow2.f32 %v2251_v35  ;;  %v646_v35 = vand.u32 2147483647, %v3081_v28  ;;  %vm657_vm3 = vweird.f32 %v3085_v0 }
 0x33d   :  { %v611_v2 = vadd.f32 %v2536_v51, %v610_v62  ;;  %2551 = vrcp.f32 %v3085_v0  ;;  %v625_v18 = vmul.f32 %v2540_v59, %v624_v3  ;;  %vm687_vm4 = vweird.f32 %v3087_v1 }
 0x33e   :  { %2553 = vrcp.f32 %v3087_v1  ;;  %vm647_vm15 = vcmp.eq.f32.partialorder %v646_v35, 8.507059e+37 }
 0x33f   :  { %v615_v15 = vsel %vm614_vm6, %v2536_v51, %v611_v2  ;;  %v626_v33 = vadd.f32 %v2540_v59, %v625_v18  ;;  %v661_v18 = vand.u32 2147483647, %v3085_v0 }
 0x340   :  { %v3089_v5 = vpop.eup %2545  ;;  %v3102_v25 = vsel %vm617_vm7, %v619_v21, %v615_v15  ;;  %v691_v15 = vand.u32 2147483647, %v3087_v1 }
 0x341   :  { %v2548_v7 = vpop.eup %2547  ;;  %v638_v14 = vmul.f32 %v3089_v5, %v3081_v28  ;;  %v630_v46 = vsel %vm629_vm10, %v2540_v59, %v626_v33  ;;  %vm643_vm12 = vweird.f32 %v3089_v5  ;;  %v648_v59 = vand.u32 2147483648, %v3081_v28 }
 0x342   :  { %v2550_v13 = vpop.eup %2549  ;;  %v3096_v20 = vadd.f32 1.0, %v2548_v7  ;;  %v3123_v8 = vsel %vm632_vm11, %v634_v48, %v630_v46  ;;  %vm644_vm14 = vmor %vm642_vm13, %vm643_vm12  ;;  %vm692_vm7 = vcmp.eq.f32.partialorder %v691_v15, 8.507059e+37  ;;  %vm662_vm8 = vcmp.eq.f32.partialorder %v661_v18, 8.507059e+37 }
 0x343   :  { %v3100_v24 = vadd.f32 1.0, %v2550_v13  ;;  %v3104_v27 = vpop.eup %2551  ;;  %v639_v31 = vsub.f32 1.0, %v638_v14  ;;  %v649_v6 = vor.u32 1.1754944e-38, %v648_v59  ;;  %v693_v13 = vand.u32 2147483648, %v3087_v1 }
 0x344   :  { %v3107_v34 = vpop.eup %2553  ;;  %2555 = vrcp.f32 %v3096_v20  ;;  %v653_v42 = vmul.f32 %v3104_v27, %v3085_v0  ;;  %vm658_vm1 = vweird.f32 %v3104_v27  ;;  %v663_v14 = vand.u32 2147483648, %v3085_v0 }
 0x345   :  { %2557 = vtanh.f32 %v3098_v22  ;;  %v640_v43 = vmul.f32 %v3089_v5, %v639_v31  ;;  %v683_v47 = vmul.f32 %v3107_v34, %v3087_v1  ;;  %vm688_vm2 = vweird.f32 %v3107_v34  ;;  %vm659_vm5 = vmor %vm657_vm3, %vm658_vm1 }
 0x346   :  { %2559 = vrcp.f32 %v3100_v24  ;;  %v654_v58 = vsub.f32 1.0, %v653_v42  ;;  %vm689_vm6 = vmor %vm687_vm4, %vm688_vm2  ;;  %v694_v37 = vor.u32 1.1754944e-38, %v693_v13  ;;  %v664_v41 = vor.u32 1.1754944e-38, %v663_v14 }
 0x347   :  { %v641_v53 = vadd.f32 %v3089_v5, %v640_v43  ;;  %v684_v57 = vsub.f32 1.0, %v683_v47  ;;  %v708_v47 = vand.u32 2147483648, %v3100_v24  ;;  %vm672_vm11 = vweird.f32 %v3096_v20 }
 0x348   :  { %v655_v61 = vmul.f32 %v3104_v27, %v654_v58  ;;  %v678_v48 = vand.u32 2147483648, %v3096_v20  ;;  %vm702_vm12 = vweird.f32 %v3100_v24  ;;  %v676_v58 = vand.u32 2147483647, %v3096_v20 }
 0x349   :  { %v645_v63 = vsel %vm644_vm14, %v3089_v5, %v641_v53  ;;  %v685_v2 = vmul.f32 %v3107_v34, %v684_v57  ;;  %v709_v57 = vor.u32 1.1754944e-38, %v708_v47  ;;  %v736_v18 = vmul.f32 %v3123_v8, %v2982_v4 }
 0x34a   :  { %v3121_v40 = vpop.eup %2555  ;;  %v3142_v28 = vsel %vm647_vm15, %v649_v6, %v645_v63  ;;  %v656_v7 = vadd.f32 %v3104_v27, %v655_v61  ;;  %v679_v59 = vor.u32 1.1754944e-38, %v678_v48  ;;  %vm677_vm1 = vcmp.eq.f32.partialorder %v676_v58, 8.507059e+37 }
 0x34b   :  { %v2558_v29 = vpop.eup %2557  ;;  %v668_v62 = vmul.f32 %v3121_v40, %v3096_v20  ;;  %v686_v12 = vadd.f32 %v3107_v34, %v685_v2  ;;  %vm673_vm9 = vweird.f32 %v3121_v40  ;;  %v2252_v20 = vmul.f32 -1.442695, %v3098_v22 }
 0x34c   :  { %v3128_v36 = vpop.eup %2559  ;;  %v660_v33 = vsel %vm659_vm5, %v3104_v27, %v656_v7  ;;  %vm674_vm13 = vmor %vm672_vm11, %vm673_vm9  ;;  %v735_v7 = vmul.f32 %v3102_v25, %v2973_v55  ;;  %v737_v4 = vmul.f32 %v3142_v28, %v2987_v11 }
 0x34d   :  { %v698_v3 = vmul.f32 %v3128_v36, %v3100_v24  ;;  %v669_v9 = vsub.f32 1.0, %v668_v62  ;;  %v690_v31 = vsel %vm689_vm6, %v3107_v34, %v686_v12  ;;  %v3162_v42 = vsel %vm662_vm8, %v664_v41, %v660_v33 }
 0x34e   :  { %v3160_v1 = vsel %vm692_vm7, %v694_v37, %v690_v31  ;;  %vm703_vm10 = vweird.f32 %v3128_v36  ;;  %2561 = vpow2.f32 %v2252_v20  ;;  %v738_v14 = vmul.f32 %v3162_v42, %v2994_v17 }
 0x34f   :  { %v699_v5 = vsub.f32 1.0, %v698_v3  ;;  %vm704_vm14 = vmor %vm702_vm12, %vm703_vm10 }
 0x367   :  { %v756_v60 = vpop.permute.xlu2 %755 }
 0x368   :  { %v777_v10 = vmul.f32 %v756_v60, %v3142_v28 }
 0x36f   :  { %v752_v26 = vpop.permute.xlu0 %751 }
 0x370   :  { %v775_v32 = vmul.f32 %v752_v26, %v3102_v25  ;;  %v670_v26 = vmul.f32 %v3121_v40, %v669_v9 }
 0x372   :  { %791 = vrot.lane.b32.xlu0 %v775_v32, %s2775_s19  ;;  %v700_v32 = vmul.f32 %v3128_v36, %v699_v5  ;;  %v671_v0 = vadd.f32 %v3121_v40, %v670_v26 }
 0x374   :  { %v701_v34 = vadd.f32 %v3128_v36, %v700_v32  ;;  %v675_v53 = vsel %vm674_vm13, %v3121_v40, %v671_v0  ;;  %v2562_v40 = vpop.eup %2561 }
 0x375   :  { %v3182_v60 = vsel %vm677_vm1, %v679_v59, %v675_v53 }
 0x376   :  { %v739_v11 = vmul.f32 %v3182_v60, %v3000_v23 }
 0x377   :  { %v754_v51 = vpop.permute.xlu1 %753 }
 0x378   :  { %v776_v38 = vmul.f32 %v754_v51, %v3123_v8  ;;  %v706_v51 = vand.u32 2147483647, %v3100_v24 }
 0x37a   :  { %793 = vrot.lane.b32.xlu1 %v776_v38, %s2775_s19  ;;  %765 = vrot.lane.b32.xlu0 %v2558_v29, %s2774_s16  ;;  %v705_v29 = vsel %vm704_vm14, %v3128_v36, %v701_v34  ;;  %vm707_vm15 = vcmp.eq.f32.partialorder %v706_v51, 8.507059e+37  ;;  %v606_v36 = vadd.f32 1.0, %v2562_v40  ;;  %v740_v34 = vmul.f32 %v3160_v1, %v2992_v16 }
 0x37b   :  { %v3180_v35 = vsel %vm707_vm15, %v709_v57, %v705_v29 }
 0x37c   :  { %2563 = vrcp.f32 %v606_v36  ;;  %v723_v5 = vand.u32 2147483648, %v606_v36  ;;  %vm717_vm3 = vweird.f32 %v606_v36  ;;  %v721_v22 = vand.u32 2147483647, %v606_v36 }
 0x37d   :  { %v741_v53 = vmul.f32 %v3180_v35, %v3006_v30 }
 0x37e   :  { %v724_v55 = vor.u32 1.1754944e-38, %v723_v5  ;;  %vm722_vm5 = vcmp.eq.f32.partialorder %v721_v22, 8.507059e+37 }
 0x37f   :  { %v762_v21 = vpop.permute.xlu2 %761 }
 0x380   :  { %v780_v46 = vmul.f32 %v762_v21, %v3160_v1 }
 0x382   :  { %795 = vrot.lane.b32.xlu1 %v777_v10, %s2775_s19  ;;  %v2564_v63 = vpop.eup %2563 }
 0x383   :  { %v713_v2 = vmul.f32 %v2564_v63, %v606_v36  ;;  %vm718_vm2 = vweird.f32 %v2564_v63 }
 0x384   :  { %vm719_vm4 = vmor %vm717_vm3, %vm718_vm2 }
 0x385   :  { %v714_v3 = vsub.f32 1.0, %v713_v2 }
 0x387   :  { %v758_v43 = vpop.permute.xlu0 %757  ;;  %v764_v38 = vpop.permute.xlu2 %763  ;;  %v715_v6 = vmul.f32 %v2564_v63, %v714_v3 }
 0x388   :  { %v778_v27 = vmul.f32 %v758_v43, %v3162_v42  ;;  %v781_v61 = vmul.f32 %v764_v38, %v3180_v35 }
 0x389   :  { %v716_v12 = vadd.f32 %v2564_v63, %v715_v6 }
 0x38a   :  { %801 = vrot.lane.b32.xlu1 %v780_v46, %s2775_s19  ;;  %797 = vrot.lane.b32.xlu2 %v778_v27, %s2775_s19 }
 0x38b   :  { %v720_v15 = vsel %vm719_vm4, %v2564_v63, %v716_v12 }
 0x38c   :  { %v3202_v32 = vsel %vm722_vm5, %v724_v55, %v720_v15 }
 0x38f   :  { %v760_v24 = vpop.permute.xlu1 %759 }
 0x390   :  { %v779_v62 = vmul.f32 %v760_v24, %v3182_v60 }
 0x392   :  { %799 = vrot.lane.b32.xlu0 %v779_v62, %s2775_s19  ;;  %803 = vrot.lane.b32.xlu2 %v781_v61, %s2775_s19  ;;  %v742_v61 = vmul.f32 %v3202_v32, %v3012_v39 }
 0x3e4   :  { %v792_v9 = vpop.permute.xlu0 %791  ;;  %v798_v13 = vpop.permute.xlu2 %797 }
 0x3e5   :  { %v3191_v10 = vadd.f32 %v792_v9, %v735_v7  ;;  %v3198_v21 = vadd.f32 %v798_v13, %v738_v14 }
 0x3e7   :  { %2565 = vtanh.f32 %v3191_v10 }
 0x3ec   :  { %v794_v26 = vpop.permute.xlu1 %793  ;;  %v766_v33 = vpop.permute.xlu0 %765 }
 0x3ed   :  { %v3200_v31 = vadd.f32 %v794_v26, %v736_v18  ;;  %v2566_v37 = vpop.eup %2565  ;;  %v782_v41 = vmul.f32 %v766_v33, %v3202_v32  ;;  %v804_v16 = vpop.permute.xlu2 %803 }
 0x3ee   :  { %839 = vrot.lane.b32.xlu1 %v2566_v37, %s2776_s20  ;;  %v3230_v38 = vadd.f32 %v804_v16, %v741_v53  ;;  %v2434_v16 = vld [vmem:[%s4036_s0 + $0x50] sm:$0xff]  }
 0x3ef   :  { %2567 = vtanh.f32 %v3200_v31  ;;  %805 = vrot.lane.b32.xlu0 %v782_v41, %s2775_s19  ;;  %v2387_v53 = vunpack.c.l.bf16 %v2434_v16 }
 0x3f0   :  { %2569 = vtanh.f32 %v3198_v21 }
 0x3f4   :  { %v796_v17 = vpop.permute.xlu1 %795 }
 0x3f5   :  { %v2568_v43 = vpop.eup %2567  ;;  %v3211_v0 = vadd.f32 %v796_v17, %v737_v4  ;;  %v2433_v17 = vld [vmem:[%s4036_s0 + $0x48] sm:$0xff]  }
 0x3f6   :  { %v2570_v46 = vpop.eup %2569  ;;  %841 = vrot.lane.b32.xlu2 %v2568_v43, %s2776_s20  ;;  %v2383_v43 = vunpack.c.l.bf16 %v2433_v17 }
 0x3f7   :  { %2571 = vtanh.f32 %v3211_v0  ;;  %845 = vrot.lane.b32.xlu1 %v2570_v46, %s2776_s20 }
 0x3fc   :  { %v802_v27 = vpop.permute.xlu1 %801 }
 0x3fd   :  { %v2572_v47 = vpop.eup %2571  ;;  %v3218_v48 = vadd.f32 %v802_v27, %v740_v34 }
 0x3fe   :  { %843 = vrot.lane.b32.xlu0 %v2572_v47, %s2776_s20  ;;  %v2384_v47 = vunpack.c.h.bf16 %v2433_v17 }
 0x3ff   :  { %2573 = vtanh.f32 %v3218_v48 }
 0x404   :  { %v800_v51 = vpop.permute.xlu0 %799 }
 0x405   :  { %v2574_v58 = vpop.eup %2573  ;;  %v3224_v29 = vadd.f32 %v800_v51, %v739_v11 }
 0x406   :  { %849 = vrot.lane.b32.xlu0 %v2574_v58, %s2776_s20 }
 0x407   :  { %2575 = vtanh.f32 %v3224_v29 }
 0x408   :  { %2577 = vtanh.f32 %v3230_v38 }
 0x40d   :  { %v2576_v57 = vpop.eup %2575 }
 0x40e   :  { %847 = vrot.lane.b32.xlu2 %v2576_v57, %s2776_s20  ;;  %v2578_v23 = vpop.eup %2577 }
 0x416   :  { %851 = vrot.lane.b32.xlu2 %v2578_v23, %s2776_s20 }
 0x450   :  { %v842_v59 = vpop.permute.xlu2 %841 }
 0x451   :  { %v3238_v62 = vmul.f32 %v842_v59, %v3123_v8 }
 0x460   :  { %v840_v24 = vpop.permute.xlu1 %839 }
 0x461   :  { %v3241_v30 = vmul.f32 %v840_v24, %v3102_v25  ;;  %v806_v20 = vpop.permute.xlu0 %805  ;;  %v2388_v24 = vunpack.c.h.bf16 %v2434_v16 }
 0x462   :  { %v3243_v40 = vadd.f32 %v806_v20, %v742_v61 }
 0x463   :  { %v929_v36 = vpack.c.bf16 %v3238_v62, %v3241_v30 }
 0x464   :  { %2579 = vtanh.f32 %v3243_v40 }
 0x465   :  { %937 = vrot.lane.b32.xlu1 %v929_v36, %s2777_s21 }
 0x468   :  { %v848_v6 = vpop.permute.xlu2 %847 }
 0x469   :  { %v846_v39 = vpop.permute.xlu1 %845  ;;  %v3260_v9 = vmul.f32 %v848_v6, %v3182_v60 }
 0x46a   :  { %v2580_v63 = vpop.eup %2579  ;;  %v3251_v8 = vmul.f32 %v846_v39, %v3162_v42 }
 0x46b   :  { %853 = vrot.lane.b32.xlu0 %v2580_v63, %s2776_s20 }
 0x470   :  { %v844_v2 = vpop.permute.xlu0 %843  ;;  %v852_v5 = vpop.permute.xlu2 %851 }
 0x471   :  { %v3254_v25 = vmul.f32 %v844_v2, %v3142_v28  ;;  %v3270_v13 = vmul.f32 %v852_v5, %v3180_v35  ;;  %v2432_v35 = vld [vmem:[%s4036_s0 + $0x40] sm:$0xff]  }
 0x472   :  { %v2379_v55 = vunpack.c.l.bf16 %v2432_v35  ;;  %v2380_v33 = vunpack.c.h.bf16 %v2432_v35 }
 0x473   :  { %v930_v3 = vpack.c.bf16 %v3251_v8, %v3254_v25 }
 0x475   :  { %939 = vrot.lane.b32.xlu1 %v930_v3, %s2777_s21 }
 0x478   :  { %v850_v7 = vpop.permute.xlu0 %849 }
 0x479   :  { %v3263_v12 = vmul.f32 %v850_v7, %v3160_v1 }
 0x47b   :  { %v931_v42 = vpack.c.bf16 %v3263_v12, %v3260_v9 }
 0x47d   :  { %941 = vrot.lane.b32.xlu2 %v931_v42, %s2777_s21 }
 0x4d7   :  { %v938_v28 = vpop.permute.xlu1 %937  ;;  %v942_v15 = vpop.permute.xlu2 %941 }
 0x4d8   :  { %2269 = vmatmul.msk.bf16.vlgmr.msrb.gmra.mxu2 %vm16_vm0, %v938_v28 }
 0x4dd   :  { %v854_v22 = vpop.permute.xlu0 %853 }
 0x4de   :  { %v3273_v14 = vmul.f32 %v854_v22, %v3202_v32 }
 0x4e0   :  { %v932_v1 = vpack.c.bf16 %v3273_v14, %v3270_v13 }
 0x4e2   :  { %943 = vrot.lane.b32.xlu0 %v932_v1, %s2777_s21 }
 0x4e7   :  { %v940_v60 = vpop.permute.xlu1 %939 }
 0x4e8   :  { %2270 = vmatmul.msk.bf16.gmra.mxu2 %vm16_vm0, %v940_v60 }
 0x4f8   :  { %2271 = vmatmul.msk.bf16.gmra.mxu2 %vm16_vm0, %v942_v15 }
 0x554   :  { %v944_v18 = vpop.permute.xlu0 %943 }
 0x555   :  { %2272 = vmatmul.msk.bf16.gmra.mxu2 %vm16_vm0, %v944_v18 }
 0x55b   :  { %v966_v26 = vpop.f32.mrf.mxu2 }
 0x55c   :  { %v986_v32 = vadd.f32 %v2379_v55, %v966_v26 }
 0x55e   :  { %2581 = vtanh.f32 %v986_v32  ;;  %v2273_v6 = vmul.f32 -1.442695, %v986_v32 }
 0x563   :  { %v968_v37 = vpop.f32.mrf.mxu2 }
 0x564   :  { %v2582_v41 = vpop.eup %2581  ;;  %v987_v4 = vadd.f32 %v2380_v33, %v968_v37 }
 0x565   :  { %1170 = vrot.lane.b32.xlu1 %v2582_v41, %s2774_s16 }
 0x566   :  { %2583 = vtanh.f32 %v987_v4  ;;  %v2274_v39 = vmul.f32 -1.442695, %v987_v4 }
 0x56b   :  { %v971_v46 = vpop.f32.mrf.mxu2 }
 0x56c   :  { %v2584_v34 = vpop.eup %2583  ;;  %v988_v27 = vadd.f32 %v2383_v43, %v971_v46 }
 0x56d   :  { %1172 = vrot.lane.b32.xlu2 %v2584_v34, %s2774_s16 }
 0x56e   :  { %2585 = vtanh.f32 %v988_v27  ;;  %v2275_v1 = vmul.f32 -1.442695, %v988_v27 }
 0x573   :  { %v973_v11 = vpop.f32.mrf.mxu2 }
 0x574   :  { %v2586_v51 = vpop.eup %2585  ;;  %v989_v58 = vadd.f32 %v2384_v47, %v973_v11 }
 0x575   :  { %1174 = vrot.lane.b32.xlu0 %v2586_v51, %s2774_s16 }
 0x576   :  { %2587 = vtanh.f32 %v989_v58  ;;  %v2276_v35 = vmul.f32 -1.442695, %v989_v58 }
 0x57b   :  { %v976_v57 = vpop.f32.mrf.mxu2 }
 0x57c   :  { %v2588_v23 = vpop.eup %2587  ;;  %v990_v59 = vadd.f32 %v2387_v53, %v976_v57 }
 0x57d   :  { %1176 = vrot.lane.b32.xlu1 %v2588_v23, %s2774_s16 }
 0x57e   :  { %2589 = vtanh.f32 %v990_v59  ;;  %v2277_v26 = vmul.f32 -1.442695, %v990_v59 }
 0x583   :  { %v978_v61 = vpop.f32.mrf.mxu2 }
 0x584   :  { %v2590_v20 = vpop.eup %2589  ;;  %v991_v36 = vadd.f32 %v2388_v24, %v978_v61  ;;  %v2435_v61 = vld [vmem:[%s4036_s0 + $0x58] sm:$0xff]  }
 0x585   :  { %1178 = vrot.lane.b32.xlu2 %v2590_v20, %s2774_s16 }
 0x586   :  { %2591 = vtanh.f32 %v991_v36  ;;  %v2278_v23 = vmul.f32 -1.442695, %v991_v36 }
 0x587   :  { %2593 = vpow2.f32 %v2274_v39 }
 0x58c   :  { %v2592_v63 = vpop.eup %2591 }
 0x58d   :  { %1180 = vrot.lane.b32.xlu0 %v2592_v63, %s2774_s16  ;;  %v2594_v2 = vpop.eup %2593 }
 0x58e   :  { %v1019_v3 = vadd.f32 1.0, %v2594_v2  ;;  %v2391_v2 = vunpack.c.l.bf16 %v2435_v61 }
 0x590   :  { %2595 = vrcp.f32 %v1019_v3  ;;  %v1052_v55 = vand.u32 2147483648, %v1019_v3  ;;  %vm1046_vm7 = vweird.f32 %v1019_v3  ;;  %v1050_v33 = vand.u32 2147483647, %v1019_v3 }
 0x591   :  { %2597 = vpow2.f32 %v2273_v6 }
 0x592   :  { %v1053_v4 = vor.u32 1.1754944e-38, %v1052_v55  ;;  %vm1051_vm9 = vcmp.eq.f32.partialorder %v1050_v33, 8.507059e+37 }
 0x596   :  { %v2596_v7 = vpop.eup %2595 }
 0x597   :  { %v2598_v42 = vpop.eup %2597  ;;  %v1042_v28 = vmul.f32 %v2596_v7, %v1019_v3  ;;  %vm1047_vm6 = vweird.f32 %v2596_v7 }
 0x598   :  { %v1018_v5 = vadd.f32 1.0, %v2598_v42  ;;  %vm1048_vm8 = vmor %vm1046_vm7, %vm1047_vm6 }
 0x599   :  { %v1043_v22 = vsub.f32 1.0, %v1042_v28 }
 0x59a   :  { %2599 = vrcp.f32 %v1018_v5  ;;  %v1037_v59 = vand.u32 2147483648, %v1018_v5  ;;  %vm1031_vm11 = vweird.f32 %v1018_v5  ;;  %v1035_v24 = vand.u32 2147483647, %v1018_v5 }
 0x59b   :  { %v1044_v60 = vmul.f32 %v2596_v7, %v1043_v22  ;;  %2601 = vpow2.f32 %v2275_v1 }
 0x59c   :  { %2603 = vpow2.f32 %v2276_v35  ;;  %v1038_v39 = vor.u32 1.1754944e-38, %v1037_v59  ;;  %vm1036_vm13 = vcmp.eq.f32.partialorder %v1035_v24, 8.507059e+37  ;;  %v2392_v35 = vunpack.c.h.bf16 %v2435_v61 }
 0x59d   :  { %v1045_v15 = vadd.f32 %v2596_v7, %v1044_v60  ;;  %2605 = vpow2.f32 %v2277_v26 }
 0x59f   :  { %v1049_v37 = vsel %vm1048_vm8, %v2596_v7, %v1045_v15 }
 0x5a0   :  { %v2600_v18 = vpop.eup %2599  ;;  %v3298_v43 = vsel %vm1051_vm9, %v1053_v4, %v1049_v37 }
 0x5a1   :  { %v2602_v32 = vpop.eup %2601  ;;  %v1027_v41 = vmul.f32 %v2600_v18, %v1018_v5  ;;  %vm1032_vm10 = vweird.f32 %v2600_v18 }
 0x5a2   :  { %v3296_v17 = vadd.f32 1.0, %v2602_v32  ;;  %v2604_v47 = vpop.eup %2603  ;;  %vm1033_vm12 = vmor %vm1031_vm11, %vm1032_vm10 }
 0x5a3   :  { %v1028_v27 = vsub.f32 1.0, %v1027_v41  ;;  %v2606_v11 = vpop.eup %2605  ;;  %v3303_v58 = vadd.f32 1.0, %v2604_v47 }
 0x5a4   :  { %2607 = vrcp.f32 %v3296_v17  ;;  %v3305_v16 = vadd.f32 1.0, %v2606_v11  ;;  %vm1061_vm15 = vweird.f32 %v3296_v17 }
 0x5a5   :  { %v1029_v51 = vmul.f32 %v2600_v18, %v1028_v27  ;;  %2609 = vrcp.f32 %v3303_v58  ;;  %vm1076_vm5 = vweird.f32 %v3303_v58 }
 0x5a6   :  { %2611 = vrcp.f32 %v3305_v16  ;;  %vm1091_vm6 = vweird.f32 %v3305_v16 }
 0x5a7   :  { %v1030_v53 = vadd.f32 %v2600_v18, %v1029_v51  ;;  %2613 = vpow2.f32 %v2278_v23 }
 0x5a9   :  { %v1034_v20 = vsel %vm1033_vm12, %v2600_v18, %v1030_v53 }
 0x5aa   :  { %v2608_v57 = vpop.eup %2607  ;;  %v3313_v36 = vsel %vm1036_vm13, %v1038_v39, %v1034_v20  ;;  %v1095_v39 = vand.u32 2147483647, %v3305_v16 }
 0x5ab   :  { %v1057_v63 = vmul.f32 %v2608_v57, %v3296_v17  ;;  %v3315_v6 = vpop.eup %2609  ;;  %vm1062_vm14 = vweird.f32 %v2608_v57 }
 0x5ac   :  { %v2612_v5 = vpop.eup %2611  ;;  %v1072_v18 = vmul.f32 %v3315_v6, %v3303_v58  ;;  %vm1063_vm1 = vmor %vm1061_vm15, %vm1062_vm14  ;;  %vm1077_vm3 = vweird.f32 %v3315_v6  ;;  %vm1096_vm9 = vcmp.eq.f32.partialorder %v1095_v39, 8.507059e+37  ;;  %v1154_v39 = vmul.f32 %v3313_v36, %v3191_v10 }
 0x5ad   :  { %v1058_v28 = vsub.f32 1.0, %v1057_v63  ;;  %v2614_v1 = vpop.eup %2613  ;;  %v1087_v60 = vmul.f32 %v2612_v5, %v3305_v16  ;;  %vm1092_vm4 = vweird.f32 %v2612_v5  ;;  %v1097_v63 = vand.u32 2147483648, %v3305_v16  ;;  %vm1078_vm7 = vmor %vm1076_vm5, %vm1077_vm3 }
 0x5ae   :  { %v3325_v55 = vadd.f32 1.0, %v2614_v1  ;;  %v1073_v37 = vsub.f32 1.0, %v1072_v18  ;;  %vm1093_vm8 = vmor %vm1091_vm6, %vm1092_vm4 }
 0x5af   :  { %v1059_v15 = vmul.f32 %v2608_v57, %v1058_v28  ;;  %v1088_v26 = vsub.f32 1.0, %v1087_v60  ;;  %v1098_v28 = vor.u32 1.1754944e-38, %v1097_v63 }
 0x5b0   :  { %v1074_v11 = vmul.f32 %v3315_v6, %v1073_v37  ;;  %vm1106_vm12 = vweird.f32 %v3325_v55 }
 0x5b1   :  { %v1060_v32 = vadd.f32 %v2608_v57, %v1059_v15  ;;  %v1089_v27 = vmul.f32 %v2612_v5, %v1088_v26 }
 0x5b3   :  { %v1064_v47 = vsel %vm1063_vm1, %v2608_v57, %v1060_v32  ;;  %v1090_v24 = vadd.f32 %v2612_v5, %v1089_v27  ;;  %v1082_v57 = vand.u32 2147483648, %v3303_v58  ;;  %v1110_v32 = vand.u32 2147483647, %v3325_v55 }
 0x5b5   :  { %v1083_v60 = vor.u32 1.1754944e-38, %v1082_v57  ;;  %vm1111_vm14 = vcmp.eq.f32.partialorder %v1110_v32, 8.507059e+37 }
 0x5c7   :  { %v1173_v46 = vpop.permute.xlu2 %1172 }
 0x5c8   :  { %v1195_v34 = vmul.f32 %v1173_v46, %v3298_v43  ;;  %v1067_v46 = vand.u32 2147483648, %v3296_v17 }
 0x5ca   :  { %1212 = vrot.lane.b32.xlu2 %v1195_v34, %s2775_s19  ;;  %v1065_v34 = vand.u32 2147483647, %v3296_v17  ;;  %v1068_v51 = vor.u32 1.1754944e-38, %v1067_v46  ;;  %v1075_v17 = vadd.f32 %v3315_v6, %v1074_v11 }
 0x5cc   :  { %vm1066_vm2 = vcmp.eq.f32.partialorder %v1065_v34, 8.507059e+37 }
 0x5cd   :  { %v3336_v53 = vsel %vm1066_vm2, %v1068_v51, %v1064_v47 }
 0x5d7   :  { %v1171_v3 = vpop.permute.xlu1 %1170 }
 0x5d8   :  { %v1194_v7 = vmul.f32 %v1171_v3, %v3313_v36  ;;  %v981_v42 = vpop.f32.mrf.mxu2  ;;  %v1094_v3 = vsel %vm1093_vm8, %v2612_v5, %v1090_v24 }
 0x5d9   :  { %v3318_v22 = vadd.f32 %v2391_v2, %v981_v42  ;;  %v1080_v2 = vand.u32 2147483647, %v3303_v58  ;;  %v3351_v15 = vsel %vm1096_vm9, %v1098_v28, %v1094_v3 }
 0x5da   :  { %1210 = vrot.lane.b32.xlu1 %v1194_v7, %s2775_s19  ;;  %v1079_v7 = vsel %vm1078_vm7, %v3315_v6, %v1075_v17 }
 0x5db   :  { %2615 = vtanh.f32 %v3318_v22  ;;  %vm1081_vm10 = vcmp.eq.f32.partialorder %v1080_v2, 8.507059e+37  ;;  %v2279_v47 = vmul.f32 -1.442695, %v3318_v22 }
 0x5dc   :  { %2617 = vrcp.f32 %v3325_v55  ;;  %v3353_v16 = vsel %vm1081_vm10, %v1083_v60, %v1079_v7 }
 0x5df   :  { %v1179_v1 = vpop.permute.xlu2 %1178 }
 0x5e0   :  { %v983_v33 = vpop.f32.mrf.mxu2 }
 0x5e1   :  { %v2616_v41 = vpop.eup %2615  ;;  %v3327_v4 = vadd.f32 %v2392_v35, %v983_v33  ;;  %v1198_v35 = vmul.f32 %v1179_v1, %v3351_v15  ;;  %v1112_v33 = vand.u32 2147483648, %v3325_v55 }
 0x5e2   :  { %1182 = vrot.lane.b32.xlu0 %v2616_v41, %s2774_s16  ;;  %v2618_v59 = vpop.eup %2617 }
 0x5e3   :  { %2619 = vtanh.f32 %v3327_v4  ;;  %v1102_v42 = vmul.f32 %v2618_v59, %v3325_v55  ;;  %vm1107_vm11 = vweird.f32 %v2618_v59  ;;  %v1113_v41 = vor.u32 1.1754944e-38, %v1112_v33 }
 0x5e4   :  { %vm1108_vm13 = vmor %vm1106_vm12, %vm1107_vm11  ;;  %2621 = vpow2.f32 %v2279_v47  ;;  %v2280_v11 = vmul.f32 -1.442695, %v3327_v4 }
 0x5e5   :  { %v1103_v26 = vsub.f32 1.0, %v1102_v42 }
 0x5e6   :  { %2623 = vpow2.f32 %v2280_v11 }
 0x5e7   :  { %v1175_v23 = vpop.permute.xlu0 %1174  ;;  %v1104_v6 = vmul.f32 %v2618_v59, %v1103_v26 }
 0x5e8   :  { %v1196_v61 = vmul.f32 %v1175_v23, %v3336_v53 }
 0x5e9   :  { %v2620_v20 = vpop.eup %2619  ;;  %v1105_v5 = vadd.f32 %v2618_v59, %v1104_v6 }
 0x5ea   :  { %1184 = vrot.lane.b32.xlu1 %v2620_v20, %s2774_s16  ;;  %1214 = vrot.lane.b32.xlu2 %v1196_v61, %s2775_s19  ;;  %v2622_v51 = vpop.eup %2621 }
 0x5eb   :  { %v1109_v37 = vsel %vm1108_vm13, %v2618_v59, %v1105_v5  ;;  %v1024_v23 = vadd.f32 1.0, %v2622_v51 }
 0x5ec   :  { %v3362_v46 = vsel %vm1111_vm14, %v1113_v41, %v1109_v37  ;;  %v2624_v55 = vpop.eup %2623 }
 0x5ed   :  { %2625 = vrcp.f32 %v1024_v23  ;;  %v1025_v59 = vadd.f32 1.0, %v2624_v55  ;;  %v1127_v7 = vand.u32 2147483648, %v1024_v23  ;;  %vm1121_vm1 = vweird.f32 %v1024_v23 }
 0x5ee   :  { %v1125_v28 = vand.u32 2147483647, %v1024_v23 }
 0x5ef   :  { %v1177_v18 = vpop.permute.xlu1 %1176  ;;  %2627 = vrcp.f32 %v1025_v59  ;;  %v1142_v32 = vand.u32 2147483648, %v1025_v59  ;;  %vm1136_vm5 = vweird.f32 %v1025_v59 }
 0x5f0   :  { %v1197_v58 = vmul.f32 %v1177_v18, %v3353_v16  ;;  %v1155_v18 = vmul.f32 %v3298_v43, %v3200_v31  ;;  %vm1126_vm3 = vcmp.eq.f32.partialorder %v1125_v28, 8.507059e+37  ;;  %v1140_v31 = vand.u32 2147483647, %v1025_v59 }
 0x5f2   :  { %1216 = vrot.lane.b32.xlu0 %v1197_v58, %s2775_s19  ;;  %1218 = vrot.lane.b32.xlu1 %v1198_v35, %s2775_s19  ;;  %v1128_v35 = vor.u32 1.1754944e-38, %v1127_v7  ;;  %vm1141_vm7 = vcmp.eq.f32.partialorder %v1140_v31, 8.507059e+37 }
 0x5f3   :  { %v2626_v24 = vpop.eup %2625 }
 0x5f4   :  { %v1117_v61 = vmul.f32 %v2626_v24, %v1024_v23  ;;  %vm1122_vm15 = vweird.f32 %v2626_v24 }
 0x5f5   :  { %v2628_v20 = vpop.eup %2627  ;;  %vm1123_vm2 = vmor %vm1121_vm1, %vm1122_vm15 }
 0x5f6   :  { %v1118_v17 = vsub.f32 1.0, %v1117_v61  ;;  %v1132_v57 = vmul.f32 %v2628_v20, %v1025_v59  ;;  %vm1137_vm4 = vweird.f32 %v2628_v20  ;;  %v1158_v61 = vmul.f32 %v3351_v15, %v3224_v29 }
 0x5f7   :  { %vm1138_vm6 = vmor %vm1136_vm5, %vm1137_vm4 }
 0x5f8   :  { %v1119_v63 = vmul.f32 %v2626_v24, %v1118_v17  ;;  %v1133_v3 = vsub.f32 1.0, %v1132_v57  ;;  %v1157_v17 = vmul.f32 %v3353_v16, %v3198_v21 }
 0x5fa   :  { %v1120_v4 = vadd.f32 %v2626_v24, %v1119_v63  ;;  %v1134_v60 = vmul.f32 %v2628_v20, %v1133_v3 }
 0x5fc   :  { %v1124_v1 = vsel %vm1123_vm2, %v2626_v24, %v1120_v4  ;;  %v1135_v33 = vadd.f32 %v2628_v20, %v1134_v60 }
 0x5fd   :  { %v3377_v58 = vsel %vm1126_vm3, %v1128_v35, %v1124_v1 }
 0x5fe   :  { %v1139_v41 = vsel %vm1138_vm6, %v2628_v20, %v1135_v33  ;;  %v1160_v21 = vmul.f32 %v3377_v58, %v3230_v38 }
 0x5ff   :  { %v1181_v34 = vpop.permute.xlu0 %1180 }
 0x600   :  { %v1199_v27 = vmul.f32 %v1181_v34, %v3362_v46  ;;  %v1156_v34 = vmul.f32 %v3336_v53, %v3211_v0  ;;  %v1159_v0 = vmul.f32 %v3362_v46, %v3218_v48 }
 0x602   :  { %1220 = vrot.lane.b32.xlu2 %v1199_v27, %s2775_s19  ;;  %v1143_v27 = vor.u32 1.1754944e-38, %v1142_v32 }
 0x604   :  { %v3387_v51 = vsel %vm1141_vm7, %v1143_v27, %v1139_v41 }
 0x605   :  { %v1161_v28 = vmul.f32 %v3387_v51, %v3243_v40 }
 0x624   :  { %v1213_v42 = vpop.permute.xlu2 %1212 }
 0x625   :  { %v3375_v10 = vadd.f32 %v1213_v42, %v1155_v18 }
 0x644   :  { %v1215_v37 = vpop.permute.xlu2 %1214 }
 0x645   :  { %v3385_v47 = vadd.f32 %v1215_v37, %v1156_v34 }
 0x64c   :  { %v1211_v22 = vpop.permute.xlu1 %1210 }
 0x64d   :  { %v3370_v2 = vadd.f32 %v1211_v22, %v1154_v39 }
 0x64f   :  { %2629 = vtanh.f32 %v3370_v2 }
 0x650   :  { %2631 = vtanh.f32 %v3375_v10 }
 0x651   :  { %2633 = vtanh.f32 %v3385_v47 }
 0x654   :  { %v1183_v26 = vpop.permute.xlu0 %1182 }
 0x655   :  { %v2630_v6 = vpop.eup %2629  ;;  %v1200_v5 = vmul.f32 %v1183_v26, %v3377_v58 }
 0x656   :  { %1258 = vrot.lane.b32.xlu2 %v2630_v6, %s2776_s20  ;;  %v2632_v55 = vpop.eup %2631 }
 0x657   :  { %1222 = vrot.lane.b32.xlu0 %v1200_v5, %s2775_s19  ;;  %v2634_v22 = vpop.eup %2633 }
 0x65c   :  { %v1185_v11 = vpop.permute.xlu1 %1184  ;;  %v1221_v24 = vpop.permute.xlu2 %1220 }
 0x65d   :  { %v1201_v23 = vmul.f32 %v1185_v11, %v3387_v51  ;;  %v3395_v59 = vadd.f32 %v1221_v24, %v1159_v0  ;;  %v2436_v0 = vld [vmem:[%s4036_s0 + $0x60] sm:$0xff]  }
 0x65f   :  { %1224 = vrot.lane.b32.xlu1 %v1201_v23, %s2775_s19  ;;  %1260 = vrot.lane.b32.xlu0 %v2632_v55, %s2776_s20  ;;  %2635 = vtanh.f32 %v3395_v59 }
 0x664   :  { %v1219_v20 = vpop.permute.xlu1 %1218  ;;  %v1217_v63 = vpop.permute.xlu0 %1216 }
 0x665   :  { %v3401_v57 = vadd.f32 %v1219_v20, %v1158_v61  ;;  %v3403_v39 = vadd.f32 %v1217_v63, %v1157_v17  ;;  %v2636_v48 = vpop.eup %2635  ;;  %v2395_v61 = vunpack.c.l.bf16 %v2436_v0 }
 0x667   :  { %2637 = vtanh.f32 %v3401_v57  ;;  %1262 = vrot.lane.b32.xlu1 %v2634_v22, %s2776_s20 }
 0x668   :  { %2639 = vtanh.f32 %v3403_v39 }
 0x66d   :  { %v2638_v29 = vpop.eup %2637 }
 0x66e   :  { %v2640_v4 = vpop.eup %2639  ;;  %1266 = vrot.lane.b32.xlu0 %v2638_v29, %s2776_s20 }
 0x66f   :  { %1264 = vrot.lane.b32.xlu2 %v2640_v4, %s2776_s20  ;;  %1268 = vrot.lane.b32.xlu1 %v2636_v48, %s2776_s20  ;;  %v2437_v48 = vld [vmem:[%s4036_s0 + $0x68] sm:$0xff]  }
 0x670   :  { %v2399_v29 = vunpack.c.l.bf16 %v2437_v48 }
 0x6b0   :  { %v1259_v42 = vpop.permute.xlu2 %1258 }
 0x6b1   :  { %v3420_v35 = vmul.f32 %v1259_v42, %v3313_v36 }
 0x6c9   :  { %v1223_v3 = vpop.permute.xlu0 %1222  ;;  %v1265_v40 = vpop.permute.xlu2 %1264 }
 0x6ca   :  { %v3414_v7 = vadd.f32 %v1223_v3, %v1160_v21  ;;  %v3433_v36 = vmul.f32 %v1265_v40, %v3353_v16  ;;  %v2438_v40 = vld [vmem:[%s4036_s0 + $0x70] sm:$0xff]  }
 0x6cc   :  { %2641 = vtanh.f32 %v3414_v7 }
 0x6d1   :  { %v1225_v1 = vpop.permute.xlu1 %1224  ;;  %v1261_v60 = vpop.permute.xlu0 %1260 }
 0x6d2   :  { %v2642_v18 = vpop.eup %2641  ;;  %v3422_v26 = vadd.f32 %v1225_v1, %v1161_v28  ;;  %v3425_v6 = vmul.f32 %v1261_v60, %v3298_v43  ;;  %v2400_v28 = vunpack.c.h.bf16 %v2437_v48 }
 0x6d3   :  { %1270 = vrot.lane.b32.xlu0 %v2642_v18, %s2776_s20 }
 0x6d4   :  { %2643 = vtanh.f32 %v3422_v26  ;;  %v1348_v38 = vpack.c.bf16 %v3425_v6, %v3420_v35 }
 0x6d6   :  { %1356 = vrot.lane.b32.xlu2 %v1348_v38, %s2777_s21 }
 0x6d9   :  { %v1263_v5 = vpop.permute.xlu1 %1262 }
 0x6da   :  { %v2644_v33 = vpop.eup %2643  ;;  %v3436_v32 = vmul.f32 %v1263_v5, %v3336_v53  ;;  %v2403_v5 = vunpack.c.l.bf16 %v2438_v40 }
 0x6db   :  { %1272 = vrot.lane.b32.xlu1 %v2644_v33, %s2776_s20 }
 0x6dc   :  { %v1349_v43 = vpack.c.bf16 %v3433_v36, %v3436_v32 }
 0x6de   :  { %1358 = vrot.lane.b32.xlu2 %v1349_v43, %s2777_s21 }
 0x6e0   :  { %v1267_v37 = vpop.permute.xlu0 %1266 }
 0x6e1   :  { %v3443_v31 = vmul.f32 %v1267_v37, %v3351_v15  ;;  %v1269_v41 = vpop.permute.xlu1 %1268  ;;  %v2404_v37 = vunpack.c.h.bf16 %v2438_v40 }
 0x6e2   :  { %v3446_v34 = vmul.f32 %v1269_v41, %v3362_v46 }
 0x6e4   :  { %v1350_v16 = vpack.c.bf16 %v3446_v34, %v3443_v31 }
 0x6e6   :  { %1360 = vrot.lane.b32.xlu0 %v1350_v16, %s2777_s21 }
 0x730   :  { %v1357_v53 = vpop.permute.xlu2 %1356 }
 0x731   :  { %2297 = vmatmul.msk.bf16.vlgmr.msrb.gmra.mxu3 %vm16_vm0, %v1357_v53 }
 0x738   :  { %v1359_v27 = vpop.permute.xlu2 %1358 }
 0x741   :  { %2298 = vmatmul.msk.bf16.gmra.mxu3 %vm16_vm0, %v1359_v27 }
 0x745   :  { %v1271_v11 = vpop.permute.xlu0 %1270 }
 0x746   :  { %v3454_v15 = vmul.f32 %v1271_v11, %v3377_v58  ;;  %v2396_v58 = vunpack.c.h.bf16 %v2436_v0 }
 0x74d   :  { %v1273_v23 = vpop.permute.xlu1 %1272 }
 0x74e   :  { %v3457_v55 = vmul.f32 %v1273_v23, %v3387_v51 }
 0x750   :  { %v1351_v46 = vpack.c.bf16 %v3457_v55, %v3454_v15 }
 0x752   :  { %1362 = vrot.lane.b32.xlu1 %v1351_v46, %s2777_s21 }
 0x758   :  { %v1361_v24 = vpop.permute.xlu0 %1360 }
 0x759   :  { %2299 = vmatmul.msk.bf16.gmra.mxu3 %vm16_vm0, %v1361_v24 }
 0x7b4   :  { %v1385_v17 = vpop.f32.mrf.mxu3 }
 0x7b5   :  { %v1405_v20 = vadd.f32 %v2395_v61, %v1385_v17 }
 0x7b7   :  { %2645 = vtanh.f32 %v1405_v20  ;;  %v2301_v27 = vmul.f32 -1.442695, %v1405_v20 }
 0x7bc   :  { %v1387_v63 = vpop.f32.mrf.mxu3 }
 0x7bd   :  { %v2646_v51 = vpop.eup %2645  ;;  %v1406_v22 = vadd.f32 %v2396_v58, %v1387_v63 }
 0x7be   :  { %1589 = vrot.lane.b32.xlu2 %v2646_v51, %s2774_s16 }
 0x7bf   :  { %2647 = vtanh.f32 %v1406_v22  ;;  %v2302_v17 = vmul.f32 -1.442695, %v1406_v22 }
 0x7c4   :  { %v1390_v4 = vpop.f32.mrf.mxu3  ;;  %v1363_v21 = vpop.permute.xlu1 %1362 }
 0x7c5   :  { %v2648_v3 = vpop.eup %2647  ;;  %v1407_v42 = vadd.f32 %v2399_v29, %v1390_v4  ;;  %2300 = vmatmul.msk.bf16.gmra.mxu3 %vm16_vm0, %v1363_v21 }
 0x7c6   :  { %1591 = vrot.lane.b32.xlu0 %v2648_v3, %s2774_s16 }
 0x7c7   :  { %2649 = vtanh.f32 %v1407_v42  ;;  %v2303_v48 = vmul.f32 -1.442695, %v1407_v42 }
 0x7cc   :  { %v1392_v1 = vpop.f32.mrf.mxu3 }
 0x7cd   :  { %v2650_v60 = vpop.eup %2649  ;;  %v1408_v18 = vadd.f32 %v2400_v28, %v1392_v1 }
 0x7ce   :  { %1593 = vrot.lane.b32.xlu1 %v2650_v60, %s2774_s16 }
 0x7cf   :  { %2651 = vtanh.f32 %v1408_v18 }
 0x7d5   :  { %v2652_v38 = vpop.eup %2651 }
 0x7d6   :  { %1595 = vrot.lane.b32.xlu2 %v2652_v38, %s2774_s16 }
 0x7dc   :  { %v1395_v33 = vpop.f32.mrf.mxu3 }
 0x7dd   :  { %v1409_v43 = vadd.f32 %v2403_v5, %v1395_v33 }
 0x7df   :  { %2653 = vtanh.f32 %v1409_v43 }
 0x7e4   :  { %v1397_v41 = vpop.f32.mrf.mxu3 }
 0x7e5   :  { %v2654_v16 = vpop.eup %2653  ;;  %v1410_v53 = vadd.f32 %v2404_v37, %v1397_v41  ;;  %v2304_v37 = vmul.f32 -1.442695, %v1408_v18 }
 0x7e6   :  { %1597 = vrot.lane.b32.xlu0 %v2654_v16, %s2774_s16 }
 0x7e7   :  { %2655 = vtanh.f32 %v1410_v53 }
 0x7e8   :  { %2657 = vpow2.f32 %v2301_v27 }
 0x7ed   :  { %v2656_v11 = vpop.eup %2655 }
 0x7ee   :  { %1599 = vrot.lane.b32.xlu1 %v2656_v11, %s2774_s16  ;;  %v2658_v23 = vpop.eup %2657 }
 0x7ef   :  { %v1437_v46 = vadd.f32 1.0, %v2658_v23  ;;  %v2305_v23 = vmul.f32 -1.442695, %v1409_v43 }
 0x7f1   :  { %2659 = vrcp.f32 %v1437_v46  ;;  %v1456_v51 = vand.u32 2147483648, %v1437_v46  ;;  %vm1450_vm9 = vweird.f32 %v1437_v46  ;;  %v1454_v29 = vand.u32 2147483647, %v1437_v46 }
 0x7f2   :  { %2661 = vpow2.f32 %v2302_v17 }
 0x7f3   :  { %v1457_v21 = vor.u32 1.1754944e-38, %v1456_v51  ;;  %2663 = vpow2.f32 %v2303_v48  ;;  %vm1455_vm11 = vcmp.eq.f32.partialorder %v1454_v29, 8.507059e+37 }
 0x7f7   :  { %v2660_v24 = vpop.eup %2659 }
 0x7f8   :  { %v1446_v0 = vmul.f32 %v2660_v24, %v1437_v46  ;;  %vm1451_vm8 = vweird.f32 %v2660_v24  ;;  %v2662_v20 = vpop.eup %2661 }
 0x7f9   :  { %vm1452_vm10 = vmor %vm1450_vm9, %vm1451_vm8  ;;  %v1438_v3 = vadd.f32 1.0, %v2662_v20  ;;  %v2664_v60 = vpop.eup %2663 }
 0x7fa   :  { %v1447_v61 = vsub.f32 1.0, %v1446_v0  ;;  %v1439_v38 = vadd.f32 1.0, %v2664_v60 }
 0x7fb   :  { %2665 = vrcp.f32 %v1438_v3  ;;  %v1471_v46 = vand.u32 2147483648, %v1438_v3  ;;  %vm1465_vm13 = vweird.f32 %v1438_v3  ;;  %v1469_v0 = vand.u32 2147483647, %v1438_v3 }
 0x7fc   :  { %v1448_v58 = vmul.f32 %v2660_v24, %v1447_v61  ;;  %2667 = vrcp.f32 %v1439_v38  ;;  %v1486_v43 = vand.u32 2147483648, %v1439_v38  ;;  %vm1480_vm2 = vweird.f32 %v1439_v38 }
 0x7fd   :  { %2669 = vpow2.f32 %v2304_v37  ;;  %vm1470_vm15 = vcmp.eq.f32.partialorder %v1469_v0, 8.507059e+37 }
 0x7fe   :  { %v1449_v63 = vadd.f32 %v2660_v24, %v1448_v58  ;;  %2671 = vpow2.f32 %v2305_v23 }
 0x800   :  { %v1453_v4 = vsel %vm1452_vm10, %v2660_v24, %v1449_v63  ;;  %v2306_v24 = vmul.f32 -1.442695, %v1410_v53  ;;  %v1472_v63 = vor.u32 1.1754944e-38, %v1471_v46  ;;  %v1484_v53 = vand.u32 2147483647, %v1439_v38 }
 0x801   :  { %v3479_v28 = vsel %vm1455_vm11, %v1457_v21, %v1453_v4  ;;  %v2666_v42 = vpop.eup %2665 }
 0x802   :  { %v1461_v40 = vmul.f32 %v2666_v42, %v1438_v3  ;;  %v2668_v33 = vpop.eup %2667  ;;  %vm1466_vm12 = vweird.f32 %v2666_v42  ;;  %2673 = vpow2.f32 %v2306_v24  ;;  %vm1485_vm4 = vcmp.eq.f32.partialorder %v1484_v53, 8.507059e+37 }
 0x803   :  { %v1476_v16 = vmul.f32 %v2668_v33, %v1439_v38  ;;  %v2670_v61 = vpop.eup %2669  ;;  %vm1467_vm14 = vmor %vm1465_vm13, %vm1466_vm12  ;;  %vm1481_vm1 = vweird.f32 %v2668_v33  ;;  %v2439_v38 = vld [vmem:[%s4036_s0 + $0x78] sm:$0xff]  }
 0x804   :  { %v1462_v5 = vsub.f32 1.0, %v1461_v40  ;;  %v1440_v51 = vadd.f32 1.0, %v2670_v61  ;;  %v2672_v4 = vpop.eup %2671  ;;  %vm1482_vm3 = vmor %vm1480_vm2, %vm1481_vm1  ;;  %v2408_v61 = vunpack.c.h.bf16 %v2439_v38 }
 0x805   :  { %v1477_v11 = vsub.f32 1.0, %v1476_v16 }
 0x806   :  { %v1463_v41 = vmul.f32 %v2666_v42, %v1462_v5  ;;  %2675 = vrcp.f32 %v1440_v51  ;;  %vm1495_vm6 = vweird.f32 %v1440_v51 }
 0x807   :  { %v1478_v58 = vmul.f32 %v2668_v33, %v1477_v11 }
 0x808   :  { %v1464_v27 = vadd.f32 %v2666_v42, %v1463_v41  ;;  %v2674_v21 = vpop.eup %2673  ;;  %v2407_v41 = vunpack.c.l.bf16 %v2439_v38 }
 0x809   :  { %v1479_v20 = vadd.f32 %v2668_v33, %v1478_v58  ;;  %v3489_v60 = vadd.f32 1.0, %v2674_v21 }
 0x80a   :  { %v1468_v17 = vsel %vm1467_vm14, %v2666_v42, %v1464_v27 }
 0x80b   :  { %v3483_v18 = vsel %vm1470_vm15, %v1472_v63, %v1468_v17  ;;  %v1483_v3 = vsel %vm1482_vm3, %v2668_v33, %v1479_v20  ;;  %v1501_v20 = vand.u32 2147483648, %v1440_v51  ;;  %vm1525_vm13 = vweird.f32 %v3489_v60 }
 0x80c   :  { %v2676_v5 = vpop.eup %2675 }
 0x80d   :  { %v1491_v33 = vmul.f32 %v2676_v5, %v1440_v51  ;;  %vm1496_vm5 = vweird.f32 %v2676_v5 }
 0x80e   :  { %vm1497_vm7 = vmor %vm1495_vm6, %vm1496_vm5 }
 0x80f   :  { %v1492_v16 = vsub.f32 1.0, %v1491_v33 }
 0x811   :  { %v1493_v24 = vmul.f32 %v2676_v5, %v1492_v16 }
 0x813   :  { %v1494_v58 = vadd.f32 %v2676_v5, %v1493_v24  ;;  %v1531_v24 = vand.u32 2147483648, %v3489_v60 }
 0x815   :  { %v1498_v21 = vsel %vm1497_vm7, %v2676_v5, %v1494_v58 }
 0x818   :  { %v1590_v1 = vpop.permute.xlu2 %1589 }
 0x819   :  { %v1613_v22 = vmul.f32 %v1590_v1, %v3479_v28  ;;  %v1487_v1 = vor.u32 1.1754944e-38, %v1486_v43 }
 0x81b   :  { %1629 = vrot.lane.b32.xlu2 %v1613_v22, %s2775_s19  ;;  %v3487_v22 = vadd.f32 1.0, %v2672_v4  ;;  %v3491_v42 = vsel %vm1485_vm4, %v1487_v1, %v1483_v3  ;;  %v1499_v4 = vand.u32 2147483647, %v1440_v51  ;;  %v1502_v1 = vor.u32 1.1754944e-38, %v1501_v20 }
 0x81d   :  { %2677 = vrcp.f32 %v3487_v22  ;;  %vm1500_vm8 = vcmp.eq.f32.partialorder %v1499_v4, 8.507059e+37  ;;  %vm1510_vm11 = vweird.f32 %v3487_v22  ;;  %v1514_v5 = vand.u32 2147483647, %v3487_v22 }
 0x81e   :  { %2679 = vrcp.f32 %v3489_v60  ;;  %v3506_v38 = vsel %vm1500_vm8, %v1502_v1, %v1498_v21 }
 0x81f   :  { %vm1515_vm15 = vcmp.eq.f32.partialorder %v1514_v5, 8.507059e+37 }
 0x823   :  { %v2678_v11 = vpop.eup %2677 }
 0x824   :  { %v2680_v46 = vpop.eup %2679  ;;  %v1506_v0 = vmul.f32 %v2678_v11, %v3487_v22  ;;  %vm1511_vm9 = vweird.f32 %v2678_v11 }
 0x825   :  { %v1521_v17 = vmul.f32 %v2680_v46, %v3489_v60  ;;  %vm1526_vm10 = vweird.f32 %v2680_v46  ;;  %vm1512_vm12 = vmor %vm1510_vm11, %vm1511_vm9 }
 0x826   :  { %vm1527_vm14 = vmor %vm1525_vm13, %vm1526_vm10 }
 0x827   :  { %v1522_v53 = vsub.f32 1.0, %v1521_v17 }
 0x838   :  { %v1592_v48 = vpop.permute.xlu0 %1591 }
 0x839   :  { %v1614_v29 = vmul.f32 %v1592_v48, %v3483_v18  ;;  %v1507_v48 = vsub.f32 1.0, %v1506_v0  ;;  %v1529_v0 = vand.u32 2147483647, %v3489_v60  ;;  %v1573_v60 = vmul.f32 %v3479_v28, %v3370_v2 }
 0x83b   :  { %1631 = vrot.lane.b32.xlu0 %v1614_v29, %s2775_s19  ;;  %v1508_v3 = vmul.f32 %v2678_v11, %v1507_v48  ;;  %v1532_v48 = vor.u32 1.1754944e-38, %v1531_v24  ;;  %vm1530_vm1 = vcmp.eq.f32.partialorder %v1529_v0, 8.507059e+37 }
 0x840   :  { %v1594_v40 = vpop.permute.xlu1 %1593 }
 0x841   :  { %v1615_v37 = vmul.f32 %v1594_v40, %v3491_v42  ;;  %v1596_v40 = vpop.permute.xlu2 %1595 }
 0x842   :  { %v1616_v33 = vmul.f32 %v1596_v40, %v3506_v38 }
 0x843   :  { %1633 = vrot.lane.b32.xlu0 %v1615_v37, %s2775_s19  ;;  %v1523_v37 = vmul.f32 %v2680_v46, %v1522_v53 }
 0x845   :  { %v1524_v51 = vadd.f32 %v2680_v46, %v1523_v37 }
 0x848   :  { %v1400_v27 = vpop.f32.mrf.mxu3 }
 0x849   :  { %v3500_v23 = vadd.f32 %v2407_v41, %v1400_v27  ;;  %v1509_v41 = vadd.f32 %v2678_v11, %v1508_v3  ;;  %v1516_v27 = vand.u32 2147483648, %v3487_v22 }
 0x84b   :  { %2681 = vtanh.f32 %v3500_v23  ;;  %v1517_v17 = vor.u32 1.1754944e-38, %v1516_v27  ;;  %v2307_v37 = vmul.f32 -1.442695, %v3500_v23 }
 0x850   :  { %v1402_v63 = vpop.f32.mrf.mxu3 }
 0x851   :  { %v2682_v29 = vpop.eup %2681  ;;  %v1412_v43 = vadd.f32 %v2408_v61, %v1402_v63  ;;  %v1513_v61 = vsel %vm1512_vm12, %v2678_v11, %v1509_v41  ;;  %v1528_v63 = vsel %vm1527_vm14, %v2680_v46, %v1524_v51 }
 0x852   :  { %1601 = vrot.lane.b32.xlu1 %v2682_v29, %s2774_s16  ;;  %v3517_v29 = vsel %vm1515_vm15, %v1517_v17, %v1513_v61  ;;  %v3520_v53 = vsel %vm1530_vm1, %v1532_v48, %v1528_v63 }
 0x853   :  { %2683 = vtanh.f32 %v1412_v43  ;;  %v2308_v3 = vmul.f32 -1.442695, %v1412_v43 }
 0x858   :  { %v1598_v58 = vpop.permute.xlu0 %1597 }
 0x859   :  { %v2684_v16 = vpop.eup %2683  ;;  %v1617_v22 = vmul.f32 %v1598_v58, %v3517_v29 }
 0x85a   :  { %1635 = vrot.lane.b32.xlu1 %v1616_v33, %s2775_s19  ;;  %1603 = vrot.lane.b32.xlu2 %v2684_v16, %s2774_s16 }
 0x860   :  { %v1600_v20 = vpop.permute.xlu1 %1599 }
 0x861   :  { %v1618_v4 = vmul.f32 %v1600_v20, %v3520_v53 }
 0x862   :  { %1637 = vrot.lane.b32.xlu2 %v1617_v22, %s2775_s19  ;;  %v1575_v22 = vmul.f32 %v3491_v42, %v3385_v47 }
 0x863   :  { %1639 = vrot.lane.b32.xlu0 %v1618_v4, %s2775_s19 }
 0x875   :  { %v1630_v11 = vpop.permute.xlu2 %1629 }
 0x876   :  { %v3527_v46 = vadd.f32 %v1630_v11, %v1573_v60 }
 0x878   :  { %2685 = vtanh.f32 %v3527_v46 }
 0x879   :  { %2687 = vpow2.f32 %v2308_v3 }
 0x87e   :  { %v2686_v21 = vpop.eup %2685 }
 0x87f   :  { %1677 = vrot.lane.b32.xlu0 %v2686_v21, %s2776_s20  ;;  %v2688_v1 = vpop.eup %2687 }
 0x880   :  { %v1444_v40 = vadd.f32 1.0, %v2688_v1 }
 0x882   :  { %2689 = vrcp.f32 %v1444_v40  ;;  %v1561_v61 = vand.u32 2147483648, %v1444_v40  ;;  %vm1555_vm3 = vweird.f32 %v1444_v40  ;;  %v1559_v43 = vand.u32 2147483647, %v1444_v40 }
 0x883   :  { %2691 = vpow2.f32 %v2307_v37 }
 0x884   :  { %v1562_v23 = vor.u32 1.1754944e-38, %v1561_v61  ;;  %vm1560_vm5 = vcmp.eq.f32.partialorder %v1559_v43, 8.507059e+37 }
 0x888   :  { %v2690_v33 = vpop.eup %2689 }
 0x889   :  { %v2692_v41 = vpop.eup %2691  ;;  %v1551_v16 = vmul.f32 %v2690_v33, %v1444_v40  ;;  %vm1556_vm2 = vweird.f32 %v2690_v33 }
 0x88a   :  { %v1443_v2 = vadd.f32 1.0, %v2692_v41  ;;  %vm1557_vm4 = vmor %vm1555_vm3, %vm1556_vm2 }
 0x88b   :  { %v1552_v27 = vsub.f32 1.0, %v1551_v16 }
 0x88c   :  { %2693 = vrcp.f32 %v1443_v2  ;;  %v1546_v40 = vand.u32 2147483648, %v1443_v2  ;;  %vm1540_vm7 = vweird.f32 %v1443_v2  ;;  %v1544_v37 = vand.u32 2147483647, %v1443_v2 }
 0x88d   :  { %v1553_v51 = vmul.f32 %v2690_v33, %v1552_v27 }
 0x88e   :  { %v1547_v41 = vor.u32 1.1754944e-38, %v1546_v40  ;;  %vm1545_vm9 = vcmp.eq.f32.partialorder %v1544_v37, 8.507059e+37 }
 0x88f   :  { %v1554_v24 = vadd.f32 %v2690_v33, %v1553_v51 }
 0x891   :  { %v1558_v17 = vsel %vm1557_vm4, %v2690_v33, %v1554_v24  ;;  %v1574_v33 = vmul.f32 %v3483_v18, %v3375_v10  ;;  %v1576_v10 = vmul.f32 %v3506_v38, %v3403_v39 }
 0x892   :  { %v2694_v0 = vpop.eup %2693  ;;  %v3532_v48 = vsel %vm1560_vm5, %v1562_v23, %v1558_v17 }
 0x893   :  { %v1536_v58 = vmul.f32 %v2694_v0, %v1443_v2  ;;  %vm1541_vm6 = vweird.f32 %v2694_v0  ;;  %v1577_v2 = vmul.f32 %v3517_v29, %v3401_v57 }
 0x894   :  { %vm1542_vm8 = vmor %vm1540_vm7, %vm1541_vm6 }
 0x895   :  { %v1537_v60 = vsub.f32 1.0, %v1536_v58  ;;  %v1578_v58 = vmul.f32 %v3520_v53, %v3395_v59 }
 0x897   :  { %v1538_v21 = vmul.f32 %v2694_v0, %v1537_v60 }
 0x899   :  { %v1539_v3 = vadd.f32 %v2694_v0, %v1538_v21 }
 0x89b   :  { %v1543_v47 = vsel %vm1542_vm8, %v2694_v0, %v1539_v3 }
 0x89c   :  { %v3546_v51 = vsel %vm1545_vm9, %v1547_v41, %v1543_v47 }
 0x89d   :  { %v1579_v21 = vmul.f32 %v3546_v51, %v3414_v7 }
 0x8ad   :  { %v1632_v5 = vpop.permute.xlu0 %1631 }
 0x8ae   :  { %v3544_v16 = vadd.f32 %v1632_v5, %v1574_v33 }
 0x8b4   :  { %v1604_v63 = vpop.permute.xlu2 %1603 }
 0x8b5   :  { %v1620_v20 = vmul.f32 %v1604_v63, %v3532_v48  ;;  %v1634_v4 = vpop.permute.xlu0 %1633 }
 0x8b6   :  { %v3537_v11 = vadd.f32 %v1634_v4, %v1575_v22 }
 0x8b7   :  { %1643 = vrot.lane.b32.xlu2 %v1620_v20, %s2775_s19  ;;  %v1580_v20 = vmul.f32 %v3532_v48, %v3422_v26 }
 0x8b8   :  { %2695 = vtanh.f32 %v3537_v11 }
 0x8b9   :  { %2697 = vtanh.f32 %v3544_v16 }
 0x8bc   :  { %v1638_v61 = vpop.permute.xlu2 %1637 }
 0x8bd   :  { %v3555_v0 = vadd.f32 %v1638_v61, %v1577_v2 }
 0x8be   :  { %v2696_v1 = vpop.eup %2695 }
 0x8bf   :  { %1681 = vrot.lane.b32.xlu2 %v2696_v1, %s2776_s20  ;;  %v2698_v17 = vpop.eup %2697 }
 0x8c4   :  { %v1602_v27 = vpop.permute.xlu1 %1601 }
 0x8c5   :  { %v1619_v24 = vmul.f32 %v1602_v27, %v3546_v51 }
 0x8c7   :  { %1641 = vrot.lane.b32.xlu1 %v1619_v24, %s2775_s19 }
 0x8cc   :  { %v1636_v5 = vpop.permute.xlu1 %1635 }
 0x8cd   :  { %v3557_v43 = vadd.f32 %v1636_v5, %v1576_v10 }
 0x8cf   :  { %2699 = vtanh.f32 %v3557_v43  ;;  %1679 = vrot.lane.b32.xlu1 %v2698_v17, %s2776_s20 }
 0x8d0   :  { %2701 = vtanh.f32 %v3555_v0 }
 0x8d5   :  { %v2700_v23 = vpop.eup %2699  ;;  %v1640_v57 = vpop.permute.xlu0 %1639 }
 0x8d6   :  { %v2702_v63 = vpop.eup %2701  ;;  %v3564_v22 = vadd.f32 %v1640_v57, %v1578_v58  ;;  %1683 = vrot.lane.b32.xlu0 %v2700_v23, %s2776_s20  ;;  %v2440_v23 = vld [vmem:[%s4036_s0 + $0x80] sm:$0xff]  }
 0x8d7   :  { %1685 = vrot.lane.b32.xlu1 %v2702_v63, %s2776_s20  ;;  %v2411_v57 = vunpack.c.l.bf16 %v2440_v23 }
 0x8d8   :  { %2703 = vtanh.f32 %v3564_v22 }
 0x8de   :  { %v2704_v39 = vpop.eup %2703 }
 0x8df   :  { %1687 = vrot.lane.b32.xlu2 %v2704_v39, %s2776_s20 }
 0x8f1   :  { %v1678_v40 = vpop.permute.xlu0 %1677 }
 0x8f2   :  { %v3582_v33 = vmul.f32 %v1678_v40, %v3479_v28 }
 0x911   :  { %v1644_v4 = vpop.permute.xlu2 %1643 }
 0x912   :  { %v3572_v60 = vadd.f32 %v1644_v4, %v1580_v20  ;;  %v2412_v4 = vunpack.c.h.bf16 %v2440_v23 }
 0x914   :  { %2705 = vtanh.f32 %v3572_v60 }
 0x919   :  { %v1682_v37 = vpop.permute.xlu2 %1681 }
 0x91a   :  { %v2706_v59 = vpop.eup %2705  ;;  %v3592_v61 = vmul.f32 %v1682_v37, %v3491_v42  ;;  %v2441_v37 = vld [vmem:[%s4036_s0 + $0x88] sm:$0xff]  }
 0x91b   :  { %1691 = vrot.lane.b32.xlu2 %v2706_v59, %s2776_s20 }
 0x939   :  { %v1642_v3 = vpop.permute.xlu1 %1641  ;;  %v1688_v27 = vpop.permute.xlu2 %1687 }
 0x93a   :  { %v3578_v1 = vadd.f32 %v1642_v3, %v1579_v21  ;;  %v3598_v10 = vmul.f32 %v1688_v27, %v3520_v53 }
 0x93c   :  { %2707 = vtanh.f32 %v3578_v1 }
 0x941   :  { %v1680_v47 = vpop.permute.xlu1 %1679 }
 0x942   :  { %v2708_v26 = vpop.eup %2707  ;;  %v3585_v41 = vmul.f32 %v1680_v47, %v3483_v18  ;;  %v2415_v47 = vunpack.c.l.bf16 %v2441_v37 }
 0x943   :  { %1689 = vrot.lane.b32.xlu1 %v2708_v26, %s2776_s20 }
 0x944   :  { %v1767_v7 = vpack.c.bf16 %v3585_v41, %v3582_v33 }
 0x946   :  { %1775 = vrot.lane.b32.xlu0 %v1767_v7, %s2777_s21 }
 0x948   :  { %v1684_v24 = vpop.permute.xlu0 %1683 }
 0x949   :  { %v3595_v2 = vmul.f32 %v1684_v24, %v3506_v38  ;;  %v1686_v28 = vpop.permute.xlu1 %1685  ;;  %v2416_v24 = vunpack.c.h.bf16 %v2441_v37 }
 0x94a   :  { %v3601_v18 = vmul.f32 %v1686_v28, %v3517_v29 }
 0x94b   :  { %v1768_v5 = vpack.c.bf16 %v3595_v2, %v3592_v61 }
 0x94c   :  { %v1769_v17 = vpack.c.bf16 %v3598_v10, %v3601_v18 }
 0x94e   :  { %1779 = vrot.lane.b32.xlu1 %v1769_v17, %s2777_s21  ;;  %1777 = vrot.lane.b32.xlu0 %v1768_v5, %s2777_s21 }
 0x956   :  { %463 = vrot.lane.b32.xlu1 %v3020_v45, %s2777_s21  ;;  %461 = vrot.lane.b32.xlu0 %v3017_v44, %s2777_s21 }
 0x95e   :  { %469 = vrot.lane.b32.xlu1 %v3038_v52, %s2777_s21  ;;  %467 = vrot.lane.b32.xlu0 %v3029_v50, %s2777_s21 }
 0x966   :  { %475 = vrot.lane.b32.xlu1 %v3047_v56, %s2777_s21  ;;  %473 = vrot.lane.b32.xlu0 %v3044_v54, %s2777_s21 }
 0x96e   :  { %883 = vrot.lane.b32.xlu1 %v3254_v25, %s2777_s21  ;;  %881 = vrot.lane.b32.xlu0 %v3238_v62, %s2777_s21 }
 0x975   :  { %v1692_v44 = vpop.permute.xlu2 %1691 }
 0x976   :  { %889 = vrot.lane.b32.xlu1 %v3263_v12, %s2777_s21  ;;  %887 = vrot.lane.b32.xlu0 %v3260_v9, %s2777_s21  ;;  %v3632_v50 = vmul.f32 %v1692_v44, %v3532_v48  ;;  %v2442_v44 = vld [vmem:[%s4036_s0 + $0x90] sm:$0xff]  }
 0x97e   :  { %893 = vrot.lane.b32.xlu0 %v3273_v14, %s2777_s21 }
 0x9b5   :  { %v1690_v45 = vpop.permute.xlu1 %1689 }
 0x9b6   :  { %v3635_v52 = vmul.f32 %v1690_v45, %v3546_v51  ;;  %v2419_v45 = vunpack.c.l.bf16 %v2442_v44 }
 0x9b8   :  { %v1770_v54 = vpack.c.bf16 %v3632_v50, %v3635_v52  ;;  %v1776_v56 = vpop.permute.xlu0 %1775 }
 0x9b9   :  { %2325 = vmatmul.msk.bf16.vlgmr.msrb.gmra.mxu0 %vm16_vm0, %v1776_v56 }
 0x9ba   :  { %1781 = vrot.lane.b32.xlu2 %v1770_v54, %s2777_s21 }
 0x9c0   :  { %v1780_v62 = vpop.permute.xlu1 %1779  ;;  %v1778_v25 = vpop.permute.xlu0 %1777 }
 0x9c2   :  { %465 = vrot.lane.b32.xlu2 %v3026_v49, %s2777_s21 }
 0x9c8   :  { %v464_v9 = vpop.permute.xlu1 %463  ;;  %v462_v12 = vpop.permute.xlu0 %461 }
 0x9c9   :  { %486 = vst.msk [vmem:[%s4037_s2 + $0x8] sm:$0xff] %vm16_vm0, %v464_v9  ;;  %2326 = vmatmul.msk.bf16.gmra.mxu0 %vm16_vm0, %v1778_v25  ;;  %v2420_v25 = vunpack.c.h.bf16 %v2442_v44 }
 0x9ca   :  { %485 = vst.msk [vmem:[%s4037_s2] sm:$0xff] %vm16_vm0, %v462_v12  ;;  %471 = vrot.lane.b32.xlu2 %v3035_v19, %s2777_s21 }
 0x9d0   :  { %v470_v14 = vpop.permute.xlu1 %469  ;;  %v468_v42 = vpop.permute.xlu0 %467 }
 0x9d1   :  { %489 = vst.msk [vmem:[%s4037_s2 + $0x20] sm:$0xff] %vm16_vm0, %v470_v14 }
 0x9d2   :  { %488 = vst.msk [vmem:[%s4037_s2 + $0x18] sm:$0xff] %vm16_vm0, %v468_v42  ;;  %879 = vrot.lane.b32.xlu2 %v3241_v30, %s2777_s21 }
 0x9d8   :  { %v476_v49 = vpop.permute.xlu1 %475  ;;  %v474_v38 = vpop.permute.xlu0 %473 }
 0x9d9   :  { %492 = vst.msk [vmem:[%s4037_s2 + $0x38] sm:$0xff] %vm16_vm0, %v476_v49  ;;  %2327 = vmatmul.msk.bf16.gmra.mxu0 %vm16_vm0, %v1780_v62 }
 0x9da   :  { %491 = vst.msk [vmem:[%s4037_s2 + $0x30] sm:$0xff] %vm16_vm0, %v474_v38  ;;  %885 = vrot.lane.b32.xlu2 %v3251_v8, %s2777_s21 }
 0x9e0   :  { %v884_v19 = vpop.permute.xlu1 %883  ;;  %v882_v29 = vpop.permute.xlu0 %881 }
 0x9e1   :  { %2255 = vst.msk [vmem:[%s4037_s2 + $0x50] sm:$0xff] %vm16_vm0, %v884_v19  ;;  %v2443_v19 = vld [vmem:[%s4036_s0 + $0x98] sm:$0xff]  }
 0x9e2   :  { %2254 = vst.msk [vmem:[%s4037_s2 + $0x48] sm:$0xff] %vm16_vm0, %v882_v29  ;;  %891 = vrot.lane.b32.xlu2 %v3270_v13, %s2777_s21  ;;  %v2424_v23 = vunpack.c.h.bf16 %v2443_v19 }
 0x9e8   :  { %v890_v30 = vpop.permute.xlu1 %889  ;;  %v888_v53 = vpop.permute.xlu0 %887 }
 0x9e9   :  { %2258 = vst.msk [vmem:[%s4037_s2 + $0x68] sm:$0xff] %vm16_vm0, %v890_v30 }
 0x9ea   :  { %2257 = vst.msk [vmem:[%s4037_s2 + $0x60] sm:$0xff] %vm16_vm0, %v888_v53 }
 0x9f0   :  { %v894_v8 = vpop.permute.xlu0 %893 }
 0x9f1   :  { %2260 = vst.msk [vmem:[%s4037_s2 + $0x78] sm:$0xff] %vm16_vm0, %v894_v8  ;;  %v2423_v8 = vunpack.c.l.bf16 %v2443_v19 }
 0xa14   :  { %v1782_v48 = vpop.permute.xlu2 %1781 }
 0xa15   :  { %2328 = vmatmul.msk.bf16.gmra.mxu0 %vm16_vm0, %v1782_v48 }
 0xa1c   :  { %v466_v13 = vpop.permute.xlu2 %465 }
 0xa1d   :  { %487 = vst.msk [vmem:[%s4037_s2 + $0x10] sm:$0xff] %vm16_vm0, %v466_v13 }
 0xa24   :  { %v472_v51 = vpop.permute.xlu2 %471 }
 0xa25   :  { %490 = vst.msk [vmem:[%s4037_s2 + $0x28] sm:$0xff] %vm16_vm0, %v472_v51 }
 0xa2c   :  { %v880_v58 = vpop.permute.xlu2 %879 }
 0xa2d   :  { %2253 = vst.msk [vmem:[%s4037_s2 + $0x40] sm:$0xff] %vm16_vm0, %v880_v58 }
 0xa34   :  { %v886_v63 = vpop.permute.xlu2 %885 }
 0xa35   :  { %2256 = vst.msk [vmem:[%s4037_s2 + $0x58] sm:$0xff] %vm16_vm0, %v886_v63 }
 0xa36   :  { %v1804_v39 = vpop.f32.mrf.mxu0 }
 0xa37   :  { %v1824_v20 = vadd.f32 %v2411_v57, %v1804_v39 }
 0xa39   :  { %2709 = vtanh.f32 %v1824_v20  ;;  %v2329_v38 = vmul.f32 -1.442695, %v1824_v20 }
 0xa3c   :  { %v892_v59 = vpop.permute.xlu2 %891 }
 0xa3d   :  { %2259 = vst.msk [vmem:[%s4037_s2 + $0x70] sm:$0xff] %vm16_vm0, %v892_v59 }
 0xa3e   :  { %v1806_v21 = vpop.f32.mrf.mxu0 }
 0xa3f   :  { %v2710_v3 = vpop.eup %2709  ;;  %v1825_v40 = vadd.f32 %v2412_v4, %v1806_v21 }
 0xa40   :  { %2008 = vrot.lane.b32.xlu1 %v2710_v3, %s2774_s16 }
 0xa41   :  { %2711 = vtanh.f32 %v1825_v40  ;;  %v2330_v49 = vmul.f32 -1.442695, %v1825_v40 }
 0xa46   :  { %v1809_v26 = vpop.f32.mrf.mxu0 }
 0xa47   :  { %v2712_v7 = vpop.eup %2711  ;;  %v1826_v27 = vadd.f32 %v2415_v47, %v1809_v26 }
 0xa48   :  { %2010 = vrot.lane.b32.xlu2 %v2712_v7, %s2774_s16 }
 0xa49   :  { %2713 = vtanh.f32 %v1826_v27 }
 0xa4e   :  { %v1811_v28 = vpop.f32.mrf.mxu0 }
 0xa4f   :  { %v2714_v5 = vpop.eup %2713  ;;  %v1827_v17 = vadd.f32 %v2416_v24, %v1811_v28 }
 0xa50   :  { %2012 = vrot.lane.b32.xlu0 %v2714_v5, %s2774_s16 }
 0xa51   :  { %2715 = vtanh.f32 %v1827_v17  ;;  %v2332_v21 = vmul.f32 -1.442695, %v1827_v17 }
 0xa56   :  { %v1814_v54 = vpop.f32.mrf.mxu0 }
 0xa57   :  { %v2716_v56 = vpop.eup %2715  ;;  %v1828_v62 = vadd.f32 %v2419_v45, %v1814_v54 }
 0xa58   :  { %2014 = vrot.lane.b32.xlu1 %v2716_v56, %s2774_s16 }
 0xa59   :  { %2717 = vtanh.f32 %v1828_v62  ;;  %v2333_v30 = vmul.f32 -1.442695, %v1828_v62 }
 0xa5e   :  { %v1816_v9 = vpop.f32.mrf.mxu0 }
 0xa5f   :  { %v2718_v12 = vpop.eup %2717  ;;  %v3731_v14 = vadd.f32 %v2420_v25, %v1816_v9 }
 0xa60   :  { %2016 = vrot.lane.b32.xlu2 %v2718_v12, %s2774_s16 }
 0xa61   :  { %2719 = vtanh.f32 %v3731_v14 }
 0xa62   :  { %2721 = vpow2.f32 %v2330_v49 }
 0xa63   :  { %2723 = vpow2.f32 %v2329_v38 }
 0xa64   :  { %2725 = vpow2.f32 %v2333_v30 }
 0xa67   :  { %v2720_v42 = vpop.eup %2719 }
 0xa68   :  { %2018 = vrot.lane.b32.xlu0 %v2720_v42, %s2774_s16  ;;  %v2722_v29 = vpop.eup %2721  ;;  %v2334_v42 = vmul.f32 -1.442695, %v3731_v14 }
 0xa69   :  { %v2724_v53 = vpop.eup %2723  ;;  %v3743_v48 = vadd.f32 1.0, %v2722_v29 }
 0xa6a   :  { %v3745_v13 = vadd.f32 1.0, %v2724_v53  ;;  %v2726_v58 = vpop.eup %2725 }
 0xa6b   :  { %2727 = vrcp.f32 %v3743_v48  ;;  %v3752_v63 = vadd.f32 1.0, %v2726_v58  ;;  %v1890_v56 = vand.u32 2147483648, %v3743_v48  ;;  %vm1884_vm12 = vweird.f32 %v3743_v48 }
 0xa6c   :  { %v1888_v9 = vand.u32 2147483647, %v3743_v48  ;;  %v1875_v12 = vand.u32 2147483648, %v3745_v13  ;;  %vm1869_vm14 = vweird.f32 %v3745_v13  ;;  %v1873_v49 = vand.u32 2147483647, %v3745_v13 }
 0xa6d   :  { %v1891_v29 = vor.u32 1.1754944e-38, %v1890_v56  ;;  %vm1929_vm4 = vweird.f32 %v3752_v63 }
 0xa6e   :  { %vm1889_vm1 = vcmp.eq.f32.partialorder %v1888_v9, 8.507059e+37  ;;  %v1876_v53 = vor.u32 1.1754944e-38, %v1875_v12  ;;  %vm1874_vm2 = vcmp.eq.f32.partialorder %v1873_v49, 8.507059e+37 }
 0xa70   :  { %1298 = vrot.lane.b32.xlu0 %v3420_v35, %s2777_s21 }
 0xa71   :  { %v2728_v57 = vpop.eup %2727 }
 0xa72   :  { %v1880_v3 = vmul.f32 %v2728_v57, %v3743_v48  ;;  %vm1885_vm10 = vweird.f32 %v2728_v57 }
 0xa73   :  { %vm1886_vm13 = vmor %vm1884_vm12, %vm1885_vm10 }
 0xa74   :  { %v1881_v26 = vsub.f32 1.0, %v1880_v3 }
 0xa76   :  { %v1882_v28 = vmul.f32 %v2728_v57, %v1881_v26 }
 0xa78   :  { %1304 = vrot.lane.b32.xlu0 %v3433_v36, %s2777_s21  ;;  %v2331_v36 = vmul.f32 -1.442695, %v1826_v27  ;;  %v1883_v54 = vadd.f32 %v2728_v57, %v1882_v28 }
 0xa7a   :  { %v1887_v38 = vsel %vm1886_vm13, %v2728_v57, %v1883_v54  ;;  %v1935_v57 = vand.u32 2147483648, %v3752_v63 }
 0xa7b   :  { %v3790_v14 = vsel %vm1889_vm1, %v1891_v29, %v1887_v38 }
 0xa92   :  { %v1819_v35 = vpop.f32.mrf.mxu0 }
 0xa93   :  { %v3747_v51 = vadd.f32 %v2423_v8, %v1819_v35 }
 0xa95   :  { %2729 = vtanh.f32 %v3747_v51 }
 0xa96   :  { %2731 = vrcp.f32 %v3745_v13 }
 0xa97   :  { %2733 = vpow2.f32 %v2331_v36 }
 0xa9a   :  { %v1821_v39 = vpop.f32.mrf.mxu0 }
 0xa9b   :  { %v2730_v20 = vpop.eup %2729  ;;  %v3754_v4 = vadd.f32 %v2424_v23, %v1821_v39  ;;  %v1933_v39 = vand.u32 2147483647, %v3752_v63 }
 0xa9c   :  { %v2732_v59 = vpop.eup %2731  ;;  %2020 = vrot.lane.b32.xlu1 %v2730_v20, %s2774_s16 }
 0xa9d   :  { %2735 = vtanh.f32 %v3754_v4  ;;  %v2734_v40 = vpop.eup %2733  ;;  %v1865_v37 = vmul.f32 %v2732_v59, %v3745_v13  ;;  %vm1870_vm11 = vweird.f32 %v2732_v59  ;;  %vm1934_vm6 = vcmp.eq.f32.partialorder %v1933_v39, 8.507059e+37 }
 0xa9e   :  { %2737 = vrcp.f32 %v3752_v63  ;;  %v3761_v47 = vadd.f32 1.0, %v2734_v40  ;;  %vm1871_vm15 = vmor %vm1869_vm14, %vm1870_vm11  ;;  %v1936_v40 = vor.u32 1.1754944e-38, %v1935_v57 }
 0xa9f   :  { %2739 = vpow2.f32 %v2332_v21  ;;  %v1866_v27 = vsub.f32 1.0, %v1865_v37 }
 0xaa0   :  { %2741 = vrcp.f32 %v3761_v47  ;;  %v1905_v28 = vand.u32 2147483648, %v3761_v47  ;;  %vm1899_vm8 = vweird.f32 %v3761_v47 }
 0xaa1   :  { %v1867_v17 = vmul.f32 %v2732_v59, %v1866_v27 }
 0xaa2   :  { %v2011_v19 = vpop.permute.xlu2 %2010 }
 0xaa3   :  { %v2736_v7 = vpop.eup %2735  ;;  %v1868_v62 = vadd.f32 %v2732_v59, %v1867_v17  ;;  %v2033_v8 = vmul.f32 %v2011_v19, %v3790_v14 }
 0xaa4   :  { %v3763_v24 = vpop.eup %2737  ;;  %1300 = vrot.lane.b32.xlu1 %v3425_v6, %s2777_s21  ;;  %2022 = vrot.lane.b32.xlu2 %v2736_v7, %s2774_s16 }
 0xaa5   :  { %v2740_v5 = vpop.eup %2739  ;;  %v1925_v44 = vmul.f32 %v3763_v24, %v3752_v63  ;;  %v1872_v30 = vsel %vm1871_vm15, %v2732_v59, %v1868_v62  ;;  %vm1930_vm3 = vweird.f32 %v3763_v24 }
 0xaa6   :  { %v3771_v45 = vadd.f32 1.0, %v2740_v5  ;;  %v3774_v6 = vpop.eup %2741  ;;  %v3793_v13 = vsel %vm1874_vm2, %v1876_v53, %v1872_v30  ;;  %vm1931_vm5 = vmor %vm1929_vm4, %vm1930_vm3 }
 0xaa7   :  { %v1926_v25 = vsub.f32 1.0, %v1925_v44  ;;  %vm1900_vm7 = vweird.f32 %v3774_v6  ;;  %v1906_v44 = vor.u32 1.1754944e-38, %v1905_v28 }
 0xaa8   :  { %2743 = vrcp.f32 %v3771_v45  ;;  %vm1901_vm9 = vmor %vm1899_vm8, %vm1900_vm7  ;;  %v1920_v12 = vand.u32 2147483648, %v3771_v45  ;;  %vm1914_vm12 = vweird.f32 %v3771_v45 }
 0xaa9   :  { %2745 = vpow2.f32 %v2334_v42 }
 0xaaa   :  { %v1921_v49 = vor.u32 1.1754944e-38, %v1920_v12 }
 0xaac   :  { %1306 = vrot.lane.b32.xlu1 %v3443_v31, %s2777_s21  ;;  %1302 = vrot.lane.b32.xlu2 %v3436_v32, %s2777_s21  ;;  %v1927_v31 = vmul.f32 %v3763_v24, %v1926_v25  ;;  %v1895_v32 = vmul.f32 %v3774_v6, %v3761_v47 }
 0xaae   :  { %v1928_v36 = vadd.f32 %v3763_v24, %v1927_v31  ;;  %v1896_v58 = vsub.f32 1.0, %v1895_v32  ;;  %v2744_v23 = vpop.eup %2743  ;;  %v2336_v32 = vmul.f32 -1.442695, %v3754_v4  ;;  %v2335_v4 = vmul.f32 -1.442695, %v3747_v51 }
 0xaaf   :  { %v2746_v20 = vpop.eup %2745  ;;  %v1910_v3 = vmul.f32 %v2744_v23, %v3771_v45  ;;  %vm1915_vm11 = vweird.f32 %v2744_v23 }
 0xab0   :  { %v1932_v59 = vsel %vm1931_vm5, %v3763_v24, %v1928_v36  ;;  %v1897_v21 = vmul.f32 %v3774_v6, %v1896_v58  ;;  %v1861_v37 = vadd.f32 1.0, %v2746_v20  ;;  %v1903_v24 = vand.u32 2147483647, %v3761_v47  ;;  %vm1916_vm13 = vmor %vm1914_vm12, %vm1915_vm11 }
 0xab1   :  { %v3808_v26 = vsel %vm1934_vm6, %v1936_v40, %v1932_v59  ;;  %v1911_v63 = vsub.f32 1.0, %v1910_v3  ;;  %v1918_v47 = vand.u32 2147483647, %v3771_v45 }
 0xab2   :  { %v2009_v48 = vpop.permute.xlu1 %2008  ;;  %v1898_v27 = vadd.f32 %v3774_v6, %v1897_v21  ;;  %2747 = vrcp.f32 %v1861_v37  ;;  %vm1904_vm10 = vcmp.eq.f32.partialorder %v1903_v24, 8.507059e+37  ;;  %vm1944_vm1 = vweird.f32 %v1861_v37 }
 0xab3   :  { %v2032_v35 = vmul.f32 %v2009_v48, %v3793_v13  ;;  %v1912_v17 = vmul.f32 %v2744_v23, %v1911_v63  ;;  %vm1919_vm14 = vcmp.eq.f32.partialorder %v1918_v47, 8.507059e+37  ;;  %2749 = vpow2.f32 %v2336_v32 }
 0xab4   :  { %2050 = vrot.lane.b32.xlu1 %v2033_v8, %s2775_s19  ;;  %1308 = vrot.lane.b32.xlu2 %v3446_v34, %s2777_s21  ;;  %v1902_v5 = vsel %vm1901_vm9, %v3774_v6, %v1898_v27  ;;  %v1950_v8 = vand.u32 2147483648, %v1861_v37  ;;  %v1948_v45 = vand.u32 2147483647, %v1861_v37 }
 0xab5   :  { %2048 = vrot.lane.b32.xlu0 %v2032_v35, %s2775_s19  ;;  %v3818_v54 = vsel %vm1904_vm10, %v1906_v44, %v1902_v5  ;;  %v1913_v25 = vadd.f32 %v2744_v23, %v1912_v17 }
 0xab6   :  { %v1951_v35 = vor.u32 1.1754944e-38, %v1950_v8  ;;  %vm1949_vm3 = vcmp.eq.f32.partialorder %v1948_v45, 8.507059e+37 }
 0xab7   :  { %v1917_v6 = vsel %vm1916_vm13, %v2744_v23, %v1913_v25 }
 0xab8   :  { %v2748_v9 = vpop.eup %2747  ;;  %v3825_v19 = vsel %vm1919_vm14, %v1921_v49, %v1917_v6 }
 0xab9   :  { %v1940_v42 = vmul.f32 %v2748_v9, %v1861_v37  ;;  %vm1945_vm15 = vweird.f32 %v2748_v9  ;;  %v2750_v23 = vpop.eup %2749 }
 0xaba   :  { %v2017_v34 = vpop.permute.xlu2 %2016  ;;  %vm1946_vm2 = vmor %vm1944_vm1, %vm1945_vm15  ;;  %v1863_v39 = vadd.f32 1.0, %v2750_v23 }
 0xabb   :  { %v2036_v7 = vmul.f32 %v2017_v34, %v3808_v26  ;;  %v1941_v30 = vsub.f32 1.0, %v1940_v42 }
 0xabc   :  { %2751 = vrcp.f32 %v1863_v39  ;;  %v1980_v27 = vand.u32 2147483648, %v1863_v39  ;;  %vm1974_vm5 = vweird.f32 %v1863_v39  ;;  %v1978_v63 = vand.u32 2147483647, %v1863_v39 }
 0xabd   :  { %2056 = vrot.lane.b32.xlu1 %v2036_v7, %s2775_s19  ;;  %v1942_v31 = vmul.f32 %v2748_v9, %v1941_v30  ;;  %2753 = vpow2.f32 %v2335_v4 }
 0xabe   :  { %v1981_v5 = vor.u32 1.1754944e-38, %v1980_v27  ;;  %vm1979_vm7 = vcmp.eq.f32.partialorder %v1978_v63, 8.507059e+37 }
 0xabf   :  { %v1943_v53 = vadd.f32 %v2748_v9, %v1942_v31 }
 0xac1   :  { %v1947_v48 = vsel %vm1946_vm2, %v2748_v9, %v1943_v53  ;;  %v1993_v53 = vmul.f32 %v3790_v14, %v3544_v16 }
 0xac2   :  { %v2013_v56 = vpop.permute.xlu0 %2012  ;;  %v3830_v36 = vsel %vm1949_vm3, %v1951_v35, %v1947_v48  ;;  %v2752_v59 = vpop.eup %2751 }
 0xac3   :  { %v2034_v62 = vmul.f32 %v2013_v56, %v3818_v54  ;;  %v2754_v3 = vpop.eup %2753  ;;  %v1970_v51 = vmul.f32 %v2752_v59, %v1863_v39  ;;  %vm1975_vm4 = vweird.f32 %v2752_v59 }
 0xac4   :  { %v1862_v40 = vadd.f32 1.0, %v2754_v3  ;;  %vm1976_vm6 = vmor %vm1974_vm5, %vm1975_vm4 }
 0xac5   :  { %2052 = vrot.lane.b32.xlu2 %v2034_v62, %s2775_s19  ;;  %v1971_v37 = vsub.f32 1.0, %v1970_v51 }
 0xac6   :  { %2755 = vrcp.f32 %v1862_v40  ;;  %v1965_v9 = vand.u32 2147483648, %v1862_v40  ;;  %vm1959_vm9 = vweird.f32 %v1862_v40  ;;  %v1963_v12 = vand.u32 2147483647, %v1862_v40 }
 0xac7   :  { %v1972_v34 = vmul.f32 %v2752_v59, %v1971_v37 }
 0xac8   :  { %v1966_v6 = vor.u32 1.1754944e-38, %v1965_v9  ;;  %vm1964_vm11 = vcmp.eq.f32.partialorder %v1963_v12, 8.507059e+37 }
 0xaca   :  { %v2015_v38 = vpop.permute.xlu1 %2014 }
 0xacb   :  { %v2035_v29 = vmul.f32 %v2015_v38, %v3825_v19 }
 0xacc   :  { %v2756_v7 = vpop.eup %2755 }
 0xacd   :  { %2054 = vrot.lane.b32.xlu0 %v2035_v29, %s2775_s19  ;;  %v1955_v24 = vmul.f32 %v2756_v7, %v1862_v40  ;;  %vm1960_vm8 = vweird.f32 %v2756_v7 }
 0xace   :  { %vm1961_vm10 = vmor %vm1959_vm9, %vm1960_vm8 }
 0xacf   :  { %v1956_v56 = vsub.f32 1.0, %v1955_v24 }
 0xada   :  { %v2019_v58 = vpop.permute.xlu0 %2018 }
 0xadb   :  { %v2037_v57 = vmul.f32 %v2019_v58, %v3830_v36 }
 0xadd   :  { %2058 = vrot.lane.b32.xlu2 %v2037_v57, %s2775_s19 }
 0xae2   :  { %v1299_v20 = vpop.permute.xlu0 %1298 }
 0xae3   :  { %2281 = vst.msk [vmem:[%s4037_s2 + $0x80] sm:$0xff] %vm16_vm0, %v1299_v20 }
 0xae5   :  { %1310 = vrot.lane.b32.xlu2 %v3454_v15, %s2777_s21  ;;  %v1973_v15 = vadd.f32 %v2752_v59, %v1972_v34 }
 0xae7   :  { %v1977_v28 = vsel %vm1976_vm6, %v2752_v59, %v1973_v15 }
 0xaea   :  { %v1305_v21 = vpop.permute.xlu0 %1304 }
 0xaeb   :  { %2284 = vst.msk [vmem:[%s4037_s2 + $0x98] sm:$0xff] %vm16_vm0, %v1305_v21 }
 0xaed   :  { %1719 = vrot.lane.b32.xlu2 %v3585_v41, %s2777_s21  ;;  %v3849_v41 = vsel %vm1979_vm7, %v1981_v5, %v1977_v28 }
 0xaee   :  { %v1999_v40 = vmul.f32 %v3849_v41, %v3572_v60 }
 0xaf5   :  { %1725 = vrot.lane.b32.xlu2 %v3601_v18, %s2777_s21  ;;  %v1957_v18 = vmul.f32 %v2756_v7, %v1956_v56 }
 0xaf7   :  { %v1958_v25 = vadd.f32 %v2756_v7, %v1957_v18 }
 0xaf9   :  { %v1962_v47 = vsel %vm1961_vm10, %v2756_v7, %v1958_v25 }
 0xafa   :  { %v3859_v49 = vsel %vm1964_vm11, %v1966_v6, %v1962_v47 }
 0xafb   :  { %v1998_v7 = vmul.f32 %v3859_v49, %v3578_v1 }
 0xafe   :  { %v2023_v17 = vpop.permute.xlu2 %2022 }
 0xaff   :  { %v2039_v44 = vmul.f32 %v2023_v17, %v3849_v41 }
 0xb01   :  { %2062 = vrot.lane.b32.xlu1 %v2039_v44, %s2775_s19 }
 0xb06   :  { %v1303_v62 = vpop.permute.xlu2 %1302 }
 0xb07   :  { %2283 = vst.msk [vmem:[%s4037_s2 + $0x90] sm:$0xff] %vm16_vm0, %v1303_v62 }
 0xb09   :  { %1717 = vrot.lane.b32.xlu1 %v3582_v33, %s2777_s21 }
 0xb0e   :  { %v2021_v42 = vpop.permute.xlu1 %2020  ;;  %v1309_v38 = vpop.permute.xlu2 %1308 }
 0xb0f   :  { %v2038_v29 = vmul.f32 %v2021_v42, %v3859_v49  ;;  %2286 = vst.msk [vmem:[%s4037_s2 + $0xa8] sm:$0xff] %vm16_vm0, %v1309_v38 }
 0xb11   :  { %2060 = vrot.lane.b32.xlu0 %v2038_v29, %s2775_s19  ;;  %1723 = vrot.lane.b32.xlu1 %v3595_v2, %s2777_s21  ;;  %v1994_v2 = vmul.f32 %v3818_v54, %v3537_v11 }
 0xb16   :  { %v1301_v33 = vpop.permute.xlu1 %1300 }
 0xb17   :  { %2282 = vst.msk [vmem:[%s4037_s2 + $0x88] sm:$0xff] %vm16_vm0, %v1301_v33 }
 0xb19   :  { %1312 = vrot.lane.b32.xlu0 %v3457_v55, %s2777_s21  ;;  %v1992_v55 = vmul.f32 %v3793_v13, %v3527_v46  ;;  %v1997_v46 = vmul.f32 %v3830_v36, %v3564_v22 }
 0xb1e   :  { %v1307_v30 = vpop.permute.xlu1 %1306 }
 0xb1f   :  { %2285 = vst.msk [vmem:[%s4037_s2 + $0xa0] sm:$0xff] %vm16_vm0, %v1307_v30  ;;  %v2053_v31 = vpop.permute.xlu2 %2052 }
 0xb20   :  { %v2074_v32 = vadd.f32 %v2053_v31, %v1994_v2 }
 0xb21   :  { %1721 = vrot.lane.b32.xlu0 %v3592_v61, %s2777_s21  ;;  %v1996_v61 = vmul.f32 %v3808_v26, %v3555_v0  ;;  %v1995_v0 = vmul.f32 %v3825_v19, %v3557_v43 }
 0xb22   :  { %2757 = vtanh.f32 %v2074_v32 }
 0xb26   :  { %v2051_v8 = vpop.permute.xlu1 %2050 }
 0xb27   :  { %v2073_v45 = vadd.f32 %v2051_v8, %v1993_v53  ;;  %v2049_v48 = vpop.permute.xlu0 %2048 }
 0xb28   :  { %v3887_v35 = vadd.f32 %v2049_v48, %v1992_v55  ;;  %v2758_v11 = vpop.eup %2757 }
 0xb29   :  { %2759 = vtanh.f32 %v2073_v45  ;;  %1727 = vrot.lane.b32.xlu0 %v3598_v10, %s2777_s21 }
 0xb2a   :  { %2761 = vtanh.f32 %v3887_v35 }
 0xb2f   :  { %v2760_v16 = vpop.eup %2759  ;;  %v2057_v58 = vpop.permute.xlu1 %2056 }
 0xb30   :  { %v2762_v23 = vpop.eup %2761  ;;  %v2076_v57 = vadd.f32 %v2057_v58, %v1996_v61  ;;  %2098 = vrot.lane.b32.xlu2 %v2760_v16, %s2776_s20 }
 0xb31   :  { %2100 = vrot.lane.b32.xlu0 %v2758_v11, %s2776_s20  ;;  %2096 = vrot.lane.b32.xlu1 %v2762_v23, %s2776_s20 }
 0xb32   :  { %2763 = vtanh.f32 %v2076_v57 }
 0xb37   :  { %v2059_v10 = vpop.permute.xlu2 %2058 }
 0xb38   :  { %v2764_v39 = vpop.eup %2763  ;;  %v3899_v4 = vadd.f32 %v2059_v10, %v1997_v46 }
 0xb39   :  { %2104 = vrot.lane.b32.xlu2 %v2764_v39, %s2776_s20 }
 0xb3a   :  { %2765 = vtanh.f32 %v3899_v4 }
 0xb3f   :  { %v1311_v20 = vpop.permute.xlu2 %1310  ;;  %v2055_v59 = vpop.permute.xlu0 %2054 }
 0xb40   :  { %v2766_v21 = vpop.eup %2765  ;;  %2287 = vst.msk [vmem:[%s4037_s2 + $0xb0] sm:$0xff] %vm16_vm0, %v1311_v20  ;;  %v2075_v22 = vadd.f32 %v2055_v59, %v1995_v0 }
 0xb41   :  { %2106 = vrot.lane.b32.xlu0 %v2766_v21, %s2776_s20 }
 0xb42   :  { %2767 = vtanh.f32 %v2075_v22 }
 0xb47   :  { %v1720_v3 = vpop.permute.xlu2 %1719 }
 0xb48   :  { %v2768_v51 = vpop.eup %2767  ;;  %2310 = vst.msk [vmem:[%s4037_s2 + $0xc8] sm:$0xff] %vm16_vm0, %v1720_v3 }
 0xb49   :  { %1729 = vrot.lane.b32.xlu0 %v3635_v52, %s2777_s21  ;;  %2102 = vrot.lane.b32.xlu1 %v2768_v51, %s2776_s20 }
 0xb4f   :  { %v1726_v43 = vpop.permute.xlu2 %1725 }
 0xb50   :  { %2313 = vst.msk [vmem:[%s4037_s2 + $0xe0] sm:$0xff] %vm16_vm0, %v1726_v43 }
 0xb51   :  { %2189 = vrot.lane.b32.xlu0 %v2074_v32, %s2778_s26 }
 0xb73   :  { %v2063_v37 = vpop.permute.xlu1 %2062 }
 0xb74   :  { %v3924_v34 = vadd.f32 %v2063_v37, %v1999_v40 }
 0xb76   :  { %2769 = vtanh.f32 %v3924_v34 }
 0xb7b   :  { %v1718_v52 = vpop.permute.xlu1 %1717 }
 0xb7c   :  { %v2770_v15 = vpop.eup %2769  ;;  %2309 = vst.msk [vmem:[%s4037_s2 + $0xc0] sm:$0xff] %vm16_vm0, %v1718_v52 }
 0xb7d   :  { %2110 = vrot.lane.b32.xlu2 %v2770_v15, %s2776_s20 }
 0xb83   :  { %v1724_v27 = vpop.permute.xlu1 %1723  ;;  %v2061_v63 = vpop.permute.xlu0 %2060 }
 0xb84   :  { %2312 = vst.msk [vmem:[%s4037_s2 + $0xd8] sm:$0xff] %vm16_vm0, %v1724_v27  ;;  %v2078_v60 = vadd.f32 %v2061_v63, %v1998_v7 }
 0xb85   :  { %2187 = vrot.lane.b32.xlu2 %v2073_v45, %s2778_s26 }
 0xb86   :  { %2771 = vtanh.f32 %v2078_v60 }
 0xb8a   :  { %v2099_v28 = vpop.permute.xlu2 %2098 }
 0xb8b   :  { %v2121_v24 = vmul.f32 %v2099_v28, %v3790_v14  ;;  %v1313_v5 = vpop.permute.xlu0 %1312 }
 0xb8c   :  { %v2772_v17 = vpop.eup %2771  ;;  %2288 = vst.msk [vmem:[%s4037_s2 + $0xb8] sm:$0xff] %vm16_vm0, %v1313_v5 }
 0xb8d   :  { %2193 = vrot.lane.b32.xlu2 %v2076_v57, %s2778_s26  ;;  %2138 = vrot.lane.b32.xlu0 %v2121_v24, %s2777_s21 }
 0xb8e   :  { %2108 = vrot.lane.b32.xlu1 %v2772_v17, %s2776_s20 }
 0xb93   :  { %v2105_v1 = vpop.permute.xlu2 %2104  ;;  %v1722_v44 = vpop.permute.xlu0 %1721 }
 0xb94   :  { %v2124_v56 = vmul.f32 %v2105_v1, %v3808_v26  ;;  %2311 = vst.msk [vmem:[%s4037_s2 + $0xd0] sm:$0xff] %vm16_vm0, %v1722_v44 }
 0xb96   :  { %1731 = vrot.lane.b32.xlu1 %v3632_v50, %s2777_s21  ;;  %2144 = vrot.lane.b32.xlu0 %v2124_v56, %s2777_s21 }
 0xb9b   :  { %v1728_v14 = vpop.permute.xlu0 %1727 }
 0xb9c   :  { %2314 = vst.msk [vmem:[%s4037_s2 + $0xe8] sm:$0xff] %vm16_vm0, %v1728_v14 }
 0xb9e   :  { %2185 = vrot.lane.b32.xlu1 %v3887_v35, %s2778_s26 }
 0xba3   :  { %v2097_v26 = vpop.permute.xlu1 %2096  ;;  %v2101_v62 = vpop.permute.xlu0 %2100 }
 0xba4   :  { %v2120_v18 = vmul.f32 %v2097_v26, %v3793_v13  ;;  %v2122_v50 = vmul.f32 %v2101_v62, %v3818_v54 }
 0xba6   :  { %2191 = vrot.lane.b32.xlu1 %v2075_v22, %s2778_s26  ;;  %2136 = vrot.lane.b32.xlu2 %v2120_v18, %s2777_s21 }
 0xbae   :  { %2140 = vrot.lane.b32.xlu1 %v2122_v50, %s2777_s21 }
 0xbb3   :  { %v2107_v25 = vpop.permute.xlu0 %2106 }
 0xbb4   :  { %v2125_v9 = vmul.f32 %v2107_v25, %v3830_v36 }
 0xbb6   :  { %2146 = vrot.lane.b32.xlu1 %v2125_v9, %s2777_s21 }
 0xbbb   :  { %v2103_v12 = vpop.permute.xlu1 %2102  ;;  %v1730_v47 = vpop.permute.xlu0 %1729 }
 0xbbc   :  { %v2123_v6 = vmul.f32 %v2103_v12, %v3825_v19  ;;  %2315 = vst.msk [vmem:[%s4037_s2 + $0xf0] sm:$0xff] %vm16_vm0, %v1730_v47 }
 0xbbe   :  { %2142 = vrot.lane.b32.xlu2 %v2123_v6, %s2777_s21  ;;  %2197 = vrot.lane.b32.xlu1 %v2078_v60, %s2778_s26 }
 0xbc3   :  { %v2190_v13 = vpop.permute.xlu0 %2189 }
 0xbc4   :  { %2211 = vst.msk [vmem:[#allocation3 + $0x10] sm:$0xff] %vm16_vm0, %v2190_v13 }
 0xbd7   :  { %v2111_v54 = vpop.permute.xlu2 %2110 }
 0xbd8   :  { %v2127_v36 = vmul.f32 %v2111_v54, %v3849_v41 }
 0xbda   :  { %2150 = vrot.lane.b32.xlu0 %v2127_v36, %s2777_s21 }
 0xbdf   :  { %v2188_v42 = vpop.permute.xlu2 %2187 }
 0xbe0   :  { %2210 = vst.msk [vmem:[#allocation3 + $0x8] sm:$0xff] %vm16_vm0, %v2188_v42 }
 0xbe2   :  { %2195 = vrot.lane.b32.xlu0 %v3899_v4, %s2778_s26 }
 0xbe7   :  { %v2194_v19 = vpop.permute.xlu2 %2193 }
 0xbe8   :  { %2213 = vst.msk [vmem:[#allocation3 + $0x20] sm:$0xff] %vm16_vm0, %v2194_v19 }
 0xbff   :  { %v2139_v38 = vpop.permute.xlu0 %2138 }
 0xc00   :  { %v2109_v29 = vpop.permute.xlu1 %2108  ;;  %2338 = vst.msk [vmem:[%s4037_s2 + $0x108] sm:$0xff] %vm16_vm0, %v2139_v38  ;;  %v2137_v33 = vpop.permute.xlu2 %2136 }
 0xc01   :  { %v2126_v41 = vmul.f32 %v2109_v29, %v3859_v49  ;;  %2170 = vst.msk [vmem:[#allocation2 + $0x8] sm:$0xff] %vm16_vm0, %v2139_v38 }
 0xc02   :  { %2337 = vst.msk [vmem:[%s4037_s2 + $0x100] sm:$0xff] %vm16_vm0, %v2137_v33 }
 0xc03   :  { %2169 = vst.msk [vmem:[#allocation2] sm:$0xff] %vm16_vm0, %v2137_v33  ;;  %2148 = vrot.lane.b32.xlu2 %v2126_v41, %s2777_s21 }
 0xc08   :  { %v1732_v30 = vpop.permute.xlu1 %1731  ;;  %v2145_v31 = vpop.permute.xlu0 %2144 }
 0xc09   :  { %2316 = vst.msk [vmem:[%s4037_s2 + $0xf8] sm:$0xff] %vm16_vm0, %v1732_v30 }
 0xc0a   :  { %2341 = vst.msk [vmem:[%s4037_s2 + $0x120] sm:$0xff] %vm16_vm0, %v2145_v31 }
 0xc0b   :  { %2173 = vst.msk [vmem:[#allocation2 + $0x20] sm:$0xff] %vm16_vm0, %v2145_v31  ;;  %2199 = vrot.lane.b32.xlu2 %v3924_v34, %s2778_s26 }
 0xc10   :  { %v2186_v49 = vpop.permute.xlu1 %2185 }
 0xc11   :  { %2209 = vst.msk [vmem:[#allocation3] sm:$0xff] %vm16_vm0, %v2186_v49 }
 0xc18   :  { %v2192_v2 = vpop.permute.xlu1 %2191  ;;  %v2143_v32 = vpop.permute.xlu2 %2142 }
 0xc19   :  { %2212 = vst.msk [vmem:[#allocation3 + $0x18] sm:$0xff] %vm16_vm0, %v2192_v2 }
 0xc1a   :  { %2340 = vst.msk [vmem:[%s4037_s2 + $0x118] sm:$0xff] %vm16_vm0, %v2143_v32 }
 0xc1b   :  { %2172 = vst.msk [vmem:[#allocation2 + $0x18] sm:$0xff] %vm16_vm0, %v2143_v32 }
 0xc20   :  { %v2141_v53 = vpop.permute.xlu1 %2140 }
 0xc21   :  { %2339 = vst.msk [vmem:[%s4037_s2 + $0x110] sm:$0xff] %vm16_vm0, %v2141_v53 }
 0xc22   :  { %2171 = vst.msk [vmem:[#allocation2 + $0x10] sm:$0xff] %vm16_vm0, %v2141_v53 }
 0xc28   :  { %v2147_v8 = vpop.permute.xlu1 %2146 }
 0xc29   :  { %2342 = vst.msk [vmem:[%s4037_s2 + $0x128] sm:$0xff] %vm16_vm0, %v2147_v8 }
 0xc2a   :  { %2174 = vst.msk [vmem:[#allocation2 + $0x28] sm:$0xff] %vm16_vm0, %v2147_v8 }
 0xc30   :  { %v2198_v55 = vpop.permute.xlu1 %2197 }
 0xc31   :  { %2215 = vst.msk [vmem:[#allocation3 + $0x30] sm:$0xff] %vm16_vm0, %v2198_v55 }
 0xc4c   :  { %v2151_v45 = vpop.permute.xlu0 %2150 }
 0xc4d   :  { %2344 = vst.msk [vmem:[%s4037_s2 + $0x138] sm:$0xff] %vm16_vm0, %v2151_v45 }
 0xc4e   :  { %2176 = vst.msk [vmem:[#allocation2 + $0x38] sm:$0xff] %vm16_vm0, %v2151_v45 }
 0xc54   :  { %v2196_v48 = vpop.permute.xlu0 %2195 }
 0xc55   :  { %2214 = vst.msk [vmem:[#allocation3 + $0x28] sm:$0xff] %vm16_vm0, %v2196_v48 }
 0xc5d   :  { %v2149_v35 = vpop.permute.xlu2 %2148 }
 0xc5e   :  { %2343 = vst.msk [vmem:[%s4037_s2 + $0x130] sm:$0xff] %vm16_vm0, %v2149_v35 }
 0xc5f   :  { %2175 = vst.msk [vmem:[#allocation2 + $0x30] sm:$0xff] %vm16_vm0, %v2149_v35 }
 0xc65   :  { %v2200_v11 = vpop.permute.xlu2 %2199 }
 0xc66   :  { %2216 = vst.msk [vmem:[#allocation3 + $0x38] sm:$0xff] %vm16_vm0, %v2200_v11 }

// kernel: nncrf_forward.17
= control target key start
LH: loop header
LB: loop body
LE: loop exit
PB: predicated region body
PF: predicated region fallthrough
CT: control target
= control target key end

     0   :  { %vm52_vm0 = vcmask 1043456   ;;  %vm39_vm1 = vcmask 326656   ;;  %vm85_vm2 = vcmask 130048   ;;  %s206_s1 = inlined_call_operand.vmem [shape: f32[40,16], index: 1, kind: input, shape index: {}]   ;;  %s207_s2 = inlined_call_operand.vmem [shape: f32[1,16], index: 2, kind: input, shape index: {}]   ;;  %s208_s0 = inlined_call_operand.vmem [shape: f32[64,40], index: 0, kind: input, shape index: {}]   ;;  %s209_s3 = inlined_call_operand.vmem [shape: f32[64,16], index: 3, kind: output, shape index: {}]  }
   0x1   :  { %v31_v0 = vld [vmem:[%s206_s1 + $0x20] sm:$0xff]  ;;  %v29_v2 = vld [vmem:[%s206_s1 + $0x10] sm:$0xff]  ;;  %v30_v3 = vld [vmem:[%s206_s1 + $0x18] sm:$0xff] }
   0x2   :  { %v34_v1 = vpack.c.bf16 %v31_v0, %v31_v0  ;;  %v33_v5 = vpack.c.bf16 %v30_v3, %v29_v2  ;;  %v27_v6 = vld [vmem:[%s206_s1] sm:$0xff]  ;;  %v28_v7 = vld [vmem:[%s206_s1 + $0x8] sm:$0xff]  ;;  %v17_v11 = vld [vmem:[%s208_s0 + $0x10] sm:$0xff] }
   0x3   :  { %v15_v8 = vld [vmem:[%s208_s0] sm:$0xff]  ;;  %v16_v9 = vld [vmem:[%s208_s0 + $0x8] sm:$0xff]  ;;  %v32_v10 = vpack.c.bf16 %v28_v7, %v27_v6  ;;  %v18_v12 = vld [vmem:[%s208_s0 + $0x18] sm:$0xff] }
   0x4   :  { %v54_v4 = vsel %vm52_vm0, %v34_v1, 0  ;;  %v19_v13 = vld [vmem:[%s208_s0 + $0x20] sm:$0xff]  ;;  %v20_v14 = vld [vmem:[%s208_s0 + $0x28] sm:$0xff]  ;;  %v21_v15 = vld [vmem:[%s208_s0 + $0x30] sm:$0xff]  ;;  %v23_v17 = vpack.c.bf16 %v16_v9, %v15_v8  ;;  %v24_v18 = vpack.c.bf16 %v18_v12, %v17_v11 }
   0x5   :  { %61 = vmatpush.bf16.msra.mxu0 %v54_v4  ;;  %102 = vmatpush.bf16.msra.mxu1 %v54_v4  ;;  %v22_v16 = vld [vmem:[%s208_s0 + $0x38] sm:$0xff]  ;;  %v25_v19 = vpack.c.bf16 %v20_v14, %v19_v13  ;;  %v111_v21 = vld [vmem:[%s207_s2] ss:$0 sm:$0xff] }
   0x6   :  { %103 = vmatpush.bf16.msra.mxu2 %v54_v4  ;;  %104 = vmatpush.bf16.msra.mxu3 %v54_v4  ;;  %v26_v20 = vpack.c.bf16 %v22_v16, %v21_v15 }
   0x9   :  { %62 = vmatpush.bf16.msra.mxu0 %v33_v5  ;;  %105 = vmatpush.bf16.msra.mxu1 %v33_v5 }
   0xa   :  { %106 = vmatpush.bf16.msra.mxu2 %v33_v5  ;;  %107 = vmatpush.bf16.msra.mxu3 %v33_v5 }
   0xd   :  { %63 = vmatpush.bf16.msra.mxu0 %v32_v10  ;;  %108 = vmatpush.bf16.msra.mxu1 %v32_v10 }
   0xe   :  { %109 = vmatpush.bf16.msra.mxu2 %v32_v10  ;;  %110 = vmatpush.bf16.msra.mxu3 %v32_v10 }
  0x10   :  { %98 = vmatmul.msk.bf16.vlgmr.msra.gmra.mxu0 %vm39_vm1, %v23_v17  ;;  %99 = vmatmul.msk.bf16.vlgmr.msra.gmra.mxu1 %vm39_vm1, %v24_v18 }
  0x11   :  { %100 = vmatmul.msk.bf16.vlgmr.msra.gmra.mxu2 %vm39_vm1, %v25_v19  ;;  %101 = vmatmul.msk.bf16.vlgmr.msra.gmra.mxu3 %vm39_vm1, %v26_v20 }
  0x8d   :  { %v65_v22 = vpop.f32.mrf.mxu0  ;;  %v70_v23 = vpop.f32.mrf.mxu1 }
  0x8e   :  { %v66_v24 = vadd.f32 %v111_v21, %v65_v22  ;;  %v71_v25 = vadd.f32 %v111_v21, %v70_v23 }
  0x90   :  { %86 = vst.msk [vmem:[%s209_s3] sm:$0xff] %vm85_vm2, %v66_v24 }
  0x91   :  { %88 = vst.msk [vmem:[%s209_s3 + $0x10] sm:$0xff] %vm85_vm2, %v71_v25 }
  0x94   :  { %v75_v26 = vpop.f32.mrf.mxu2  ;;  %v80_v27 = vpop.f32.mrf.mxu3 }
  0x95   :  { %v76_v28 = vadd.f32 %v111_v21, %v75_v26  ;;  %v81_v29 = vadd.f32 %v111_v21, %v80_v27  ;;  %v67_v30 = vpop.f32.mrf.mxu0  ;;  %v72_v31 = vpop.f32.mrf.mxu1 }
  0x96   :  { %v68_v32 = vadd.f32 %v111_v21, %v67_v30  ;;  %v73_v33 = vadd.f32 %v111_v21, %v72_v31 }
  0x97   :  { %90 = vst.msk [vmem:[%s209_s3 + $0x20] sm:$0xff] %vm85_vm2, %v76_v28 }
  0x98   :  { %92 = vst.msk [vmem:[%s209_s3 + $0x30] sm:$0xff] %vm85_vm2, %v81_v29 }
  0x99   :  { %87 = vst.msk [vmem:[%s209_s3 + $0x8] sm:$0xff] %vm85_vm2, %v68_v32 }
  0x9a   :  { %89 = vst.msk [vmem:[%s209_s3 + $0x18] sm:$0xff] %vm85_vm2, %v73_v33 }
  0x9c   :  { %v77_v34 = vpop.f32.mrf.mxu2  ;;  %v82_v35 = vpop.f32.mrf.mxu3 }
  0x9d   :  { %v78_v36 = vadd.f32 %v111_v21, %v77_v34  ;;  %v83_v37 = vadd.f32 %v111_v21, %v82_v35 }
  0x9f   :  { %91 = vst.msk [vmem:[%s209_s3 + $0x28] sm:$0xff] %vm85_vm2, %v78_v36 }
  0xa0   :  { %93 = vst.msk [vmem:[%s209_s3 + $0x38] sm:$0xff] %vm85_vm2, %v83_v37 }

// kernel: nncrf_forward.19
= control target key start
LH: loop header
LB: loop body
LE: loop exit
PB: predicated region body
PF: predicated region fallthrough
CT: control target
= control target key end

     0   :  { %vm57_vm0 = vcmask 523264   ;;  %vm136_vm1 = vcmask 1043456   ;;  %vm137_vm2 = vcmask 523268   ;;  %s314_s1 = inlined_call_operand.vmem [shape: f32[64,192], index: 1, kind: input, shape index: {}]   ;;  %s315_s0 = inlined_call_operand.vmem [shape: f32[64,64], index: 0, kind: input, shape index: {}]   ;;  %s316_s2 = inlined_call_operand.vmem [shape: f32[1,192], index: 2, kind: input, shape index: {}]   ;;  %s317_s3 = inlined_call_operand.vmem [shape: bf16[64,192], index: 3, kind: output, shape index: {}]  }
   0x1   :  { %v39_v0 = vld [vmem:[%s314_s1 + $0x60] sm:$0xff]  ;;  %v41_v1 = vld [vmem:[%s314_s1 + $0x70] sm:$0xff]  ;;  %v40_v2 = vld [vmem:[%s314_s1 + $0x68] sm:$0xff] }
   0x2   :  { %v49_v3 = vpack.c.bf16 %v41_v1, %v39_v0  ;;  %v42_v4 = vld [vmem:[%s314_s1 + $0x78] sm:$0xff]  ;;  %v35_v5 = vld [vmem:[%s314_s1 + $0x40] sm:$0xff]  ;;  %v37_v6 = vld [vmem:[%s314_s1 + $0x50] sm:$0xff] }
   0x3   :  { %v50_v7 = vpack.c.bf16 %v42_v4, %v40_v2  ;;  %v36_v8 = vld [vmem:[%s314_s1 + $0x48] sm:$0xff]  ;;  %v38_v9 = vld [vmem:[%s314_s1 + $0x58] sm:$0xff]  ;;  %v47_v10 = vpack.c.bf16 %v37_v6, %v35_v5  ;;  %v31_v12 = vld [vmem:[%s314_s1 + $0x20] sm:$0xff] }
   0x4   :  { %74 = vmatpush.bf16.msra.mxu0 %v49_v3  ;;  %159 = vmatpush.bf16.msra.mxu2 %v49_v3  ;;  %v48_v11 = vpack.c.bf16 %v38_v9, %v36_v8  ;;  %v33_v13 = vld [vmem:[%s314_s1 + $0x30] sm:$0xff]  ;;  %v32_v14 = vld [vmem:[%s314_s1 + $0x28] sm:$0xff]  ;;  %v34_v15 = vld [vmem:[%s314_s1 + $0x38] sm:$0xff] }
   0x5   :  { %103 = vmatpush.bf16.msra.mxu1 %v50_v7  ;;  %163 = vmatpush.bf16.msra.mxu3 %v50_v7  ;;  %v45_v16 = vpack.c.bf16 %v33_v13, %v31_v12  ;;  %v46_v17 = vpack.c.bf16 %v34_v15, %v32_v14  ;;  %v27_v18 = vld [vmem:[%s314_s1] sm:$0xff]  ;;  %v29_v19 = vld [vmem:[%s314_s1 + $0x10] sm:$0xff]  ;;  %v28_v20 = vld [vmem:[%s314_s1 + $0x8] sm:$0xff] }
   0x6   :  { %v30_v21 = vld [vmem:[%s314_s1 + $0x18] sm:$0xff]  ;;  %v15_v22 = vld [vmem:[%s315_s0] sm:$0xff]  ;;  %v43_v23 = vpack.c.bf16 %v29_v19, %v27_v18  ;;  %v16_v24 = vld [vmem:[%s315_s0 + $0x8] sm:$0xff] }
   0x7   :  { %v19_v25 = vld [vmem:[%s315_s0 + $0x20] sm:$0xff]  ;;  %v20_v26 = vld [vmem:[%s315_s0 + $0x28] sm:$0xff]  ;;  %v44_v27 = vpack.c.bf16 %v30_v21, %v28_v20  ;;  %v23_v28 = vpack.c.bf16 %v16_v24, %v15_v22  ;;  %v17_v30 = vld [vmem:[%s315_s0 + $0x10] sm:$0xff] }
   0x8   :  { %75 = vmatpush.bf16.msra.mxu0 %v47_v10  ;;  %160 = vmatpush.bf16.msra.mxu2 %v47_v10  ;;  %v25_v29 = vpack.c.bf16 %v20_v26, %v19_v25  ;;  %v18_v31 = vld [vmem:[%s315_s0 + $0x18] sm:$0xff]  ;;  %v21_v32 = vld [vmem:[%s315_s0 + $0x30] sm:$0xff]  ;;  %v51_v36 = vld [vmem:[%s316_s2] sm:$0x3] }
   0x9   :  { %104 = vmatpush.bf16.msra.mxu1 %v48_v11  ;;  %164 = vmatpush.bf16.msra.mxu3 %v48_v11  ;;  %v22_v33 = vld [vmem:[%s315_s0 + $0x38] sm:$0xff]  ;;  %v24_v34 = vpack.c.bf16 %v18_v31, %v17_v30  ;;  %v53_v37 = vperm.slane %v51_v36, 0  ;;  %v54_v38 = vperm.slane %v51_v36, 1  ;;  %vm270_vm3 = vmor %vm137_vm2, %vm136_vm1 }
   0xa   :  { %v26_v35 = vpack.c.bf16 %v22_v33, %v21_v32 }
   0xc   :  { %76 = vmatpush.bf16.msra.mxu0 %v45_v16  ;;  %161 = vmatpush.bf16.msra.mxu2 %v45_v16 }
   0xd   :  { %105 = vmatpush.bf16.msra.mxu1 %v46_v17  ;;  %165 = vmatpush.bf16.msra.mxu3 %v46_v17 }
  0x10   :  { %77 = vmatpush.bf16.msra.mxu0 %v43_v23  ;;  %162 = vmatpush.bf16.msra.mxu2 %v43_v23 }
  0x11   :  { %106 = vmatpush.bf16.msra.mxu1 %v44_v27  ;;  %166 = vmatpush.bf16.msra.mxu3 %v44_v27 }
  0x13   :  { %151 = vmatmul.msk.bf16.vlgmr.msra.gmra.mxu0 %vm57_vm0, %v23_v28  ;;  %153 = vmatmul.msk.bf16.vlgmr.msra.gmra.mxu2 %vm57_vm0, %v25_v29 }
  0x14   :  { %155 = vmatmul.msk.bf16.vlgmr.msra.gmra.mxu1 %vm57_vm0, %v23_v28  ;;  %157 = vmatmul.msk.bf16.vlgmr.msra.gmra.mxu3 %vm57_vm0, %v25_v29 }
  0x23   :  { %152 = vmatmul.msk.bf16.gmra.mxu0 %vm57_vm0, %v24_v34  ;;  %154 = vmatmul.msk.bf16.gmra.mxu2 %vm57_vm0, %v26_v35 }
  0x24   :  { %156 = vmatmul.msk.bf16.gmra.mxu1 %vm57_vm0, %v24_v34  ;;  %158 = vmatmul.msk.bf16.gmra.mxu3 %vm57_vm0, %v26_v35 }
  0x90   :  { %v79_v39 = vpop.f32.mrf.mxu0 }
  0x91   :  { %v80_v40 = vadd.f32 %v79_v39, %v53_v37  ;;  %v108_v41 = vpop.f32.mrf.mxu1 }
  0x92   :  { %v109_v42 = vadd.f32 %v108_v41, %v54_v38 }
  0x94   :  { %v128_v44 = vpack.c.bf16 %v109_v42, %v80_v40 }
  0x96   :  { %139 = vst.msk [vmem:[%s317_s3] sm:$0xff] %vm270_vm3, %v128_v44  ;;  %v89_v45 = vpop.f32.mrf.mxu2 }
  0x97   :  { %v90_v46 = vadd.f32 %v89_v45, %v53_v37  ;;  %v118_v47 = vpop.f32.mrf.mxu3 }
  0x98   :  { %v119_v48 = vadd.f32 %v118_v47, %v54_v38  ;;  %v81_v49 = vpop.f32.mrf.mxu0 }
  0x99   :  { %v82_v50 = vadd.f32 %v81_v49, %v53_v37  ;;  %v110_v51 = vpop.f32.mrf.mxu1 }
  0x9a   :  { %v132_v52 = vpack.c.bf16 %v119_v48, %v90_v46  ;;  %v111_v53 = vadd.f32 %v110_v51, %v54_v38 }
  0x9c   :  { %143 = vst.msk [vmem:[%s317_s3 + $0x20] sm:$0xff] %vm270_vm3, %v132_v52  ;;  %v129_v54 = vpack.c.bf16 %v111_v53, %v82_v50 }
  0x9e   :  { %140 = vst.msk [vmem:[%s317_s3 + $0x8] sm:$0xff] %vm270_vm3, %v129_v54  ;;  %v91_v55 = vpop.f32.mrf.mxu2 }
  0x9f   :  { %v92_v56 = vadd.f32 %v91_v55, %v53_v37  ;;  %v120_v57 = vpop.f32.mrf.mxu3 }
  0xa0   :  { %v121_v58 = vadd.f32 %v120_v57, %v54_v38  ;;  %v84_v59 = vpop.f32.mrf.mxu0 }
  0xa1   :  { %v85_v60 = vadd.f32 %v84_v59, %v53_v37  ;;  %v113_v61 = vpop.f32.mrf.mxu1 }
  0xa2   :  { %v133_v62 = vpack.c.bf16 %v121_v58, %v92_v56  ;;  %v114_v63 = vadd.f32 %v113_v61, %v54_v38 }
  0xa4   :  { %144 = vst.msk [vmem:[%s317_s3 + $0x28] sm:$0xff] %vm270_vm3, %v133_v62  ;;  %v130_v0 = vpack.c.bf16 %v114_v63, %v85_v60 }
  0xa6   :  { %141 = vst.msk [vmem:[%s317_s3 + $0x10] sm:$0xff] %vm270_vm3, %v130_v0  ;;  %v94_v1 = vpop.f32.mrf.mxu2 }
  0xa7   :  { %v95_v2 = vadd.f32 %v94_v1, %v53_v37  ;;  %v123_v3 = vpop.f32.mrf.mxu3 }
  0xa8   :  { %v124_v4 = vadd.f32 %v123_v3, %v54_v38  ;;  %v86_v5 = vpop.f32.mrf.mxu0 }
  0xa9   :  { %v87_v6 = vadd.f32 %v86_v5, %v53_v37  ;;  %v115_v7 = vpop.f32.mrf.mxu1 }
  0xaa   :  { %v134_v8 = vpack.c.bf16 %v124_v4, %v95_v2  ;;  %v116_v9 = vadd.f32 %v115_v7, %v54_v38 }
  0xac   :  { %145 = vst.msk [vmem:[%s317_s3 + $0x30] sm:$0xff] %vm270_vm3, %v134_v8  ;;  %v131_v10 = vpack.c.bf16 %v116_v9, %v87_v6 }
  0xae   :  { %142 = vst.msk [vmem:[%s317_s3 + $0x18] sm:$0xff] %vm270_vm3, %v131_v10  ;;  %v96_v11 = vpop.f32.mrf.mxu2 }
  0xaf   :  { %v97_v12 = vadd.f32 %v96_v11, %v53_v37  ;;  %v125_v13 = vpop.f32.mrf.mxu3 }
  0xb0   :  { %v126_v14 = vadd.f32 %v125_v13, %v54_v38 }
  0xb2   :  { %v135_v15 = vpack.c.bf16 %v126_v14, %v97_v12 }
  0xb4   :  { %146 = vst.msk [vmem:[%s317_s3 + $0x38] sm:$0xff] %vm270_vm3, %v135_v15 }

// kernel: nncrf_forward.20
= control target key start
LH: loop header
LB: loop body
LE: loop exit
PB: predicated region body
PF: predicated region fallthrough
CT: control target
= control target key end

     0   :  { %vm16_vm0 = vcmask 261120   ;;  %v877_v3 = vmov 0.0   ;;  %s878_s26 = smov 64   ;;  %s879_s27 = smov 32   ;;  %s1121_s1 = inlined_call_operand.vmem [shape: f32[32,192], index: 1, kind: input, shape index: {}]   ;;  %s1122_s0 = inlined_call_operand.vmem [shape: bf16[8,8,192], index: 0, kind: input, shape index: {}]   ;;  %s1123_s2 = inlined_call_operand.vmem [shape: f32[8,8,32], index: 2, kind: output, shape index: {}]  }
   0x1   :  { %v23_v0 = vld [vmem:[%s1121_s1 + $0x20] sm:$0xff]  ;;  %v25_v1 = vld [vmem:[%s1121_s1 + $0x30] sm:$0xff]  ;;  %v24_v2 = vld [vmem:[%s1121_s1 + $0x28] sm:$0xff]  ;;  %17 = vst.msk [vmem:[#allocation2] sm:$0xff] %vm16_vm0, %v877_v3  ;;  %s880_s28 = smov 96  }
   0x2   :  { %v906_v4 = vpack.c.bf16 %v25_v1, %v23_v0  ;;  %v26_v5 = vld [vmem:[%s1121_s1 + $0x38] sm:$0xff]  ;;  %v19_v6 = vld [vmem:[%s1121_s1] sm:$0xff]  ;;  %v21_v7 = vld [vmem:[%s1121_s1 + $0x10] sm:$0xff]  ;;  %18 = vst.msk [vmem:[#allocation3] sm:$0xff] %vm16_vm0, %v877_v3 }
   0x3   :  { %v918_v8 = vpack.c.bf16 %v26_v5, %v24_v2  ;;  %v20_v9 = vld [vmem:[%s1121_s1 + $0x8] sm:$0xff]  ;;  %v22_v10 = vld [vmem:[%s1121_s1 + $0x18] sm:$0xff]  ;;  %v927_v11 = vpack.c.bf16 %v21_v7, %v19_v6  ;;  %v33_v15 = vld [vmem:[%s1122_s0] sm:$0xff] }
   0x4   :  { %47 = vmatpush.bf16.msra.mxu0 %v906_v4  ;;  %138 = vmatpush.bf16.msra.mxu2 %v906_v4  ;;  %v931_v12 = vpack.c.bf16 %v22_v10, %v20_v9  ;;  %v35_v16 = vunpack.c.h.bf16 %v33_v15  ;;  %v34_v24 = vunpack.c.l.bf16 %v33_v15  ;;  %v774_v53 = vld [vmem:[%s1122_s0 + $0x8] sm:$0xff] }
   0x5   :  { %60 = vmatpush.bf16.msra.mxu1 %v918_v8  ;;  %151 = vmatpush.bf16.msra.mxu3 %v918_v8  ;;  %v123_v54 = vunpack.c.l.bf16 %v774_v53  ;;  %v124_v55 = vunpack.c.h.bf16 %v774_v53 }
   0x8   :  { %48 = vmatpush.bf16.msra.mxu0 %v927_v11  ;;  %v31_v13 = vld [vmem:[#allocation2] sm:$0xff]  ;;  %139 = vmatpush.bf16.msra.mxu2 %v927_v11 }
   0x9   :  { %61 = vmatpush.bf16.msra.mxu1 %v931_v12  ;;  %v36_v14 = vpack.c.bf16 %v31_v13, %v31_v13  ;;  %152 = vmatpush.bf16.msra.mxu3 %v931_v12  ;;  %v32_v23 = vld [vmem:[#allocation3] sm:$0xff] }
   0xb   :  { %771 = vmatmul.msk.bf16.vlgmr.msra.gmra.mxu0 %vm16_vm0, %v36_v14 }
   0xc   :  { %230 = vmatpush.bf16.msrb.mxu0 %v906_v4  ;;  %772 = vmatmul.msk.bf16.vlgmr.msra.gmra.mxu1 %vm16_vm0, %v36_v14 }
   0xd   :  { %243 = vmatpush.bf16.msrb.mxu1 %v918_v8  ;;  %335 = vmatpush.bf16.msrb.mxu3 %v918_v8 }
   0xe   :  { %322 = vmatpush.bf16.msrb.mxu2 %v906_v4 }
  0x10   :  { %231 = vmatpush.bf16.msrb.mxu0 %v927_v11 }
  0x11   :  { %244 = vmatpush.bf16.msrb.mxu1 %v931_v12  ;;  %336 = vmatpush.bf16.msrb.mxu3 %v931_v12 }
  0x12   :  { %323 = vmatpush.bf16.msrb.mxu2 %v927_v11 }
  0x14   :  { %414 = vmatpush.bf16.msra.mxu0 %v906_v4 }
  0x15   :  { %427 = vmatpush.bf16.msra.mxu1 %v918_v8 }
  0x18   :  { %415 = vmatpush.bf16.msra.mxu0 %v927_v11 }
  0x19   :  { %428 = vmatpush.bf16.msra.mxu1 %v931_v12 }
  0x88   :  { %v50_v17 = vpop.f32.mrf.mxu0 }
  0x89   :  { %v63_v18 = vpop.f32.mrf.mxu1  ;;  %v67_v25 = vadd.f32 %v50_v17, %v34_v24 }
  0x8a   :  { %v68_v19 = vadd.f32 %v63_v18, %v35_v16 }
  0x8b   :  { %v773_v26 = vmul.f32 -1.442695, %v67_v25 }
  0x8c   :  { %813 = vtanh.f32 %v68_v19 }
  0x8d   :  { %815 = vpow2.f32 %v773_v26 }
  0x90   :  { %v52_v20 = vpop.f32.mrf.mxu0 }
  0x91   :  { %v65_v21 = vpop.f32.mrf.mxu1 }
  0x92   :  { %v814_v22 = vpop.eup %813 }
  0x93   :  { %91 = vrot.lane.b32.xlu0 %v814_v22, %s878_s26  ;;  %v816_v27 = vpop.eup %815 }
  0x94   :  { %v72_v28 = vadd.f32 1.0, %v816_v27 }
  0x96   :  { %817 = vrcp.f32 %v72_v28  ;;  %vm78_vm1 = vweird.f32 %v72_v28  ;;  %v84_v33 = vand.u32 2147483648, %v72_v28  ;;  %v82_v35 = vand.u32 2147483647, %v72_v28 }
  0x98   :  { %v85_v36 = vor.u32 1.1754944e-38, %v84_v33  ;;  %vm83_vm4 = vcmp.eq.f32.partialorder %v82_v35, 8.507059e+37 }
  0x9b   :  { %101 = vrot.lane.b32.xlu0 %v32_v23, %s878_s26 }
  0x9c   :  { %v818_v29 = vpop.eup %817 }
  0x9d   :  { %v74_v30 = vmul.f32 %v818_v29, %v72_v28  ;;  %vm79_vm2 = vweird.f32 %v818_v29 }
  0x9e   :  { %vm80_vm3 = vmor %vm78_vm1, %vm79_vm2 }
  0x9f   :  { %v75_v31 = vsub.f32 1.0, %v74_v30  ;;  %v779_v30 = vld [vmem:[%s1122_s0 + $0x10] sm:$0xff] }
  0xa1   :  { %v76_v32 = vmul.f32 %v818_v29, %v75_v31  ;;  %v215_v31 = vunpack.c.l.bf16 %v779_v30 }
  0xa3   :  { %v77_v34 = vadd.f32 %v818_v29, %v76_v32  ;;  %v216_v32 = vunpack.c.h.bf16 %v779_v30 }
  0xa5   :  { %v81_v37 = vsel %vm80_vm3, %v818_v29, %v77_v34 }
  0xa6   :  { %v86_v39 = vsel %vm83_vm4, %v85_v36, %v81_v37 }
  0xa7   :  { %v89_v44 = vmul.f32 %v814_v22, %v86_v39 }
 0x105   :  { %v92_v38 = vpop.permute.xlu0 %91 }
 0x106   :  { %v94_v40 = vmul.f32 %v92_v38, %v86_v39 }
 0x108   :  { %96 = vrot.lane.b32.xlu1 %v94_v40, %s879_s27 }
 0x10d   :  { %v102_v41 = vpop.permute.xlu0 %101 }
 0x10e   :  { %v104_v42 = vmul.f32 %v102_v41, %v86_v39 }
 0x110   :  { %106 = vrot.lane.b32.xlu1 %v104_v42, %s878_s26 }
 0x17a   :  { %v97_v43 = vpop.permute.xlu1 %96 }
 0x17b   :  { %v99_v45 = vadd.f32 %v97_v43, %v89_v44 }
 0x182   :  { %v107_v46 = vpop.permute.xlu1 %106 }
 0x183   :  { %v109_v47 = vadd.f32 %v107_v46, %v99_v45 }
 0x185   :  { %819 = vtanh.f32 %v109_v47  ;;  %192 = vrot.lane.b32.xlu1 %v109_v47, %s878_s26 }
 0x18b   :  { %v820_v48 = vpop.eup %819 }
 0x18c   :  { %112 = vrot.lane.b32.xlu2 %v820_v48, %s879_s27 }
 0x1e6   :  { %v113_v49 = vpop.permute.xlu2 %112 }
 0x1e7   :  { %v961_v50 = vmul.f32 %v113_v49, %v86_v39 }
 0x1e9   :  { %v125_v51 = vpack.c.bf16 %v961_v50, %v961_v50 }
 0x1eb   :  { %127 = vrot.lane.b32.xlu2 %v125_v51, %s880_s28 }
 0x1f7   :  { %v193_v15 = vpop.permute.xlu1 %192 }
 0x245   :  { %v128_v52 = vpop.permute.xlu2 %127 }
 0x246   :  { %775 = vmatmul.msk.bf16.vlgmr.msra.gmra.mxu2 %vm16_vm0, %v128_v52  ;;  %776 = vmatmul.msk.bf16.vlgmr.msra.gmra.mxu3 %vm16_vm0, %v128_v52 }
 0x247   :  { %519 = vmatpush.bf16.msra.mxu3 %v918_v8  ;;  %506 = vmatpush.bf16.msra.mxu2 %v906_v4 }
 0x24b   :  { %520 = vmatpush.bf16.msra.mxu3 %v931_v12  ;;  %507 = vmatpush.bf16.msra.mxu2 %v927_v11 }
 0x2c9   :  { %v141_v56 = vpop.f32.mrf.mxu2  ;;  %v154_v57 = vpop.f32.mrf.mxu3 }
 0x2ca   :  { %v158_v58 = vadd.f32 %v141_v56, %v123_v54  ;;  %v159_v59 = vadd.f32 %v154_v57, %v124_v55 }
 0x2cc   :  { %v777_v60 = vmul.f32 -1.442695, %v158_v58  ;;  %821 = vtanh.f32 %v159_v59 }
 0x2ce   :  { %823 = vpow2.f32 %v777_v60 }
 0x2d1   :  { %v143_v61 = vpop.f32.mrf.mxu2  ;;  %v156_v62 = vpop.f32.mrf.mxu3 }
 0x2d2   :  { %v822_v63 = vpop.eup %821 }
 0x2d3   :  { %182 = vrot.lane.b32.xlu0 %v822_v63, %s878_s26 }
 0x2d4   :  { %v824_v0 = vpop.eup %823 }
 0x2d5   :  { %v163_v1 = vadd.f32 1.0, %v824_v0 }
 0x2d7   :  { %825 = vrcp.f32 %v163_v1  ;;  %v175_v6 = vand.u32 2147483648, %v163_v1  ;;  %v173_v9 = vand.u32 2147483647, %v163_v1  ;;  %vm169_vm6 = vweird.f32 %v163_v1 }
 0x2d9   :  { %v176_v13 = vor.u32 1.1754944e-38, %v175_v6  ;;  %vm174_vm8 = vcmp.eq.f32.partialorder %v173_v9, 8.507059e+37 }
 0x2dd   :  { %v826_v2 = vpop.eup %825 }
 0x2de   :  { %v165_v3 = vmul.f32 %v826_v2, %v163_v1  ;;  %vm170_vm5 = vweird.f32 %v826_v2 }
 0x2df   :  { %vm171_vm7 = vmor %vm169_vm6, %vm170_vm5 }
 0x2e0   :  { %v166_v5 = vsub.f32 1.0, %v165_v3 }
 0x2e2   :  { %v167_v7 = vmul.f32 %v826_v2, %v166_v5  ;;  %v784_v5 = vld [vmem:[%s1122_s0 + $0x18] sm:$0xff] }
 0x2e3   :  { %v307_v6 = vunpack.c.l.bf16 %v784_v5 }
 0x2e4   :  { %v168_v10 = vadd.f32 %v826_v2, %v167_v7  ;;  %v308_v7 = vunpack.c.h.bf16 %v784_v5 }
 0x2e6   :  { %v172_v14 = vsel %vm171_vm7, %v826_v2, %v168_v10 }
 0x2e7   :  { %v177_v16 = vsel %vm174_vm8, %v176_v13, %v172_v14 }
 0x2e8   :  { %v195_v17 = vmul.f32 %v193_v15, %v177_v16  ;;  %v180_v20 = vmul.f32 %v822_v63, %v177_v16 }
 0x2ea   :  { %197 = vrot.lane.b32.xlu0 %v195_v17, %s878_s26 }
 0x345   :  { %v183_v18 = vpop.permute.xlu0 %182 }
 0x346   :  { %v185_v19 = vmul.f32 %v183_v18, %v177_v16 }
 0x348   :  { %187 = vrot.lane.b32.xlu2 %v185_v19, %s879_s27 }
 0x35c   :  { %v198_v23 = vpop.permute.xlu0 %197 }
 0x3a2   :  { %v188_v21 = vpop.permute.xlu2 %187 }
 0x3a3   :  { %v190_v22 = vadd.f32 %v188_v21, %v180_v20 }
 0x3a5   :  { %v200_v24 = vadd.f32 %v198_v23, %v190_v22 }
 0x3a7   :  { %827 = vtanh.f32 %v200_v24 }
 0x3ad   :  { %v828_v25 = vpop.eup %827 }
 0x3ae   :  { %203 = vrot.lane.b32.xlu1 %v828_v25, %s879_s27 }
 0x3b6   :  { %284 = vrot.lane.b32.xlu1 %v200_v24, %s878_s26 }
 0x420   :  { %v204_v26 = vpop.permute.xlu1 %203 }
 0x421   :  { %v980_v27 = vmul.f32 %v204_v26, %v177_v16 }
 0x423   :  { %v217_v28 = vpack.c.bf16 %v980_v27, %v980_v27 }
 0x425   :  { %219 = vrot.lane.b32.xlu2 %v217_v28, %s880_s28 }
 0x428   :  { %v285_v53 = vpop.permute.xlu1 %284 }
 0x47f   :  { %v220_v29 = vpop.permute.xlu2 %219 }
 0x480   :  { %780 = vmatmul.msk.bf16.vlgmr.msrb.gmra.mxu0 %vm16_vm0, %v220_v29  ;;  %781 = vmatmul.msk.bf16.vlgmr.msrb.gmra.mxu1 %vm16_vm0, %v220_v29 }
 0x481   :  { %611 = vmatpush.bf16.msrb.mxu1 %v918_v8  ;;  %598 = vmatpush.bf16.msrb.mxu0 %v906_v4 }
 0x485   :  { %612 = vmatpush.bf16.msrb.mxu1 %v931_v12  ;;  %599 = vmatpush.bf16.msrb.mxu0 %v927_v11 }
 0x4fd   :  { %v233_v33 = vpop.f32.mrf.mxu0  ;;  %v246_v34 = vpop.f32.mrf.mxu1 }
 0x4fe   :  { %v250_v35 = vadd.f32 %v233_v33, %v215_v31  ;;  %v251_v36 = vadd.f32 %v246_v34, %v216_v32 }
 0x500   :  { %v782_v37 = vmul.f32 -1.442695, %v250_v35  ;;  %829 = vtanh.f32 %v251_v36 }
 0x502   :  { %831 = vpow2.f32 %v782_v37 }
 0x505   :  { %v235_v38 = vpop.f32.mrf.mxu0  ;;  %v248_v39 = vpop.f32.mrf.mxu1 }
 0x506   :  { %v830_v40 = vpop.eup %829 }
 0x507   :  { %274 = vrot.lane.b32.xlu0 %v830_v40, %s878_s26 }
 0x508   :  { %v832_v41 = vpop.eup %831 }
 0x509   :  { %v255_v42 = vadd.f32 1.0, %v832_v41 }
 0x50b   :  { %833 = vrcp.f32 %v255_v42  ;;  %v267_v46 = vand.u32 2147483648, %v255_v42  ;;  %v265_v48 = vand.u32 2147483647, %v255_v42  ;;  %vm261_vm10 = vweird.f32 %v255_v42 }
 0x50d   :  { %v268_v51 = vor.u32 1.1754944e-38, %v267_v46  ;;  %vm266_vm12 = vcmp.eq.f32.partialorder %v265_v48, 8.507059e+37 }
 0x511   :  { %v834_v43 = vpop.eup %833 }
 0x512   :  { %v257_v44 = vmul.f32 %v834_v43, %v255_v42  ;;  %vm262_vm9 = vweird.f32 %v834_v43  ;;  %v789_v42 = vld [vmem:[%s1122_s0 + $0x20] sm:$0xff] }
 0x513   :  { %vm263_vm11 = vmor %vm261_vm10, %vm262_vm9 }
 0x514   :  { %v258_v45 = vsub.f32 1.0, %v257_v44  ;;  %v400_v44 = vunpack.c.h.bf16 %v789_v42 }
 0x516   :  { %v259_v47 = vmul.f32 %v834_v43, %v258_v45 }
 0x518   :  { %v260_v49 = vadd.f32 %v834_v43, %v259_v47 }
 0x51a   :  { %v264_v52 = vsel %vm263_vm11, %v834_v43, %v260_v49  ;;  %v399_v43 = vunpack.c.l.bf16 %v789_v42 }
 0x51b   :  { %v269_v54 = vsel %vm266_vm12, %v268_v51, %v264_v52 }
 0x51c   :  { %v287_v55 = vmul.f32 %v285_v53, %v269_v54  ;;  %v272_v58 = vmul.f32 %v830_v40, %v269_v54 }
 0x51e   :  { %289 = vrot.lane.b32.xlu0 %v287_v55, %s878_s26 }
 0x579   :  { %v275_v56 = vpop.permute.xlu0 %274 }
 0x57a   :  { %v277_v57 = vmul.f32 %v275_v56, %v269_v54 }
 0x57c   :  { %279 = vrot.lane.b32.xlu2 %v277_v57, %s879_s27 }
 0x590   :  { %v290_v61 = vpop.permute.xlu0 %289 }
 0x5d6   :  { %v280_v59 = vpop.permute.xlu2 %279 }
 0x5d7   :  { %v282_v60 = vadd.f32 %v280_v59, %v272_v58 }
 0x5d9   :  { %v292_v62 = vadd.f32 %v290_v61, %v282_v60 }
 0x5db   :  { %835 = vtanh.f32 %v292_v62 }
 0x5e1   :  { %v836_v63 = vpop.eup %835 }
 0x5e2   :  { %295 = vrot.lane.b32.xlu1 %v836_v63, %s879_s27 }
 0x5ea   :  { %376 = vrot.lane.b32.xlu1 %v292_v62, %s878_s26 }
 0x654   :  { %v296_v0 = vpop.permute.xlu1 %295 }
 0x655   :  { %v999_v1 = vmul.f32 %v296_v0, %v269_v54 }
 0x657   :  { %v309_v2 = vpack.c.bf16 %v999_v1, %v999_v1 }
 0x659   :  { %311 = vrot.lane.b32.xlu2 %v309_v2, %s880_s28 }
 0x65c   :  { %v377_v26 = vpop.permute.xlu1 %376 }
 0x6b3   :  { %v312_v3 = vpop.permute.xlu2 %311 }
 0x6b4   :  { %785 = vmatmul.msk.bf16.vlgmr.msrb.gmra.mxu2 %vm16_vm0, %v312_v3  ;;  %786 = vmatmul.msk.bf16.vlgmr.msrb.gmra.mxu3 %vm16_vm0, %v312_v3 }
 0x6b5   :  { %703 = vmatpush.bf16.msrb.mxu3 %v918_v8  ;;  %690 = vmatpush.bf16.msrb.mxu2 %v906_v4 }
 0x6b9   :  { %704 = vmatpush.bf16.msrb.mxu3 %v931_v12  ;;  %691 = vmatpush.bf16.msrb.mxu2 %v927_v11 }
 0x737   :  { %v325_v9 = vpop.f32.mrf.mxu2  ;;  %v338_v10 = vpop.f32.mrf.mxu3 }
 0x738   :  { %v342_v13 = vadd.f32 %v325_v9, %v307_v6  ;;  %v343_v14 = vadd.f32 %v338_v10, %v308_v7 }
 0x73a   :  { %v787_v15 = vmul.f32 -1.442695, %v342_v13  ;;  %837 = vtanh.f32 %v343_v14 }
 0x73c   :  { %839 = vpow2.f32 %v787_v15 }
 0x73f   :  { %v327_v8 = vpop.f32.mrf.mxu2  ;;  %v340_v16 = vpop.f32.mrf.mxu3 }
 0x740   :  { %v838_v4 = vpop.eup %837 }
 0x741   :  { %366 = vrot.lane.b32.xlu0 %v838_v4, %s878_s26 }
 0x742   :  { %v840_v12 = vpop.eup %839 }
 0x743   :  { %v347_v11 = vadd.f32 1.0, %v840_v12 }
 0x745   :  { %841 = vrcp.f32 %v347_v11  ;;  %v359_v20 = vand.u32 2147483648, %v347_v11  ;;  %v357_v22 = vand.u32 2147483647, %v347_v11  ;;  %vm353_vm14 = vweird.f32 %v347_v11 }
 0x747   :  { %v360_v24 = vor.u32 1.1754944e-38, %v359_v20  ;;  %vm358_vm1 = vcmp.eq.f32.partialorder %v357_v22, 8.507059e+37 }
 0x74b   :  { %v842_v17 = vpop.eup %841 }
 0x74c   :  { %v349_v18 = vmul.f32 %v842_v17, %v347_v11  ;;  %vm354_vm13 = vweird.f32 %v842_v17 }
 0x74d   :  { %vm355_vm15 = vmor %vm353_vm14, %vm354_vm13 }
 0x74e   :  { %v350_v19 = vsub.f32 1.0, %v349_v18 }
 0x750   :  { %v351_v21 = vmul.f32 %v842_v17, %v350_v19 }
 0x752   :  { %v352_v23 = vadd.f32 %v842_v17, %v351_v21 }
 0x754   :  { %v356_v25 = vsel %vm355_vm15, %v842_v17, %v352_v23  ;;  %v794_v17 = vld [vmem:[%s1122_s0 + $0x28] sm:$0xff] }
 0x755   :  { %v361_v28 = vsel %vm358_vm1, %v360_v24, %v356_v25  ;;  %v491_v18 = vunpack.c.l.bf16 %v794_v17  ;;  %v492_v19 = vunpack.c.h.bf16 %v794_v17 }
 0x756   :  { %v379_v29 = vmul.f32 %v377_v26, %v361_v28  ;;  %v364_v32 = vmul.f32 %v838_v4, %v361_v28 }
 0x758   :  { %381 = vrot.lane.b32.xlu0 %v379_v29, %s878_s26 }
 0x7b3   :  { %v367_v30 = vpop.permute.xlu0 %366 }
 0x7b4   :  { %v369_v31 = vmul.f32 %v367_v30, %v361_v28 }
 0x7b6   :  { %371 = vrot.lane.b32.xlu2 %v369_v31, %s879_s27 }
 0x7ca   :  { %v382_v35 = vpop.permute.xlu0 %381 }
 0x810   :  { %v372_v33 = vpop.permute.xlu2 %371 }
 0x811   :  { %v374_v34 = vadd.f32 %v372_v33, %v364_v32 }
 0x813   :  { %v384_v36 = vadd.f32 %v382_v35, %v374_v34 }
 0x815   :  { %843 = vtanh.f32 %v384_v36 }
 0x81b   :  { %v844_v37 = vpop.eup %843 }
 0x81c   :  { %387 = vrot.lane.b32.xlu1 %v844_v37, %s879_s27 }
 0x824   :  { %468 = vrot.lane.b32.xlu1 %v384_v36, %s878_s26 }
 0x88e   :  { %v388_v38 = vpop.permute.xlu1 %387 }
 0x88f   :  { %v1018_v39 = vmul.f32 %v388_v38, %v361_v28 }
 0x891   :  { %v401_v40 = vpack.c.bf16 %v1018_v39, %v1018_v39 }
 0x893   :  { %403 = vrot.lane.b32.xlu2 %v401_v40, %s880_s28 }
 0x896   :  { %v469_v2 = vpop.permute.xlu1 %468 }
 0x8ed   :  { %v404_v41 = vpop.permute.xlu2 %403 }
 0x8ee   :  { %790 = vmatmul.msk.bf16.vlgmr.msra.gmra.mxu0 %vm16_vm0, %v404_v41  ;;  %791 = vmatmul.msk.bf16.vlgmr.msra.gmra.mxu1 %vm16_vm0, %v404_v41 }
 0x96b   :  { %v417_v45 = vpop.f32.mrf.mxu0  ;;  %v430_v46 = vpop.f32.mrf.mxu1 }
 0x96c   :  { %v434_v47 = vadd.f32 %v417_v45, %v399_v43  ;;  %v435_v48 = vadd.f32 %v430_v46, %v400_v44 }
 0x96e   :  { %v792_v49 = vmul.f32 -1.442695, %v434_v47  ;;  %845 = vtanh.f32 %v435_v48 }
 0x970   :  { %847 = vpow2.f32 %v792_v49 }
 0x973   :  { %v419_v51 = vpop.f32.mrf.mxu0  ;;  %v432_v52 = vpop.f32.mrf.mxu1 }
 0x974   :  { %v846_v53 = vpop.eup %845 }
 0x975   :  { %458 = vrot.lane.b32.xlu0 %v846_v53, %s878_s26 }
 0x976   :  { %v848_v54 = vpop.eup %847 }
 0x977   :  { %v439_v55 = vadd.f32 1.0, %v848_v54 }
 0x979   :  { %849 = vrcp.f32 %v439_v55  ;;  %v451_v59 = vand.u32 2147483648, %v439_v55  ;;  %v449_v61 = vand.u32 2147483647, %v439_v55  ;;  %vm445_vm3 = vweird.f32 %v439_v55 }
 0x97b   :  { %v452_v63 = vor.u32 1.1754944e-38, %v451_v59  ;;  %vm450_vm5 = vcmp.eq.f32.partialorder %v449_v61, 8.507059e+37 }
 0x97f   :  { %v850_v56 = vpop.eup %849 }
 0x980   :  { %v441_v57 = vmul.f32 %v850_v56, %v439_v55  ;;  %vm446_vm2 = vweird.f32 %v850_v56 }
 0x981   :  { %vm447_vm4 = vmor %vm445_vm3, %vm446_vm2 }
 0x982   :  { %v442_v58 = vsub.f32 1.0, %v441_v57  ;;  %v799_v57 = vld [vmem:[%s1122_s0 + $0x30] sm:$0xff] }
 0x983   :  { %v584_v59 = vunpack.c.h.bf16 %v799_v57 }
 0x984   :  { %v443_v60 = vmul.f32 %v850_v56, %v442_v58  ;;  %v583_v58 = vunpack.c.l.bf16 %v799_v57 }
 0x986   :  { %v444_v62 = vadd.f32 %v850_v56, %v443_v60 }
 0x988   :  { %v448_v0 = vsel %vm447_vm4, %v850_v56, %v444_v62 }
 0x989   :  { %v453_v3 = vsel %vm450_vm5, %v452_v63, %v448_v0 }
 0x98a   :  { %v471_v5 = vmul.f32 %v469_v2, %v453_v3  ;;  %v456_v9 = vmul.f32 %v846_v53, %v453_v3 }
 0x98c   :  { %473 = vrot.lane.b32.xlu0 %v471_v5, %s878_s26 }
 0x9e7   :  { %v459_v6 = vpop.permute.xlu0 %458 }
 0x9e8   :  { %v461_v7 = vmul.f32 %v459_v6, %v453_v3 }
 0x9ea   :  { %463 = vrot.lane.b32.xlu2 %v461_v7, %s879_s27 }
 0x9fe   :  { %v474_v14 = vpop.permute.xlu0 %473 }
 0xa44   :  { %v464_v10 = vpop.permute.xlu2 %463 }
 0xa45   :  { %v466_v13 = vadd.f32 %v464_v10, %v456_v9 }
 0xa47   :  { %v476_v15 = vadd.f32 %v474_v14, %v466_v13 }
 0xa49   :  { %851 = vtanh.f32 %v476_v15 }
 0xa4f   :  { %v852_v8 = vpop.eup %851 }
 0xa50   :  { %479 = vrot.lane.b32.xlu1 %v852_v8, %s879_s27 }
 0xa58   :  { %560 = vrot.lane.b32.xlu1 %v476_v15, %s878_s26 }
 0xac2   :  { %v480_v16 = vpop.permute.xlu1 %479 }
 0xac3   :  { %v1033_v4 = vmul.f32 %v480_v16, %v453_v3 }
 0xac5   :  { %v493_v12 = vpack.c.bf16 %v1033_v4, %v1033_v4 }
 0xac7   :  { %495 = vrot.lane.b32.xlu2 %v493_v12, %s880_s28 }
 0xaca   :  { %v561_v41 = vpop.permute.xlu1 %560 }
 0xb21   :  { %v496_v11 = vpop.permute.xlu2 %495 }
 0xb22   :  { %795 = vmatmul.msk.bf16.vlgmr.msra.gmra.mxu2 %vm16_vm0, %v496_v11  ;;  %796 = vmatmul.msk.bf16.vlgmr.msra.gmra.mxu3 %vm16_vm0, %v496_v11 }
 0xba5   :  { %v509_v20 = vpop.f32.mrf.mxu2  ;;  %v522_v21 = vpop.f32.mrf.mxu3 }
 0xba6   :  { %v526_v22 = vadd.f32 %v509_v20, %v491_v18  ;;  %v527_v23 = vadd.f32 %v522_v21, %v492_v19 }
 0xba8   :  { %v797_v24 = vmul.f32 -1.442695, %v526_v22  ;;  %853 = vtanh.f32 %v527_v23 }
 0xbaa   :  { %855 = vpow2.f32 %v797_v24 }
 0xbad   :  { %v511_v25 = vpop.f32.mrf.mxu2  ;;  %v524_v26 = vpop.f32.mrf.mxu3 }
 0xbae   :  { %v854_v28 = vpop.eup %853 }
 0xbaf   :  { %550 = vrot.lane.b32.xlu0 %v854_v28, %s878_s26 }
 0xbb0   :  { %v856_v29 = vpop.eup %855 }
 0xbb1   :  { %v531_v30 = vadd.f32 1.0, %v856_v29 }
 0xbb3   :  { %857 = vrcp.f32 %v531_v30  ;;  %v543_v34 = vand.u32 2147483648, %v531_v30  ;;  %v541_v36 = vand.u32 2147483647, %v531_v30  ;;  %vm537_vm7 = vweird.f32 %v531_v30 }
 0xbb5   :  { %v544_v38 = vor.u32 1.1754944e-38, %v543_v34  ;;  %vm542_vm9 = vcmp.eq.f32.partialorder %v541_v36, 8.507059e+37 }
 0xbb9   :  { %v858_v31 = vpop.eup %857 }
 0xbba   :  { %v533_v32 = vmul.f32 %v858_v31, %v531_v30  ;;  %vm538_vm6 = vweird.f32 %v858_v31 }
 0xbbb   :  { %vm539_vm8 = vmor %vm537_vm7, %vm538_vm6 }
 0xbbc   :  { %v534_v33 = vsub.f32 1.0, %v533_v32 }
 0xbbe   :  { %v535_v35 = vmul.f32 %v858_v31, %v534_v33  ;;  %v804_v33 = vld [vmem:[%s1122_s0 + $0x38] sm:$0xff] }
 0xbbf   :  { %v675_v34 = vunpack.c.l.bf16 %v804_v33 }
 0xbc0   :  { %v536_v37 = vadd.f32 %v858_v31, %v535_v35  ;;  %v676_v35 = vunpack.c.h.bf16 %v804_v33 }
 0xbc2   :  { %v540_v40 = vsel %vm539_vm8, %v858_v31, %v536_v37 }
 0xbc3   :  { %v545_v42 = vsel %vm542_vm9, %v544_v38, %v540_v40 }
 0xbc4   :  { %v563_v43 = vmul.f32 %v561_v41, %v545_v42  ;;  %v548_v46 = vmul.f32 %v854_v28, %v545_v42 }
 0xbc6   :  { %565 = vrot.lane.b32.xlu0 %v563_v43, %s878_s26 }
 0xc21   :  { %v551_v44 = vpop.permute.xlu0 %550 }
 0xc22   :  { %v553_v45 = vmul.f32 %v551_v44, %v545_v42 }
 0xc24   :  { %555 = vrot.lane.b32.xlu2 %v553_v45, %s879_s27 }
 0xc38   :  { %v566_v49 = vpop.permute.xlu0 %565 }
 0xc7e   :  { %v556_v47 = vpop.permute.xlu2 %555 }
 0xc7f   :  { %v558_v48 = vadd.f32 %v556_v47, %v548_v46 }
 0xc81   :  { %v568_v51 = vadd.f32 %v566_v49, %v558_v48 }
 0xc83   :  { %859 = vtanh.f32 %v568_v51 }
 0xc89   :  { %v860_v52 = vpop.eup %859 }
 0xc8a   :  { %571 = vrot.lane.b32.xlu1 %v860_v52, %s879_s27 }
 0xc92   :  { %652 = vrot.lane.b32.xlu1 %v568_v51, %s878_s26 }
 0xcfc   :  { %v572_v53 = vpop.permute.xlu1 %571 }
 0xcfd   :  { %v1048_v54 = vmul.f32 %v572_v53, %v545_v42 }
 0xcff   :  { %v585_v55 = vpack.c.bf16 %v1048_v54, %v1048_v54 }
 0xd01   :  { %587 = vrot.lane.b32.xlu2 %v585_v55, %s880_s28 }
 0xd04   :  { %v653_v17 = vpop.permute.xlu1 %652 }
 0xd5b   :  { %v588_v56 = vpop.permute.xlu2 %587 }
 0xd5c   :  { %800 = vmatmul.msk.bf16.vlgmr.msrb.gmra.mxu0 %vm16_vm0, %v588_v56  ;;  %801 = vmatmul.msk.bf16.vlgmr.msrb.gmra.mxu1 %vm16_vm0, %v588_v56 }
 0xdd9   :  { %v601_v60 = vpop.f32.mrf.mxu0  ;;  %v614_v61 = vpop.f32.mrf.mxu1 }
 0xdda   :  { %v618_v62 = vadd.f32 %v601_v60, %v583_v58  ;;  %v619_v63 = vadd.f32 %v614_v61, %v584_v59 }
 0xddc   :  { %v802_v0 = vmul.f32 -1.442695, %v618_v62  ;;  %861 = vtanh.f32 %v619_v63 }
 0xdde   :  { %863 = vpow2.f32 %v802_v0 }
 0xde1   :  { %v603_v2 = vpop.f32.mrf.mxu0  ;;  %v616_v3 = vpop.f32.mrf.mxu1 }
 0xde2   :  { %v862_v5 = vpop.eup %861 }
 0xde3   :  { %642 = vrot.lane.b32.xlu0 %v862_v5, %s878_s26 }
 0xde4   :  { %v864_v6 = vpop.eup %863 }
 0xde5   :  { %v623_v7 = vadd.f32 1.0, %v864_v6 }
 0xde7   :  { %865 = vrcp.f32 %v623_v7  ;;  %v635_v14 = vand.u32 2147483648, %v623_v7  ;;  %v633_v8 = vand.u32 2147483647, %v623_v7  ;;  %vm629_vm11 = vweird.f32 %v623_v7 }
 0xde9   :  { %v636_v12 = vor.u32 1.1754944e-38, %v635_v14  ;;  %vm634_vm13 = vcmp.eq.f32.partialorder %v633_v8, 8.507059e+37 }
 0xded   :  { %v866_v9 = vpop.eup %865 }
 0xdee   :  { %v625_v10 = vmul.f32 %v866_v9, %v623_v7  ;;  %vm630_vm10 = vweird.f32 %v866_v9 }
 0xdef   :  { %vm631_vm12 = vmor %vm629_vm11, %vm630_vm10 }
 0xdf0   :  { %v626_v13 = vsub.f32 1.0, %v625_v10 }
 0xdf2   :  { %v627_v15 = vmul.f32 %v866_v9, %v626_v13 }
 0xdf4   :  { %v628_v16 = vadd.f32 %v866_v9, %v627_v15 }
 0xdf6   :  { %v632_v11 = vsel %vm631_vm12, %v866_v9, %v628_v16 }
 0xdf7   :  { %v637_v18 = vsel %vm634_vm13, %v636_v12, %v632_v11 }
 0xdf8   :  { %v655_v19 = vmul.f32 %v653_v17, %v637_v18  ;;  %v640_v22 = vmul.f32 %v862_v5, %v637_v18 }
 0xdfa   :  { %657 = vrot.lane.b32.xlu0 %v655_v19, %s878_s26 }
 0xe55   :  { %v643_v20 = vpop.permute.xlu0 %642 }
 0xe56   :  { %v645_v21 = vmul.f32 %v643_v20, %v637_v18 }
 0xe58   :  { %647 = vrot.lane.b32.xlu2 %v645_v21, %s879_s27 }
 0xe6c   :  { %v658_v25 = vpop.permute.xlu0 %657 }
 0xeb2   :  { %v648_v23 = vpop.permute.xlu2 %647 }
 0xeb3   :  { %v650_v24 = vadd.f32 %v648_v23, %v640_v22 }
 0xeb5   :  { %v660_v26 = vadd.f32 %v658_v25, %v650_v24 }
 0xeb7   :  { %867 = vtanh.f32 %v660_v26 }
 0xebd   :  { %v868_v28 = vpop.eup %867 }
 0xebe   :  { %663 = vrot.lane.b32.xlu1 %v868_v28, %s879_s27 }
 0xec6   :  { %744 = vrot.lane.b32.xlu1 %v660_v26, %s878_s26 }
 0xf30   :  { %v664_v29 = vpop.permute.xlu1 %663 }
 0xf31   :  { %v666_v30 = vmul.f32 %v664_v29, %v637_v18 }
 0xf33   :  { %v677_v31 = vpack.c.bf16 %v666_v30, %v666_v30 }
 0xf35   :  { %679 = vrot.lane.b32.xlu2 %v677_v31, %s880_s28 }
 0xf38   :  { %v745_v58 = vpop.permute.xlu1 %744 }
 0xf8f   :  { %v680_v32 = vpop.permute.xlu2 %679 }
 0xf90   :  { %805 = vmatmul.msk.bf16.vlgmr.msrb.gmra.mxu2 %vm16_vm0, %v680_v32  ;;  %806 = vmatmul.msk.bf16.vlgmr.msrb.gmra.mxu3 %vm16_vm0, %v680_v32 }
0x1013   :  { %v693_v36 = vpop.f32.mrf.mxu2  ;;  %v706_v37 = vpop.f32.mrf.mxu3 }
0x1014   :  { %v710_v38 = vadd.f32 %v693_v36, %v675_v34  ;;  %v711_v40 = vadd.f32 %v706_v37, %v676_v35 }
0x1016   :  { %v807_v41 = vmul.f32 -1.442695, %v710_v38  ;;  %869 = vtanh.f32 %v711_v40 }
0x1018   :  { %871 = vpow2.f32 %v807_v41 }
0x101b   :  { %v695_v42 = vpop.f32.mrf.mxu2  ;;  %v708_v43 = vpop.f32.mrf.mxu3 }
0x101c   :  { %v870_v44 = vpop.eup %869 }
0x101d   :  { %734 = vrot.lane.b32.xlu0 %v870_v44, %s878_s26 }
0x101e   :  { %v872_v45 = vpop.eup %871 }
0x101f   :  { %v715_v46 = vadd.f32 1.0, %v872_v45 }
0x1021   :  { %873 = vrcp.f32 %v715_v46  ;;  %v727_v51 = vand.u32 2147483648, %v715_v46  ;;  %v725_v53 = vand.u32 2147483647, %v715_v46  ;;  %vm721_vm15 = vweird.f32 %v715_v46 }
0x1023   :  { %v728_v56 = vor.u32 1.1754944e-38, %v727_v51  ;;  %vm726_vm2 = vcmp.eq.f32.partialorder %v725_v53, 8.507059e+37 }
0x1027   :  { %v874_v47 = vpop.eup %873 }
0x1028   :  { %v717_v48 = vmul.f32 %v874_v47, %v715_v46  ;;  %vm722_vm14 = vweird.f32 %v874_v47 }
0x1029   :  { %vm723_vm1 = vmor %vm721_vm15, %vm722_vm14 }
0x102a   :  { %v718_v49 = vsub.f32 1.0, %v717_v48 }
0x102c   :  { %v719_v52 = vmul.f32 %v874_v47, %v718_v49 }
0x102e   :  { %v720_v55 = vadd.f32 %v874_v47, %v719_v52 }
0x1030   :  { %v724_v57 = vsel %vm723_vm1, %v874_v47, %v720_v55 }
0x1031   :  { %v729_v59 = vsel %vm726_vm2, %v728_v56, %v724_v57 }
0x1032   :  { %v747_v60 = vmul.f32 %v745_v58, %v729_v59 }
0x1034   :  { %749 = vrot.lane.b32.xlu0 %v747_v60, %s878_s26 }
0x103c   :  { %208 = vrot.lane.b32.xlu0 %v980_v27, %s880_s28 }
0x1044   :  { %484 = vrot.lane.b32.xlu0 %v1033_v4, %s880_s28  ;;  %v732_v4 = vmul.f32 %v870_v44, %v729_v59 }
0x108f   :  { %v735_v61 = vpop.permute.xlu0 %734 }
0x1090   :  { %v737_v62 = vmul.f32 %v735_v61, %v729_v59 }
0x1092   :  { %739 = vrot.lane.b32.xlu2 %v737_v62, %s879_s27 }
0x109a   :  { %117 = vrot.lane.b32.xlu2 %v961_v50, %s880_s28 }
0x10a2   :  { %392 = vrot.lane.b32.xlu2 %v1018_v39, %s880_s28 }
0x10a6   :  { %v750_v63 = vpop.permute.xlu0 %749 }
0x10aa   :  { %668 = vrot.lane.b32.xlu2 %v666_v30, %s880_s28 }
0x10ae   :  { %v209_v0 = vpop.permute.xlu0 %208 }
0x10af   :  { %778 = vst.msk [vmem:[%s1123_s2 + $0x8] sm:$0xff] %vm16_vm0, %v209_v0 }
0x10b6   :  { %v485_v27 = vpop.permute.xlu0 %484 }
0x10b7   :  { %793 = vst.msk [vmem:[%s1123_s2 + $0x20] sm:$0xff] %vm16_vm0, %v485_v27 }
0x10ec   :  { %v740_v50 = vpop.permute.xlu2 %739 }
0x10ed   :  { %v742_v2 = vadd.f32 %v740_v50, %v732_v4 }
0x10ef   :  { %v752_v3 = vadd.f32 %v750_v63, %v742_v2 }
0x10f1   :  { %875 = vtanh.f32 %v752_v3  ;;  %766 = vst.msk [vmem:[#allocation3] sm:$0xff] %vm16_vm0, %v752_v3 }
0x10f4   :  { %v118_v39 = vpop.permute.xlu2 %117 }
0x10f5   :  { %120 = vst.msk [vmem:[%s1123_s2] sm:$0xff] %vm16_vm0, %v118_v39 }
0x10f7   :  { %v876_v5 = vpop.eup %875 }
0x10f8   :  { %755 = vrot.lane.b32.xlu1 %v876_v5, %s879_s27 }
0x10fc   :  { %v393_v6 = vpop.permute.xlu2 %392 }
0x10fd   :  { %788 = vst.msk [vmem:[%s1123_s2 + $0x18] sm:$0xff] %vm16_vm0, %v393_v6 }
0x1100   :  { %300 = vrot.lane.b32.xlu1 %v999_v1, %s880_s28 }
0x1104   :  { %v669_v7 = vpop.permute.xlu2 %668 }
0x1105   :  { %803 = vst.msk [vmem:[%s1123_s2 + $0x30] sm:$0xff] %vm16_vm0, %v669_v7 }
0x1108   :  { %576 = vrot.lane.b32.xlu1 %v1048_v54, %s880_s28 }
0x116a   :  { %v756_v9 = vpop.permute.xlu1 %755 }
0x116b   :  { %v758_v10 = vmul.f32 %v756_v9, %v729_v59 }
0x116d   :  { %760 = vrot.lane.b32.xlu0 %v758_v10, %s880_s28 }
0x1172   :  { %v301_v13 = vpop.permute.xlu1 %300 }
0x1173   :  { %783 = vst.msk [vmem:[%s1123_s2 + $0x10] sm:$0xff] %vm16_vm0, %v301_v13 }
0x117a   :  { %v577_v1 = vpop.permute.xlu1 %576 }
0x117b   :  { %798 = vst.msk [vmem:[%s1123_s2 + $0x28] sm:$0xff] %vm16_vm0, %v577_v1 }
0x11df   :  { %v761_v14 = vpop.permute.xlu0 %760 }
0x11e0   :  { %808 = vst.msk [vmem:[%s1123_s2 + $0x38] sm:$0xff] %vm16_vm0, %v761_v14 }
0x11e1   :  { %765 = vst.msk [vmem:[#allocation2] sm:$0xff] %vm16_vm0, %v761_v14 }

// kernel: nncrf_forward.25
= control target key start
LH: loop header
LB: loop body
LE: loop exit
PB: predicated region body
PF: predicated region fallthrough
CT: control target
= control target key end

     0   :  { %vm49_vm0 = vcmask 261120   ;;  %vm91_vm1 = vcmask 130048   ;;  %v406_v43 = vmov 16.0   ;;  %s691_s1 = inlined_call_operand.vmem [shape: f32[32,16], index: 1, kind: input, shape index: {}]   ;;  %s692_s0 = inlined_call_operand.vmem [shape: f32[64,32], index: 0, kind: input, shape index: {}]   ;;  %s693_s2 = inlined_call_operand.vmem [shape: f32[1,16], index: 2, kind: input, shape index: {}]   ;;  %s694_s3 = inlined_call_operand.vmem [shape: f32[1,16], index: 3, kind: input, shape index: {}]   ;;  %s695_s4 = inlined_call_operand.vmem [shape: f32[1,16], index: 4, kind: input, shape index: {}]   ;;  %s696_s6 = inlined_call_operand.vmem [shape: f32[1,5], index: 6, kind: input, shape index: {}]   ;;  %s697_s5 = inlined_call_operand.vmem [shape: f32[16,5], index: 5, kind: input, shape index: {}]   ;;  %s698_s7 = inlined_call_operand.vmem [shape: f32[64,5], index: 7, kind: output, shape index: {}]  }
   0x1   :  { %v41_v0 = vld [vmem:[%s691_s1 + $0x10] sm:$0xff]  ;;  %v42_v1 = vld [vmem:[%s691_s1 + $0x18] sm:$0xff]  ;;  %v39_v2 = vld [vmem:[%s691_s1] sm:$0xff]  ;;  %388 = vrcp.f32 %v406_v43 }
   0x2   :  { %v44_v3 = vpack.c.bf16 %v42_v1, %v41_v0  ;;  %v40_v4 = vld [vmem:[%s691_s1 + $0x8] sm:$0xff]  ;;  %v27_v5 = vld [vmem:[%s692_s0] sm:$0xff]  ;;  %v29_v12 = vld [vmem:[%s692_s0 + $0x10] sm:$0xff] }
   0x3   :  { %v43_v6 = vpack.c.bf16 %v40_v4, %v39_v2  ;;  %v28_v7 = vld [vmem:[%s692_s0 + $0x8] sm:$0xff]  ;;  %v31_v8 = vld [vmem:[%s692_s0 + $0x20] sm:$0xff]  ;;  %v30_v13 = vld [vmem:[%s692_s0 + $0x18] sm:$0xff] }
   0x4   :  { %68 = vmatpush.bf16.msra.mxu0 %v44_v3  ;;  %380 = vmatpush.bf16.msra.mxu2 %v44_v3  ;;  %v32_v9 = vld [vmem:[%s692_s0 + $0x28] sm:$0xff]  ;;  %v35_v10 = vpack.c.bf16 %v28_v7, %v27_v5  ;;  %v33_v14 = vld [vmem:[%s692_s0 + $0x30] sm:$0xff]  ;;  %v34_v15 = vld [vmem:[%s692_s0 + $0x38] sm:$0xff]  ;;  %v36_v16 = vpack.c.bf16 %v30_v13, %v29_v12 }
   0x5   :  { %v37_v11 = vpack.c.bf16 %v32_v9, %v31_v8  ;;  %v38_v17 = vpack.c.bf16 %v34_v15, %v33_v14  ;;  %v384_v19 = vld [vmem:[%s693_s2] ss:$0 sm:$0xff] }
   0x7   :  { %v389_v44 = vpop.eup %388 }
   0x8   :  { %69 = vmatpush.bf16.msra.mxu0 %v43_v6  ;;  %381 = vmatpush.bf16.msra.mxu2 %v43_v6  ;;  %v117_v45 = vmul.f32 16.0, %v389_v44  ;;  %vm121_vm2 = vweird.f32 %v389_v44 }
   0xa   :  { %v118_v46 = vsub.f32 1.0, %v117_v45 }
   0xb   :  { %372 = vmatmul.msk.bf16.vlgmr.msra.gmra.mxu0 %vm49_vm0, %v35_v10  ;;  %374 = vmatmul.msk.bf16.vlgmr.msra.gmra.mxu2 %vm49_vm0, %v37_v11 }
   0xc   :  { %v119_v47 = vmul.f32 %v389_v44, %v118_v46 }
   0xe   :  { %v120_v48 = vadd.f32 %v389_v44, %v119_v47 }
  0x10   :  { %v497_v49 = vsel %vm121_vm2, %v389_v44, %v120_v48 }
  0x1b   :  { %373 = vmatmul.msk.bf16.gmra.mxu0 %vm49_vm0, %v36_v16  ;;  %375 = vmatmul.msk.bf16.gmra.mxu2 %vm49_vm0, %v38_v17 }
  0x88   :  { %v71_v18 = vpop.f32.mrf.mxu0 }
  0x89   :  { %v72_v39 = vadd.f32 %v384_v19, %v71_v18 }
  0x8b   :  { %v92_v42 = vsel %vm91_vm1, %v72_v39, 0.0 }
  0x8e   :  { %v81_v20 = vpop.f32.mrf.mxu2 }
  0x8f   :  { %v82_v21 = vadd.f32 %v384_v19, %v81_v20 }
  0x90   :  { %v73_v22 = vpop.f32.mrf.mxu0 }
  0x91   :  { %v104_v23 = vsel %vm91_vm1, %v82_v21, 0.0  ;;  %v489_v30 = vadd.f32 %v384_v19, %v73_v22 }
  0x92   :  { %105 = vadd.xlane.f32.xlu1 %v104_v23 }
  0x93   :  { %v95_v36 = vsel %vm91_vm1, %v489_v30, 0.0 }
  0x96   :  { %v83_v24 = vpop.f32.mrf.mxu2 }
  0x97   :  { %v84_v25 = vadd.f32 %v384_v19, %v83_v24 }
  0x98   :  { %v76_v26 = vpop.f32.mrf.mxu0 }
  0x99   :  { %v77_v27 = vadd.f32 %v384_v19, %v76_v26  ;;  %v107_v28 = vsel %vm91_vm1, %v84_v25, 0.0 }
  0x9a   :  { %108 = vadd.xlane.f32.xlu1 %v107_v28 }
  0x9b   :  { %v98_v29 = vsel %vm91_vm1, %v77_v27, 0.0 }
  0x9c   :  { %99 = vadd.xlane.f32.xlu0 %v98_v29 }
  0x9e   :  { %v86_v31 = vpop.f32.mrf.mxu2 }
  0x9f   :  { %v87_v32 = vadd.f32 %v384_v19, %v86_v31  ;;  %v311_v31 = vld [vmem:[%s697_s5] sm:$0xff] }
  0xa0   :  { %v78_v33 = vpop.f32.mrf.mxu0 }
  0xa1   :  { %v79_v34 = vadd.f32 %v384_v19, %v78_v33  ;;  %v110_v35 = vsel %vm91_vm1, %v87_v32, 0.0 }
  0xa2   :  { %111 = vadd.xlane.f32.xlu2 %v110_v35  ;;  %96 = vadd.xlane.f32.xlu1 %v95_v36 }
  0xa3   :  { %v101_v37 = vsel %vm91_vm1, %v79_v34, 0.0 }
  0xa4   :  { %102 = vadd.xlane.f32.xlu0 %v101_v37 }
  0xa6   :  { %v88_v38 = vpop.f32.mrf.mxu2 }
  0xa7   :  { %v89_v40 = vadd.f32 %v384_v19, %v88_v38 }
  0xa9   :  { %v113_v41 = vsel %vm91_vm1, %v89_v40, 0.0 }
  0xaa   :  { %114 = vadd.xlane.f32.xlu2 %v113_v41 }
  0xac   :  { %93 = vadd.xlane.f32.xlu0 %v92_v42 }
 0x105   :  { %v106_v50 = vpop.xlane.xlu1 %105 }
 0x106   :  { %v127_v51 = vmul.f32 %v497_v49, %v106_v50 }
 0x108   :  { %v500_v52 = vsub.f32 %v82_v21, %v127_v51 }
 0x10a   :  { %v143_v53 = vmul.f32 %v500_v52, %v500_v52 }
 0x10c   :  { %v159_v54 = vsel %vm91_vm1, %v143_v53, 0.0 }
 0x10d   :  { %160 = vadd.xlane.f32.xlu1 %v159_v54  ;;  %v109_v55 = vpop.xlane.xlu1 %108 }
 0x10e   :  { %v128_v58 = vmul.f32 %v497_v49, %v109_v55 }
 0x10f   :  { %v100_v56 = vpop.xlane.xlu0 %99 }
 0x110   :  { %v125_v57 = vmul.f32 %v497_v49, %v100_v56  ;;  %v511_v62 = vsub.f32 %v84_v25, %v128_v58 }
 0x112   :  { %v507_v59 = vsub.f32 %v77_v27, %v125_v57  ;;  %v144_v4 = vmul.f32 %v511_v62, %v511_v62 }
 0x114   :  { %v141_v60 = vmul.f32 %v507_v59, %v507_v59  ;;  %v162_v9 = vsel %vm91_vm1, %v144_v4, 0.0 }
 0x115   :  { %v112_v61 = vpop.xlane.xlu2 %111  ;;  %v97_v11 = vpop.xlane.xlu1 %96 }
 0x116   :  { %v153_v63 = vsel %vm91_vm1, %v141_v60, 0.0  ;;  %v129_v2 = vmul.f32 %v497_v49, %v112_v61  ;;  %v124_v15 = vmul.f32 %v497_v49, %v97_v11 }
 0x117   :  { %154 = vadd.xlane.f32.xlu2 %v153_v63  ;;  %v103_v0 = vpop.xlane.xlu0 %102 }
 0x118   :  { %v126_v1 = vmul.f32 %v497_v49, %v103_v0  ;;  %v522_v7 = vsub.f32 %v87_v32, %v129_v2  ;;  %v541_v21 = vsub.f32 %v489_v30, %v124_v15  ;;  %v312_v32 = vld [vmem:[%s697_s5 + $0x8] sm:$0xff] }
 0x11a   :  { %v516_v3 = vsub.f32 %v79_v34, %v126_v1  ;;  %v145_v18 = vmul.f32 %v522_v7, %v522_v7  ;;  %v140_v24 = vmul.f32 %v541_v21, %v541_v21  ;;  %v313_v34 = vpack.c.bf16 %v312_v32, %v311_v31  ;;  %v601_v31 = vld [vmem:[%s695_s4] ss:$0 sm:$0xff] }
 0x11c   :  { %v142_v5 = vmul.f32 %v516_v3, %v516_v3  ;;  %v165_v22 = vsel %vm91_vm1, %v145_v18, 0.0  ;;  %v150_v25 = vsel %vm91_vm1, %v140_v24, 0.0  ;;  %382 = vmatpush.bf16.msra.mxu3 %v313_v34  ;;  %337 = vmatpush.bf16.msra.mxu1 %v313_v34 }
 0x11d   :  { %v115_v6 = vpop.xlane.xlu2 %114 }
 0x11e   :  { %v130_v8 = vmul.f32 %v497_v49, %v115_v6  ;;  %v156_v10 = vsel %vm91_vm1, %v142_v5, 0.0 }
 0x11f   :  { %163 = vadd.xlane.f32.xlu2 %v162_v9  ;;  %157 = vadd.xlane.f32.xlu0 %v156_v10  ;;  %v94_v12 = vpop.xlane.xlu0 %93 }
 0x120   :  { %v527_v13 = vsub.f32 %v89_v40, %v130_v8  ;;  %v123_v14 = vmul.f32 %v497_v49, %v94_v12 }
 0x122   :  { %v531_v16 = vsub.f32 %v72_v39, %v123_v14  ;;  %v146_v17 = vmul.f32 %v527_v13, %v527_v13 }
 0x124   :  { %v168_v19 = vsel %vm91_vm1, %v146_v17, 0.0  ;;  %v139_v20 = vmul.f32 %v531_v16, %v531_v16 }
 0x125   :  { %169 = vadd.xlane.f32.xlu1 %v168_v19 }
 0x126   :  { %v147_v23 = vsel %vm91_vm1, %v139_v20, 0.0 }
 0x127   :  { %166 = vadd.xlane.f32.xlu0 %v165_v22  ;;  %148 = vadd.xlane.f32.xlu2 %v147_v23  ;;  %v588_v23 = vld [vmem:[%s694_s3] ss:$0 sm:$0xff] }
 0x12f   :  { %151 = vadd.xlane.f32.xlu0 %v150_v25 }
 0x180   :  { %v161_v26 = vpop.xlane.xlu1 %160 }
 0x181   :  { %v175_v28 = vmul.f32 %v161_v26, %v497_v49 }
 0x183   :  { %v556_v33 = vadd.f32 1e-05, %v175_v28 }
 0x185   :  { %vm233_vm15 = vweird.f32 %v556_v33 }
 0x18a   :  { %v155_v27 = vpop.xlane.xlu2 %154 }
 0x18b   :  { %v173_v29 = vmul.f32 %v155_v27, %v497_v49 }
 0x18d   :  { %v181_v30 = vadd.f32 1e-05, %v173_v29 }
 0x18f   :  { %390 = vrsqrt.f32 %v181_v30  ;;  %vm213_vm4 = vweird.f32 %v181_v30 }
 0x190   :  { %392 = vrsqrt.f32 %v556_v33 }
 0x192   :  { %v164_v35 = vpop.xlane.xlu2 %163  ;;  %v158_v36 = vpop.xlane.xlu0 %157 }
 0x193   :  { %v176_v37 = vmul.f32 %v164_v35, %v497_v49  ;;  %v174_v38 = vmul.f32 %v158_v36, %v497_v49 }
 0x195   :  { %v391_v39 = vpop.eup %390  ;;  %v561_v40 = vadd.f32 1e-05, %v176_v37  ;;  %v182_v41 = vadd.f32 1e-05, %v174_v38 }
 0x196   :  { %v208_v42 = vmul.f32 %v391_v39, %v181_v30  ;;  %v564_v44 = vpop.eup %392  ;;  %vm214_vm3 = vweird.f32 %v391_v39 }
 0x197   :  { %394 = vrsqrt.f32 %v561_v40  ;;  %v228_v53 = vmul.f32 %v564_v44, %v556_v33  ;;  %vm215_vm5 = vmor %vm213_vm4, %vm214_vm3  ;;  %vm223_vm7 = vweird.f32 %v182_v41  ;;  %vm234_vm11 = vweird.f32 %v564_v44 }
 0x198   :  { %v209_v43 = vmul.f32 %v391_v39, %v208_v42  ;;  %396 = vrsqrt.f32 %v182_v41  ;;  %v170_v45 = vpop.xlane.xlu1 %169  ;;  %vm243_vm12 = vweird.f32 %v561_v40  ;;  %vm235_vm2 = vmor %vm233_vm15, %vm234_vm11 }
 0x199   :  { %v178_v55 = vmul.f32 %v170_v45, %v497_v49  ;;  %v229_v1 = vmul.f32 %v564_v44, %v228_v53 }
 0x19a   :  { %v210_v46 = vmul.f32 0.5, %v209_v43  ;;  %v149_v47 = vpop.xlane.xlu2 %148  ;;  %v167_v48 = vpop.xlane.xlu0 %166 }
 0x19b   :  { %v171_v50 = vmul.f32 %v149_v47, %v497_v49  ;;  %v177_v51 = vmul.f32 %v167_v48, %v497_v49  ;;  %v579_v4 = vadd.f32 1e-05, %v178_v55  ;;  %v230_v12 = vmul.f32 0.5, %v229_v1 }
 0x19c   :  { %v211_v54 = vsub.f32 1.5, %v210_v46 }
 0x19d   :  { %v571_v56 = vpop.eup %394  ;;  %v179_v57 = vadd.f32 1e-05, %v171_v50  ;;  %v575_v0 = vadd.f32 1e-05, %v177_v51  ;;  %v231_v25 = vsub.f32 1.5, %v230_v12 }
 0x19e   :  { %v397_v58 = vpop.eup %396  ;;  %v212_v60 = vmul.f32 %v391_v39, %v211_v54  ;;  %v238_v61 = vmul.f32 %v571_v56, %v561_v40  ;;  %vm244_vm9 = vweird.f32 %v571_v56 }
 0x19f   :  { %v218_v63 = vmul.f32 %v397_v58, %v182_v41  ;;  %398 = vrsqrt.f32 %v179_v57  ;;  %vm224_vm6 = vweird.f32 %v397_v58  ;;  %vm610_vm13 = vmor %vm243_vm12, %vm244_vm9  ;;  %vm193_vm14 = vweird.f32 %v179_v57 }
 0x1a0   :  { %v239_v2 = vmul.f32 %v571_v56, %v238_v61  ;;  %v216_v6 = vsel %vm215_vm5, %v391_v39, %v212_v60  ;;  %400 = vrsqrt.f32 %v575_v0  ;;  %vm225_vm8 = vmor %vm223_vm7, %vm224_vm6  ;;  %vm359_vm12 = vcmask 39936  }
 0x1a1   :  { %v219_v5 = vmul.f32 %v397_v58, %v218_v63  ;;  %402 = vrsqrt.f32 %v579_v4  ;;  %v269_v15 = vmul.f32 %v216_v6, %v507_v59 }
 0x1a2   :  { %v152_v8 = vpop.xlane.xlu0 %151  ;;  %v240_v9 = vmul.f32 0.5, %v239_v2 }
 0x1a3   :  { %v220_v10 = vmul.f32 0.5, %v219_v5  ;;  %v172_v11 = vmul.f32 %v152_v8, %v497_v49  ;;  %v281_v59 = vmul.f32 %v588_v23, %v269_v15 }
 0x1a4   :  { %v241_v20 = vsub.f32 1.5, %v240_v9 }
 0x1a5   :  { %v399_v14 = vpop.eup %398  ;;  %v221_v17 = vsub.f32 1.5, %v220_v10  ;;  %v180_v18 = vadd.f32 1e-05, %v172_v11  ;;  %v293_v37 = vadd.f32 %v601_v31, %v281_v59 }
 0x1a6   :  { %v188_v19 = vmul.f32 %v399_v14, %v179_v57  ;;  %v590_v24 = vpop.eup %400  ;;  %v242_v30 = vmul.f32 %v571_v56, %v241_v20  ;;  %vm194_vm10 = vweird.f32 %v399_v14 }
 0x1a7   :  { %v222_v22 = vmul.f32 %v397_v58, %v221_v17  ;;  %404 = vrsqrt.f32 %v180_v18  ;;  %v593_v27 = vpop.eup %402  ;;  %v248_v34 = vmul.f32 %v590_v24, %v575_v0  ;;  %vm195_vm0 = vmor %vm193_vm14, %vm194_vm10  ;;  %v301_v48 = vmax.f32 %v293_v37, 0.0 }
 0x1a8   :  { %v189_v49 = vmul.f32 %v399_v14, %v188_v19  ;;  %v258_v39 = vmul.f32 %v593_v27, %v579_v4  ;;  %v246_v40 = vsel %vm610_vm13, %v571_v56, %v242_v30  ;;  %vm203_vm4 = vweird.f32 %v180_v18 }
 0x1a9   :  { %v226_v26 = vsel %vm225_vm8, %v397_v58, %v222_v22  ;;  %v249_v46 = vmul.f32 %v590_v24, %v248_v34  ;;  %v272_v54 = vmul.f32 %v246_v40, %v511_v62  ;;  %vm254_vm6 = vweird.f32 %v590_v24 }
 0x1aa   :  { %v270_v28 = vmul.f32 %v226_v26, %v516_v3  ;;  %v190_v29 = vmul.f32 0.5, %v189_v49  ;;  %v232_v3 = vmul.f32 %v564_v44, %v231_v25  ;;  %v259_v33 = vmul.f32 %v593_v27, %v258_v39 }
 0x1ab   :  { %v250_v56 = vmul.f32 0.5, %v249_v46  ;;  %v284_v1 = vmul.f32 %v588_v23, %v272_v54  ;;  %vm264_vm7 = vweird.f32 %v593_v27  ;;  %vm253_vm8 = vweird.f32 %v575_v0 }
 0x1ac   :  { %v191_v32 = vsub.f32 1.5, %v190_v29  ;;  %v282_v35 = vmul.f32 %v588_v23, %v270_v28  ;;  %v236_v51 = vsel %vm235_vm2, %v564_v44, %v232_v3  ;;  %v260_v61 = vmul.f32 0.5, %v259_v33  ;;  %vm255_vm9 = vmor %vm253_vm8, %vm254_vm6 }
 0x1ad   :  { %v405_v36 = vpop.eup %404  ;;  %v271_v60 = vmul.f32 %v236_v51, %v500_v52  ;;  %v251_v2 = vsub.f32 1.5, %v250_v56  ;;  %v296_v9 = vadd.f32 %v601_v31, %v284_v1  ;;  %vm263_vm10 = vweird.f32 %v579_v4 }
 0x1ae   :  { %v192_v41 = vmul.f32 %v399_v14, %v191_v32  ;;  %v198_v42 = vmul.f32 %v405_v36, %v180_v18  ;;  %v294_v43 = vadd.f32 %v601_v31, %v282_v35  ;;  %vm204_vm3 = vweird.f32 %v405_v36  ;;  %vm265_vm11 = vmor %vm263_vm10, %vm264_vm7 }
 0x1af   :  { %vm205_vm5 = vmor %vm203_vm4, %vm204_vm3  ;;  %v283_v5 = vmul.f32 %v588_v23, %v271_v60  ;;  %v261_v6 = vsub.f32 1.5, %v260_v61  ;;  %v252_v10 = vmul.f32 %v590_v24, %v251_v2  ;;  %v304_v17 = vmax.f32 %v296_v9, 0.0 }
 0x1b0   :  { %v196_v45 = vsel %vm195_vm0, %v399_v14, %v192_v41  ;;  %v199_v47 = vmul.f32 %v405_v36, %v198_v42  ;;  %v302_v50 = vmax.f32 %v294_v43, 0.0 }
 0x1b1   :  { %v267_v55 = vmul.f32 %v196_v45, %v531_v16  ;;  %v295_v12 = vadd.f32 %v601_v31, %v283_v5  ;;  %v262_v14 = vmul.f32 %v593_v27, %v261_v6  ;;  %v256_v18 = vsel %vm255_vm9, %v590_v24, %v252_v10 }
 0x1b2   :  { %v200_v53 = vmul.f32 0.5, %v199_v47  ;;  %v308_v57 = vpack.c.bf16 %v302_v50, %v301_v48  ;;  %v273_v49 = vmul.f32 %v256_v18, %v522_v7  ;;  %v387_v7 = vld [vmem:[%s696_s6] ss:$0 sm:$0xff] }
 0x1b3   :  { %v279_v44 = vmul.f32 %v588_v23, %v267_v55  ;;  %v303_v20 = vmax.f32 %v295_v12, 0.0  ;;  %v266_v22 = vsel %vm265_vm11, %v593_v27, %v262_v14 }
 0x1b4   :  { %v201_v58 = vsub.f32 1.5, %v200_v53  ;;  %377 = vmatmul.msk.bf16.vlgmr.msra.gmra.mxu3 %vm91_vm1, %v308_v57  ;;  %v274_v0 = vmul.f32 %v266_v22, %v527_v13  ;;  %v285_v26 = vmul.f32 %v588_v23, %v273_v49 }
 0x1b5   :  { %v291_v52 = vadd.f32 %v601_v31, %v279_v44  ;;  %v309_v25 = vpack.c.bf16 %v304_v17, %v303_v20 }
 0x1b6   :  { %v202_v63 = vmul.f32 %v405_v36, %v201_v58  ;;  %v286_v4 = vmul.f32 %v588_v23, %v274_v0  ;;  %v297_v24 = vadd.f32 %v601_v31, %v285_v26 }
 0x1b8   :  { %v206_v62 = vsel %vm205_vm5, %v405_v36, %v202_v63  ;;  %v298_v59 = vadd.f32 %v601_v31, %v286_v4  ;;  %v305_v28 = vmax.f32 %v297_v24, 0.0 }
 0x1b9   :  { %v268_v16 = vmul.f32 %v206_v62, %v541_v21  ;;  %v299_v21 = vmax.f32 %v291_v52, 0.0 }
 0x1ba   :  { %v306_v29 = vmax.f32 %v298_v59, 0.0 }
 0x1bb   :  { %v280_v8 = vmul.f32 %v588_v23, %v268_v16 }
 0x1bc   :  { %v310_v27 = vpack.c.bf16 %v306_v29, %v305_v28 }
 0x1bd   :  { %v292_v11 = vadd.f32 %v601_v31, %v280_v8 }
 0x1bf   :  { %v300_v15 = vmax.f32 %v292_v11, 0.0 }
 0x1c1   :  { %v307_v19 = vpack.c.bf16 %v300_v15, %v299_v21 }
 0x1c3   :  { %376 = vmatmul.msk.bf16.vlgmr.msra.gmra.mxu1 %vm91_vm1, %v307_v19 }
 0x1c4   :  { %378 = vmatmul.msk.bf16.gmra.mxu3 %vm91_vm1, %v309_v25 }
 0x1d4   :  { %379 = vmatmul.msk.bf16.gmra.mxu3 %vm91_vm1, %v310_v27 }
 0x237   :  { %v344_v13 = vpop.f32.mrf.mxu3 }
 0x238   :  { %v345_v30 = vadd.f32 %v387_v7, %v344_v13 }
 0x23a   :  { %362 = vst.msk [vmem:[%s698_s7 + $0x10] sm:$0xff] %vm359_vm12, %v345_v30 }
 0x23f   :  { %v346_v23 = vpop.f32.mrf.mxu3 }
 0x240   :  { %v339_v32 = vpop.f32.mrf.mxu1  ;;  %v347_v31 = vadd.f32 %v387_v7, %v346_v23 }
 0x241   :  { %v340_v34 = vadd.f32 %v387_v7, %v339_v32 }
 0x242   :  { %363 = vst.msk [vmem:[%s698_s7 + $0x18] sm:$0xff] %vm359_vm12, %v347_v31 }
 0x243   :  { %360 = vst.msk [vmem:[%s698_s7] sm:$0xff] %vm359_vm12, %v340_v34 }
 0x247   :  { %v349_v35 = vpop.f32.mrf.mxu3 }
 0x248   :  { %v341_v36 = vpop.f32.mrf.mxu1  ;;  %v350_v3 = vadd.f32 %v387_v7, %v349_v35 }
 0x249   :  { %v342_v37 = vadd.f32 %v387_v7, %v341_v36 }
 0x24a   :  { %364 = vst.msk [vmem:[%s698_s7 + $0x20] sm:$0xff] %vm359_vm12, %v350_v3 }
 0x24b   :  { %361 = vst.msk [vmem:[%s698_s7 + $0x8] sm:$0xff] %vm359_vm12, %v342_v37 }
 0x24f   :  { %v351_v38 = vpop.f32.mrf.mxu3 }
 0x250   :  { %v352_v39 = vadd.f32 %v387_v7, %v351_v38 }
 0x252   :  { %365 = vst.msk [vmem:[%s698_s7 + $0x28] sm:$0xff] %vm359_vm12, %v352_v39 }
 0x257   :  { %v354_v41 = vpop.f32.mrf.mxu3 }
 0x258   :  { %v355_v42 = vadd.f32 %v387_v7, %v354_v41 }
 0x25a   :  { %366 = vst.msk [vmem:[%s698_s7 + $0x30] sm:$0xff] %vm359_vm12, %v355_v42 }
 0x25f   :  { %v356_v43 = vpop.f32.mrf.mxu3 }
 0x260   :  { %v357_v40 = vadd.f32 %v387_v7, %v356_v43 }
 0x262   :  { %367 = vst.msk [vmem:[%s698_s7 + $0x38] sm:$0xff] %vm359_vm12, %v357_v40 }

// kernel: nncrf_forward.21
= control target key start
LH: loop header
LB: loop body
LE: loop exit
PB: predicated region body
PF: predicated region fallthrough
CT: control target
= control target key end

     0   :  { %s510_s12 = smov 0   ;;  %s512_s13 = smov 0   ;;  %s591_s0 = inlined_call_operand.vmem [shape: f32[64,32], index: 0, kind: input, shape index: {}]   ;;  %s592_s1 = inlined_call_operand.vmem [shape: f32[2,32,64], index: 1, kind: input, shape index: {}]   ;;  %s593_s2 = inlined_call_operand.vmem [shape: f32[2,1,64], index: 2, kind: input, shape index: {}]   ;;  %s594_s3 = inlined_call_operand.vmem [shape: bf16[2,64,64], index: 3, kind: output, shape index: {}]  }
   0x1   :  { %s514_s14 = smov 0  }
   0x2 LB: > { %s25_s15 = sadd.s32 1, %s484_s13  ;;  %p422_p0 = scmp.ge.s32.totalorder %s488_s14, 1  ;;  %s488_s14 = sphi %s514_s14, %s13_s14   ;;  %s484_s13 = sphi %s512_s13, %s596_s13   ;;  %s480_s12 = sphi %s510_s12, %s595_s12  }
   0x3   : > { %p27_p1 = scmp.ge.s32.totalorder %s25_s15, 2  ;;  %p170_p2 = scmp.lt.s32.totalorder %s488_s14, 3 }
   0x5   : > { %s598_s15 = smov (%p27_p1, %s25_s15), 0  ;;  %p171_p3 = pnand %p422_p0, %p170_p2 }
   0x6   : > { %p212_p4 = scmp.lt.s32.totalorder (!%p171_p3), %s480_s12, 1 }
   0x7   : > { %174 = sbr.rel (%p171_p3) target bundleno = 172 (0xac), region = 32 }
   0xc   : > { %s600_s12 = smov (!%p212_p4, %s480_s12), 1  ;;  %v231_v5 = vld [vmem:[%s591_s0] sm:$0xff]  ;;  %v232_v6 = vld [vmem:[%s591_s0 + $0x8] sm:$0xff]  ;;  %v233_v8 = vld [vmem:[%s591_s0 + $0x10] sm:$0xff]  ;;  %vm253_vm0 = vcmask 261120   ;;  %vm303_vm1 = vcmask 519168  }
   0xd   : > { %s433_s16 = sshll.u32 %s600_s12, 5  ;;  %s219_s19 = scalar_lea.vmem %s593_s2, %s600_s12  ;;  %v234_v9 = vld [vmem:[%s591_s0 + $0x18] sm:$0xff]  ;;  %v235_v10 = vld [vmem:[%s591_s0 + $0x20] sm:$0xff]  ;;  %v236_v11 = vld [vmem:[%s591_s0 + $0x28] sm:$0xff]  ;;  %v239_v14 = vpack.c.bf16 %v232_v6, %v231_v5 }
   0xe   : > { %s216_s22 = scalar_lea.vmem %s592_s1, %s433_s16  ;;  %v237_v12 = vld [vmem:[%s591_s0 + $0x30] sm:$0xff]  ;;  %v238_v13 = vld [vmem:[%s591_s0 + $0x38] sm:$0xff]  ;;  %v240_v15 = vpack.c.bf16 %v234_v9, %v233_v8  ;;  %v241_v16 = vpack.c.bf16 %v236_v11, %v235_v10  ;;  %v465_v18 = vld [vmem:[%s219_s19] ss:$0 sm:$0xff] }
   0xf   : > { %v245_v0 = vld [vmem:[%s216_s22 + $0x10] sm:$0xff]  ;;  %v246_v1 = vld [vmem:[%s216_s22 + $0x18] sm:$0xff]  ;;  %v243_v2 = vld [vmem:[%s216_s22] sm:$0xff]  ;;  %v242_v17 = vpack.c.bf16 %v238_v13, %v237_v12 }
  0x10   : > { %v248_v3 = vpack.c.bf16 %v246_v1, %v245_v0  ;;  %v244_v4 = vld [vmem:[%s216_s22 + $0x8] sm:$0xff]  ;;  %s228_s22 = scalar_lea.vmem %s594_s3, %s433_s16 }
  0x11   : > { %v247_v7 = vpack.c.bf16 %v244_v4, %v243_v2 }
  0x12   : > { %272 = vmatpush.bf16.msra.mxu0 %v248_v3  ;;  %435 = vmatpush.bf16.msra.mxu1 %v248_v3 }
  0x13   : > { %436 = vmatpush.bf16.msra.mxu2 %v248_v3  ;;  %437 = vmatpush.bf16.msra.mxu3 %v248_v3 }
  0x16   : > { %273 = vmatpush.bf16.msra.mxu0 %v247_v7  ;;  %438 = vmatpush.bf16.msra.mxu1 %v247_v7 }
  0x17   : > { %439 = vmatpush.bf16.msra.mxu2 %v247_v7  ;;  %440 = vmatpush.bf16.msra.mxu3 %v247_v7 }
  0x19   : > { %427 = vmatmul.msk.bf16.vlgmr.msra.gmra.mxu0 %vm253_vm0, %v239_v14  ;;  %428 = vmatmul.msk.bf16.vlgmr.msra.gmra.mxu1 %vm253_vm0, %v240_v15 }
  0x1a   : > { %429 = vmatmul.msk.bf16.vlgmr.msra.gmra.mxu2 %vm253_vm0, %v241_v16  ;;  %430 = vmatmul.msk.bf16.vlgmr.msra.gmra.mxu3 %vm253_vm0, %v242_v17 }
  0x96   : > { %v275_v19 = vpop.f32.mrf.mxu0  ;;  %v280_v20 = vpop.f32.mrf.mxu1 }
  0x97   : > { %v276_v21 = vadd.f32 %v465_v18, %v275_v19  ;;  %v281_v22 = vadd.f32 %v465_v18, %v280_v20 }
  0x99   : > { %v295_v23 = vpack.c.bf16 %v276_v21, %v276_v21  ;;  %v297_v24 = vpack.c.bf16 %v281_v22, %v281_v22 }
  0x9b   : > { %304 = vst.msk [vmem:[%s228_s22] sm:$0xf] %vm303_vm1, %v295_v23 }
  0x9c   : > { %306 = vst.msk [vmem:[%s228_s22 + $0x8] sm:$0xf] %vm303_vm1, %v297_v24 }
  0x9d   : > { %v285_v25 = vpop.f32.mrf.mxu2  ;;  %v290_v26 = vpop.f32.mrf.mxu3 }
  0x9e   : > { %v286_v27 = vadd.f32 %v465_v18, %v285_v25  ;;  %v291_v28 = vadd.f32 %v465_v18, %v290_v26  ;;  %v277_v29 = vpop.f32.mrf.mxu0  ;;  %v282_v30 = vpop.f32.mrf.mxu1 }
  0x9f   : > { %v278_v31 = vadd.f32 %v465_v18, %v277_v29  ;;  %v283_v32 = vadd.f32 %v465_v18, %v282_v30 }
  0xa0   : > { %v299_v33 = vpack.c.bf16 %v286_v27, %v286_v27  ;;  %v301_v34 = vpack.c.bf16 %v291_v28, %v291_v28 }
  0xa1   : > { %v296_v35 = vpack.c.bf16 %v278_v31, %v278_v31  ;;  %v298_v36 = vpack.c.bf16 %v283_v32, %v283_v32 }
  0xa2   : > { %308 = vst.msk [vmem:[%s228_s22 + $0x10] sm:$0xf] %vm303_vm1, %v299_v33 }
  0xa3   : > { %310 = vst.msk [vmem:[%s228_s22 + $0x18] sm:$0xf] %vm303_vm1, %v301_v34 }
  0xa4   : > { %305 = vst.msk [vmem:[%s228_s22 + $0x4] sm:$0xf] %vm303_vm1, %v296_v35 }
  0xa5   : > { %307 = vst.msk [vmem:[%s228_s22 + $0xc] sm:$0xf] %vm303_vm1, %v298_v36  ;;  %v287_v37 = vpop.f32.mrf.mxu2  ;;  %v292_v38 = vpop.f32.mrf.mxu3 }
  0xa6   : > { %v288_v39 = vadd.f32 %v465_v18, %v287_v37  ;;  %v293_v40 = vadd.f32 %v465_v18, %v292_v38 }
  0xa8   : > { %v300_v41 = vpack.c.bf16 %v288_v39, %v288_v39  ;;  %v302_v42 = vpack.c.bf16 %v293_v40, %v293_v40 }
  0xaa   : > { %309 = vst.msk [vmem:[%s228_s22 + $0x14] sm:$0xf] %vm303_vm1, %v300_v41 }
  0xab   : > { %311 = vst.msk [vmem:[%s228_s22 + $0x1c] sm:$0xf] %vm303_vm1, %v302_v42 }
  0xac PF: > { %s13_s14 = sadd.s32 1, %s488_s14   ;;  %s595_s12 = smov %s484_s13 }
  0xad   : > { %p10_p5 = scmp.ge.s32.totalorder %s13_s14, 4   ;;  %s596_s13 = smov %s598_s15 }
  0xaf   :  { %12 = sbr.rel (!%p10_p5) target bundleno = 2 (0x2), region = 68 }

// kernel: nncrf_forward.26
= control target key start
LH: loop header
LB: loop body
LE: loop exit
PB: predicated region body
PF: predicated region fallthrough
CT: control target
= control target key end

     0   :  { %vm32_vm0 = vcmask 130048   ;;  %vm28_vm1 = vcmask 261120   ;;  %v142_v3 = vmov -inf   ;;  %s143_s22 = smov 16   ;;  %v144_v43 = vmov 0.0   ;;  %s146_s10 = smov 32   ;;  %s248_s0 = inlined_call_operand.vmem [shape: f32[2,8,8,16], index: 0, kind: input, shape index: {}]   ;;  %s249_s1 = inlined_call_operand.vmem [shape: f32[8,96], index: 1, kind: output, shape index: {}]  }
   0x1   :  { %v16_v0 = vld [vmem:[%s248_s0 + $0x40] sm:$0xff]  ;;  %v17_v1 = vld [vmem:[%s248_s0 + $0x48] sm:$0xff]  ;;  %v18_v2 = vld [vmem:[%s248_s0 + $0x50] sm:$0xff]  ;;  %30 = vst.msk [vmem:[#allocation3] sm:$0xff] %vm28_vm1, %v142_v3  ;;  %vm129_vm2 = vcmask 523264   ;;  %vm131_vm3 = vcmask 785408  }
   0x2   :  { %v19_v4 = vld [vmem:[%s248_s0 + $0x58] sm:$0xff]  ;;  %v20_v5 = vld [vmem:[%s248_s0 + $0x60] sm:$0xff]  ;;  %v21_v6 = vld [vmem:[%s248_s0 + $0x68] sm:$0xff]  ;;  %v87_v7 = vsel %vm32_vm0, %v16_v0, -inf  ;;  %v49_v10 = vsel %vm32_vm0, %v17_v1, 0.0  ;;  %v88_v11 = vsel %vm32_vm0, %v17_v1, -inf }
   0x3   :  { %v22_v8 = vld [vmem:[%s248_s0 + $0x70] sm:$0xff]  ;;  %v23_v9 = vld [vmem:[%s248_s0 + $0x78] sm:$0xff]  ;;  %v89_v12 = vsel %vm32_vm0, %v18_v2, -inf  ;;  %v90_v13 = vsel %vm32_vm0, %v19_v4, -inf  ;;  %v91_v14 = vsel %vm32_vm0, %v20_v5, -inf  ;;  %v93_v15 = vsel %vm32_vm0, %v21_v6, -inf }
   0x4   :  { %v95_v16 = vsel %vm32_vm0, %v22_v8, -inf  ;;  %v97_v17 = vsel %vm32_vm0, %v23_v9, -inf  ;;  %v92_v18 = vmax.f32 %v87_v7, %v91_v14  ;;  %v94_v19 = vmax.f32 %v88_v11, %v93_v15  ;;  %v8_v39 = vld [vmem:[%s248_s0] sm:$0xff]  ;;  %v9_v40 = vld [vmem:[%s248_s0 + $0x8] sm:$0xff]  ;;  %29 = vst.msk [vmem:[#allocation2] sm:$0xff] %vm28_vm1, %v144_v43  ;;  %v10_v44 = vld [vmem:[%s248_s0 + $0x10] sm:$0xff] }
   0x5   :  { %v96_v20 = vmax.f32 %v89_v12, %v95_v16  ;;  %v98_v21 = vmax.f32 %v90_v13, %v97_v17  ;;  %v51_v22 = vsel %vm32_vm0, %v18_v2, 0.0  ;;  %v48_v23 = vsel %vm32_vm0, %v16_v0, 0.0  ;;  %v11_v45 = vld [vmem:[%s248_s0 + $0x18] sm:$0xff]  ;;  %v12_v46 = vld [vmem:[%s248_s0 + $0x20] sm:$0xff]  ;;  %v13_v47 = vld [vmem:[%s248_s0 + $0x28] sm:$0xff] }
   0x6   :  { %v99_v24 = vmax.f32 %v92_v18, %v94_v19  ;;  %v50_v26 = vadd.f32 %v49_v10, %v48_v23  ;;  %v53_v27 = vsel %vm32_vm0, %v19_v4, 0.0  ;;  %v55_v30 = vsel %vm32_vm0, %v20_v5, 0.0  ;;  %v14_v48 = vld [vmem:[%s248_s0 + $0x30] sm:$0xff]  ;;  %v15_v49 = vld [vmem:[%s248_s0 + $0x38] sm:$0xff]  ;;  %s145_s0 = smov 64  }
   0x7   :  { %v100_v25 = vmax.f32 %v96_v20, %v98_v21  ;;  %v57_v32 = vsel %vm32_vm0, %v21_v6, 0.0  ;;  %v59_v34 = vsel %vm32_vm0, %v22_v8, 0.0  ;;  %v61_v36 = vsel %vm32_vm0, %v23_v9, 0.0 }
   0x8   :  { %v52_v29 = vadd.f32 %v51_v22, %v50_v26  ;;  %v33_v41 = vsel %vm32_vm0, %v8_v39, 0.0  ;;  %v34_v42 = vsel %vm32_vm0, %v9_v40, 0.0  ;;  %v36_v51 = vsel %vm32_vm0, %v10_v44, 0.0 }
   0x9   :  { %v101_v28 = vmax.f32 %v99_v24, %v100_v25  ;;  %v35_v50 = vadd.f32 %v34_v42, %v33_v41  ;;  %v72_v52 = vsel %vm32_vm0, %v8_v39, -inf  ;;  %v73_v53 = vsel %vm32_vm0, %v9_v40, -inf }
   0xa   :  { %v54_v31 = vadd.f32 %v53_v27, %v52_v29  ;;  %v74_v54 = vsel %vm32_vm0, %v10_v44, -inf  ;;  %v75_v55 = vsel %vm32_vm0, %v11_v45, -inf  ;;  %v76_v56 = vsel %vm32_vm0, %v12_v46, -inf }
   0xb   :  { %103 = vrot.lane.b32.xlu0 %v101_v28, %s143_s22  ;;  %v78_v57 = vsel %vm32_vm0, %v13_v47, -inf  ;;  %v80_v58 = vsel %vm32_vm0, %v14_v48, -inf  ;;  %v82_v59 = vsel %vm32_vm0, %v15_v49, -inf  ;;  %v37_v60 = vadd.f32 %v36_v51, %v35_v50  ;;  %v31_v20 = vld [vmem:[#allocation2] sm:$0xff] }
   0xc   :  { %v56_v33 = vadd.f32 %v55_v30, %v54_v31  ;;  %v38_v61 = vsel %vm32_vm0, %v11_v45, 0.0  ;;  %v77_v62 = vmax.f32 %v72_v52, %v76_v56  ;;  %v79_v63 = vmax.f32 %v73_v53, %v78_v57 }
   0xd   :  { %v81_v0 = vmax.f32 %v74_v54, %v80_v58  ;;  %v83_v1 = vmax.f32 %v75_v55, %v82_v59  ;;  %v39_v2 = vadd.f32 %v38_v61, %v37_v60  ;;  %v40_v3 = vsel %vm32_vm0, %v12_v46, 0.0 }
   0xe   :  { %v58_v35 = vadd.f32 %v57_v32, %v56_v33  ;;  %v84_v4 = vmax.f32 %v77_v62, %v79_v63  ;;  %v42_v7 = vsel %vm32_vm0, %v13_v47, 0.0  ;;  %v44_v12 = vsel %vm32_vm0, %v14_v48, 0.0 }
   0xf   :  { %v85_v5 = vmax.f32 %v81_v0, %v83_v1  ;;  %v41_v6 = vadd.f32 %v40_v3, %v39_v2  ;;  %v46_v16 = vsel %vm32_vm0, %v15_v49, 0.0 }
  0x10   :  { %v60_v37 = vadd.f32 %v59_v34, %v58_v35 }
  0x11   :  { %v86_v8 = vmax.f32 %v84_v4, %v85_v5  ;;  %v43_v10 = vadd.f32 %v42_v7, %v41_v6 }
  0x12   :  { %v62_v38 = vadd.f32 %v61_v36, %v60_v37 }
  0x13   :  { %113 = vrot.lane.b32.xlu0 %v23_v9, %s143_s22  ;;  %v71_v9 = vld [vmem:[#allocation3] sm:$0xff]  ;;  %v45_v15 = vadd.f32 %v44_v12, %v43_v10 }
  0x14   :  { %64 = vrot.lane.b32.xlu1 %v62_v38, %s143_s22 }
  0x15   :  { %v47_v17 = vadd.f32 %v46_v16, %v45_v15 }
  0x7d   :  { %v104_v11 = vpop.permute.xlu0 %103 }
  0x7e   :  { %v106_v13 = vsel %vm32_vm0, %v86_v8, %v104_v11 }
  0x7f   :  { %v107_v14 = vmax.f32 %v71_v9, %v106_v13 }
  0x81   :  { %108 = vst.msk [vmem:[#allocation3] sm:$0xff] %vm28_vm1, %v107_v14 }
  0x85   :  { %v114_v18 = vpop.permute.xlu0 %113 }
  0x86   :  { %v116_v19 = vsel %vm32_vm0, %v15_v49, %v114_v18  ;;  %v65_v21 = vpop.permute.xlu1 %64 }
  0x87   :  { %125 = vrot.lane.b32.xlu2 %v116_v19, %s145_s0  ;;  %v67_v23 = vsel %vm32_vm0, %v47_v17, %v65_v21 }
  0x88   :  { %v119_v22 = vld [vmem:[#allocation3] sm:$0xff]  ;;  %v68_v24 = vadd.f32 %v67_v23, %v31_v20 }
  0x89   :  { %121 = vrot.lane.b32.xlu1 %v119_v22, %s146_s10 }
  0x8a   :  { %70 = vst.msk [vmem:[#allocation2] sm:$0xff] %vm28_vm1, %v68_v24 }
  0x91   :  { %v117_v25 = vld [vmem:[#allocation2] sm:$0xff] }
  0x92   :  { %v118_v26 = vmul.f32 0.125, %v117_v25 }
  0xe1   :  { %v126_v27 = vpop.permute.xlu2 %125 }
  0xfb   :  { %v122_v28 = vpop.permute.xlu1 %121 }
  0xfc   :  { %v128_v29 = vsel %vm28_vm1, %v118_v26, %v122_v28 }
  0xfd   :  { %v130_v30 = vsel %vm129_vm2, %v128_v29, %v126_v27 }
  0xfe   :  { %132 = vst.msk [vmem:[%s249_s1] sm:$0xff] %vm131_vm3, %v130_v30 }

// kernel: nncrf_forward.22
= control target key start
LH: loop header
LB: loop body
LE: loop exit
PB: predicated region body
PF: predicated region fallthrough
CT: control target
= control target key end

     0   :  { %s1202_s9 = smov 0   ;;  %s1204_s10 = smov 0   ;;  %s1376_s0 = inlined_call_operand.vmem [shape: bf16[2,8,8,64], index: 0, kind: input, shape index: {}]   ;;  %s1377_s1 = inlined_call_operand.vmem [shape: f32[2,16,64], index: 1, kind: input, shape index: {}]   ;;  %s1378_s2 = inlined_call_operand.vmem [shape: f32[2,8,8,16], index: 2, kind: output, shape index: {}]  }
   0x1   :  { %s1206_s11 = smov 0  }
   0x2 LB: > { %s24_s12 = sadd.s32 1, %s1175_s10  ;;  %p1006_p0 = scmp.ge.s32.totalorder %s1179_s11, 1  ;;  %s1179_s11 = sphi %s1206_s11, %s12_s11   ;;  %s1175_s10 = sphi %s1204_s10, %s1380_s10   ;;  %s1171_s9 = sphi %s1202_s9, %s1379_s9  }
   0x3   : > { %p26_p1 = scmp.ge.s32.totalorder %s24_s12, 2  ;;  %p167_p2 = scmp.lt.s32.totalorder %s1179_s11, 3 }
   0x5   : > { %s1382_s12 = smov (%p26_p1, %s24_s12), 0  ;;  %p168_p3 = pnand %p1006_p0, %p167_p2 }
   0x6   : > { %p215_p4 = scmp.lt.s32.totalorder (!%p168_p3), %s1171_s9, 1  ;;  %s1062_s19 = smul.u32 (!%p168_p3), 28, %s1171_s9 }
   0x7   : > { %171 = sbr.rel (%p168_p3) target bundleno = 4688 (0x1250), region = 28  ;;  %s1182_s24 = smov (!%p168_p3), 96  }
   0x8   : > { %s1183_s25 = smov (!%p168_p3), 16   ;;  %s1184_s26 = smov (!%p168_p3), 32  }
   0x9   : > { %s1185_s27 = smov (!%p168_p3), 80   ;;  %s1017_s28 = smul.u32 (!%p168_p3), 20, %s1171_s9 }
   0xa   : > { %s1023_s30 = smul.u32 (!%p168_p3), 12, %s1171_s9  ;;  %s1029_s4 = sshll.u32 (!%p168_p3), %s1171_s9, 2 }
   0xb   : > { %s548_s6 = ssub.s32 (!%p168_p3), 4, %s1171_s9  ;;  %s1045_s16 = smul.u32 (!%p168_p3), 4294967276, %s1171_s9 }
   0xc   : > { %vm256_vm0 = vcmask 130048   ;;  %v1181_v0 = vmov 0.0   ;;  %s1225_s13 = scalar_select %p215_p4, %s1171_s9, 1 }
   0xd   : > { %257 = vst.msk [vmem:[#allocation2] sm:$0xff] %vm256_vm0, %v1181_v0  ;;  %s1035_s7 = sshll.u32 %s548_s6, 2  ;;  %s1016_s21 = smul.u32 56, %s1171_s9 }
   0xe   : > { %258 = vst.msk [vmem:[#allocation3] sm:$0xff] %vm256_vm0, %v1181_v0  ;;  %s1060_s14 = sshll.u32 %s1225_s13, 4  ;;  %s1059_s18 = sshll.u32 %s1225_s13, 5 }
   0xf   : > { %s232_s17 = scalar_lea.vmem %s1377_s1, %s1060_s14  ;;  %s1238_s22 = scalar_lea.vmem %s1376_s0, %s1059_s18 }
  0x10   : > { %v259_v1 = vld [vmem:[%s232_s17] sm:$0xff]  ;;  %v260_v2 = vld [vmem:[%s232_s17 + $0x8] sm:$0xff]  ;;  %s266_s23 = scalar_lea.vmem %s1238_s22, %s1062_s19  ;;  %s911_s29 = scalar_lea.vmem %s1238_s22, %s1017_s28 }
  0x11   : > { %v261_v3 = vpack.c.bf16 %v260_v2, %v259_v1  ;;  %v267_v6 = vld [vmem:[%s266_s23] sm:$0xf]  ;;  %v1018_v37 = vld [vmem:[%s911_s29 + $0x4] sm:$0xf]  ;;  %s919_s3 = scalar_lea.vmem %s1238_s22, %s1023_s30  ;;  %s926_s5 = scalar_lea.vmem %s1238_s22, %s1029_s4 }
  0x12   : > { %v268_v7 = vunpack.c.l.bf16 %v267_v6  ;;  %v341_v38 = vunpack.c.l.bf16 %v1018_v37  ;;  %v1024_v2 = vld [vmem:[%s919_s3 + $0x8] sm:$0xf]  ;;  %s550_s8 = scalar_lea.vmem %s1238_s22, %s1035_s7  ;;  %s1039_s14 = smul.u32 4294967284, %s1171_s9 }
  0x13   : > { %281 = vmatpush.bf16.msra.mxu0 %v261_v3  ;;  %356 = vmatpush.bf16.msra.mxu1 %v261_v3  ;;  %s945_s17 = scalar_lea.vmem %s1238_s22, %s1045_s16  ;;  %s1051_s18 = smul.u32 4294967268, %s1171_s9 }
  0x14   : > { %v262_v4 = vld [vmem:[#allocation2] sm:$0xff]  ;;  %427 = vmatpush.bf16.msra.mxu2 %v261_v3  ;;  %497 = vmatpush.bf16.msra.mxu3 %v261_v3  ;;  %s937_s15 = scalar_lea.vmem %s1238_s22, %s1039_s14  ;;  %s1061_s20 = sshll.u32 %s1225_s13, 6 }
  0x15   : > { %v269_v5 = vpack.c.bf16 %v262_v4, %v262_v4  ;;  %v263_v12 = vld [vmem:[#allocation3] sm:$0xff]  ;;  %s953_s19 = scalar_lea.vmem %s1238_s22, %s1051_s18  ;;  %s1021_s13 = smul.u32 40, %s1171_s9 }
  0x16   : > { %s1186_s29 = smov 112   ;;  %s1027_s30 = smul.u32 24, %s1171_s9 }
  0x17   : > { %567 = vmatpush.bf16.msrb.mxu0 %v261_v3  ;;  %638 = vmatpush.bf16.msrb.mxu1 %v261_v3  ;;  %s1033_s3 = sshll.u32 %s1171_s9, 3  ;;  %s1049_s14 = smul.u32 4294967256, %s1171_s9 }
  0x18   : > { %1014 = vmatmul.msk.bf16.vlgmr.msra.gmra.mxu0 %vm256_vm0, %v269_v5  ;;  %709 = vmatpush.bf16.msrb.mxu2 %v261_v3 }
  0x19   : > { %780 = vmatpush.bf16.msrb.mxu3 %v261_v3  ;;  %v412_v3 = vunpack.c.l.bf16 %v1024_v2 }
  0x95   : > { %v283_v8 = vpop.f32.mrf.mxu0 }
  0x96   : > { %v287_v9 = vadd.f32 %v283_v8, %v268_v7 }
  0x98   : > { %1093 = vtanh.f32 %v287_v9  ;;  %v1015_v13 = vmul.f32 -1.442695, %v287_v9 }
  0x9a   : > { %1095 = vpow2.f32 %v1015_v13 }
  0x9d   : > { %v285_v10 = vpop.f32.mrf.mxu0 }
  0x9e   : > { %v1094_v11 = vpop.eup %1093 }
  0x9f   : > { %314 = vrot.lane.b32.xlu0 %v1094_v11, %s1182_s24 }
  0xa0   : > { %v1096_v14 = vpop.eup %1095 }
  0xa1   : > { %v291_v15 = vadd.f32 1.0, %v1096_v14 }
  0xa3   : > { %1097 = vrcp.f32 %v291_v15  ;;  %v303_v21 = vand.u32 2147483648, %v291_v15  ;;  %vm297_vm2 = vweird.f32 %v291_v15  ;;  %v301_v22 = vand.u32 2147483647, %v291_v15 }
  0xa5   : > { %v304_v24 = vor.u32 1.1754944e-38, %v303_v21  ;;  %vm302_vm4 = vcmp.eq.f32.partialorder %v301_v22, 8.507059e+37 }
  0xa7   : > { %309 = vrot.lane.b32.xlu0 %v263_v12, %s1183_s25 }
  0xa9   : > { %v1098_v16 = vpop.eup %1097 }
  0xaa   : > { %v293_v17 = vmul.f32 %v1098_v16, %v291_v15  ;;  %vm298_vm1 = vweird.f32 %v1098_v16 }
  0xab   : > { %vm299_vm3 = vmor %vm297_vm2, %vm298_vm1 }
  0xac   : > { %v294_v18 = vsub.f32 1.0, %v293_v17 }
  0xae   : > { %v295_v19 = vmul.f32 %v1098_v16, %v294_v18 }
  0xb0   : > { %v296_v20 = vadd.f32 %v1098_v16, %v295_v19 }
  0xb2   : > { %v300_v23 = vsel %vm299_vm3, %v1098_v16, %v296_v20 }
  0xb3   : > { %v305_v26 = vsel %vm302_vm4, %v304_v24, %v300_v23 }
 0x111   : > { %v315_v25 = vpop.permute.xlu0 %314 }
 0x112   : > { %v317_v27 = vmul.f32 %v315_v25, %v305_v26 }
 0x114   : > { %319 = vrot.lane.b32.xlu1 %v317_v27, %s1183_s25 }
 0x119   : > { %v310_v28 = vpop.permute.xlu0 %309 }
 0x11a   : > { %v312_v29 = vmul.f32 %v310_v28, %v305_v26 }
 0x186   : > { %v320_v30 = vpop.permute.xlu1 %319 }
 0x187   : > { %v322_v31 = vadd.f32 %v320_v30, %v312_v29 }
 0x189   : > { %1099 = vtanh.f32 %v322_v31 }
 0x18f   : > { %v1100_v32 = vpop.eup %1099 }
 0x190   : > { %325 = vrot.lane.b32.xlu1 %v1100_v32, %s1184_s26 }
 0x202   : > { %v326_v33 = vpop.permute.xlu1 %325 }
 0x203   : > { %v1245_v34 = vmul.f32 %v326_v33, %v305_v26 }
 0x205   : > { %v342_v35 = vpack.c.bf16 %v1245_v34, %v1245_v34 }
 0x207   : > { %344 = vrot.lane.b32.xlu2 %v342_v35, %s1185_s27 }
 0x261   : > { %v345_v36 = vpop.permute.xlu2 %344 }
 0x262   : > { %1019 = vmatmul.msk.bf16.vlgmr.msra.gmra.mxu1 %vm256_vm0, %v345_v36 }
 0x2df   : > { %v358_v39 = vpop.f32.mrf.mxu1 }
 0x2e0   : > { %v362_v40 = vadd.f32 %v358_v39, %v341_v38 }
 0x2e2   : > { %1101 = vtanh.f32 %v362_v40  ;;  %v1020_v43 = vmul.f32 -1.442695, %v362_v40 }
 0x2e4   : > { %1103 = vpow2.f32 %v1020_v43 }
 0x2e7   : > { %v360_v41 = vpop.f32.mrf.mxu1 }
 0x2e8   : > { %v1102_v42 = vpop.eup %1101 }
 0x2e9   : > { %385 = vrot.lane.b32.xlu2 %v1102_v42, %s1182_s24 }
 0x2ea   : > { %v1104_v44 = vpop.eup %1103 }
 0x2eb   : > { %v366_v45 = vadd.f32 1.0, %v1104_v44 }
 0x2ed   : > { %1105 = vrcp.f32 %v366_v45  ;;  %v378_v51 = vand.u32 2147483648, %v366_v45  ;;  %vm372_vm6 = vweird.f32 %v366_v45  ;;  %v376_v52 = vand.u32 2147483647, %v366_v45 }
 0x2ef   : > { %v379_v54 = vor.u32 1.1754944e-38, %v378_v51  ;;  %vm377_vm8 = vcmp.eq.f32.partialorder %v376_v52, 8.507059e+37 }
 0x2f3   : > { %v1106_v46 = vpop.eup %1105 }
 0x2f4   : > { %v368_v47 = vmul.f32 %v1106_v46, %v366_v45  ;;  %vm373_vm5 = vweird.f32 %v1106_v46 }
 0x2f5   : > { %vm374_vm7 = vmor %vm372_vm6, %vm373_vm5 }
 0x2f6   : > { %v369_v48 = vsub.f32 1.0, %v368_v47 }
 0x2f8   : > { %v370_v49 = vmul.f32 %v1106_v46, %v369_v48 }
 0x2fa   : > { %v371_v50 = vadd.f32 %v1106_v46, %v370_v49 }
 0x2fc   : > { %v375_v53 = vsel %vm374_vm7, %v1106_v46, %v371_v50 }
 0x2fd   : > { %v380_v56 = vsel %vm377_vm8, %v379_v54, %v375_v53 }
 0x2fe   : > { %v383_v58 = vmul.f32 %v380_v56, %v322_v31  ;;  %v1030_v31 = vld [vmem:[%s926_s5 + $0xc] sm:$0xf] }
 0x2ff   : > { %v482_v32 = vunpack.c.l.bf16 %v1030_v31 }
 0x343   : > { %v386_v55 = vpop.permute.xlu2 %385 }
 0x344   : > { %v388_v57 = vmul.f32 %v386_v55, %v380_v56 }
 0x346   : > { %390 = vrot.lane.b32.xlu0 %v388_v57, %s1183_s25 }
 0x3b8   : > { %v391_v59 = vpop.permute.xlu0 %390 }
 0x3b9   : > { %v393_v60 = vadd.f32 %v391_v59, %v383_v58 }
 0x3bb   : > { %1107 = vtanh.f32 %v393_v60 }
 0x3c1   : > { %v1108_v61 = vpop.eup %1107 }
 0x3c2   : > { %396 = vrot.lane.b32.xlu1 %v1108_v61, %s1184_s26  ;;  %v551_v61 = vld [vmem:[%s550_s8] sm:$0xf]  ;;  %s1043_s8 = smul.u32 4294967272, %s1171_s9 }
 0x434   : > { %v397_v62 = vpop.permute.xlu1 %396 }
 0x435   : > { %v1256_v63 = vmul.f32 %v397_v62, %v380_v56  ;;  %v552_v62 = vunpack.c.l.bf16 %v551_v61 }
 0x437   : > { %v413_v0 = vpack.c.bf16 %v1256_v63, %v1256_v63 }
 0x439   : > { %415 = vrot.lane.b32.xlu2 %v413_v0, %s1185_s27 }
 0x493   : > { %v416_v1 = vpop.permute.xlu2 %415 }
 0x494   : > { %1025 = vmatmul.msk.bf16.vlgmr.msra.gmra.mxu2 %vm256_vm0, %v416_v1 }
 0x517   : > { %v429_v4 = vpop.f32.mrf.mxu2 }
 0x518   : > { %v433_v5 = vadd.f32 %v429_v4, %v412_v3 }
 0x51a   : > { %1109 = vtanh.f32 %v433_v5  ;;  %v1026_v8 = vmul.f32 -1.442695, %v433_v5 }
 0x51c   : > { %1111 = vpow2.f32 %v1026_v8 }
 0x51f   : > { %v431_v6 = vpop.f32.mrf.mxu2 }
 0x520   : > { %v1110_v7 = vpop.eup %1109 }
 0x521   : > { %456 = vrot.lane.b32.xlu0 %v1110_v7, %s1182_s24 }
 0x522   : > { %v1112_v9 = vpop.eup %1111 }
 0x523   : > { %v437_v10 = vadd.f32 1.0, %v1112_v9 }
 0x525   : > { %1113 = vrcp.f32 %v437_v10  ;;  %v449_v16 = vand.u32 2147483648, %v437_v10  ;;  %vm443_vm10 = vweird.f32 %v437_v10  ;;  %v447_v17 = vand.u32 2147483647, %v437_v10 }
 0x527   : > { %v450_v19 = vor.u32 1.1754944e-38, %v449_v16  ;;  %vm448_vm12 = vcmp.eq.f32.partialorder %v447_v17, 8.507059e+37 }
 0x52b   : > { %v1114_v11 = vpop.eup %1113 }
 0x52c   : > { %v439_v12 = vmul.f32 %v1114_v11, %v437_v10  ;;  %vm444_vm9 = vweird.f32 %v1114_v11 }
 0x52d   : > { %vm445_vm11 = vmor %vm443_vm10, %vm444_vm9 }
 0x52e   : > { %v440_v13 = vsub.f32 1.0, %v439_v12 }
 0x530   : > { %v441_v14 = vmul.f32 %v1114_v11, %v440_v13 }
 0x532   : > { %v442_v15 = vadd.f32 %v1114_v11, %v441_v14 }
 0x534   : > { %v446_v18 = vsel %vm445_vm11, %v1114_v11, %v442_v15 }
 0x535   : > { %v451_v21 = vsel %vm448_vm12, %v450_v19, %v446_v18 }
 0x536   : > { %v454_v23 = vmul.f32 %v451_v21, %v393_v60 }
 0x593   : > { %v457_v20 = vpop.permute.xlu0 %456 }
 0x594   : > { %v459_v22 = vmul.f32 %v457_v20, %v451_v21 }
 0x596   : > { %461 = vrot.lane.b32.xlu1 %v459_v22, %s1183_s25 }
 0x608   : > { %v462_v24 = vpop.permute.xlu1 %461 }
 0x609   : > { %v464_v25 = vadd.f32 %v462_v24, %v454_v23 }
 0x60b   : > { %1115 = vtanh.f32 %v464_v25 }
 0x611   : > { %v1116_v26 = vpop.eup %1115 }
 0x612   : > { %467 = vrot.lane.b32.xlu2 %v1116_v26, %s1184_s26 }
 0x66c   : > { %v468_v27 = vpop.permute.xlu2 %467 }
 0x66d   : > { %v1267_v28 = vmul.f32 %v468_v27, %v451_v21  ;;  %v1040_v27 = vld [vmem:[%s937_s15 + $0x14] sm:$0xf] }
 0x66f   : > { %v483_v29 = vpack.c.bf16 %v1267_v28, %v1267_v28 }
 0x671   : > { %485 = vrot.lane.b32.xlu0 %v483_v29, %s1185_s27  ;;  %v623_v29 = vunpack.c.l.bf16 %v1040_v27 }
 0x6e3   : > { %v486_v30 = vpop.permute.xlu0 %485 }
 0x6e4   : > { %1031 = vmatmul.msk.bf16.vlgmr.msra.gmra.mxu3 %vm256_vm0, %v486_v30 }
 0x767   : > { %v499_v33 = vpop.f32.mrf.mxu3 }
 0x768   : > { %v503_v35 = vadd.f32 %v499_v33, %v482_v32 }
 0x76a   : > { %1117 = vtanh.f32 %v503_v35  ;;  %v1032_v38 = vmul.f32 -1.442695, %v503_v35 }
 0x76c   : > { %1119 = vpow2.f32 %v1032_v38 }
 0x76f   : > { %v501_v36 = vpop.f32.mrf.mxu3 }
 0x770   : > { %v1118_v37 = vpop.eup %1117 }
 0x771   : > { %526 = vrot.lane.b32.xlu1 %v1118_v37, %s1182_s24 }
 0x772   : > { %v1120_v39 = vpop.eup %1119 }
 0x773   : > { %v507_v40 = vadd.f32 1.0, %v1120_v39 }
 0x775   : > { %1121 = vrcp.f32 %v507_v40  ;;  %v519_v46 = vand.u32 2147483648, %v507_v40  ;;  %vm513_vm14 = vweird.f32 %v507_v40  ;;  %v517_v47 = vand.u32 2147483647, %v507_v40 }
 0x777   : > { %v520_v49 = vor.u32 1.1754944e-38, %v519_v46  ;;  %vm518_vm1 = vcmp.eq.f32.partialorder %v517_v47, 8.507059e+37 }
 0x77b   : > { %v1122_v41 = vpop.eup %1121 }
 0x77c   : > { %v509_v42 = vmul.f32 %v1122_v41, %v507_v40  ;;  %vm514_vm13 = vweird.f32 %v1122_v41 }
 0x77d   : > { %vm515_vm15 = vmor %vm513_vm14, %vm514_vm13 }
 0x77e   : > { %v510_v43 = vsub.f32 1.0, %v509_v42 }
 0x780   : > { %v511_v44 = vmul.f32 %v1122_v41, %v510_v43 }
 0x782   : > { %v512_v45 = vadd.f32 %v1122_v41, %v511_v44 }
 0x784   : > { %v516_v48 = vsel %vm515_vm15, %v1122_v41, %v512_v45 }
 0x785   : > { %v521_v51 = vsel %vm518_vm1, %v520_v49, %v516_v48 }
 0x786   : > { %v524_v53 = vmul.f32 %v521_v51, %v464_v25 }
 0x7e3   : > { %v527_v50 = vpop.permute.xlu1 %526 }
 0x7e4   : > { %v529_v52 = vmul.f32 %v527_v50, %v521_v51 }
 0x7e6   : > { %531 = vrot.lane.b32.xlu2 %v529_v52, %s1183_s25 }
 0x840   : > { %v532_v54 = vpop.permute.xlu2 %531 }
 0x841   : > { %v534_v55 = vadd.f32 %v532_v54, %v524_v53 }
 0x843   : > { %1123 = vtanh.f32 %v534_v55 }
 0x849   : > { %v1124_v56 = vpop.eup %1123 }
 0x84a   : > { %537 = vrot.lane.b32.xlu0 %v1124_v56, %s1184_s26 }
 0x8bc   : > { %v538_v57 = vpop.permute.xlu0 %537 }
 0x8bd   : > { %v1278_v58 = vmul.f32 %v538_v57, %v521_v51 }
 0x8bf   : > { %v553_v59 = vpack.c.bf16 %v1278_v58, %v1278_v58 }
 0x8c1   : > { %555 = vrot.lane.b32.xlu1 %v553_v59, %s1185_s27  ;;  %v1046_v59 = vld [vmem:[%s945_s17 + $0x18] sm:$0xf] }
 0x933   : > { %v556_v60 = vpop.permute.xlu1 %555 }
 0x934   : > { %1036 = vmatmul.msk.bf16.vlgmr.msrb.gmra.mxu0 %vm256_vm0, %v556_v60  ;;  %v694_v60 = vunpack.c.l.bf16 %v1046_v59 }
 0x9b1   : > { %v569_v0 = vpop.f32.mrf.mxu0 }
 0x9b2   : > { %v573_v1 = vadd.f32 %v569_v0, %v552_v62 }
 0x9b4   : > { %1125 = vtanh.f32 %v573_v1  ;;  %v1037_v4 = vmul.f32 -1.442695, %v573_v1 }
 0x9b6   : > { %1127 = vpow2.f32 %v1037_v4 }
 0x9b9   : > { %v571_v2 = vpop.f32.mrf.mxu0 }
 0x9ba   : > { %v1126_v3 = vpop.eup %1125 }
 0x9bb   : > { %596 = vrot.lane.b32.xlu2 %v1126_v3, %s1182_s24 }
 0x9bc   : > { %v1128_v5 = vpop.eup %1127 }
 0x9bd   : > { %v577_v6 = vadd.f32 1.0, %v1128_v5 }
 0x9bf   : > { %1129 = vrcp.f32 %v577_v6  ;;  %v589_v12 = vand.u32 2147483648, %v577_v6  ;;  %vm583_vm3 = vweird.f32 %v577_v6  ;;  %v587_v13 = vand.u32 2147483647, %v577_v6 }
 0x9c1   : > { %v590_v15 = vor.u32 1.1754944e-38, %v589_v12  ;;  %vm588_vm5 = vcmp.eq.f32.partialorder %v587_v13, 8.507059e+37 }
 0x9c5   : > { %v1130_v7 = vpop.eup %1129 }
 0x9c6   : > { %v579_v8 = vmul.f32 %v1130_v7, %v577_v6  ;;  %vm584_vm2 = vweird.f32 %v1130_v7 }
 0x9c7   : > { %vm585_vm4 = vmor %vm583_vm3, %vm584_vm2 }
 0x9c8   : > { %v580_v9 = vsub.f32 1.0, %v579_v8 }
 0x9ca   : > { %v581_v10 = vmul.f32 %v1130_v7, %v580_v9 }
 0x9cc   : > { %v582_v11 = vadd.f32 %v1130_v7, %v581_v10 }
 0x9ce   : > { %v586_v14 = vsel %vm585_vm4, %v1130_v7, %v582_v11 }
 0x9cf   : > { %v591_v17 = vsel %vm588_vm5, %v590_v15, %v586_v14 }
 0x9d0   : > { %v594_v19 = vmul.f32 %v591_v17, %v534_v55 }
 0xa15   : > { %v597_v16 = vpop.permute.xlu2 %596 }
 0xa16   : > { %v599_v18 = vmul.f32 %v597_v16, %v591_v17 }
 0xa18   : > { %601 = vrot.lane.b32.xlu0 %v599_v18, %s1183_s25 }
 0xa8a   : > { %v602_v20 = vpop.permute.xlu0 %601 }
 0xa8b   : > { %v604_v21 = vadd.f32 %v602_v20, %v594_v19 }
 0xa8d   : > { %1131 = vtanh.f32 %v604_v21 }
 0xa93   : > { %v1132_v22 = vpop.eup %1131 }
 0xa94   : > { %607 = vrot.lane.b32.xlu1 %v1132_v22, %s1184_s26 }
 0xb06   : > { %v608_v23 = vpop.permute.xlu1 %607 }
 0xb07   : > { %v1291_v24 = vmul.f32 %v608_v23, %v591_v17 }
 0xb09   : > { %v624_v25 = vpack.c.bf16 %v1291_v24, %v1291_v24 }
 0xb0b   : > { %626 = vrot.lane.b32.xlu2 %v624_v25, %s1185_s27 }
 0xb65   : > { %v627_v26 = vpop.permute.xlu2 %626 }
 0xb66   : > { %1041 = vmatmul.msk.bf16.vlgmr.msrb.gmra.mxu1 %vm256_vm0, %v627_v26  ;;  %v1052_v26 = vld [vmem:[%s953_s19 + $0x1c] sm:$0xf] }
 0xb67   : > { %v765_v27 = vunpack.c.l.bf16 %v1052_v26 }
 0xbe3   : > { %v640_v30 = vpop.f32.mrf.mxu1 }
 0xbe4   : > { %v644_v31 = vadd.f32 %v640_v30, %v623_v29 }
 0xbe6   : > { %1133 = vtanh.f32 %v644_v31  ;;  %v1042_v35 = vmul.f32 -1.442695, %v644_v31 }
 0xbe8   : > { %1135 = vpow2.f32 %v1042_v35 }
 0xbeb   : > { %v642_v32 = vpop.f32.mrf.mxu1 }
 0xbec   : > { %v1134_v33 = vpop.eup %1133 }
 0xbed   : > { %667 = vrot.lane.b32.xlu0 %v1134_v33, %s1182_s24 }
 0xbee   : > { %v1136_v36 = vpop.eup %1135 }
 0xbef   : > { %v648_v37 = vadd.f32 1.0, %v1136_v36 }
 0xbf1   : > { %1137 = vrcp.f32 %v648_v37  ;;  %v660_v43 = vand.u32 2147483648, %v648_v37  ;;  %vm654_vm7 = vweird.f32 %v648_v37  ;;  %v658_v44 = vand.u32 2147483647, %v648_v37 }
 0xbf3   : > { %v661_v46 = vor.u32 1.1754944e-38, %v660_v43  ;;  %vm659_vm9 = vcmp.eq.f32.partialorder %v658_v44, 8.507059e+37 }
 0xbf7   : > { %v1138_v38 = vpop.eup %1137 }
 0xbf8   : > { %v650_v39 = vmul.f32 %v1138_v38, %v648_v37  ;;  %vm655_vm6 = vweird.f32 %v1138_v38 }
 0xbf9   : > { %vm656_vm8 = vmor %vm654_vm7, %vm655_vm6 }
 0xbfa   : > { %v651_v40 = vsub.f32 1.0, %v650_v39 }
 0xbfc   : > { %v652_v41 = vmul.f32 %v1138_v38, %v651_v40 }
 0xbfe   : > { %v653_v42 = vadd.f32 %v1138_v38, %v652_v41 }
 0xc00   : > { %v657_v45 = vsel %vm656_vm8, %v1138_v38, %v653_v42 }
 0xc01   : > { %v662_v48 = vsel %vm659_vm9, %v661_v46, %v657_v45 }
 0xc02   : > { %v665_v50 = vmul.f32 %v662_v48, %v604_v21 }
 0xc5f   : > { %v668_v47 = vpop.permute.xlu0 %667 }
 0xc60   : > { %v670_v49 = vmul.f32 %v668_v47, %v662_v48 }
 0xc62   : > { %672 = vrot.lane.b32.xlu1 %v670_v49, %s1183_s25 }
 0xcd4   : > { %v673_v51 = vpop.permute.xlu1 %672 }
 0xcd5   : > { %v675_v52 = vadd.f32 %v673_v51, %v665_v50 }
 0xcd7   : > { %1139 = vtanh.f32 %v675_v52 }
 0xcdd   : > { %v1140_v53 = vpop.eup %1139 }
 0xcde   : > { %678 = vrot.lane.b32.xlu2 %v1140_v53, %s1184_s26 }
 0xd38   : > { %v679_v54 = vpop.permute.xlu2 %678 }
 0xd39   : > { %v1302_v55 = vmul.f32 %v679_v54, %v662_v48 }
 0xd3b   : > { %v695_v56 = vpack.c.bf16 %v1302_v55, %v1302_v55 }
 0xd3d   : > { %697 = vrot.lane.b32.xlu0 %v695_v56, %s1185_s27 }
 0xdaf   : > { %v698_v57 = vpop.permute.xlu0 %697 }
 0xdb0   : > { %1047 = vmatmul.msk.bf16.vlgmr.msrb.gmra.mxu2 %vm256_vm0, %v698_v57 }
 0xe33   : > { %v711_v61 = vpop.f32.mrf.mxu2 }
 0xe34   : > { %v715_v62 = vadd.f32 %v711_v61, %v694_v60 }
 0xe36   : > { %1141 = vtanh.f32 %v715_v62  ;;  %v1048_v2 = vmul.f32 -1.442695, %v715_v62 }
 0xe38   : > { %1143 = vpow2.f32 %v1048_v2 }
 0xe3b   : > { %v713_v0 = vpop.f32.mrf.mxu2 }
 0xe3c   : > { %v1142_v1 = vpop.eup %1141 }
 0xe3d   : > { %738 = vrot.lane.b32.xlu1 %v1142_v1, %s1182_s24 }
 0xe3e   : > { %v1144_v3 = vpop.eup %1143 }
 0xe3f   : > { %v719_v4 = vadd.f32 1.0, %v1144_v3 }
 0xe41   : > { %1145 = vrcp.f32 %v719_v4  ;;  %v731_v10 = vand.u32 2147483648, %v719_v4  ;;  %vm725_vm11 = vweird.f32 %v719_v4  ;;  %v729_v11 = vand.u32 2147483647, %v719_v4 }
 0xe43   : > { %v732_v13 = vor.u32 1.1754944e-38, %v731_v10  ;;  %vm730_vm13 = vcmp.eq.f32.partialorder %v729_v11, 8.507059e+37 }
 0xe47   : > { %v1146_v5 = vpop.eup %1145 }
 0xe48   : > { %v721_v6 = vmul.f32 %v1146_v5, %v719_v4  ;;  %vm726_vm10 = vweird.f32 %v1146_v5 }
 0xe49   : > { %vm727_vm12 = vmor %vm725_vm11, %vm726_vm10 }
 0xe4a   : > { %v722_v7 = vsub.f32 1.0, %v721_v6 }
 0xe4c   : > { %v723_v8 = vmul.f32 %v1146_v5, %v722_v7 }
 0xe4e   : > { %v724_v9 = vadd.f32 %v1146_v5, %v723_v8 }
 0xe50   : > { %v728_v12 = vsel %vm727_vm12, %v1146_v5, %v724_v9 }
 0xe51   : > { %v733_v15 = vsel %vm730_vm13, %v732_v13, %v728_v12 }
 0xe52   : > { %v736_v17 = vmul.f32 %v733_v15, %v675_v52 }
 0xeaf   : > { %v739_v14 = vpop.permute.xlu1 %738 }
 0xeb0   : > { %v741_v16 = vmul.f32 %v739_v14, %v733_v15 }
 0xeb2   : > { %743 = vrot.lane.b32.xlu2 %v741_v16, %s1183_s25 }
 0xf0c   : > { %v744_v18 = vpop.permute.xlu2 %743 }
 0xf0d   : > { %v746_v19 = vadd.f32 %v744_v18, %v736_v17 }
 0xf0f   : > { %1147 = vtanh.f32 %v746_v19 }
 0xf15   : > { %v1148_v20 = vpop.eup %1147 }
 0xf16   : > { %749 = vrot.lane.b32.xlu0 %v1148_v20, %s1184_s26 }
 0xf88   : > { %v750_v21 = vpop.permute.xlu0 %749 }
 0xf89   : > { %v752_v22 = vmul.f32 %v750_v21, %v733_v15 }
 0xf8b   : > { %v766_v23 = vpack.c.bf16 %v752_v22, %v752_v22 }
 0xf8d   : > { %768 = vrot.lane.b32.xlu1 %v766_v23, %s1185_s27 }
 0xfff   : > { %v769_v25 = vpop.permute.xlu1 %768 }
0x1000   : > { %1053 = vmatmul.msk.bf16.vlgmr.msrb.gmra.mxu3 %vm256_vm0, %v769_v25 }
0x1083   : > { %v782_v29 = vpop.f32.mrf.mxu3 }
0x1084   : > { %v786_v30 = vadd.f32 %v782_v29, %v765_v27 }
0x1086   : > { %1149 = vtanh.f32 %v786_v30  ;;  %v1054_v33 = vmul.f32 -1.442695, %v786_v30 }
0x1088   : > { %1151 = vpow2.f32 %v1054_v33 }
0x108b   : > { %v784_v31 = vpop.f32.mrf.mxu3 }
0x108c   : > { %v1150_v32 = vpop.eup %1149 }
0x108d   : > { %809 = vrot.lane.b32.xlu2 %v1150_v32, %s1182_s24  ;;  %s1328_s24 = scalar_lea.vmem %s1378_s2, %s1061_s20 }
0x108e   : > { %v1152_v35 = vpop.eup %1151  ;;  %s334_s28 = scalar_lea.vmem %s1328_s24, %s1016_s21  ;;  %s923_s4 = scalar_lea.vmem %s1328_s24, %s1027_s30 }
0x108f   : > { %v790_v36 = vadd.f32 1.0, %v1152_v35  ;;  %s929_s5 = scalar_lea.vmem %s1328_s24, %s1033_s3  ;;  %s949_s15 = scalar_lea.vmem %s1328_s24, %s1049_s14 }
0x1091   : > { %1153 = vrcp.f32 %v790_v36  ;;  %v802_v42 = vand.u32 2147483648, %v790_v36  ;;  %vm796_vm15 = vweird.f32 %v790_v36 }
0x1093   : > { %v803_v43 = vor.u32 1.1754944e-38, %v802_v42 }
0x1095   : > { %330 = vrot.lane.b32.xlu2 %v1245_v34, %s1185_s27  ;;  %v800_v34 = vand.u32 2147483647, %v790_v36 }
0x1097   : > { %v1154_v37 = vpop.eup %1153  ;;  %vm801_vm2 = vcmp.eq.f32.partialorder %v800_v34, 8.507059e+37 }
0x1098   : > { %v792_v38 = vmul.f32 %v1154_v37, %v790_v36  ;;  %vm797_vm14 = vweird.f32 %v1154_v37 }
0x1099   : > { %vm798_vm1 = vmor %vm796_vm15, %vm797_vm14 }
0x109a   : > { %v793_v39 = vsub.f32 1.0, %v792_v38 }
0x109c   : > { %v794_v40 = vmul.f32 %v1154_v37, %v793_v39 }
0x109d   : > { %542 = vrot.lane.b32.xlu2 %v1278_v58, %s1185_s27 }
0x109e   : > { %v795_v41 = vadd.f32 %v1154_v37, %v794_v40 }
0x10a0   : > { %v799_v58 = vsel %vm798_vm1, %v1154_v37, %v795_v41 }
0x10a1   : > { %v804_v45 = vsel %vm801_vm2, %v803_v43, %v799_v58 }
0x10a2   : > { %v807_v48 = vmul.f32 %v804_v45, %v746_v19 }
0x10a5   : > { %754 = vrot.lane.b32.xlu2 %v752_v22, %s1185_s27 }
0x10e7   : > { %v810_v44 = vpop.permute.xlu2 %809 }
0x10e8   : > { %v812_v46 = vmul.f32 %v810_v44, %v804_v45 }
0x10ea   : > { %814 = vrot.lane.b32.xlu0 %v812_v46, %s1183_s25  ;;  %s915_s25 = scalar_lea.vmem %s1328_s24, %s1021_s13 }
0x10ef   : > { %v331_v47 = vpop.permute.xlu2 %330 }
0x10f0   : > { %335 = vst.msk [vmem:[%s334_s28] sm:$0xff] %vm256_vm0, %v331_v47 }
0x10f2   : > { %401 = vrot.lane.b32.xlu0 %v1256_v63, %s1185_s27 }
0x10f7   : > { %v543_v53 = vpop.permute.xlu2 %542 }
0x10fa   : > { %612 = vrot.lane.b32.xlu0 %v1291_v24, %s1185_s27 }
0x10ff   : > { %v755_v56 = vpop.permute.xlu2 %754 }
0x115c   : > { %v815_v49 = vpop.permute.xlu0 %814 }
0x115d   : > { %v817_v50 = vadd.f32 %v815_v49, %v807_v48 }
0x115f   : > { %1155 = vtanh.f32 %v817_v50 }
0x1164   : > { %v402_v51 = vpop.permute.xlu0 %401 }
0x1165   : > { %v1156_v52 = vpop.eup %1155  ;;  %1022 = vst.msk [vmem:[%s915_s25 + $0x8] sm:$0xff] %vm256_vm0, %v402_v51 }
0x1166   : > { %820 = vrot.lane.b32.xlu1 %v1156_v52, %s1184_s26  ;;  %s1038_s26 = sshll.u32 %s548_s6, 3  ;;  %s1055_s6 = smul.u32 4294967240, %s1171_s9 }
0x1167   : > { %s616_s7 = scalar_lea.vmem %s1328_s24, %s1038_s26 }
0x1168   : > { %s957_s16 = scalar_lea.vmem %s1328_s24, %s1055_s6 }
0x116c   : > { %v613_v54 = vpop.permute.xlu0 %612 }
0x116e   : > { %472 = vrot.lane.b32.xlu1 %v1267_v28, %s1185_s27 }
0x1176   : > { %683 = vrot.lane.b32.xlu1 %v1302_v55, %s1185_s27 }
0x117e   : > { %833 = vrot.lane.b32.xlu1 %v817_v50, %s1186_s29 }
0x11d8   : > { %v821_v63 = vpop.permute.xlu1 %820 }
0x11d9   : > { %v823_v24 = vmul.f32 %v821_v63, %v804_v45 }
0x11db   : > { %825 = vrot.lane.b32.xlu0 %v823_v24, %s1185_s27  ;;  %s941_s27 = scalar_lea.vmem %s1328_s24, %s1043_s8 }
0x11e0   : > { %v473_v28 = vpop.permute.xlu1 %472 }
0x11e1   : > { %1028 = vst.msk [vmem:[%s923_s4 + $0x10] sm:$0xff] %vm256_vm0, %v473_v28 }
0x11e2   : > { %1034 = vst.msk [vmem:[%s929_s5 + $0x18] sm:$0xff] %vm256_vm0, %v543_v53 }
0x11e3   : > { %617 = vst.msk [vmem:[%s616_s7] sm:$0xff] %vm256_vm0, %v613_v54 }
0x11e8   : > { %v684_v55 = vpop.permute.xlu1 %683 }
0x11e9   : > { %1044 = vst.msk [vmem:[%s941_s27 + $0x28] sm:$0xff] %vm256_vm0, %v684_v55 }
0x11ea   : > { %1050 = vst.msk [vmem:[%s949_s15 + $0x30] sm:$0xff] %vm256_vm0, %v755_v56 }
0x11f0   : > { %v834_v57 = vpop.permute.xlu1 %833 }
0x11f1   : > { %836 = vst.msk [vmem:[#allocation3] sm:$0xff] %vm256_vm0, %v834_v57 }
0x124d   : > { %v826_v59 = vpop.permute.xlu0 %825 }
0x124e   : > { %1056 = vst.msk [vmem:[%s957_s16 + $0x38] sm:$0xff] %vm256_vm0, %v826_v59 }
0x124f   : > { %831 = vst.msk [vmem:[#allocation2] sm:$0xff] %vm256_vm0, %v826_v59 }
0x1250 PF: > { %s12_s11 = sadd.s32 1, %s1179_s11   ;;  %s1379_s9 = smov %s1175_s10 }
0x1251   : > { %p9_p5 = scmp.ge.s32.totalorder %s12_s11, 4   ;;  %s1380_s10 = smov %s1382_s12 }
0x1253   :  { %11 = sbr.rel (!%p9_p5) target bundleno = 2 (0x2), region = 81 }

// kernel: nncrf_forward.23
= control target key start
LH: loop header
LB: loop body
LE: loop exit
PB: predicated region body
PF: predicated region fallthrough
CT: control target
= control target key end

     0   :  { %s633_s12 = smov 0   ;;  %s635_s13 = smov 0   ;;  %s756_s0 = inlined_call_operand.vmem [shape: f32[2,64,16], index: 0, kind: input, shape index: {}]   ;;  %s757_s1 = inlined_call_operand.vmem [shape: f32[2,2,16,64], index: 1, kind: input, shape index: {}]   ;;  %s758_s2 = inlined_call_operand.vmem [shape: f32[2,1,64], index: 2, kind: input, shape index: {}]   ;;  %s759_s3 = inlined_call_operand.vmem [shape: bf16[2,64,64], index: 3, kind: output, shape index: {}]  }
   0x1   :  { %s637_s14 = smov 0  }
   0x2 LB: > { %s25_s15 = sadd.s32 1, %s607_s13  ;;  %p545_p0 = scmp.ge.s32.totalorder %s611_s14, 1  ;;  %s611_s14 = sphi %s637_s14, %s13_s14   ;;  %s607_s13 = sphi %s635_s13, %s761_s13   ;;  %s603_s12 = sphi %s633_s12, %s760_s12  }
   0x3   : > { %p27_p1 = scmp.ge.s32.totalorder %s25_s15, 2  ;;  %p170_p2 = scmp.lt.s32.totalorder %s611_s14, 3 }
   0x5   : > { %s763_s15 = smov (%p27_p1, %s25_s15), 0  ;;  %p171_p3 = pnand %p545_p0, %p170_p2 }
   0x6   : > { %p212_p4 = scmp.lt.s32.totalorder (!%p171_p3), %s603_s12, 1 }
   0x7   : > { %174 = sbr.rel (%p171_p3) target bundleno = 190 (0xbe), region = 32 }
   0xc   : > { %v239_v0 = vld [vmem:[%s756_s0 + $0x40] sm:$0xff]  ;;  %v240_v1 = vld [vmem:[%s756_s0 + $0x48] sm:$0xff]  ;;  %s765_s12 = smov (!%p212_p4, %s603_s12), 1  ;;  %vm297_vm0 = vcmask 130048   ;;  %v241_v42 = vld [vmem:[%s756_s0 + $0x50] sm:$0xff]  ;;  %vm426_vm1 = vcmask 519168  }
   0xd   : > { %v243_v2 = vld [vmem:[%s756_s0 + $0x60] sm:$0xff]  ;;  %v244_v3 = vld [vmem:[%s756_s0 + $0x68] sm:$0xff]  ;;  %v255_v6 = vpack.c.bf16 %v239_v0, %v239_v0  ;;  %v256_v7 = vpack.c.bf16 %v240_v1, %v240_v1  ;;  %s560_s5 = sshll.u32 %s765_s12, 5  ;;  %s219_s8 = scalar_lea.vmem %s758_s2, %s765_s12  ;;  %v242_v43 = vld [vmem:[%s756_s0 + $0x58] sm:$0xff]  ;;  %v257_v50 = vpack.c.bf16 %v241_v42, %v241_v42 }
   0xe   : > { %v231_v4 = vld [vmem:[%s756_s0] sm:$0xff]  ;;  %v232_v5 = vld [vmem:[%s756_s0 + $0x8] sm:$0xff]  ;;  %v259_v8 = vpack.c.bf16 %v243_v2, %v243_v2  ;;  %v260_v11 = vpack.c.bf16 %v244_v3, %v244_v3  ;;  %s216_s11 = scalar_lea.vmem %s757_s1, %s560_s5  ;;  %v245_v44 = vld [vmem:[%s756_s0 + $0x70] sm:$0xff]  ;;  %v258_v51 = vpack.c.bf16 %v242_v43, %v242_v43 }
   0xf   : > { %v235_v9 = vld [vmem:[%s756_s0 + $0x20] sm:$0xff]  ;;  %v236_v10 = vld [vmem:[%s756_s0 + $0x28] sm:$0xff]  ;;  %v247_v12 = vpack.c.bf16 %v231_v4, %v231_v4  ;;  %v248_v13 = vpack.c.bf16 %v232_v5, %v232_v5  ;;  %v265_v16 = vld [vmem:[%s216_s11 + $0x10] sm:$0xff]  ;;  %v279_v19 = vunpack.c.l.b16 %v255_v6  ;;  %v280_v20 = vunpack.c.l.b16 %v256_v7 }
  0x10   : > { %v251_v14 = vpack.c.bf16 %v235_v9, %v235_v9  ;;  %v252_v15 = vpack.c.bf16 %v236_v10, %v236_v10  ;;  %v266_v17 = vld [vmem:[%s216_s11 + $0x18] sm:$0xff]  ;;  %v263_v18 = vld [vmem:[%s216_s11] sm:$0xff]  ;;  %v283_v21 = vunpack.c.l.b16 %v259_v8  ;;  %v269_v22 = vpack.c.bf16 %v265_v16, %v265_v16  ;;  %v264_v24 = vld [vmem:[%s216_s11 + $0x8] sm:$0xff]  ;;  %s729_s11 = scalar_lea.vmem %s759_s3, %s560_s5 }
  0x11   : > { %v270_v23 = vpack.c.bf16 %v266_v17, %v266_v17  ;;  %v267_v25 = vpack.c.bf16 %v263_v18, %v263_v18  ;;  %v284_v26 = vunpack.c.l.b16 %v260_v11  ;;  %v268_v27 = vpack.c.bf16 %v264_v24, %v264_v24  ;;  %v246_v45 = vld [vmem:[%s756_s0 + $0x78] sm:$0xff]  ;;  %v233_v46 = vld [vmem:[%s756_s0 + $0x10] sm:$0xff]  ;;  %v588_v6 = vld [vmem:[%s219_s8] ss:$0 sm:$0xff] }
  0x12   : > { %v347_v28 = vunpack.c.l.b16 %v247_v12  ;;  %v348_v29 = vunpack.c.l.b16 %v248_v13  ;;  %v351_v30 = vunpack.c.l.b16 %v251_v14  ;;  %v293_v31 = vunpack.c.l.b16 %v269_v22  ;;  %v234_v47 = vld [vmem:[%s756_s0 + $0x18] sm:$0xff]  ;;  %v237_v48 = vld [vmem:[%s756_s0 + $0x30] sm:$0xff] }
  0x13   : > { %v294_v32 = vunpack.c.l.b16 %v270_v23  ;;  %v361_v33 = vunpack.c.l.b16 %v267_v25  ;;  %v352_v34 = vunpack.c.l.b16 %v252_v15  ;;  %v362_v35 = vunpack.c.l.b16 %v268_v27  ;;  %v238_v49 = vld [vmem:[%s756_s0 + $0x38] sm:$0xff] }
  0x14   : > { %v287_v38 = vpack.c.b16 %v280_v20, %v279_v19  ;;  %v289_v39 = vpack.c.b16 %v284_v26, %v283_v21  ;;  %v355_v40 = vpack.c.b16 %v348_v29, %v347_v28  ;;  %v261_v52 = vpack.c.bf16 %v245_v44, %v245_v44 }
  0x15   : > { %v295_v36 = vpack.c.b16 %v294_v32, %v293_v31  ;;  %v363_v37 = vpack.c.b16 %v362_v35, %v361_v33  ;;  %v357_v41 = vpack.c.b16 %v352_v34, %v351_v30  ;;  %v262_v53 = vpack.c.bf16 %v246_v45, %v246_v45 }
  0x16   : > { %v249_v54 = vpack.c.bf16 %v233_v46, %v233_v46  ;;  %v250_v55 = vpack.c.bf16 %v234_v47, %v234_v47  ;;  %v253_v56 = vpack.c.bf16 %v237_v48, %v237_v48  ;;  %v254_v57 = vpack.c.bf16 %v238_v49, %v238_v49 }
  0x17   : > { %317 = vmatpush.bf16.msra.mxu0 %v295_v36  ;;  %562 = vmatpush.bf16.msra.mxu2 %v295_v36  ;;  %v281_v58 = vunpack.c.l.b16 %v257_v50  ;;  %v282_v59 = vunpack.c.l.b16 %v258_v51  ;;  %v285_v60 = vunpack.c.l.b16 %v261_v52  ;;  %v286_v61 = vunpack.c.l.b16 %v262_v53 }
  0x18   : > { %384 = vmatpush.bf16.msra.mxu1 %v363_v37  ;;  %563 = vmatpush.bf16.msra.mxu3 %v363_v37  ;;  %v349_v62 = vunpack.c.l.b16 %v249_v54  ;;  %v350_v63 = vunpack.c.l.b16 %v250_v55  ;;  %v353_v0 = vunpack.c.l.b16 %v253_v56  ;;  %v354_v1 = vunpack.c.l.b16 %v254_v57 }
  0x19   : > { %v288_v2 = vpack.c.b16 %v282_v59, %v281_v58  ;;  %v290_v3 = vpack.c.b16 %v286_v61, %v285_v60 }
  0x1a   : > { %550 = vmatmul.msk.bf16.vlgmr.msra.gmra.mxu0 %vm297_vm0, %v287_v38  ;;  %552 = vmatmul.msk.bf16.vlgmr.msra.gmra.mxu2 %vm297_vm0, %v289_v39  ;;  %v356_v4 = vpack.c.b16 %v350_v63, %v349_v62  ;;  %v358_v5 = vpack.c.b16 %v354_v1, %v353_v0 }
  0x1b   : > { %554 = vmatmul.msk.bf16.vlgmr.msra.gmra.mxu1 %vm297_vm0, %v355_v40  ;;  %556 = vmatmul.msk.bf16.vlgmr.msra.gmra.mxu3 %vm297_vm0, %v357_v41 }
  0x2a   : > { %551 = vmatmul.msk.bf16.gmra.mxu0 %vm297_vm0, %v288_v2  ;;  %553 = vmatmul.msk.bf16.gmra.mxu2 %vm297_vm0, %v290_v3 }
  0x2b   : > { %555 = vmatmul.msk.bf16.gmra.mxu1 %vm297_vm0, %v356_v4  ;;  %557 = vmatmul.msk.bf16.gmra.mxu3 %vm297_vm0, %v358_v5 }
  0x97   : > { %v319_v7 = vpop.f32.mrf.mxu0 }
  0x98   : > { %v386_v8 = vpop.f32.mrf.mxu1 }
  0x99   : > { %v387_v9 = vadd.f32 %v386_v8, %v319_v7 }
  0x9b   : > { %v410_v10 = vadd.f32 %v588_v6, %v387_v9 }
  0x9d   : > { %v418_v11 = vpack.c.bf16 %v410_v10, %v410_v10  ;;  %v329_v12 = vpop.f32.mrf.mxu2 }
  0x9e   : > { %v396_v13 = vpop.f32.mrf.mxu3 }
  0x9f   : > { %427 = vst.msk [vmem:[%s729_s11] sm:$0xf] %vm426_vm1, %v418_v11  ;;  %v397_v14 = vadd.f32 %v396_v13, %v329_v12  ;;  %v321_v15 = vpop.f32.mrf.mxu0 }
  0xa0   : > { %v388_v16 = vpop.f32.mrf.mxu1 }
  0xa1   : > { %v414_v17 = vadd.f32 %v588_v6, %v397_v14  ;;  %v389_v18 = vadd.f32 %v388_v16, %v321_v15 }
  0xa3   : > { %v422_v19 = vpack.c.bf16 %v414_v17, %v414_v17  ;;  %v411_v20 = vadd.f32 %v588_v6, %v389_v18 }
  0xa5   : > { %431 = vst.msk [vmem:[%s729_s11 + $0x10] sm:$0xf] %vm426_vm1, %v422_v19  ;;  %v419_v21 = vpack.c.bf16 %v411_v20, %v411_v20  ;;  %v331_v22 = vpop.f32.mrf.mxu2 }
  0xa6   : > { %v398_v23 = vpop.f32.mrf.mxu3 }
  0xa7   : > { %428 = vst.msk [vmem:[%s729_s11 + $0x4] sm:$0xf] %vm426_vm1, %v419_v21  ;;  %v399_v24 = vadd.f32 %v398_v23, %v331_v22  ;;  %v324_v25 = vpop.f32.mrf.mxu0 }
  0xa8   : > { %v391_v26 = vpop.f32.mrf.mxu1 }
  0xa9   : > { %v415_v27 = vadd.f32 %v588_v6, %v399_v24  ;;  %v392_v28 = vadd.f32 %v391_v26, %v324_v25 }
  0xab   : > { %v423_v29 = vpack.c.bf16 %v415_v27, %v415_v27  ;;  %v412_v30 = vadd.f32 %v588_v6, %v392_v28 }
  0xad   : > { %432 = vst.msk [vmem:[%s729_s11 + $0x14] sm:$0xf] %vm426_vm1, %v423_v29  ;;  %v420_v31 = vpack.c.bf16 %v412_v30, %v412_v30  ;;  %v334_v32 = vpop.f32.mrf.mxu2 }
  0xae   : > { %v401_v33 = vpop.f32.mrf.mxu3 }
  0xaf   : > { %429 = vst.msk [vmem:[%s729_s11 + $0x8] sm:$0xf] %vm426_vm1, %v420_v31  ;;  %v402_v34 = vadd.f32 %v401_v33, %v334_v32  ;;  %v326_v35 = vpop.f32.mrf.mxu0 }
  0xb0   : > { %v393_v36 = vpop.f32.mrf.mxu1 }
  0xb1   : > { %v416_v37 = vadd.f32 %v588_v6, %v402_v34  ;;  %v394_v38 = vadd.f32 %v393_v36, %v326_v35 }
  0xb3   : > { %v424_v39 = vpack.c.bf16 %v416_v37, %v416_v37  ;;  %v413_v40 = vadd.f32 %v588_v6, %v394_v38 }
  0xb5   : > { %433 = vst.msk [vmem:[%s729_s11 + $0x18] sm:$0xf] %vm426_vm1, %v424_v39  ;;  %v421_v41 = vpack.c.bf16 %v413_v40, %v413_v40  ;;  %v336_v42 = vpop.f32.mrf.mxu2 }
  0xb6   : > { %v403_v43 = vpop.f32.mrf.mxu3 }
  0xb7   : > { %430 = vst.msk [vmem:[%s729_s11 + $0xc] sm:$0xf] %vm426_vm1, %v421_v41  ;;  %v404_v44 = vadd.f32 %v403_v43, %v336_v42 }
  0xb9   : > { %v417_v45 = vadd.f32 %v588_v6, %v404_v44 }
  0xbb   : > { %v425_v46 = vpack.c.bf16 %v417_v45, %v417_v45 }
  0xbd   : > { %434 = vst.msk [vmem:[%s729_s11 + $0x1c] sm:$0xf] %vm426_vm1, %v425_v46 }
  0xbe PF: > { %s13_s14 = sadd.s32 1, %s611_s14   ;;  %s760_s12 = smov %s607_s13 }
  0xbf   : > { %p10_p5 = scmp.ge.s32.totalorder %s13_s14, 4   ;;  %s761_s13 = smov %s763_s15 }
  0xc1   :  { %12 = sbr.rel (!%p10_p5) target bundleno = 2 (0x2), region = 68 }

// kernel: nncrf_forward.27
= control target key start
LH: loop header
LB: loop body
LE: loop exit
PB: predicated region body
PF: predicated region fallthrough
CT: control target
= control target key end

     0   :  { %vm51_vm0 = vcmask 785408   ;;  %vm68_vm1 = vcmask 523264   ;;  %v159_v25 = vmov 64.0   ;;  %vm142_vm6 = vcmask 15360   ;;  %s281_s1 = inlined_call_operand.vmem [shape: f32[96,64], index: 1, kind: input, shape index: {}]   ;;  %s282_s2 = inlined_call_operand.vmem [shape: f32[1,64], index: 2, kind: input, shape index: {}]   ;;  %s283_s0 = inlined_call_operand.vmem [shape: f32[8,96], index: 0, kind: input, shape index: {}]   ;;  %s284_s3 = inlined_call_operand.vmem [shape: f32[1,64], index: 3, kind: input, shape index: {}]   ;;  %s285_s4 = inlined_call_operand.vmem [shape: f32[1,64], index: 4, kind: input, shape index: {}]   ;;  %s286_s6 = inlined_call_operand.vmem [shape: f32[1,2], index: 6, kind: input, shape index: {}]   ;;  %s287_s5 = inlined_call_operand.vmem [shape: f32[64,2], index: 5, kind: input, shape index: {}]   ;;  %s288_s7 = inlined_call_operand.vmem [shape: f32[8,2], index: 7, kind: output, shape index: {}]  }
   0x1   :  { %v39_v0 = vld [vmem:[%s281_s1 + $0x50] sm:$0xff]  ;;  %v40_v1 = vld [vmem:[%s281_s1 + $0x58] sm:$0xff]  ;;  %v37_v2 = vld [vmem:[%s281_s1 + $0x40] sm:$0xff]  ;;  %155 = vrcp.f32 %v159_v25 }
   0x2   :  { %v46_v3 = vpack.c.bf16 %v40_v1, %v39_v0  ;;  %v38_v4 = vld [vmem:[%s281_s1 + $0x48] sm:$0xff]  ;;  %v35_v6 = vld [vmem:[%s281_s1 + $0x30] sm:$0xff]  ;;  %v36_v7 = vld [vmem:[%s281_s1 + $0x38] sm:$0xff] }
   0x3   :  { %v45_v5 = vpack.c.bf16 %v38_v4, %v37_v2  ;;  %v44_v8 = vpack.c.bf16 %v36_v7, %v35_v6  ;;  %v33_v9 = vld [vmem:[%s281_s1 + $0x20] sm:$0xff]  ;;  %v34_v10 = vld [vmem:[%s281_s1 + $0x28] sm:$0xff]  ;;  %v31_v12 = vld [vmem:[%s281_s1 + $0x10] sm:$0xff] }
   0x4   :  { %57 = vmatpush.bf16.msra.mxu0 %v46_v3  ;;  %v43_v11 = vpack.c.bf16 %v34_v10, %v33_v9  ;;  %v32_v13 = vld [vmem:[%s281_s1 + $0x18] sm:$0xff]  ;;  %v29_v15 = vld [vmem:[%s281_s1] sm:$0xff]  ;;  %v30_v16 = vld [vmem:[%s281_s1 + $0x8] sm:$0xff] }
   0x5   :  { %v42_v14 = vpack.c.bf16 %v32_v13, %v31_v12  ;;  %v41_v17 = vpack.c.bf16 %v30_v16, %v29_v15  ;;  %v27_v18 = vld [vmem:[%s283_s0] sm:$0xff]  ;;  %v116_v37 = vld [vmem:[%s287_s5 + $0x30] sm:$0xff]  ;;  %v117_v38 = vld [vmem:[%s287_s5 + $0x38] sm:$0xff] }
   0x6   :  { %v28_v19 = vpack.c.bf16 %v27_v18, %v27_v18  ;;  %v151_v20 = vld [vmem:[%s282_s2] ss:$0 sm:$0xff]  ;;  %v121_v39 = vpack.c.bf16 %v117_v38, %v116_v37  ;;  %v115_v41 = vld [vmem:[%s287_s5 + $0x28] sm:$0xff]  ;;  %v112_v43 = vld [vmem:[%s287_s5 + $0x10] sm:$0xff] }
   0x7   :  { %v156_v26 = vpop.eup %155  ;;  %v114_v40 = vld [vmem:[%s287_s5 + $0x20] sm:$0xff]  ;;  %v113_v44 = vld [vmem:[%s287_s5 + $0x18] sm:$0xff]  ;;  %v111_v47 = vld [vmem:[%s287_s5 + $0x8] sm:$0xff] }
   0x8   :  { %58 = vmatpush.bf16.msra.mxu0 %v45_v5  ;;  %v73_v27 = vmul.f32 64.0, %v156_v26  ;;  %vm77_vm2 = vweird.f32 %v156_v26  ;;  %133 = vmatpush.bf16.msra.mxu1 %v121_v39  ;;  %v120_v42 = vpack.c.bf16 %v115_v41, %v114_v40  ;;  %v119_v45 = vpack.c.bf16 %v113_v44, %v112_v43  ;;  %v110_v46 = vld [vmem:[%s287_s5] sm:$0xff] }
   0x9   :  { %v118_v48 = vpack.c.bf16 %v111_v47, %v110_v46  ;;  %v152_v58 = vld [vmem:[%s284_s3] ss:$0 sm:$0xff] }
   0xa   :  { %v74_v28 = vsub.f32 1.0, %v73_v27  ;;  %v153_v61 = vld [vmem:[%s285_s4] ss:$0 sm:$0xff] }
   0xb   :  { %v154_v2 = vld [vmem:[%s286_s6] ss:$0 sm:$0xff] }
   0xc   :  { %59 = vmatpush.bf16.msra.mxu0 %v44_v8  ;;  %v75_v29 = vmul.f32 %v156_v26, %v74_v28  ;;  %134 = vmatpush.bf16.msra.mxu1 %v120_v42 }
   0xe   :  { %v76_v30 = vadd.f32 %v156_v26, %v75_v29 }
  0x10   :  { %60 = vmatpush.bf16.msra.mxu0 %v43_v11  ;;  %v78_v31 = vsel %vm77_vm2, %v156_v26, %v76_v30  ;;  %135 = vmatpush.bf16.msra.mxu1 %v119_v45 }
  0x14   :  { %61 = vmatpush.bf16.msra.mxu0 %v42_v14  ;;  %136 = vmatpush.bf16.msra.mxu1 %v118_v48 }
  0x18   :  { %62 = vmatpush.bf16.msra.mxu0 %v41_v17 }
  0x1b   :  { %148 = vmatmul.msk.bf16.vlgmr.msra.gmra.mxu0 %vm51_vm0, %v28_v19 }
  0x98   :  { %v64_v21 = vpop.f32.mrf.mxu0 }
  0x99   :  { %v65_v22 = vadd.f32 %v151_v20, %v64_v21 }
  0x9b   :  { %v69_v23 = vsel %vm68_vm1, %v65_v22, 0.0 }
  0x9c   :  { %70 = vadd.xlane.f32.xlu0 %v69_v23 }
  0xa0   :  { %v66_v24 = vpop.f32.mrf.mxu0 }
 0x10f   :  { %v71_v32 = vpop.xlane.xlu0 %70 }
 0x110   :  { %v79_v33 = vmul.f32 %v78_v31, %v71_v32 }
 0x112   :  { %v80_v34 = vsub.f32 %v65_v22, %v79_v33 }
 0x114   :  { %v81_v35 = vmul.f32 %v80_v34, %v80_v34 }
 0x116   :  { %v82_v36 = vsel %vm68_vm1, %v81_v35, 0.0 }
 0x117   :  { %83 = vadd.xlane.f32.xlu0 %v82_v36 }
 0x18a   :  { %v84_v49 = vpop.xlane.xlu0 %83 }
 0x18b   :  { %v85_v50 = vmul.f32 %v84_v49, %v78_v31 }
 0x18d   :  { %v86_v51 = vadd.f32 1e-05, %v85_v50 }
 0x18f   :  { %157 = vrsqrt.f32 %v86_v51  ;;  %vm93_vm4 = vweird.f32 %v86_v51 }
 0x195   :  { %v158_v52 = vpop.eup %157 }
 0x196   :  { %v88_v53 = vmul.f32 %v158_v52, %v86_v51  ;;  %vm94_vm3 = vweird.f32 %v158_v52 }
 0x197   :  { %vm95_vm5 = vmor %vm93_vm4, %vm94_vm3 }
 0x198   :  { %v89_v54 = vmul.f32 %v158_v52, %v88_v53 }
 0x19a   :  { %v90_v55 = vmul.f32 0.5, %v89_v54 }
 0x19c   :  { %v91_v56 = vsub.f32 1.5, %v90_v55 }
 0x19e   :  { %v92_v57 = vmul.f32 %v158_v52, %v91_v56 }
 0x1a0   :  { %v96_v59 = vsel %vm95_vm5, %v158_v52, %v92_v57 }
 0x1a1   :  { %v97_v60 = vmul.f32 %v96_v59, %v80_v34 }
 0x1a3   :  { %v102_v62 = vmul.f32 %v152_v58, %v97_v60 }
 0x1a5   :  { %v107_v63 = vadd.f32 %v153_v61, %v102_v62 }
 0x1a7   :  { %v108_v0 = vmax.f32 %v107_v63, 0.0 }
 0x1a9   :  { %v109_v1 = vpack.c.bf16 %v108_v0, %v108_v0 }
 0x1ab   :  { %149 = vmatmul.msk.bf16.vlgmr.msra.gmra.mxu1 %vm68_vm1, %v109_v1 }
 0x228   :  { %v138_v3 = vpop.f32.mrf.mxu1 }
 0x229   :  { %v139_v4 = vadd.f32 %v154_v2, %v138_v3 }
 0x22b   :  { %143 = vst.msk [vmem:[%s288_s7] sm:$0xff] %vm142_vm6, %v139_v4 }
 0x230   :  { %v140_v5 = vpop.f32.mrf.mxu1 }

</bundles_post_ra>
